<compile_context>
chip_gen: v5e
topology: v5e:2x2
jax: 0.10.0
libtpu: 0.0.40
codegen_flags: <defaults>
</compile_context>

<pallas_src>
import functools

import jax
import jax.numpy as jnp
from jax.experimental import pallas as pl
from jax.experimental.pallas import tpu as pltpu

# logical (PyTorch) sizes
LATENT_DIM = 10
D_IN = 784          # kept un-padded: block last dim == full array dim is legal
D_H1 = 256
D_H2 = 100

# lane-padded sizes used inside the kernel (multiples of 128)
D_H2_P = 128
LATENT_P = 128


def vae_forward_kernel(
    x_ref, eps_ref,
    w_in_ref, b_in_ref,
    w_eh_ref, b_eh_ref,
    w_mg_ref, b_mg_ref,     # fused mean/gamma weight: [D_H2_P, 2*LATENT_P]
    w_d0_ref, b_d0_ref,
    w_d1_ref, b_d1_ref,
    w_d2_ref, b_d2_ref,
    out_ref, mg_ref,
):
    f32 = jnp.float32
    bf16 = jnp.bfloat16

    x = x_ref[...].astype(bf16)          # cast in-kernel (no wrapper pad/cast pass)

    # ---- encoder ----
    h = jnp.dot(x, w_in_ref[...], preferred_element_type=f32) + b_in_ref[...]
    h = jnp.maximum(h, 0.0).astype(bf16)                       # ReLU fused with downcast
    h = jnp.dot(h, w_eh_ref[...], preferred_element_type=f32) + b_eh_ref[...]
    h = jnp.maximum(h, 0.0).astype(bf16)

    # ---- fused mean / gamma heads (one lane-dense matmul) ----
    mg = jnp.dot(h, w_mg_ref[...], preferred_element_type=f32) + b_mg_ref[...]
    m = mg[:, :LATENT_P]
    gamma = mg[:, LATENT_P:]

    # ---- reparameterization: randn * exp(gamma/2) + m  (f32) ----
    # padded lanes: gamma=0 -> exp(0)=1, m=0 -> z=eps there; harmless because
    # the corresponding rows of w_d0 are zero.
    z = eps_ref[...] * jnp.exp(gamma * 0.5) + m

    # ---- decoder ----
    d = jnp.dot(z.astype(bf16), w_d0_ref[...],
                preferred_element_type=f32) + b_d0_ref[...]
    d = jnp.maximum(d, 0.0).astype(bf16)
    d = jnp.dot(d, w_d1_ref[...], preferred_element_type=f32) + b_d1_ref[...]
    d = jnp.maximum(d, 0.0).astype(bf16)
    d = jnp.dot(d, w_d2_ref[...], preferred_element_type=f32) + b_d2_ref[...]

    out_ref[...] = d.astype(out_ref.dtype)      # bf16 writeback, 784 lanes
    mg_ref[...] = mg                            # fused m/gamma, f32


def make_params(key, latent_dim=LATENT_DIM):
    """Deterministic synthetic params. Weights stored as [in, out], biases [1, out]."""
    dims = [
        ("input_layer", D_IN, D_H1),
        ("encoder_hidden", D_H1, D_H2),
        ("mean_layer", D_H2, latent_dim),
        ("gamma_layer", D_H2, latent_dim),
        ("initial_decoder", latent_dim, D_H2),
        ("hidden_decoder", D_H2, D_H1),
        ("final_decoder", D_H1, D_IN),
    ]
    params = {}
    for name, din, dout in dims:
        key, kw, kb = jax.random.split(key, 3)
        scale = 1.0 / jnp.sqrt(jnp.float32(din))
        params[name] = (
            jax.random.uniform(kw, (din, dout), jnp.float32, -scale, scale),
            jax.random.uniform(kb, (1, dout), jnp.float32, -scale, scale),
        )
    return params


def _pack_params(params):
    """Zero-pad hidden/latent dims to lane-dense widths, fuse mean/gamma,
    cast weights to bf16 (biases stay f32)."""
    bf16 = jnp.bfloat16
    f32 = jnp.float32

    def padw(w, rows, cols):
        return jnp.pad(w, ((0, rows - w.shape[0]), (0, cols - w.shape[1]))).astype(bf16)

    def padb(b, cols):
        return jnp.pad(b, ((0, 0), (0, cols - b.shape[1]))).astype(f32)

    w_in, b_in = params["input_layer"]
    w_eh, b_eh = params["encoder_hidden"]
    w_m, b_m = params["mean_layer"]
    w_g, b_g = params["gamma_layer"]
    w_d0, b_d0 = params["initial_decoder"]
    w_d1, b_d1 = params["hidden_decoder"]
    w_d2, b_d2 = params["final_decoder"]

    latent = w_m.shape[1]
    assert latent <= LATENT_P

    # fused mean/gamma weight: columns [0:latent] = mean, [128:128+latent] = gamma
    w_mg = jnp.zeros((D_H2_P, 2 * LATENT_P), f32)
    w_mg = w_mg.at[:D_H2, :latent].set(w_m)
    w_mg = w_mg.at[:D_H2, LATENT_P:LATENT_P + latent].set(w_g)
    w_mg = w_mg.astype(bf16)
    b_mg = jnp.zeros((1, 2 * LATENT_P), f32)
    b_mg = b_mg.at[:, :latent].set(b_m)
    b_mg = b_mg.at[:, LATENT_P:LATENT_P + latent].set(b_g)

    return [
        w_in.astype(bf16), b_in.astype(f32),          # (784, 256), (1, 256)
        padw(w_eh, D_H1, D_H2_P), padb(b_eh, D_H2_P),  # (256, 128), (1, 128)
        w_mg, b_mg,                                    # (128, 256), (1, 256)
        padw(w_d0, LATENT_P, D_H2_P), padb(b_d0, D_H2_P),  # (128, 128), (1, 128)
        padw(w_d1, D_H2_P, D_H1), padb(b_d1, D_H1),    # (128, 256), (1, 256)
        w_d2.astype(bf16), b_d2.astype(f32),           # (256, 784), (1, 784)
    ]


@functools.partial(jax.jit, static_argnames=("batch_tile",))
def vae_forward(x, eps, params, batch_tile=256):
    """Fused VAE forward.

    batch_tile: 256 fills the v6e/v7x 256-row MXU and amortizes per-step
    overhead; use >=2 tiles worth of batch on v7x so both TensorCores are busy.
    Returns (reconstruction[B,784] bf16, m[B,latent] f32, gamma[B,latent] f32).
    """
    B, d_in = x.shape
    assert d_in == D_IN
    latent = params["mean_layer"][0].shape[1]

    B_pad = pl.cdiv(B, batch_tile) * batch_tile

    # eps accepted at (B, latent) or already lane-dense (B, LATENT_P).
    eps = eps.astype(jnp.float32)
    if eps.shape[1] != LATENT_P:
        eps = jnp.pad(eps, ((0, 0), (0, LATENT_P - eps.shape[1])))
    # Only pad the batch dim if needed (cheap row pad; no feature pad/cast pass).
    if B_pad != B:
        x = jnp.pad(x, ((0, B_pad - B), (0, 0)))
        eps = jnp.pad(eps, ((0, B_pad - B), (0, 0)))

    flat = _pack_params(params)

    def data_spec(feat):
        return pl.BlockSpec((batch_tile, feat), lambda i: (i, 0))

    def const_spec(shape):
        return pl.BlockSpec(shape, lambda i: (0, 0))

    grid = (B_pad // batch_tile,)

    flops = 2 * B_pad * (
        D_IN * D_H1 + D_H1 * D_H2_P + D_H2_P * 2 * LATENT_P
        + LATENT_P * D_H2_P + D_H2_P * D_H1 + D_H1 * D_IN)
    w_bytes = sum(int(p.size) * p.dtype.itemsize for p in flat)
    bytes_accessed = (B_pad * D_IN * 4          # x in (f32)
                      + B_pad * LATENT_P * 4    # eps in (f32)
                      + w_bytes                 # weights (bf16) + biases (f32)
                      + B_pad * D_IN * 2        # reconstruction out (bf16)
                      + B_pad * 2 * LATENT_P * 4)  # fused m/gamma out (f32)

    out_p, mg_p = pl.pallas_call(
        vae_forward_kernel,
        out_shape=(
            jax.ShapeDtypeStruct((B_pad, D_IN), jnp.bfloat16),        # reconstruction
            jax.ShapeDtypeStruct((B_pad, 2 * LATENT_P), jnp.float32),  # fused m|gamma
        ),
        grid_spec=pltpu.PrefetchScalarGridSpec(
            num_scalar_prefetch=0,
            grid=grid,
            in_specs=[data_spec(D_IN), data_spec(LATENT_P)]
                     + [const_spec(p.shape) for p in flat],
            out_specs=[data_spec(D_IN), data_spec(2 * LATENT_P)],
        ),
        compiler_params=pltpu.CompilerParams(
            dimension_semantics=("parallel",)),
        cost_estimate=pl.CostEstimate(
            flops=int(flops),
            transcendentals=int(B_pad * LATENT_P),
            bytes_accessed=int(bytes_accessed)),
    )(x, eps, *flat)

    out = out_p[:B]
    m = mg_p[:B, :latent]
    gamma = mg_p[:B, LATENT_P:LATENT_P + latent]
    return out, m, gamma


def vae_forward_ref(x, eps, params):
    """Pure-JAX reference mirroring the kernel numerics (bf16 matmul inputs,
    f32 accumulation), matching the PyTorch module's dataflow."""
    bf16 = jnp.bfloat16
    f32 = jnp.float32

    def lin(a, name):
        w, b = params[name]
        return jnp.dot(a.astype(bf16), w.astype(bf16),
                       preferred_element_type=f32) + b

    relu = lambda a: jnp.maximum(a, 0.0)
    h = relu(lin(x, "input_layer"))
    h = relu(lin(h, "encoder_hidden"))
    m = lin(h, "mean_layer")
    gamma = lin(h, "gamma_layer")
    z = eps * jnp.exp(gamma / 2) + m
    d = relu(lin(z, "initial_decoder"))
    d = relu(lin(d, "hidden_decoder"))
    d = lin(d, "final_decoder")
    return d, m, gamma


if __name__ == "__main__":
    key = jax.random.PRNGKey(0)
    k_param, k_x, k_eps = jax.random.split(key, 3)

    # 512 rows / tile of 256 -> 2 "parallel" grid steps: fills the 256-row MXU
    # on v6e/v7x and keeps both v7x TensorCores busy; fine on v5e too.
    B = 512
    params = make_params(k_param)
    x = jax.random.normal(k_x, (B, D_IN), jnp.float32)
    # torch.randn_like(m) equivalent, drawn deterministically outside the
    # kernel, generated directly at the lane-dense width (no pad pass).
    eps_full = jax.random.normal(k_eps, (B, LATENT_P), jnp.float32)

    out, m, gamma = vae_forward(x, eps_full, params, batch_tile=256)
    jax.block_until_ready((out, m, gamma))

    ref_out, ref_m, ref_gamma = vae_forward_ref(x, eps_full[:, :LATENT_DIM], params)
    assert out.shape == (B, D_IN) and out.dtype == jnp.bfloat16
    assert m.shape == (B, LATENT_DIM) and gamma.shape == (B, LATENT_DIM)
    assert jnp.allclose(m, ref_m, atol=1e-3, rtol=1e-3)
    assert jnp.allclose(gamma, ref_gamma, atol=1e-3, rtol=1e-3)
    # reconstruction is stored bf16 (f32 accumulation) -> looser tolerance
    assert jnp.allclose(out.astype(jnp.float32), ref_out, atol=2e-2, rtol=2e-2)

    print("KERNEL_OK")
</pallas_src>

<mosaic_0001>
module attributes {stable_mosaic.version = 11 : i64} {
  func.func @vae_forward_kernel(%arg0: i32, %arg1: memref<256x784xf32, #tpu.memory_space<vmem>>, %arg2: memref<256x128xf32, #tpu.memory_space<vmem>>, %arg3: memref<784x256xbf16, #tpu.memory_space<vmem>>, %arg4: memref<1x256xf32, #tpu.memory_space<vmem>>, %arg5: memref<256x128xbf16, #tpu.memory_space<vmem>>, %arg6: memref<1x128xf32, #tpu.memory_space<vmem>>, %arg7: memref<128x256xbf16, #tpu.memory_space<vmem>>, %arg8: memref<1x256xf32, #tpu.memory_space<vmem>>, %arg9: memref<128x128xbf16, #tpu.memory_space<vmem>>, %arg10: memref<1x128xf32, #tpu.memory_space<vmem>>, %arg11: memref<128x256xbf16, #tpu.memory_space<vmem>>, %arg12: memref<1x256xf32, #tpu.memory_space<vmem>>, %arg13: memref<256x784xbf16, #tpu.memory_space<vmem>>, %arg14: memref<1x784xf32, #tpu.memory_space<vmem>>, %arg15: memref<256x784xbf16, #tpu.memory_space<vmem>>, %arg16: memref<256x256xf32, #tpu.memory_space<vmem>>) attributes {dimension_semantics = [#tpu.dimension_semantics<parallel>], iteration_bounds = array<i64: 2>, scalar_prefetch = 0 : i64, scratch_operands = 0 : i64, tpu.core_type = #tpu.core_type<tc>, window_params = [{transform_indices = @transform_0, window_bounds = array<i64: 256, 784>}, {transform_indices = @transform_1, window_bounds = array<i64: 256, 128>}, {pipeline_mode = #tpu.pipeline_mode<synchronous>, transform_indices = @transform_2, window_bounds = array<i64: 784, 256>}, {pipeline_mode = #tpu.pipeline_mode<synchronous>, transform_indices = @transform_3, window_bounds = array<i64: 1, 256>}, {pipeline_mode = #tpu.pipeline_mode<synchronous>, transform_indices = @transform_4, window_bounds = array<i64: 256, 128>}, {pipeline_mode = #tpu.pipeline_mode<synchronous>, transform_indices = @transform_5, window_bounds = array<i64: 1, 128>}, {pipeline_mode = #tpu.pipeline_mode<synchronous>, transform_indices = @transform_6, window_bounds = array<i64: 128, 256>}, {pipeline_mode = #tpu.pipeline_mode<synchronous>, transform_indices = @transform_7, window_bounds = array<i64: 1, 256>}, {pipeline_mode = #tpu.pipeline_mode<synchronous>, transform_indices = @transform_8, window_bounds = array<i64: 128, 128>}, {pipeline_mode = #tpu.pipeline_mode<synchronous>, transform_indices = @transform_9, window_bounds = array<i64: 1, 128>}, {pipeline_mode = #tpu.pipeline_mode<synchronous>, transform_indices = @transform_10, window_bounds = array<i64: 128, 256>}, {pipeline_mode = #tpu.pipeline_mode<synchronous>, transform_indices = @transform_11, window_bounds = array<i64: 1, 256>}, {pipeline_mode = #tpu.pipeline_mode<synchronous>, transform_indices = @transform_12, window_bounds = array<i64: 256, 784>}, {pipeline_mode = #tpu.pipeline_mode<synchronous>, transform_indices = @transform_13, window_bounds = array<i64: 1, 784>}, {transform_indices = @transform_14, window_bounds = array<i64: 256, 784>}, {transform_indices = @transform_15, window_bounds = array<i64: 256, 256>}]} {
    %c0 = arith.constant 0 : index
    %c0_0 = arith.constant 0 : index
    %0 = vector.load %arg1[%c0, %c0_0] : memref<256x784xf32, #tpu.memory_space<vmem>>, vector<256x784xf32>
    %1 = arith.truncf %0 : vector<256x784xf32> to vector<256x784xbf16>
    %c0_1 = arith.constant 0 : index
    %c0_2 = arith.constant 0 : index
    %2 = vector.load %arg3[%c0_1, %c0_2] : memref<784x256xbf16, #tpu.memory_space<vmem>>, vector<784x256xbf16>
    %cst = arith.constant dense<0.000000e+00> : vector<256x256xf32>
    %3 = tpu.matmul %1, %2, %cst {dimension_numbers = #tpu.dot_dimension_numbers<[1], [0], [0], [1], [0, 0, 1, 1], [], []>} : vector<256x784xbf16>, vector<784x256xbf16>, vector<256x256xf32> -> vector<256x256xf32>
    %c0_3 = arith.constant 0 : index
    %c0_4 = arith.constant 0 : index
    %4 = vector.load %arg4[%c0_3, %c0_4] : memref<1x256xf32, #tpu.memory_space<vmem>>, vector<1x256xf32>
    %5 = vector.broadcast %4 : vector<1x256xf32> to vector<256x256xf32>
    %6 = arith.addf %3, %5 : vector<256x256xf32>
    %cst_5 = arith.constant 0.000000e+00 : f32
    %7 = vector.broadcast %cst_5 : f32 to vector<256x256xf32>
    %8 = arith.maximumf %6, %7 : vector<256x256xf32>
    %9 = arith.truncf %8 : vector<256x256xf32> to vector<256x256xbf16>
    %c0_6 = arith.constant 0 : index
    %c0_7 = arith.constant 0 : index
    %10 = vector.load %arg5[%c0_6, %c0_7] : memref<256x128xbf16, #tpu.memory_space<vmem>>, vector<256x128xbf16>
    %cst_8 = arith.constant dense<0.000000e+00> : vector<256x128xf32>
    %11 = tpu.matmul %9, %10, %cst_8 {dimension_numbers = #tpu.dot_dimension_numbers<[1], [0], [0], [1], [0, 0, 1, 1], [], []>} : vector<256x256xbf16>, vector<256x128xbf16>, vector<256x128xf32> -> vector<256x128xf32>
    %c0_9 = arith.constant 0 : index
    %c0_10 = arith.constant 0 : index
    %12 = vector.load %arg6[%c0_9, %c0_10] : memref<1x128xf32, #tpu.memory_space<vmem>>, vector<1x128xf32>
    %13 = vector.broadcast %12 : vector<1x128xf32> to vector<256x128xf32>
    %14 = arith.addf %11, %13 : vector<256x128xf32>
    %cst_11 = arith.constant 0.000000e+00 : f32
    %15 = vector.broadcast %cst_11 : f32 to vector<256x128xf32>
    %16 = arith.maximumf %14, %15 : vector<256x128xf32>
    %17 = arith.truncf %16 : vector<256x128xf32> to vector<256x128xbf16>
    %c0_12 = arith.constant 0 : index
    %c0_13 = arith.constant 0 : index
    %18 = vector.load %arg7[%c0_12, %c0_13] : memref<128x256xbf16, #tpu.memory_space<vmem>>, vector<128x256xbf16>
    %cst_14 = arith.constant dense<0.000000e+00> : vector<256x256xf32>
    %19 = tpu.matmul %17, %18, %cst_14 {dimension_numbers = #tpu.dot_dimension_numbers<[1], [0], [0], [1], [0, 0, 1, 1], [], []>} : vector<256x128xbf16>, vector<128x256xbf16>, vector<256x256xf32> -> vector<256x256xf32>
    %c0_15 = arith.constant 0 : index
    %c0_16 = arith.constant 0 : index
    %20 = vector.load %arg8[%c0_15, %c0_16] : memref<1x256xf32, #tpu.memory_space<vmem>>, vector<1x256xf32>
    %21 = vector.broadcast %20 : vector<1x256xf32> to vector<256x256xf32>
    %22 = arith.addf %19, %21 : vector<256x256xf32>
    %23 = vector.extract_strided_slice %22 {offsets = [0, 0], sizes = [256, 128], strides = [1, 1]} : vector<256x256xf32> to vector<256x128xf32>
    %24 = vector.extract_strided_slice %22 {offsets = [0, 128], sizes = [256, 128], strides = [1, 1]} : vector<256x256xf32> to vector<256x128xf32>
    %c0_17 = arith.constant 0 : index
    %c0_18 = arith.constant 0 : index
    %25 = vector.load %arg2[%c0_17, %c0_18] : memref<256x128xf32, #tpu.memory_space<vmem>>, vector<256x128xf32>
    %cst_19 = arith.constant 5.000000e-01 : f32
    %26 = vector.broadcast %cst_19 : f32 to vector<256x128xf32>
    %27 = arith.mulf %24, %26 : vector<256x128xf32>
    %28 = math.exp %27 : vector<256x128xf32>
    %29 = arith.mulf %25, %28 : vector<256x128xf32>
    %30 = arith.addf %29, %23 : vector<256x128xf32>
    %31 = arith.truncf %30 : vector<256x128xf32> to vector<256x128xbf16>
    %c0_20 = arith.constant 0 : index
    %c0_21 = arith.constant 0 : index
    %32 = vector.load %arg9[%c0_20, %c0_21] : memref<128x128xbf16, #tpu.memory_space<vmem>>, vector<128x128xbf16>
    %cst_22 = arith.constant dense<0.000000e+00> : vector<256x128xf32>
    %33 = tpu.matmul %31, %32, %cst_22 {dimension_numbers = #tpu.dot_dimension_numbers<[1], [0], [0], [1], [0, 0, 1, 1], [], []>} : vector<256x128xbf16>, vector<128x128xbf16>, vector<256x128xf32> -> vector<256x128xf32>
    %c0_23 = arith.constant 0 : index
    %c0_24 = arith.constant 0 : index
    %34 = vector.load %arg10[%c0_23, %c0_24] : memref<1x128xf32, #tpu.memory_space<vmem>>, vector<1x128xf32>
    %35 = vector.broadcast %34 : vector<1x128xf32> to vector<256x128xf32>
    %36 = arith.addf %33, %35 : vector<256x128xf32>
    %cst_25 = arith.constant 0.000000e+00 : f32
    %37 = vector.broadcast %cst_25 : f32 to vector<256x128xf32>
    %38 = arith.maximumf %36, %37 : vector<256x128xf32>
    %39 = arith.truncf %38 : vector<256x128xf32> to vector<256x128xbf16>
    %c0_26 = arith.constant 0 : index
    %c0_27 = arith.constant 0 : index
    %40 = vector.load %arg11[%c0_26, %c0_27] : memref<128x256xbf16, #tpu.memory_space<vmem>>, vector<128x256xbf16>
    %cst_28 = arith.constant dense<0.000000e+00> : vector<256x256xf32>
    %41 = tpu.matmul %39, %40, %cst_28 {dimension_numbers = #tpu.dot_dimension_numbers<[1], [0], [0], [1], [0, 0, 1, 1], [], []>} : vector<256x128xbf16>, vector<128x256xbf16>, vector<256x256xf32> -> vector<256x256xf32>
    %c0_29 = arith.constant 0 : index
    %c0_30 = arith.constant 0 : index
    %42 = vector.load %arg12[%c0_29, %c0_30] : memref<1x256xf32, #tpu.memory_space<vmem>>, vector<1x256xf32>
    %43 = vector.broadcast %42 : vector<1x256xf32> to vector<256x256xf32>
    %44 = arith.addf %41, %43 : vector<256x256xf32>
    %cst_31 = arith.constant 0.000000e+00 : f32
    %45 = vector.broadcast %cst_31 : f32 to vector<256x256xf32>
    %46 = arith.maximumf %44, %45 : vector<256x256xf32>
    %47 = arith.truncf %46 : vector<256x256xf32> to vector<256x256xbf16>
    %c0_32 = arith.constant 0 : index
    %c0_33 = arith.constant 0 : index
    %48 = vector.load %arg13[%c0_32, %c0_33] : memref<256x784xbf16, #tpu.memory_space<vmem>>, vector<256x784xbf16>
    %cst_34 = arith.constant dense<0.000000e+00> : vector<256x784xf32>
    %49 = tpu.matmul %47, %48, %cst_34 {dimension_numbers = #tpu.dot_dimension_numbers<[1], [0], [0], [1], [0, 0, 1, 1], [], []>} : vector<256x256xbf16>, vector<256x784xbf16>, vector<256x784xf32> -> vector<256x784xf32>
    %c0_35 = arith.constant 0 : index
    %c0_36 = arith.constant 0 : index
    %50 = vector.load %arg14[%c0_35, %c0_36] : memref<1x784xf32, #tpu.memory_space<vmem>>, vector<1x784xf32>
    %51 = vector.broadcast %50 : vector<1x784xf32> to vector<256x784xf32>
    %52 = arith.addf %49, %51 : vector<256x784xf32>
    %53 = arith.truncf %52 : vector<256x784xf32> to vector<256x784xbf16>
    %c0_37 = arith.constant 0 : index
    %c0_38 = arith.constant 0 : index
    %54 = vector.load %arg15[%c0_37, %c0_38] : memref<256x784xbf16, #tpu.memory_space<vmem>>, vector<256x784xbf16>
    tpu.vector_store %arg15[%c0_37, %c0_38], %53 {strides = array<i32>} : memref<256x784xbf16, #tpu.memory_space<vmem>>, vector<256x784xbf16>,
    %c0_39 = arith.constant 0 : index
    %c0_40 = arith.constant 0 : index
    %55 = vector.load %arg16[%c0_39, %c0_40] : memref<256x256xf32, #tpu.memory_space<vmem>>, vector<256x256xf32>
    tpu.vector_store %arg16[%c0_39, %c0_40], %22 {strides = array<i32>} : memref<256x256xf32, #tpu.memory_space<vmem>>, vector<256x256xf32>,
    return
  }
  func.func @transform_0(%arg0: i32) -> (i32, i32) {
    %c0_i32 = arith.constant 0 : i32
    %c0_i32_0 = arith.constant 0 : i32
    return %arg0, %c0_i32 : i32, i32
  }
  func.func @transform_1(%arg0: i32) -> (i32, i32) {
    %c0_i32 = arith.constant 0 : i32
    %c0_i32_0 = arith.constant 0 : i32
    return %arg0, %c0_i32 : i32, i32
  }
  func.func @transform_2(%arg0: i32) -> (i32, i32) {
    %c0_i32 = arith.constant 0 : i32
    %c0_i32_0 = arith.constant 0 : i32
    %c0_i32_1 = arith.constant 0 : i32
    return %c0_i32, %c0_i32_0 : i32, i32
  }
  func.func @transform_3(%arg0: i32) -> (i32, i32) {
    %c0_i32 = arith.constant 0 : i32
    %c0_i32_0 = arith.constant 0 : i32
    %c0_i32_1 = arith.constant 0 : i32
    return %c0_i32, %c0_i32_0 : i32, i32
  }
  func.func @transform_4(%arg0: i32) -> (i32, i32) {
    %c0_i32 = arith.constant 0 : i32
    %c0_i32_0 = arith.constant 0 : i32
    %c0_i32_1 = arith.constant 0 : i32
    return %c0_i32, %c0_i32_0 : i32, i32
  }
  func.func @transform_5(%arg0: i32) -> (i32, i32) {
    %c0_i32 = arith.constant 0 : i32
    %c0_i32_0 = arith.constant 0 : i32
    %c0_i32_1 = arith.constant 0 : i32
    return %c0_i32, %c0_i32_0 : i32, i32
  }
  func.func @transform_6(%arg0: i32) -> (i32, i32) {
    %c0_i32 = arith.constant 0 : i32
    %c0_i32_0 = arith.constant 0 : i32
    %c0_i32_1 = arith.constant 0 : i32
    return %c0_i32, %c0_i32_0 : i32, i32
  }
  func.func @transform_7(%arg0: i32) -> (i32, i32) {
    %c0_i32 = arith.constant 0 : i32
    %c0_i32_0 = arith.constant 0 : i32
    %c0_i32_1 = arith.constant 0 : i32
    return %c0_i32, %c0_i32_0 : i32, i32
  }
  func.func @transform_8(%arg0: i32) -> (i32, i32) {
    %c0_i32 = arith.constant 0 : i32
    %c0_i32_0 = arith.constant 0 : i32
    %c0_i32_1 = arith.constant 0 : i32
    return %c0_i32, %c0_i32_0 : i32, i32
  }
  func.func @transform_9(%arg0: i32) -> (i32, i32) {
    %c0_i32 = arith.constant 0 : i32
    %c0_i32_0 = arith.constant 0 : i32
    %c0_i32_1 = arith.constant 0 : i32
    return %c0_i32, %c0_i32_0 : i32, i32
  }
  func.func @transform_10(%arg0: i32) -> (i32, i32) {
    %c0_i32 = arith.constant 0 : i32
    %c0_i32_0 = arith.constant 0 : i32
    %c0_i32_1 = arith.constant 0 : i32
    return %c0_i32, %c0_i32_0 : i32, i32
  }
  func.func @transform_11(%arg0: i32) -> (i32, i32) {
    %c0_i32 = arith.constant 0 : i32
    %c0_i32_0 = arith.constant 0 : i32
    %c0_i32_1 = arith.constant 0 : i32
    return %c0_i32, %c0_i32_0 : i32, i32
  }
  func.func @transform_12(%arg0: i32) -> (i32, i32) {
    %c0_i32 = arith.constant 0 : i32
    %c0_i32_0 = arith.constant 0 : i32
    %c0_i32_1 = arith.constant 0 : i32
    return %c0_i32, %c0_i32_0 : i32, i32
  }
  func.func @transform_13(%arg0: i32) -> (i32, i32) {
    %c0_i32 = arith.constant 0 : i32
    %c0_i32_0 = arith.constant 0 : i32
    %c0_i32_1 = arith.constant 0 : i32
    return %c0_i32, %c0_i32_0 : i32, i32
  }
  func.func @transform_14(%arg0: i32) -> (i32, i32) {
    %c0_i32 = arith.constant 0 : i32
    %c0_i32_0 = arith.constant 0 : i32
    return %arg0, %c0_i32 : i32, i32
  }
  func.func @transform_15(%arg0: i32) -> (i32, i32) {
    %c0_i32 = arith.constant 0 : i32
    %c0_i32_0 = arith.constant 0 : i32
    return %arg0, %c0_i32 : i32, i32
  }
}

</mosaic_0001>

<bundles_post_ra>
// kernel: vae_forward.1
= control target key start
LH: loop header
LB: loop body
LE: loop exit
PB: predicated region body
PF: predicated region fallthrough
CT: control target
= control target key end

     0   :  { %s8254_s18 = smov 0   ;;  %s12427_s0 = inlined_call_operand.vmem [shape: f32[512,784], index: 0, kind: input, shape index: {}]   ;;  %s12428_s1 = inlined_call_operand.vmem [shape: f32[512,128], index: 1, kind: input, shape index: {}]   ;;  %s12429_s2 = inlined_call_operand.vmem [shape: bf16[784,256], index: 2, kind: input, shape index: {}]   ;;  %s12430_s3 = inlined_call_operand.vmem [shape: f32[1,256], index: 3, kind: input, shape index: {}]   ;;  %s12431_s4 = inlined_call_operand.vmem [shape: bf16[256,128], index: 4, kind: input, shape index: {}]   ;;  %s12432_s5 = inlined_call_operand.vmem [shape: f32[1,128], index: 5, kind: input, shape index: {}]   ;;  %s12433_s6 = inlined_call_operand.vmem [shape: bf16[128,256], index: 6, kind: input, shape index: {}]   ;;  %s12434_s7 = inlined_call_operand.vmem [shape: f32[1,256], index: 7, kind: input, shape index: {}]   ;;  %s12435_s8 = inlined_call_operand.vmem [shape: bf16[128,128], index: 8, kind: input, shape index: {}]   ;;  %s12436_s9 = inlined_call_operand.vmem [shape: f32[1,128], index: 9, kind: input, shape index: {}]   ;;  %s12437_s10 = inlined_call_operand.vmem [shape: bf16[128,256], index: 10, kind: input, shape index: {}]   ;;  %s12438_s11 = inlined_call_operand.vmem [shape: f32[1,256], index: 11, kind: input, shape index: {}]   ;;  %s12439_s12 = inlined_call_operand.vmem [shape: bf16[256,784], index: 12, kind: input, shape index: {}]   ;;  %s12440_s13 = inlined_call_operand.vmem [shape: f32[1,784], index: 13, kind: input, shape index: {}]   ;;  %s12441_s14 = inlined_call_operand.vmem [shape: bf16[512,784], index: 14, kind: output, shape index: {0}]   ;;  %s12442_s15 = inlined_call_operand.vmem [shape: f32[512,256], index: 15, kind: output, shape index: {1}]  }
   0x1 LB: > { %s6683_s19 = sadd.s32 4294967295, %s8172_s18   ;;  %p6687_p0 = scmp.ge.s32.totalorder %s8172_s18, 1  ;;  %s8172_s18 = sphi %s8254_s18, %s26_s18  }
   0x2   : > { %p453_p1 = scmp.lt.s32.totalorder %s8172_s18, 3 }
   0x4   : > { %p454_p2 = pnand %p6687_p0, %p453_p1 }
   0x6   : > { %457 = sbr.rel (%p454_p2) target bundleno = 2745 (0xab9), region = 76 }
   0xb   : > { %v6755_v0 = vld [vmem:[%s12429_s2 + $0x70] sm:$0xf]  ;;  %v7811_v1 = vld [vmem:[%s12429_s2 + $0x74] sm:$0xf0]  ;;  %v6747_v5 = vld [vmem:[%s12429_s2 + $0x60] sm:$0xf] }
   0xc   : > { %v6883_v2 = vld [vmem:[%s12429_s2 + $0x170] sm:$0xf]  ;;  %v6756_v3 = vor.u32 %v7811_v1, %v6755_v0  ;;  %v7843_v4 = vld [vmem:[%s12429_s2 + $0x174] sm:$0xf0]  ;;  %v7809_v6 = vld [vmem:[%s12429_s2 + $0x64] sm:$0xf0] }
   0xd   : > { %v8280_v7 = vor.u32 %v7843_v4, %v6883_v2  ;;  %v6875_v8 = vld [vmem:[%s12429_s2 + $0x160] sm:$0xf]  ;;  %v7841_v9 = vld [vmem:[%s12429_s2 + $0x164] sm:$0xf0]  ;;  %v6748_v10 = vor.u32 %v7809_v6, %v6747_v5  ;;  %v6739_v11 = vld [vmem:[%s12429_s2 + $0x50] sm:$0xf] }
   0xe   : > { %8062 = vmatpush.bf16.msra.mxu3 %v6756_v3  ;;  %1521 = vmatpush.bf16.msra.mxu0 %v6756_v3  ;;  %v8292_v12 = vor.u32 %v7841_v9, %v6875_v8  ;;  %v7807_v13 = vld [vmem:[%s12429_s2 + $0x54] sm:$0xf0]  ;;  %v6819_v14 = vld [vmem:[%s12429_s2 + $0xf0] sm:$0xf]  ;;  %v6811_v19 = vld [vmem:[%s12429_s2 + $0xe0] sm:$0xf] }
   0xf   : > { %1699 = vmatpush.bf16.msra.mxu2 %v8280_v7  ;;  %v7827_v15 = vld [vmem:[%s12429_s2 + $0xf4] sm:$0xf0]  ;;  %v6867_v16 = vld [vmem:[%s12429_s2 + $0x150] sm:$0xf]  ;;  %v7825_v20 = vld [vmem:[%s12429_s2 + $0xe4] sm:$0xf0]  ;;  %v6740_v21 = vor.u32 %v7807_v13, %v6739_v11 }
  0x10   : > { %v7839_v17 = vld [vmem:[%s12429_s2 + $0x154] sm:$0xf0]  ;;  %v8309_v18 = vor.u32 %v7827_v15, %v6819_v14  ;;  %v6731_v22 = vld [vmem:[%s12429_s2 + $0x40] sm:$0xf]  ;;  %v8321_v23 = vor.u32 %v7825_v20, %v6811_v19  ;;  %v7805_v25 = vld [vmem:[%s12429_s2 + $0x44] sm:$0xf0] }
  0x11   : > { %v8324_v24 = vor.u32 %v7839_v17, %v6867_v16  ;;  %v6803_v26 = vld [vmem:[%s12429_s2 + $0xd0] sm:$0xf]  ;;  %v7823_v27 = vld [vmem:[%s12429_s2 + $0xd4] sm:$0xf0]  ;;  %v6859_v28 = vld [vmem:[%s12429_s2 + $0x140] sm:$0xf]  ;;  %v6732_v30 = vor.u32 %v7805_v25, %v6731_v22 }
  0x12   : > { %8063 = vmatpush.bf16.msra.mxu3 %v6748_v10  ;;  %1610 = vmatpush.bf16.msra.mxu1 %v8309_v18  ;;  %v7837_v29 = vld [vmem:[%s12429_s2 + $0x144] sm:$0xf0]  ;;  %v6723_v31 = vld [vmem:[%s12429_s2 + $0x30] sm:$0xf]  ;;  %v8345_v32 = vor.u32 %v7823_v27, %v6803_v26  ;;  %v7803_v34 = vld [vmem:[%s12429_s2 + $0x34] sm:$0xf0] }
  0x13   : > { %1700 = vmatpush.bf16.msra.mxu2 %v8292_v12  ;;  %1522 = vmatpush.bf16.msra.mxu0 %v6748_v10  ;;  %v8348_v33 = vor.u32 %v7837_v29, %v6859_v28  ;;  %v6795_v35 = vld [vmem:[%s12429_s2 + $0xc0] sm:$0xf]  ;;  %v7821_v36 = vld [vmem:[%s12429_s2 + $0xc4] sm:$0xf0]  ;;  %v6851_v37 = vld [vmem:[%s12429_s2 + $0x130] sm:$0xf]  ;;  %v6724_v40 = vor.u32 %v7803_v34, %v6723_v31 }
  0x14   : > { %v7835_v38 = vld [vmem:[%s12429_s2 + $0x134] sm:$0xf0]  ;;  %v6715_v39 = vld [vmem:[%s12429_s2 + $0x20] sm:$0xf]  ;;  %s6688_s26 = sshll.u32 %s6683_s19, 5  ;;  %v8377_v43 = vor.u32 %v7821_v36, %v6795_v35  ;;  %vm1472_vm0 = vcmask 130048  }
  0x15   : > { %v7801_v41 = vld [vmem:[%s12429_s2 + $0x24] sm:$0xf0]  ;;  %v6843_v42 = vld [vmem:[%s12429_s2 + $0x120] sm:$0xf]  ;;  %p515_p3 = scmp.lt.s32.totalorder %s6688_s26, 63  ;;  %v8380_v44 = vor.u32 %v7835_v38, %v6851_v37  ;;  %vm6387_vm1 = vcmask 125952  }
  0x16   : > { %8064 = vmatpush.bf16.msra.mxu3 %v6740_v21  ;;  %1611 = vmatpush.bf16.msra.mxu1 %v8321_v23  ;;  %v6787_v45 = vld [vmem:[%s12429_s2 + $0xb0] sm:$0xf]  ;;  %v7819_v46 = vld [vmem:[%s12429_s2 + $0xb4] sm:$0xf0]  ;;  %v7833_v47 = vld [vmem:[%s12429_s2 + $0x124] sm:$0xf0]  ;;  %v6716_v48 = vor.u32 %v7801_v41, %v6715_v39 }
  0x17   : > { %1701 = vmatpush.bf16.msra.mxu2 %v8324_v24  ;;  %1523 = vmatpush.bf16.msra.mxu0 %v6740_v21  ;;  %s12783_s26 = smov (!%p515_p3, %s6688_s26), 63  ;;  %v6707_v49 = vld [vmem:[%s12429_s2 + $0x10] sm:$0xf]  ;;  %v7799_v50 = vld [vmem:[%s12429_s2 + $0x14] sm:$0xf0]  ;;  %v8400_v51 = vor.u32 %v7819_v46, %v6787_v45  ;;  %v8403_v52 = vor.u32 %v7833_v47, %v6843_v42 }
  0x18   : > { %v6779_v53 = vld [vmem:[%s12429_s2 + $0xa0] sm:$0xf]  ;;  %v7817_v54 = vld [vmem:[%s12429_s2 + $0xa4] sm:$0xf0]  ;;  %s8086_s16 = smul.u32 56, %s12783_s26  ;;  %v6708_v57 = vor.u32 %v7799_v50, %v6707_v49  ;;  %s7795_s29 = sshll.u32 %s12783_s26, 4 }
  0x19   : > { %v6835_v55 = vld [vmem:[%s12429_s2 + $0x110] sm:$0xf]  ;;  %v7831_v56 = vld [vmem:[%s12429_s2 + $0x114] sm:$0xf0]  ;;  %v6699_v58 = vld [vmem:[%s12429_s2] sm:$0xf]  ;;  %v6780_v59 = vor.u32 %v7817_v54, %v6779_v53  ;;  %s10377_s20 = scalar_lea.vmem %s12442_s15, %s7795_s29 }
  0x1a   : > { %8065 = vmatpush.bf16.msra.mxu3 %v6732_v30  ;;  %1612 = vmatpush.bf16.msra.mxu1 %v8345_v32  ;;  %v8423_v60 = vor.u32 %v7831_v56, %v6835_v55  ;;  %v7797_v61 = vld [vmem:[%s12429_s2 + $0x4] sm:$0xf0]  ;;  %s8431_s30 = scalar_lea.vmem %s12427_s0, %s8086_s16  ;;  %v6771_v62 = vld [vmem:[%s12429_s2 + $0x90] sm:$0xf]  ;;  %v7815_v63 = vld [vmem:[%s12429_s2 + $0x94] sm:$0xf0] }
  0x1b   : > { %1702 = vmatpush.bf16.msra.mxu2 %v8348_v33  ;;  %1524 = vmatpush.bf16.msra.mxu0 %v6732_v30  ;;  %v6827_v0 = vld [vmem:[%s12429_s2 + $0x100] sm:$0xf]  ;;  %v7829_v1 = vld [vmem:[%s12429_s2 + $0x104] sm:$0xf0]  ;;  %v6700_v2 = vor.u32 %v7797_v61, %v6699_v58  ;;  %v717_v4 = vld [vmem:[%s8431_s30 + $0x578] sm:$0xff]  ;;  %v6772_v5 = vor.u32 %v7815_v63, %v6771_v62  ;;  %s6691_s21 = sshll.u32 %s12783_s26, 3 }
  0x1c   : > { %v710_v3 = vld [vmem:[%s8431_s30 + $0x540] sm:$0xff]  ;;  %v8451_v8 = vor.u32 %v7829_v1, %v6827_v0  ;;  %v544_v9 = vld [vmem:[%s8431_s30 + $0x10] sm:$0xff]  ;;  %v551_v10 = vld [vmem:[%s8431_s30 + $0x48] sm:$0xff]  ;;  %s8087_s28 = smul.u32 28, %s12783_s26 }
  0x1d   : > { %v6763_v6 = vld [vmem:[%s12429_s2 + $0x80] sm:$0xf]  ;;  %v7813_v11 = vld [vmem:[%s12429_s2 + $0x84] sm:$0xf0]  ;;  %v549_v14 = vld [vmem:[%s8431_s30 + $0x38] sm:$0xff]  ;;  %v8460_v15 = vpack.c.bf16 %v717_v4, %v710_v3  ;;  %v8462_v16 = vpack.c.bf16 %v551_v10, %v544_v9 }
  0x1e   : > { %8066 = vmatpush.bf16.msra.mxu3 %v6724_v40  ;;  %1613 = vmatpush.bf16.msra.mxu1 %v8377_v43  ;;  %v542_v13 = vld [vmem:[%s8431_s30] sm:$0xff]  ;;  %v6764_v17 = vor.u32 %v7813_v11, %v6763_v6  ;;  %v543_v19 = vld [vmem:[%s8431_s30 + $0x8] sm:$0xff]  ;;  %v565_v27 = vld [vmem:[%s8431_s30 + $0xb8] sm:$0xff]  ;;  %s11237_s17 = scalar_lea.vmem %s12441_s14, %s8087_s28 }
  0x1f   : > { %1703 = vmatpush.bf16.msra.mxu2 %v8380_v44  ;;  %1525 = vmatpush.bf16.msra.mxu0 %v6724_v40  ;;  %12546 = vst [vmem:[#allocation2_spill] sm:$0xff] %v8460_v15  ;;  %v550_v20 = vld [vmem:[%s8431_s30 + $0x40] sm:$0xff]  ;;  %v8468_v21 = vpack.c.bf16 %v549_v14, %v542_v13  ;;  %v731_v25 = vld [vmem:[%s8431_s30 + $0x5e8] sm:$0xff]  ;;  %v556_v28 = vld [vmem:[%s8431_s30 + $0x70] sm:$0xff] }
  0x20   : > { %v8471_v22 = vpack.c.bf16 %v550_v20, %v543_v19  ;;  %v558_v26 = vld [vmem:[%s8431_s30 + $0x80] sm:$0xff]  ;;  %v563_v29 = vld [vmem:[%s8431_s30 + $0xa8] sm:$0xff]  ;;  %v564_v34 = vld [vmem:[%s8431_s30 + $0xb0] sm:$0xff] }
  0x21   : > { %v8487_v31 = vpack.c.bf16 %v565_v27, %v558_v26  ;;  %v738_v36 = vld [vmem:[%s8431_s30 + $0x620] sm:$0xff]  ;;  %v745_v37 = vld [vmem:[%s8431_s30 + $0x658] sm:$0xff]  ;;  %v572_v38 = vld [vmem:[%s8431_s30 + $0xf0] sm:$0xff] }
  0x22   : > { %8067 = vmatpush.bf16.msra.mxu3 %v6716_v48  ;;  %1614 = vmatpush.bf16.msra.mxu1 %v8400_v51  ;;  %v579_v39 = vld [vmem:[%s8431_s30 + $0x128] sm:$0xff]  ;;  %v570_v40 = vld [vmem:[%s8431_s30 + $0xe0] sm:$0xff]  ;;  %v577_v41 = vld [vmem:[%s8431_s30 + $0x118] sm:$0xff]  ;;  %v8507_v42 = vpack.c.bf16 %v745_v37, %v738_v36 }
  0x23   : > { %1704 = vmatpush.bf16.msra.mxu2 %v8403_v52  ;;  %1526 = vmatpush.bf16.msra.mxu0 %v6716_v48  ;;  %12548 = vst [vmem:[#allocation4_spill] sm:$0xff] %v8487_v31  ;;  %v571_v45 = vld [vmem:[%s8431_s30 + $0xe8] sm:$0xff]  ;;  %v578_v46 = vld [vmem:[%s8431_s30 + $0x120] sm:$0xff]  ;;  %v8513_v47 = vpack.c.bf16 %v577_v41, %v570_v40  ;;  %v605_v62 = vld [vmem:[%s8431_s30 + $0x1f8] sm:$0xff] }
  0x24   : > { %12551 = vst [vmem:[#allocation7_spill] sm:$0xff] %v8507_v42  ;;  %v8517_v48 = vpack.c.bf16 %v578_v46, %v571_v45  ;;  %v759_v49 = vld [vmem:[%s8431_s30 + $0x6c8] sm:$0xff]  ;;  %v586_v50 = vld [vmem:[%s8431_s30 + $0x160] sm:$0xff]  ;;  %v725_v4 = vld [vmem:[%s8431_s30 + $0x5b8] sm:$0xff] }
  0x25   : > { %12553 = vst [vmem:[#allocation9_spill] sm:$0xff] %v8513_v47  ;;  %v591_v53 = vld [vmem:[%s8431_s30 + $0x188] sm:$0xff]  ;;  %v718_v58 = vld [vmem:[%s8431_s30 + $0x580] sm:$0xff]  ;;  %v612_v9 = vld [vmem:[%s8431_s30 + $0x230] sm:$0xff] }
  0x26   : > { %8068 = vmatpush.bf16.msra.mxu3 %v6708_v57  ;;  %1615 = vmatpush.bf16.msra.mxu1 %v6780_v59  ;;  %12554 = vst [vmem:[#allocation10_spill] sm:$0xff] %v8517_v48  ;;  %v598_v61 = vld [vmem:[%s8431_s30 + $0x1c0] sm:$0xff]  ;;  %v619_v10 = vld [vmem:[%s8431_s30 + $0x268] sm:$0xff]  ;;  %v613_v14 = vld [vmem:[%s8431_s30 + $0x238] sm:$0xff] }
  0x27   : > { %1705 = vmatpush.bf16.msra.mxu2 %v8423_v60  ;;  %1527 = vmatpush.bf16.msra.mxu0 %v6708_v57  ;;  %v606_v1 = vld [vmem:[%s8431_s30 + $0x200] sm:$0xff]  ;;  %v8580_v19 = vpack.c.bf16 %v619_v10, %v612_v9  ;;  %v7075_v26 = vld [vmem:[%s12429_s2 + $0x2f0] sm:$0xf]  ;;  %v635_v37 = vld [vmem:[%s8431_s30 + $0x2e8] sm:$0xff] }
  0x28   : > { %v614_v6 = vld [vmem:[%s8431_s30 + $0x240] sm:$0xff]  ;;  %v628_v36 = vld [vmem:[%s8431_s30 + $0x2b0] sm:$0xff]  ;;  %v627_v45 = vld [vmem:[%s8431_s30 + $0x2a8] sm:$0xff] }
  0x29   : > { %12565 = vst [vmem:[#allocation21_spill] sm:$0xff] %v8580_v19  ;;  %v8608_v41 = vpack.c.bf16 %v635_v37, %v628_v36  ;;  %v634_v46 = vld [vmem:[%s8431_s30 + $0x2e0] sm:$0xff]  ;;  %v641_v10 = vld [vmem:[%s8431_s30 + $0x318] sm:$0xff]  ;;  %v712_v36 = vld [vmem:[%s8431_s30 + $0x550] sm:$0xff] }
  0x2a   : > { %8069 = vmatpush.bf16.msra.mxu3 %v6700_v2  ;;  %1616 = vmatpush.bf16.msra.mxu1 %v6772_v5  ;;  %v719_v37 = vld [vmem:[%s8431_s30 + $0x588] sm:$0xff] }
  0x2b   : > { %1706 = vmatpush.bf16.msra.mxu2 %v8451_v8  ;;  %1528 = vmatpush.bf16.msra.mxu0 %v6700_v2  ;;  %v8560_v2 = vpack.c.bf16 %v605_v62, %v598_v61  ;;  %12568 = vst [vmem:[#allocation24_spill] sm:$0xff] %v8608_v41  ;;  %v760_v61 = vld [vmem:[%s8431_s30 + $0x6d0] sm:$0xff]  ;;  %v642_v62 = vld [vmem:[%s8431_s30 + $0x320] sm:$0xff] }
  0x2d   : > { %1589 = vmatmul.bf16.vlgmr.msra.gmra.mxu3 %v8460_v15  ;;  %12561 = vst [vmem:[#allocation17_spill] sm:$0xff] %v8560_v2  ;;  %v696_v15 = vld [vmem:[%s8431_s30 + $0x4d0] sm:$0xff] }
  0x2e   : > { %8070 = vmatpush.bf16.msrb.mxu3 %v8309_v18  ;;  %1707 = vmatmul.bf16.vlgmr.msra.gmra.mxu2 %v8462_v16  ;;  %v724_v18 = vld [vmem:[%s8431_s30 + $0x5b0] sm:$0xff] }
  0x2f   : > { %1617 = vmatpush.bf16.msra.mxu1 %v6764_v17  ;;  %1529 = vmatmul.bf16.vlgmr.msra.gmra.mxu0 %v8468_v21  ;;  %v8485_v30 = vpack.c.bf16 %v731_v25, %v724_v18  ;;  %v7011_v18 = vld [vmem:[%s12429_s2 + $0x270] sm:$0xf]  ;;  %v7875_v25 = vld [vmem:[%s12429_s2 + $0x274] sm:$0xf0] }
  0x30   : > { %v7012_v27 = vor.u32 %v7875_v25, %v7011_v18 }
  0x31   : > { %12547 = vst [vmem:[#allocation3_spill] sm:$0xff] %v8485_v30 }
  0x32   : > { %8071 = vmatpush.bf16.msrb.mxu3 %v8321_v23  ;;  %1618 = vmatmul.bf16.vlgmr.msra.gmra.mxu1 %v8471_v22  ;;  %v557_v23 = vld [vmem:[%s8431_s30 + $0x78] sm:$0xff] }
  0x33   : > { %v8495_v35 = vpack.c.bf16 %v564_v34, %v557_v23  ;;  %1877 = vmatpush.bf16.msrb.mxu0 %v7012_v27  ;;  %v739_v23 = vld [vmem:[%s8431_s30 + $0x628] sm:$0xff]  ;;  %v746_v34 = vld [vmem:[%s8431_s30 + $0x660] sm:$0xff]  ;;  %v7855_v27 = vld [vmem:[%s12429_s2 + $0x1d4] sm:$0xf0] }
  0x34   : > { %v8606_v40 = vpack.c.bf16 %v746_v34, %v739_v23  ;;  %v7853_v23 = vld [vmem:[%s12429_s2 + $0x1c4] sm:$0xf0] }
  0x35   : > { %12550 = vst [vmem:[#allocation6_spill] sm:$0xff] %v8495_v35 }
  0x36   : > { %8072 = vmatpush.bf16.msrb.mxu3 %v8345_v32  ;;  %v8491_v32 = vpack.c.bf16 %v563_v29, %v556_v28  ;;  %v7891_v28 = vld [vmem:[%s12429_s2 + $0x2f4] sm:$0xf0]  ;;  %12567 = vst [vmem:[#allocation23_spill] sm:$0xff] %v8606_v40 }
  0x37   : > { %v7076_v29 = vor.u32 %v7891_v28, %v7075_v26  ;;  %v6931_v26 = vld [vmem:[%s12429_s2 + $0x1d0] sm:$0xf] }
  0x38   : > { %12549 = vst [vmem:[#allocation5_spill] sm:$0xff] %v8491_v32  ;;  %v6932_v28 = vor.u32 %v7855_v27, %v6931_v26  ;;  %v7059_v26 = vld [vmem:[%s12429_s2 + $0x2d0] sm:$0xf]  ;;  %v7887_v27 = vld [vmem:[%s12429_s2 + $0x2d4] sm:$0xf0] }
  0x39   : > { %1966 = vmatpush.bf16.msrb.mxu1 %v7076_v29  ;;  %v6923_v29 = vld [vmem:[%s12429_s2 + $0x1c0] sm:$0xf] }
  0x3a   : > { %8073 = vmatpush.bf16.msrb.mxu3 %v8377_v43  ;;  %v8509_v43 = vpack.c.bf16 %v579_v39, %v572_v38  ;;  %v626_v38 = vld [vmem:[%s8431_s30 + $0x2a0] sm:$0xff]  ;;  %v633_v39 = vld [vmem:[%s8431_s30 + $0x2d8] sm:$0xff]  ;;  %v6924_v34 = vor.u32 %v7853_v23, %v6923_v29  ;;  %v7849_v23 = vld [vmem:[%s12429_s2 + $0x1a4] sm:$0xf0] }
  0x3b   : > { %v6907_v29 = vld [vmem:[%s12429_s2 + $0x1a0] sm:$0xf] }
  0x3c   : > { %12552 = vst [vmem:[#allocation8_spill] sm:$0xff] %v8509_v43 }
  0x3d   : > { %1594 = vmatmul.bf16.gmra.mxu3 %v8485_v30  ;;  %v690_v30 = vld [vmem:[%s8431_s30 + $0x4a0] sm:$0xff] }
  0x3e   : > { %8074 = vmatpush.bf16.msrb.mxu3 %v8400_v51  ;;  %1712 = vmatmul.bf16.gmra.mxu2 %v8487_v31  ;;  %v584_v51 = vld [vmem:[%s8431_s30 + $0x150] sm:$0xff] }
  0x3f   : > { %1534 = vmatmul.bf16.gmra.mxu0 %v8491_v32  ;;  %v8537_v56 = vpack.c.bf16 %v591_v53, %v584_v51  ;;  %v6939_v53 = vld [vmem:[%s12429_s2 + $0x1e0] sm:$0xf] }
  0x41   : > { %12557 = vst [vmem:[#allocation13_spill] sm:$0xff] %v8537_v56 }
  0x42   : > { %8075 = vmatpush.bf16.msrb.mxu3 %v6780_v59  ;;  %1623 = vmatmul.bf16.gmra.mxu1 %v8495_v35  ;;  %v607_v59 = vld [vmem:[%s8431_s30 + $0x208] sm:$0xff] }
  0x43   : > { %v623_v35 = vld [vmem:[%s8431_s30 + $0x288] sm:$0xff] }
  0x46   : > { %8076 = vmatpush.bf16.msrb.mxu3 %v6772_v5  ;;  %v732_v5 = vld [vmem:[%s8431_s30 + $0x5f0] sm:$0xff] }
  0x47   : > { %v8574_v11 = vpack.c.bf16 %v732_v5, %v725_v4  ;;  %v647_v4 = vld [vmem:[%s8431_s30 + $0x348] sm:$0xff] }
  0x49   : > { %12563 = vst [vmem:[#allocation19_spill] sm:$0xff] %v8574_v11 }
  0x4a   : > { %8077 = vmatpush.bf16.msrb.mxu3 %v6764_v17  ;;  %v620_v17 = vld [vmem:[%s8431_s30 + $0x270] sm:$0xff] }
  0x4b   : > { %v8583_v20 = vpack.c.bf16 %v620_v17, %v613_v14  ;;  %v648_v14 = vld [vmem:[%s8431_s30 + $0x350] sm:$0xff] }
  0x4c   : > { %v8659_v25 = vpack.c.bf16 %v648_v14, %v641_v10 }
  0x4d   : > { %1599 = vmatmul.bf16.gmra.mxu3 %v8507_v42  ;;  %12566 = vst [vmem:[#allocation22_spill] sm:$0xff] %v8583_v20  ;;  %v7881_v42 = vld [vmem:[%s12429_s2 + $0x2a4] sm:$0xf0] }
  0x4e   : > { %8078 = vmatpush.bf16.msra.mxu3 %v8280_v7  ;;  %1717 = vmatmul.bf16.gmra.mxu2 %v8509_v43  ;;  %v752_v7 = vld [vmem:[%s8431_s30 + $0x690] sm:$0xff]  ;;  %12574 = vst [vmem:[#allocation30_spill] sm:$0xff] %v8659_v25 }
  0x4f   : > { %1539 = vmatmul.bf16.gmra.mxu0 %v8513_v47  ;;  %v8531_v54 = vpack.c.bf16 %v759_v49, %v752_v7  ;;  %v8612_v7 = vpack.c.bf16 %v633_v39, %v626_v38  ;;  %v8615_v49 = vpack.c.bf16 %v634_v46, %v627_v45  ;;  %v656_v38 = vld [vmem:[%s8431_s30 + $0x390] sm:$0xff]  ;;  %v663_v39 = vld [vmem:[%s8431_s30 + $0x3c8] sm:$0xff]  ;;  %v976_v45 = vld [vmem:[%s12430_s3] sm:$0x3] }
  0x50   : > { %v654_v46 = vld [vmem:[%s8431_s30 + $0x380] sm:$0xff] }
  0x51   : > { %12555 = vst [vmem:[#allocation11_spill] sm:$0xff] %v8531_v54  ;;  %v610_v47 = vld [vmem:[%s8431_s30 + $0x220] sm:$0xff] }
  0x52   : > { %8079 = vmatpush.bf16.msra.mxu3 %v8292_v12  ;;  %1628 = vmatmul.bf16.gmra.mxu1 %v8517_v48  ;;  %v593_v12 = vld [vmem:[%s8431_s30 + $0x198] sm:$0xff]  ;;  %12569 = vst [vmem:[#allocation25_spill] sm:$0xff] %v8612_v7 }
  0x53   : > { %v8533_v55 = vpack.c.bf16 %v593_v12, %v586_v50  ;;  %12570 = vst [vmem:[#allocation26_spill] sm:$0xff] %v8615_v49  ;;  %v6947_v50 = vld [vmem:[%s12429_s2 + $0x1f0] sm:$0xf]  ;;  %v7859_v12 = vld [vmem:[%s12429_s2 + $0x1f4] sm:$0xf0] }
  0x54   : > { %v6948_v51 = vor.u32 %v7859_v12, %v6947_v50  ;;  %v661_v50 = vld [vmem:[%s8431_s30 + $0x3b8] sm:$0xff]  ;;  %v8685_v12 = vpack.c.bf16 %v719_v37, %v712_v36 }
  0x55   : > { %12556 = vst [vmem:[#allocation12_spill] sm:$0xff] %v8533_v55 }
  0x56   : > { %8080 = vmatpush.bf16.msra.mxu3 %v8324_v24  ;;  %v585_v24 = vld [vmem:[%s8431_s30 + $0x158] sm:$0xff]  ;;  %12575 = vst [vmem:[#allocation31_spill] sm:$0xff] %v8685_v12 }
  0x5a   : > { %8081 = vmatpush.bf16.msra.mxu3 %v8348_v33  ;;  %v592_v33 = vld [vmem:[%s8431_s30 + $0x190] sm:$0xff] }
  0x5b   : > { %v8541_v57 = vpack.c.bf16 %v592_v33, %v585_v24  ;;  %v7857_v24 = vld [vmem:[%s12429_s2 + $0x1e4] sm:$0xf0] }
  0x5c   : > { %v6940_v33 = vor.u32 %v7857_v24, %v6939_v53  ;;  %v655_v53 = vld [vmem:[%s8431_s30 + $0x388] sm:$0xff]  ;;  %v662_v24 = vld [vmem:[%s8431_s30 + $0x3c0] sm:$0xff] }
  0x5d   : > { %1604 = vmatmul.bf16.gmra.mxu3 %v8531_v54  ;;  %12558 = vst [vmem:[#allocation14_spill] sm:$0xff] %v8541_v57  ;;  %v7865_v54 = vld [vmem:[%s12429_s2 + $0x224] sm:$0xf0] }
  0x5e   : > { %8082 = vmatpush.bf16.msra.mxu3 %v8380_v44  ;;  %1722 = vmatmul.bf16.gmra.mxu2 %v8533_v55  ;;  %v711_v44 = vld [vmem:[%s8431_s30 + $0x548] sm:$0xff] }
  0x5f   : > { %1544 = vmatmul.bf16.gmra.mxu0 %v8537_v56  ;;  %v8554_v63 = vpack.c.bf16 %v718_v58, %v711_v44  ;;  %v7003_v44 = vld [vmem:[%s12429_s2 + $0x260] sm:$0xf]  ;;  %v7873_v58 = vld [vmem:[%s12429_s2 + $0x264] sm:$0xf0]  ;;  %v596_v56 = vld [vmem:[%s8431_s30 + $0x1b0] sm:$0xff] }
  0x61   : > { %12559 = vst [vmem:[#allocation15_spill] sm:$0xff] %v8554_v63 }
  0x62   : > { %8083 = vmatpush.bf16.msra.mxu3 %v8403_v52  ;;  %1633 = vmatmul.bf16.gmra.mxu1 %v8541_v57  ;;  %v600_v52 = vld [vmem:[%s8431_s30 + $0x1d0] sm:$0xff]  ;;  %v589_v57 = vld [vmem:[%s8431_s30 + $0x178] sm:$0xff] }
  0x63   : > { %v8556_v0 = vpack.c.bf16 %v607_v59, %v600_v52  ;;  %v7004_v52 = vor.u32 %v7873_v58, %v7003_v44  ;;  %v753_v59 = vld [vmem:[%s8431_s30 + $0x698] sm:$0xff]  ;;  %v8693_v44 = vpack.c.bf16 %v661_v50, %v654_v46  ;;  %v670_v50 = vld [vmem:[%s8431_s30 + $0x400] sm:$0xff] }
  0x64   : > { %v8644_v5 = vpack.c.bf16 %v760_v61, %v753_v59  ;;  %v8697_v59 = vpack.c.bf16 %v662_v24, %v655_v53  ;;  %v677_v53 = vld [vmem:[%s8431_s30 + $0x438] sm:$0xff] }
  0x65   : > { %12560 = vst [vmem:[#allocation16_spill] sm:$0xff] %v8556_v0  ;;  %1878 = vmatpush.bf16.msrb.mxu0 %v7004_v52 }
  0x66   : > { %8084 = vmatpush.bf16.msra.mxu3 %v8423_v60  ;;  %v599_v60 = vld [vmem:[%s8431_s30 + $0x1c8] sm:$0xff]  ;;  %12571 = vst [vmem:[#allocation27_spill] sm:$0xff] %v8644_v5 }
  0x67   : > { %v8563_v3 = vpack.c.bf16 %v606_v1, %v599_v60  ;;  %v649_v60 = vld [vmem:[%s8431_s30 + $0x358] sm:$0xff]  ;;  %v640_v1 = vld [vmem:[%s8431_s30 + $0x310] sm:$0xff]  ;;  %12577 = vst [vmem:[#allocation33_spill] sm:$0xff] %v8693_v44 }
  0x68   : > { %v8652_v9 = vpack.c.bf16 %v649_v60, %v642_v62  ;;  %v8656_v18 = vpack.c.bf16 %v647_v4, %v640_v1  ;;  %12578 = vst [vmem:[#allocation34_spill] sm:$0xff] %v8697_v59  ;;  %v6915_v62 = vld [vmem:[%s12429_s2 + $0x1b0] sm:$0xf]  ;;  %v7851_v60 = vld [vmem:[%s12429_s2 + $0x1b4] sm:$0xf0] }
  0x69   : > { %12562 = vst [vmem:[#allocation18_spill] sm:$0xff] %v8563_v3  ;;  %v6995_v1 = vld [vmem:[%s12429_s2 + $0x250] sm:$0xf] }
  0x6a   : > { %8085 = vmatpush.bf16.msra.mxu3 %v8451_v8  ;;  %v621_v8 = vld [vmem:[%s8431_s30 + $0x278] sm:$0xff]  ;;  %12572 = vst [vmem:[#allocation28_spill] sm:$0xff] %v8652_v9 }
  0x6b   : > { %v8576_v13 = vpack.c.bf16 %v621_v8, %v614_v6  ;;  %v7067_v6 = vld [vmem:[%s12429_s2 + $0x2e0] sm:$0xf]  ;;  %v7889_v8 = vld [vmem:[%s12429_s2 + $0x2e4] sm:$0xf0]  ;;  %12573 = vst [vmem:[#allocation29_spill] sm:$0xff] %v8656_v18 }
  0x6c   : > { %v7068_v17 = vor.u32 %v7889_v8, %v7067_v6  ;;  %v6916_v6 = vor.u32 %v7851_v60, %v6915_v62  ;;  %v7871_v8 = vld [vmem:[%s12429_s2 + $0x254] sm:$0xf0]  ;;  %v8747_v60 = vpack.c.bf16 %v677_v53, %v670_v50  ;;  %v7051_v53 = vld [vmem:[%s12429_s2 + $0x2c0] sm:$0xf] }
  0x6d   : > { %1678 = vmatmul.bf16.vlgmr.msrb.gmra.mxu3 %v8554_v63  ;;  %12564 = vst [vmem:[#allocation20_spill] sm:$0xff] %v8576_v13  ;;  %v6996_v14 = vor.u32 %v7871_v8, %v6995_v1  ;;  %v669_v1 = vld [vmem:[%s8431_s30 + $0x3f8] sm:$0xff] }
  0x6e   : > { %1727 = vmatmul.bf16.gmra.mxu2 %v8556_v0  ;;  %1788 = vmatpush.bf16.msrb.mxu3 %v6948_v51  ;;  %v8687_v51 = vpack.c.bf16 %v663_v39, %v656_v38  ;;  %v726_v39 = vld [vmem:[%s8431_s30 + $0x5c0] sm:$0xff]  ;;  %12580 = vst [vmem:[#allocation36_spill] sm:$0xff] %v8747_v60 }
  0x6f   : > { %1549 = vmatmul.bf16.gmra.mxu0 %v8560_v2  ;;  %1967 = vmatpush.bf16.msrb.mxu1 %v7068_v17  ;;  %v582_v0 = vld [vmem:[%s8431_s30 + $0x140] sm:$0xff]  ;;  %v595_v2 = vld [vmem:[%s8431_s30 + $0x1a8] sm:$0xff] }
  0x70   : > { %12576 = vst [vmem:[#allocation32_spill] sm:$0xff] %v8687_v51  ;;  %1879 = vmatpush.bf16.msrb.mxu0 %v6996_v14 }
  0x72   : > { %1638 = vmatmul.bf16.gmra.mxu1 %v8563_v3  ;;  %1789 = vmatpush.bf16.msrb.mxu3 %v6940_v33  ;;  %v8691_v33 = vperm.slane %v976_v45, 0  ;;  %v733_v45 = vld [vmem:[%s8431_s30 + $0x5f8] sm:$0xff] }
  0x73   : > { %v8745_v62 = vpack.c.bf16 %v733_v45, %v726_v39  ;;  %v7869_v39 = vld [vmem:[%s12429_s2 + $0x244] sm:$0xf0] }
  0x75   : > { %12579 = vst [vmem:[#allocation35_spill] sm:$0xff] %v8745_v62 }
  0x76   : > { %1790 = vmatpush.bf16.msrb.mxu3 %v6932_v28  ;;  %v7060_v28 = vor.u32 %v7887_v27, %v7059_v26 }
  0x78   : > { %1968 = vmatpush.bf16.msrb.mxu1 %v7060_v28 }
  0x7a   : > { %1791 = vmatpush.bf16.msrb.mxu3 %v6924_v34  ;;  %v6908_v34 = vor.u32 %v7849_v23, %v6907_v29  ;;  %v6899_v29 = vld [vmem:[%s12429_s2 + $0x190] sm:$0xf]  ;;  %v7847_v23 = vld [vmem:[%s12429_s2 + $0x194] sm:$0xf0] }
  0x7d   : > { %1683 = vmatmul.bf16.gmra.mxu3 %v8574_v11  ;;  %v683_v11 = vld [vmem:[%s8431_s30 + $0x468] sm:$0xff] }
  0x7e   : > { %1732 = vmatmul.bf16.gmra.mxu2 %v8576_v13  ;;  %1792 = vmatpush.bf16.msrb.mxu3 %v6916_v6  ;;  %v676_v6 = vld [vmem:[%s8431_s30 + $0x430] sm:$0xff] }
  0x7f   : > { %1554 = vmatmul.bf16.gmra.mxu0 %v8580_v19  ;;  %v8755_v27 = vpack.c.bf16 %v676_v6, %v669_v1  ;;  %v6891_v1 = vld [vmem:[%s12429_s2 + $0x180] sm:$0xf]  ;;  %v7845_v6 = vld [vmem:[%s12429_s2 + $0x184] sm:$0xf0] }
  0x80   : > { %v575_v19 = vld [vmem:[%s8431_s30 + $0x108] sm:$0xff] }
  0x81   : > { %12582 = vst [vmem:[#allocation38_spill] sm:$0xff] %v8755_v27 }
  0x82   : > { %1643 = vmatmul.bf16.gmra.mxu1 %v8583_v20  ;;  %1793 = vmatpush.bf16.msrb.mxu3 %v6908_v34 }
  0x8d   : > { %1688 = vmatmul.bf16.gmra.mxu3 %v8606_v40 }
  0x8e   : > { %1737 = vmatmul.bf16.gmra.mxu2 %v8608_v41  ;;  %v561_v41 = vld [vmem:[%s8431_s30 + $0x98] sm:$0xff] }
  0x8f   : > { %1559 = vmatmul.bf16.gmra.mxu0 %v8612_v7 }
  0x92   : > { %1648 = vmatmul.bf16.gmra.mxu1 %v8615_v49  ;;  %v568_v49 = vld [vmem:[%s8431_s30 + $0xd0] sm:$0xff] }
  0x9d   : > { %1693 = vmatmul.bf16.gmra.mxu3 %v8644_v5  ;;  %v691_v5 = vld [vmem:[%s8431_s30 + $0x4a8] sm:$0xff] }
  0x9e   : > { %1742 = vmatmul.bf16.gmra.mxu2 %v8652_v9  ;;  %v560_v9 = vld [vmem:[%s8431_s30 + $0x90] sm:$0xff] }
  0x9f   : > { %1564 = vmatmul.bf16.gmra.mxu0 %v8656_v18 }
  0xa2   : > { %1653 = vmatmul.bf16.gmra.mxu1 %v8659_v25  ;;  %v567_v25 = vld [vmem:[%s8431_s30 + $0xc8] sm:$0xff] }
  0xa3   : > { %v8982_v7 = vpack.c.bf16 %v567_v25, %v560_v9 }
  0xa5   : > { %12596 = vst [vmem:[#allocation52_spill] sm:$0xff] %v8982_v7 }
  0xac   : > { %v1530_v58 = vpop.f32.mrf.mxu0 }
  0xad   : > { %1767 = vmatmul.bf16.vlgmr.msra.gmra.mxu3 %v8685_v12  ;;  %v1531_v52 = vadd.f32 %v1530_v58, %v8691_v33  ;;  %v668_v58 = vld [vmem:[%s8431_s30 + $0x3f0] sm:$0xff]  ;;  %v7863_v12 = vld [vmem:[%s12429_s2 + $0x214] sm:$0xf0] }
  0xae   : > { %1747 = vmatmul.bf16.gmra.mxu2 %v8687_v51  ;;  %v554_v51 = vld [vmem:[%s8431_s30 + $0x60] sm:$0xff] }
  0xaf   : > { %v1619_v61 = vpop.f32.mrf.mxu1  ;;  %1569 = vmatmul.bf16.gmra.mxu0 %v8693_v44  ;;  %v566_v44 = vld [vmem:[%s8431_s30 + $0xc0] sm:$0xff] }
  0xb0   : > { %v8709_v4 = vadd.f32 %v1619_v61, %v1531_v52  ;;  %v8715_v10 = vpop.f32.mrf.mxu3  ;;  %v675_v52 = vld [vmem:[%s8431_s30 + $0x428] sm:$0xff] }
  0xb1   : > { %v8717_v17 = vpop.f32.mrf.mxu2  ;;  %v8751_v8 = vpack.c.bf16 %v675_v52, %v668_v58  ;;  %v7885_v58 = vld [vmem:[%s12429_s2 + $0x2c4] sm:$0xf0] }
  0xb2   : > { %1658 = vmatmul.bf16.gmra.mxu1 %v8697_v59  ;;  %v7052_v52 = vor.u32 %v7885_v58, %v7051_v53  ;;  %v747_v53 = vld [vmem:[%s8431_s30 + $0x668] sm:$0xff]  ;;  %v7043_v58 = vld [vmem:[%s12429_s2 + $0x2b0] sm:$0xf] }
  0xb3   : > { %12581 = vst [vmem:[#allocation37_spill] sm:$0xff] %v8751_v8 }
  0xb4   : > { %v1532_v36 = vpop.f32.mrf.mxu0  ;;  %1969 = vmatpush.bf16.msrb.mxu1 %v7052_v52  ;;  %v682_v52 = vld [vmem:[%s8431_s30 + $0x460] sm:$0xff] }
  0xb5   : > { %v1533_v37 = vadd.f32 %v1532_v36, %v8691_v33  ;;  %v6900_v36 = vor.u32 %v7847_v23, %v6899_v29 }
  0xb7   : > { %v1621_v38 = vpop.f32.mrf.mxu1  ;;  %1794 = vmatpush.bf16.msrb.mxu3 %v6900_v36 }
  0xb8   : > { %v8735_v46 = vadd.f32 %v1621_v38, %v1533_v37  ;;  %v8739_v24 = vpop.f32.mrf.mxu3  ;;  %v6987_v38 = vld [vmem:[%s12429_s2 + $0x240] sm:$0xf] }
  0xb9   : > { %v8743_v61 = vpop.f32.mrf.mxu2  ;;  %v6988_v50 = vor.u32 %v7869_v39, %v6987_v38  ;;  %v684_v38 = vld [vmem:[%s8431_s30 + $0x470] sm:$0xff] }
  0xba   : > { %v740_v39 = vld [vmem:[%s8431_s30 + $0x630] sm:$0xff] }
  0xbb   : > { %1880 = vmatpush.bf16.msrb.mxu0 %v6988_v50  ;;  %v8824_v40 = vpack.c.bf16 %v747_v53, %v740_v39 }
  0xbc   : > { %v1535_v14 = vpop.f32.mrf.mxu0 }
  0xbd   : > { %1772 = vmatmul.bf16.gmra.mxu3 %v8745_v62  ;;  %v1536_v26 = vadd.f32 %v1535_v14, %v8691_v33  ;;  %v6892_v14 = vor.u32 %v7845_v6, %v6891_v1  ;;  %v7883_v1 = vld [vmem:[%s12429_s2 + $0x2b4] sm:$0xf0]  ;;  %12583 = vst [vmem:[#allocation39_spill] sm:$0xff] %v8824_v40  ;;  %v8835_v62 = vpack.c.bf16 %v691_v5, %v684_v38 }
  0xbe   : > { %1752 = vmatmul.bf16.gmra.mxu2 %v8747_v60  ;;  %v8849_v38 = vpack.c.bf16 %v690_v30, %v683_v11  ;;  %v7879_v11 = vld [vmem:[%s12429_s2 + $0x294] sm:$0xf0] }
  0xbf   : > { %v1624_v28 = vpop.f32.mrf.mxu1  ;;  %1574 = vmatmul.bf16.gmra.mxu0 %v8751_v8  ;;  %1795 = vmatpush.bf16.msrb.mxu3 %v6892_v14  ;;  %12584 = vst [vmem:[#allocation40_spill] sm:$0xff] %v8835_v62  ;;  %v547_v8 = vld [vmem:[%s8431_s30 + $0x28] sm:$0xff] }
  0xc0   : > { %v8764_v34 = vadd.f32 %v1624_v28, %v1536_v26  ;;  %v8767_v37 = vpop.f32.mrf.mxu3  ;;  %v6979_v26 = vld [vmem:[%s12429_s2 + $0x230] sm:$0xf]  ;;  %v7867_v28 = vld [vmem:[%s12429_s2 + $0x234] sm:$0xf0]  ;;  %12586 = vst [vmem:[#allocation42_spill] sm:$0xff] %v8849_v38 }
  0xc1   : > { %v8775_v45 = vpop.f32.mrf.mxu2  ;;  %v6980_v23 = vor.u32 %v7867_v28, %v6979_v26  ;;  %v689_v26 = vld [vmem:[%s8431_s30 + $0x498] sm:$0xff]  ;;  %v7044_v28 = vor.u32 %v7883_v1, %v7043_v58  ;;  %v7893_v58 = vld [vmem:[%s12429_s2 + $0x304] sm:$0xf0]  ;;  %v7035_v1 = vld [vmem:[%s12429_s2 + $0x2a0] sm:$0xf] }
  0xc2   : > { %1663 = vmatmul.bf16.gmra.mxu1 %v8755_v27  ;;  %v7036_v53 = vor.u32 %v7881_v42, %v7035_v1 }
  0xc3   : > { %1881 = vmatpush.bf16.msrb.mxu0 %v6980_v23  ;;  %1970 = vmatpush.bf16.msrb.mxu1 %v7044_v28  ;;  %v8839_v28 = vpack.c.bf16 %v689_v26, %v682_v52  ;;  %v7810_v26 = vld [vmem:[%s12429_s2 + $0x74] sm:$0xf] }
  0xc4   : > { %v1537_v29 = vpop.f32.mrf.mxu0 }
  0xc5   : > { %v1538_v36 = vadd.f32 %v1537_v29, %v8691_v33  ;;  %v6971_v29 = vld [vmem:[%s12429_s2 + $0x220] sm:$0xf]  ;;  %12585 = vst [vmem:[#allocation41_spill] sm:$0xff] %v8839_v28 }
  0xc6   : > { %v6972_v23 = vor.u32 %v7865_v54, %v6971_v29  ;;  %v6963_v29 = vld [vmem:[%s12429_s2 + $0x210] sm:$0xf] }
  0xc7   : > { %v1626_v50 = vpop.f32.mrf.mxu1  ;;  %1971 = vmatpush.bf16.msrb.mxu1 %v7036_v53  ;;  %v6964_v42 = vor.u32 %v7863_v12, %v6963_v29  ;;  %v7861_v53 = vld [vmem:[%s12429_s2 + $0x204] sm:$0xf0] }
  0xc8   : > { %v8806_v6 = vadd.f32 %v1626_v50, %v1538_v36  ;;  %v8811_v14 = vpop.f32.mrf.mxu3  ;;  %v7083_v36 = vld [vmem:[%s12429_s2 + $0x300] sm:$0xf]  ;;  %1882 = vmatpush.bf16.msrb.mxu0 %v6972_v23  ;;  %v7027_v23 = vld [vmem:[%s12429_s2 + $0x290] sm:$0xf] }
  0xc9   : > { %v8822_v50 = vpop.f32.mrf.mxu2  ;;  %v7084_v39 = vor.u32 %v7893_v58, %v7083_v36  ;;  %v6757_v36 = vld [vmem:[%s12429_s2 + $0x78] sm:$0xf0]  ;;  %v7028_v1 = vor.u32 %v7879_v11, %v7027_v23 }
  0xca   : > { %v6760_v30 = vor.u32 %v7810_v26, %v6757_v36  ;;  %v761_v11 = vld [vmem:[%s8431_s30 + $0x6d8] sm:$0xff] }
  0xcb   : > { %2062 = vmatpush.bf16.msrb.mxu2 %v7084_v39  ;;  %v6955_v39 = vld [vmem:[%s12429_s2 + $0x200] sm:$0xf]  ;;  %1972 = vmatpush.bf16.msrb.mxu1 %v7028_v1 }
  0xcc   : > { %v1540_v54 = vpop.f32.mrf.mxu0  ;;  %1883 = vmatpush.bf16.msrb.mxu0 %v6964_v42  ;;  %2144 = vmatpush.bf16.msra.mxu3 %v6760_v30  ;;  %v6956_v29 = vor.u32 %v7861_v53, %v6955_v39  ;;  %v7877_v42 = vld [vmem:[%s12429_s2 + $0x284] sm:$0xf0]  ;;  %v754_v30 = vld [vmem:[%s8431_s30 + $0x6a0] sm:$0xff] }
  0xcd   : > { %1777 = vmatmul.bf16.gmra.mxu3 %v8824_v40  ;;  %v1541_v5 = vadd.f32 %v1540_v54, %v8691_v33  ;;  %v698_v53 = vld [vmem:[%s8431_s30 + $0x4e0] sm:$0xff]  ;;  %v705_v40 = vld [vmem:[%s8431_s30 + $0x518] sm:$0xff] }
  0xce   : > { %1757 = vmatmul.bf16.gmra.mxu2 %v8835_v62  ;;  %v703_v62 = vld [vmem:[%s8431_s30 + $0x508] sm:$0xff] }
  0xcf   : > { %v1629_v52 = vpop.f32.mrf.mxu1  ;;  %1579 = vmatmul.bf16.gmra.mxu0 %v8839_v28  ;;  %v553_v28 = vld [vmem:[%s8431_s30 + $0x58] sm:$0xff] }
  0xd0   : > { %v8861_v58 = vadd.f32 %v1629_v52, %v1541_v5  ;;  %v8867_v12 = vpop.f32.mrf.mxu3  ;;  %v7019_v5 = vld [vmem:[%s12429_s2 + $0x280] sm:$0xf]  ;;  %1884 = vmatpush.bf16.msrb.mxu0 %v6956_v29  ;;  %v8899_v29 = vpack.c.bf16 %v705_v40, %v698_v53 }
  0xd1   : > { %v8875_v54 = vpop.f32.mrf.mxu2  ;;  %v7020_v52 = vor.u32 %v7877_v42, %v7019_v5  ;;  %v8897_v5 = vpack.c.bf16 %v761_v11, %v754_v30  ;;  %v697_v42 = vld [vmem:[%s8431_s30 + $0x4d8] sm:$0xff] }
  0xd2   : > { %1668 = vmatmul.bf16.gmra.mxu1 %v8849_v38  ;;  %12588 = vst [vmem:[#allocation44_spill] sm:$0xff] %v8899_v29  ;;  %v8903_v38 = vpack.c.bf16 %v703_v62, %v696_v15 }
  0xd3   : > { %1973 = vmatpush.bf16.msrb.mxu1 %v7020_v52  ;;  %12587 = vst [vmem:[#allocation43_spill] sm:$0xff] %v8897_v5 }
  0xd4   : > { %v1542_v26 = vpop.f32.mrf.mxu0  ;;  %12589 = vst [vmem:[#allocation45_spill] sm:$0xff] %v8903_v38 }
  0xd5   : > { %v1543_v36 = vadd.f32 %v1542_v26, %v8691_v33  ;;  %v704_v26 = vld [vmem:[%s8431_s30 + $0x510] sm:$0xff] }
  0xd7   : > { %v1631_v23 = vpop.f32.mrf.mxu1 }
  0xd8   : > { %v8887_v39 = vadd.f32 %v1631_v23, %v1543_v36  ;;  %v8891_v63 = vpop.f32.mrf.mxu3  ;;  %v8907_v23 = vpack.c.bf16 %v704_v26, %v697_v42  ;;  %v545_v26 = vld [vmem:[%s8431_s30 + $0x18] sm:$0xff] }
  0xd9   : > { %v8895_v1 = vpop.f32.mrf.mxu2 }
  0xda   : > { %12590 = vst [vmem:[#allocation46_spill] sm:$0xff] %v8907_v23 }
  0xdc   : > { %v1545_v52 = vpop.f32.mrf.mxu0 }
  0xdd   : > { %1782 = vmatmul.bf16.gmra.mxu3 %v8897_v5  ;;  %v1546_v36 = vadd.f32 %v1545_v52, %v8691_v33  ;;  %v552_v52 = vld [vmem:[%s8431_s30 + $0x50] sm:$0xff] }
  0xde   : > { %1762 = vmatmul.bf16.gmra.mxu2 %v8899_v29  ;;  %v8931_v27 = vpack.c.bf16 %v552_v52, %v545_v26  ;;  %v7808_v52 = vld [vmem:[%s12429_s2 + $0x64] sm:$0xf] }
  0xdf   : > { %v1634_v40 = vpop.f32.mrf.mxu1  ;;  %1584 = vmatmul.bf16.gmra.mxu0 %v8903_v38  ;;  %v546_v38 = vld [vmem:[%s8431_s30 + $0x20] sm:$0xff] }
  0xe0   : > { %v8910_v30 = vadd.f32 %v1634_v40, %v1546_v36  ;;  %v8913_v15 = vpop.f32.mrf.mxu3  ;;  %v548_v36 = vld [vmem:[%s8431_s30 + $0x30] sm:$0xff]  ;;  %v555_v40 = vld [vmem:[%s8431_s30 + $0x68] sm:$0xff] }
  0xe1   : > { %v8915_v62 = vpop.f32.mrf.mxu2 }
  0xe2   : > { %1673 = vmatmul.bf16.gmra.mxu1 %v8907_v23  ;;  %v8933_v23 = vpack.c.bf16 %v555_v40, %v548_v36 }
  0xe4   : > { %v1547_v11 = vpop.f32.mrf.mxu0  ;;  %12591 = vst [vmem:[#allocation47_spill] sm:$0xff] %v8933_v23 }
  0xe5   : > { %v1548_v53 = vadd.f32 %v1547_v11, %v8691_v33  ;;  %v8937_v11 = vpack.c.bf16 %v553_v28, %v546_v38  ;;  %v6749_v28 = vld [vmem:[%s12429_s2 + $0x68] sm:$0xf0]  ;;  %v1591_v38 = vadd.f32 %v8715_v10, %v8691_v33 }
  0xe7   : > { %v1636_v42 = vpop.f32.mrf.mxu1  ;;  %12592 = vst [vmem:[#allocation48_spill] sm:$0xff] %v8937_v11 }
  0xe8   : > { %v8921_v5 = vadd.f32 %v1636_v42, %v1548_v53  ;;  %v8925_v29 = vpop.f32.mrf.mxu3  ;;  %v8941_v42 = vpack.c.bf16 %v554_v51, %v547_v8 }
  0xe9   : > { %v8929_v60 = vpop.f32.mrf.mxu2 }
  0xea   : > { %12593 = vst [vmem:[#allocation49_spill] sm:$0xff] %v8941_v42 }
  0xec   : > { %v1550_v59 = vpop.f32.mrf.mxu0 }
  0xed   : > { %1796 = vmatmul.bf16.vlgmr.msrb.gmra.mxu3 %v8931_v27  ;;  %v1551_v53 = vadd.f32 %v1550_v59, %v8691_v33  ;;  %v6752_v59 = vor.u32 %v7808_v52, %v6749_v28  ;;  %v1593_v52 = vadd.f32 %v8739_v24, %v8691_v33 }
  0xee   : > { %7089 = vmatmul.msk.bf16.vlgmr.msrb.gmra.mxu2 %vm1472_vm0, %v8933_v23 }
  0xef   : > { %v1639_v26 = vpop.f32.mrf.mxu1  ;;  %1885 = vmatmul.bf16.vlgmr.msrb.gmra.mxu0 %v8937_v11  ;;  %2145 = vmatpush.bf16.msra.mxu3 %v6752_v59 }
  0xf0   : > { %v8953_v51 = vadd.f32 %v1639_v26, %v1551_v53  ;;  %v1679_v8 = vpop.f32.mrf.mxu3  ;;  %v559_v26 = vld [vmem:[%s8431_s30 + $0x88] sm:$0xff] }
  0xf1   : > { %v8956_v36 = vadd.f32 %v1679_v8, %v1591_v38  ;;  %v8958_v40 = vpop.f32.mrf.mxu2  ;;  %v562_v38 = vld [vmem:[%s8431_s30 + $0xa0] sm:$0xff]  ;;  %v569_v8 = vld [vmem:[%s8431_s30 + $0xd8] sm:$0xff]  ;;  %v8976_v18 = vpack.c.bf16 %v566_v44, %v559_v26 }
  0xf2   : > { %1974 = vmatmul.bf16.vlgmr.msrb.gmra.mxu1 %v8941_v42 }
  0xf3   : > { %12594 = vst [vmem:[#allocation50_spill] sm:$0xff] %v8976_v18 }
  0xf4   : > { %v1552_v23 = vpop.f32.mrf.mxu0 }
  0xf5   : > { %v1553_v10 = vadd.f32 %v1552_v23, %v8691_v33  ;;  %v8978_v23 = vpack.c.bf16 %v569_v8, %v562_v38  ;;  %v580_v8 = vld [vmem:[%s8431_s30 + $0x130] sm:$0xff] }
  0xf7   : > { %v1641_v53 = vpop.f32.mrf.mxu1  ;;  %12595 = vst [vmem:[#allocation51_spill] sm:$0xff] %v8978_v23 }
  0xf8   : > { %v8966_v28 = vadd.f32 %v1641_v53, %v1553_v10  ;;  %v1681_v11 = vpop.f32.mrf.mxu3  ;;  %v8986_v53 = vpack.c.bf16 %v568_v49, %v561_v41 }
  0xf9   : > { %v8972_v42 = vadd.f32 %v1681_v11, %v1593_v52  ;;  %v8974_v59 = vpop.f32.mrf.mxu2  ;;  %v1596_v11 = vadd.f32 %v8767_v37, %v8691_v33  ;;  %v573_v37 = vld [vmem:[%s8431_s30 + $0xf8] sm:$0xff] }
  0xfa   : > { %12597 = vst [vmem:[#allocation53_spill] sm:$0xff] %v8986_v53  ;;  %v9015_v20 = vpack.c.bf16 %v580_v8, %v573_v37  ;;  %v7806_v37 = vld [vmem:[%s12429_s2 + $0x54] sm:$0xf] }
  0xfc   : > { %v1555_v24 = vpop.f32.mrf.mxu0  ;;  %12598 = vst [vmem:[#allocation54_spill] sm:$0xff] %v9015_v20 }
  0xfd   : > { %1801 = vmatmul.bf16.gmra.mxu3 %v8976_v18  ;;  %v1556_v10 = vadd.f32 %v1555_v24, %v8691_v33  ;;  %v1598_v24 = vadd.f32 %v8811_v14, %v8691_v33 }
  0xfe   : > { %7090 = vmatmul.msk.bf16.gmra.mxu2 %vm1472_vm0, %v8978_v23  ;;  %v574_v23 = vld [vmem:[%s8431_s30 + $0x100] sm:$0xff] }
  0xff   : > { %v1644_v44 = vpop.f32.mrf.mxu1  ;;  %1890 = vmatmul.bf16.gmra.mxu0 %v8982_v7  ;;  %v581_v7 = vld [vmem:[%s8431_s30 + $0x138] sm:$0xff] }
 0x100   : > { %v8992_v9 = vadd.f32 %v1644_v44, %v1556_v10  ;;  %v1684_v25 = vpop.f32.mrf.mxu3  ;;  %v576_v44 = vld [vmem:[%s8431_s30 + $0x110] sm:$0xff]  ;;  %v9021_v3 = vpack.c.bf16 %v581_v7, %v574_v23  ;;  %v6741_v7 = vld [vmem:[%s12429_s2 + $0x58] sm:$0xf0]  ;;  %v1601_v23 = vadd.f32 %v8867_v12, %v8691_v33 }
 0x101   : > { %v8995_v26 = vadd.f32 %v1684_v25, %v1596_v11  ;;  %v8997_v41 = vpop.f32.mrf.mxu2  ;;  %v583_v11 = vld [vmem:[%s8431_s30 + $0x148] sm:$0xff] }
 0x102   : > { %1979 = vmatmul.bf16.gmra.mxu1 %v8986_v53  ;;  %12600 = vst [vmem:[#allocation56_spill] sm:$0xff] %v9021_v3 }
 0x104   : > { %v1557_v49 = vpop.f32.mrf.mxu0 }
 0x105   : > { %v1558_v52 = vadd.f32 %v1557_v49, %v8691_v33  ;;  %v9017_v49 = vpack.c.bf16 %v583_v11, %v576_v44 }
 0x107   : > { %v1646_v38 = vpop.f32.mrf.mxu1  ;;  %12599 = vst [vmem:[#allocation55_spill] sm:$0xff] %v9017_v49 }
 0x108   : > { %v9005_v10 = vadd.f32 %v1646_v38, %v1558_v52  ;;  %v1686_v25 = vpop.f32.mrf.mxu3  ;;  %v9025_v38 = vpack.c.bf16 %v582_v0, %v575_v19  ;;  %v6744_v19 = vor.u32 %v7806_v37, %v6741_v7  ;;  %v1603_v37 = vadd.f32 %v8891_v63, %v8691_v33 }
 0x109   : > { %v9011_v13 = vadd.f32 %v1686_v25, %v1598_v24  ;;  %v9013_v53 = vpop.f32.mrf.mxu2 }
 0x10a   : > { %12601 = vst [vmem:[#allocation57_spill] sm:$0xff] %v9025_v38  ;;  %2146 = vmatpush.bf16.msra.mxu3 %v6744_v19 }
 0x10c   : > { %v1560_v14 = vpop.f32.mrf.mxu0 }
 0x10d   : > { %1806 = vmatmul.bf16.gmra.mxu3 %v9015_v20  ;;  %v1561_v52 = vadd.f32 %v1560_v14, %v8691_v33  ;;  %v603_v20 = vld [vmem:[%s8431_s30 + $0x1e8] sm:$0xff] }
 0x10e   : > { %7091 = vmatmul.msk.bf16.gmra.mxu2 %vm1472_vm0, %v9017_v49 }
 0x10f   : > { %v1649_v24 = vpop.f32.mrf.mxu1  ;;  %1895 = vmatmul.bf16.gmra.mxu0 %v9021_v3  ;;  %v588_v3 = vld [vmem:[%s8431_s30 + $0x170] sm:$0xff] }
 0x110   : > { %v9037_v0 = vadd.f32 %v1649_v24, %v1561_v52  ;;  %v1689_v8 = vpop.f32.mrf.mxu3  ;;  %v587_v52 = vld [vmem:[%s8431_s30 + $0x168] sm:$0xff]  ;;  %v594_v24 = vld [vmem:[%s8431_s30 + $0x1a0] sm:$0xff]  ;;  %v9066_v43 = vpack.c.bf16 %v595_v2, %v588_v3 }
 0x111   : > { %v9040_v44 = vadd.f32 %v1689_v8, %v1601_v23  ;;  %v9042_v11 = vpop.f32.mrf.mxu2  ;;  %v590_v23 = vld [vmem:[%s8431_s30 + $0x180] sm:$0xff]  ;;  %v597_v8 = vld [vmem:[%s8431_s30 + $0x1b8] sm:$0xff]  ;;  %v9060_v55 = vpack.c.bf16 %v594_v24, %v587_v52  ;;  %v1606_v52 = vadd.f32 %v8913_v15, %v8691_v33 }
 0x112   : > { %1984 = vmatmul.bf16.gmra.mxu1 %v9025_v38  ;;  %12604 = vst [vmem:[#allocation60_spill] sm:$0xff] %v9066_v43  ;;  %v601_v15 = vld [vmem:[%s8431_s30 + $0x1d8] sm:$0xff] }
 0x113   : > { %12602 = vst [vmem:[#allocation58_spill] sm:$0xff] %v9060_v55 }
 0x114   : > { %v1562_v25 = vpop.f32.mrf.mxu0 }
 0x115   : > { %v1563_v12 = vadd.f32 %v1562_v25, %v8691_v33  ;;  %v9062_v25 = vpack.c.bf16 %v597_v8, %v590_v23  ;;  %v608_v8 = vld [vmem:[%s8431_s30 + $0x210] sm:$0xff] }
 0x116   : > { %v9099_v48 = vpack.c.bf16 %v608_v8, %v601_v15  ;;  %v7804_v8 = vld [vmem:[%s12429_s2 + $0x44] sm:$0xf] }
 0x117   : > { %v1651_v14 = vpop.f32.mrf.mxu1  ;;  %12603 = vst [vmem:[#allocation59_spill] sm:$0xff] %v9062_v25 }
 0x118   : > { %v9050_v7 = vadd.f32 %v1651_v14, %v1563_v12  ;;  %v1691_v49 = vpop.f32.mrf.mxu3  ;;  %v9070_v14 = vpack.c.bf16 %v596_v56, %v589_v57  ;;  %12606 = vst [vmem:[#allocation62_spill] sm:$0xff] %v9099_v48 }
 0x119   : > { %v9056_v38 = vadd.f32 %v1691_v49, %v1603_v37  ;;  %v9058_v19 = vpop.f32.mrf.mxu2 }
 0x11a   : > { %12605 = vst [vmem:[#allocation61_spill] sm:$0xff] %v9070_v14 }
 0x11c   : > { %v1565_v63 = vpop.f32.mrf.mxu0 }
 0x11d   : > { %1811 = vmatmul.bf16.gmra.mxu3 %v9060_v55  ;;  %v1566_v12 = vadd.f32 %v1565_v63, %v8691_v33  ;;  %v1608_v63 = vadd.f32 %v8925_v29, %v8691_v33 }
 0x11e   : > { %7092 = vmatmul.msk.bf16.gmra.mxu2 %vm1472_vm0, %v9062_v25  ;;  %v602_v25 = vld [vmem:[%s8431_s30 + $0x1e0] sm:$0xff] }
 0x11f   : > { %v1654_v49 = vpop.f32.mrf.mxu1  ;;  %1900 = vmatmul.bf16.gmra.mxu0 %v9066_v43  ;;  %v609_v43 = vld [vmem:[%s8431_s30 + $0x218] sm:$0xff] }
 0x120   : > { %v9076_v2 = vadd.f32 %v1654_v49, %v1566_v12  ;;  %v1694_v3 = vpop.f32.mrf.mxu3  ;;  %v604_v49 = vld [vmem:[%s8431_s30 + $0x1f0] sm:$0xff]  ;;  %v9105_v31 = vpack.c.bf16 %v609_v43, %v602_v25  ;;  %v6733_v43 = vld [vmem:[%s12429_s2 + $0x48] sm:$0xf0] }
 0x121   : > { %v9079_v24 = vadd.f32 %v1694_v3, %v1606_v52  ;;  %v9081_v56 = vpop.f32.mrf.mxu2  ;;  %v611_v52 = vld [vmem:[%s8431_s30 + $0x228] sm:$0xff] }
 0x122   : > { %1989 = vmatmul.bf16.gmra.mxu1 %v9070_v14  ;;  %12608 = vst [vmem:[#allocation64_spill] sm:$0xff] %v9105_v31 }
 0x124   : > { %v1567_v57 = vpop.f32.mrf.mxu0 }
 0x125   : > { %v1568_v37 = vadd.f32 %v1567_v57, %v8691_v33  ;;  %v9101_v57 = vpack.c.bf16 %v611_v52, %v604_v49 }
 0x127   : > { %v1656_v23 = vpop.f32.mrf.mxu1  ;;  %12607 = vst [vmem:[#allocation63_spill] sm:$0xff] %v9101_v57 }
 0x128   : > { %v9089_v12 = vadd.f32 %v1656_v23, %v1568_v37  ;;  %v1696_v3 = vpop.f32.mrf.mxu3  ;;  %v9109_v23 = vpack.c.bf16 %v610_v47, %v603_v20  ;;  %v6736_v47 = vor.u32 %v7804_v8, %v6733_v43  ;;  %v618_v8 = vld [vmem:[%s8431_s30 + $0x260] sm:$0xff]  ;;  %v625_v43 = vld [vmem:[%s8431_s30 + $0x298] sm:$0xff] }
 0x129   : > { %v9095_v55 = vadd.f32 %v1696_v3, %v1608_v63  ;;  %v9097_v14 = vpop.f32.mrf.mxu2 }
 0x12a   : > { %12609 = vst [vmem:[#allocation65_spill] sm:$0xff] %v9109_v23  ;;  %2147 = vmatpush.bf16.msra.mxu3 %v6736_v47 }
 0x12c   : > { %v1570_v29 = vpop.f32.mrf.mxu0 }
 0x12d   : > { %1816 = vmatmul.bf16.gmra.mxu3 %v9099_v48  ;;  %v1571_v37 = vadd.f32 %v1570_v29, %v8691_v33  ;;  %v616_v48 = vld [vmem:[%s8431_s30 + $0x250] sm:$0xff] }
 0x12e   : > { %7093 = vmatmul.msk.bf16.gmra.mxu2 %vm1472_vm0, %v9101_v57  ;;  %v9148_v18 = vpack.c.bf16 %v623_v35, %v616_v48  ;;  %v6821_v35 = vld [vmem:[%s12429_s2 + $0xf8] sm:$0xf0] }
 0x12f   : > { %v1659_v15 = vpop.f32.mrf.mxu1  ;;  %1905 = vmatmul.bf16.gmra.mxu0 %v9105_v31 }
 0x130   : > { %v9119_v25 = vadd.f32 %v1659_v15, %v1571_v37  ;;  %v1768_v20 = vpop.f32.mrf.mxu3  ;;  %v615_v37 = vld [vmem:[%s8431_s30 + $0x248] sm:$0xff]  ;;  %v622_v15 = vld [vmem:[%s8431_s30 + $0x280] sm:$0xff]  ;;  %12614 = vst [vmem:[#allocation70_spill] sm:$0xff] %v9148_v18 }
 0x131   : > { %v9122_v63 = vpop.f32.mrf.mxu2  ;;  %v9125_v49 = vadd.f32 %v1768_v20, %v8956_v36  ;;  %v9142_v47 = vpack.c.bf16 %v622_v15, %v615_v37 }
 0x132   : > { %1994 = vmatmul.bf16.gmra.mxu1 %v9109_v23  ;;  %v9144_v23 = vpack.c.bf16 %v625_v43, %v618_v8  ;;  %v7842_v43 = vld [vmem:[%s12429_s2 + $0x174] sm:$0xf] }
 0x133   : > { %12610 = vst [vmem:[#allocation66_spill] sm:$0xff] %v9125_v49  ;;  %v624_v49 = vld [vmem:[%s8431_s30 + $0x290] sm:$0xff] }
 0x134   : > { %v1572_v52 = vpop.f32.mrf.mxu0  ;;  %12612 = vst [vmem:[#allocation68_spill] sm:$0xff] %v9142_v47 }
 0x135   : > { %v1573_v3 = vadd.f32 %v1572_v52, %v8691_v33  ;;  %12613 = vst [vmem:[#allocation69_spill] sm:$0xff] %v9144_v23  ;;  %v617_v52 = vld [vmem:[%s8431_s30 + $0x258] sm:$0xff] }
 0x136   : > { %v9152_v32 = vpack.c.bf16 %v624_v49, %v617_v52  ;;  %v6885_v52 = vld [vmem:[%s12429_s2 + $0x178] sm:$0xf0] }
 0x137   : > { %v1661_v29 = vpop.f32.mrf.mxu1 }
 0x138   : > { %v9131_v57 = vadd.f32 %v1661_v29, %v1573_v3  ;;  %v1770_v31 = vpop.f32.mrf.mxu3  ;;  %12615 = vst [vmem:[#allocation71_spill] sm:$0xff] %v9152_v32 }
 0x139   : > { %v9137_v36 = vpop.f32.mrf.mxu2  ;;  %v9140_v20 = vadd.f32 %v1770_v31, %v8972_v42  ;;  %v7826_v42 = vld [vmem:[%s12429_s2 + $0xf4] sm:$0xf] }
 0x13a   : > { %v6824_v49 = vor.u32 %v7826_v42, %v6821_v35  ;;  %v629_v42 = vld [vmem:[%s8431_s30 + $0x2b8] sm:$0xff]  ;;  %v636_v35 = vld [vmem:[%s8431_s30 + $0x2f0] sm:$0xff] }
 0x13b   : > { %12611 = vst [vmem:[#allocation67_spill] sm:$0xff] %v9140_v20  ;;  %v638_v20 = vld [vmem:[%s8431_s30 + $0x300] sm:$0xff] }
 0x13c   : > { %v1575_v3 = vpop.f32.mrf.mxu0  ;;  %2233 = vmatpush.bf16.msra.mxu0 %v6824_v49  ;;  %v632_v49 = vld [vmem:[%s8431_s30 + $0x2d0] sm:$0xff] }
 0x13d   : > { %1821 = vmatmul.bf16.gmra.mxu3 %v9142_v47  ;;  %v1576_v29 = vadd.f32 %v1575_v3, %v8691_v33  ;;  %v6888_v3 = vor.u32 %v7842_v43, %v6885_v52  ;;  %v9191_v52 = vpack.c.bf16 %v636_v35, %v629_v42 }
 0x13e   : > { %7094 = vmatmul.msk.bf16.gmra.mxu2 %vm1472_vm0, %v9144_v23  ;;  %v639_v23 = vld [vmem:[%s8431_s30 + $0x308] sm:$0xff] }
 0x13f   : > { %v1664_v31 = vpop.f32.mrf.mxu1  ;;  %1910 = vmatmul.bf16.gmra.mxu0 %v9148_v18  ;;  %2322 = vmatpush.bf16.msra.mxu1 %v6888_v3  ;;  %v630_v18 = vld [vmem:[%s8431_s30 + $0x2c0] sm:$0xff]  ;;  %12620 = vst [vmem:[#allocation76_spill] sm:$0xff] %v9191_v52  ;;  %v9193_v3 = vpack.c.bf16 %v639_v23, %v632_v49 }
 0x140   : > { %v9162_v48 = vadd.f32 %v1664_v31, %v1576_v29  ;;  %v1773_v37 = vpop.f32.mrf.mxu3 }
 0x141   : > { %v9165_v15 = vpop.f32.mrf.mxu2  ;;  %v9168_v8 = vadd.f32 %v1773_v37, %v8995_v26  ;;  %12621 = vst [vmem:[#allocation77_spill] sm:$0xff] %v9193_v3 }
 0x142   : > { %12616 = vst [vmem:[#allocation72_spill] sm:$0xff] %v9165_v15  ;;  %1999 = vmatmul.bf16.gmra.mxu1 %v9152_v32 }
 0x143   : > { %12617 = vst [vmem:[#allocation73_spill] sm:$0xff] %v9168_v8  ;;  %v637_v8 = vld [vmem:[%s8431_s30 + $0x2f8] sm:$0xff] }
 0x144   : > { %v1577_v29 = vpop.f32.mrf.mxu0  ;;  %v9197_v15 = vpack.c.bf16 %v637_v8, %v630_v18  ;;  %v6725_v18 = vld [vmem:[%s12429_s2 + $0x38] sm:$0xf0] }
 0x145   : > { %v1578_v26 = vadd.f32 %v1577_v29, %v8691_v33  ;;  %v631_v29 = vld [vmem:[%s8431_s30 + $0x2c8] sm:$0xff] }
 0x146   : > { %12622 = vst [vmem:[#allocation78_spill] sm:$0xff] %v9197_v15 }
 0x147   : > { %v1666_v31 = vpop.f32.mrf.mxu1 }
 0x148   : > { %v9180_v37 = vadd.f32 %v1666_v31, %v1578_v26  ;;  %v1775_v32 = vpop.f32.mrf.mxu3 }
 0x149   : > { %v9186_v47 = vpop.f32.mrf.mxu2  ;;  %v9189_v43 = vadd.f32 %v1775_v32, %v9011_v13  ;;  %v7802_v13 = vld [vmem:[%s12429_s2 + $0x34] sm:$0xf] }
 0x14a   : > { %12618 = vst [vmem:[#allocation74_spill] sm:$0xff] %v9180_v37  ;;  %v9201_v37 = vpack.c.bf16 %v638_v20, %v631_v29  ;;  %v6728_v20 = vor.u32 %v7802_v13, %v6725_v18  ;;  %v646_v13 = vld [vmem:[%s8431_s30 + $0x340] sm:$0xff]  ;;  %v653_v18 = vld [vmem:[%s8431_s30 + $0x378] sm:$0xff] }
 0x14b   : > { %12619 = vst [vmem:[#allocation75_spill] sm:$0xff] %v9189_v43  ;;  %v651_v43 = vld [vmem:[%s8431_s30 + $0x368] sm:$0xff] }
 0x14c   : > { %v1580_v26 = vpop.f32.mrf.mxu0  ;;  %12623 = vst [vmem:[#allocation79_spill] sm:$0xff] %v9201_v37  ;;  %2148 = vmatpush.bf16.msra.mxu3 %v6728_v20 }
 0x14d   : > { %1826 = vmatmul.bf16.gmra.mxu3 %v9191_v52  ;;  %v1581_v31 = vadd.f32 %v1580_v26, %v8691_v33  ;;  %v644_v52 = vld [vmem:[%s8431_s30 + $0x330] sm:$0xff] }
 0x14e   : > { %7095 = vmatmul.msk.bf16.gmra.mxu2 %vm1472_vm0, %v9193_v3 }
 0x14f   : > { %v1669_v32 = vpop.f32.mrf.mxu1  ;;  %1915 = vmatmul.bf16.gmra.mxu0 %v9197_v15 }
 0x150   : > { %v9211_v23 = vadd.f32 %v1669_v32, %v1581_v31  ;;  %v1778_v8 = vpop.f32.mrf.mxu3  ;;  %v643_v31 = vld [vmem:[%s8431_s30 + $0x328] sm:$0xff]  ;;  %v650_v32 = vld [vmem:[%s8431_s30 + $0x360] sm:$0xff] }
 0x151   : > { %v9214_v42 = vpop.f32.mrf.mxu2  ;;  %v9217_v35 = vadd.f32 %v1778_v8, %v9040_v44  ;;  %v9234_v20 = vpack.c.bf16 %v650_v32, %v643_v31  ;;  %v6813_v32 = vld [vmem:[%s12429_s2 + $0xe8] sm:$0xf0] }
 0x152   : > { %12624 = vst [vmem:[#allocation80_spill] sm:$0xff] %v9214_v42  ;;  %2004 = vmatmul.bf16.gmra.mxu1 %v9201_v37  ;;  %v9236_v37 = vpack.c.bf16 %v653_v18, %v646_v13  ;;  %v9240_v42 = vpack.c.bf16 %v651_v43, %v644_v52  ;;  %v7840_v13 = vld [vmem:[%s12429_s2 + $0x164] sm:$0xf] }
 0x153   : > { %12625 = vst [vmem:[#allocation81_spill] sm:$0xff] %v9217_v35  ;;  %v652_v35 = vld [vmem:[%s8431_s30 + $0x370] sm:$0xff] }
 0x154   : > { %v1582_v49 = vpop.f32.mrf.mxu0  ;;  %12628 = vst [vmem:[#allocation84_spill] sm:$0xff] %v9234_v20 }
 0x155   : > { %v1583_v29 = vadd.f32 %v1582_v49, %v8691_v33  ;;  %12629 = vst [vmem:[#allocation85_spill] sm:$0xff] %v9236_v37  ;;  %v645_v49 = vld [vmem:[%s8431_s30 + $0x338] sm:$0xff] }
 0x156   : > { %12630 = vst [vmem:[#allocation86_spill] sm:$0xff] %v9240_v42 }
 0x157   : > { %v1671_v26 = vpop.f32.mrf.mxu1 }
 0x158   : > { %v9223_v3 = vadd.f32 %v1671_v26, %v1583_v29  ;;  %v1780_v15 = vpop.f32.mrf.mxu3 }
 0x159   : > { %v9229_v44 = vpop.f32.mrf.mxu2  ;;  %v9232_v8 = vadd.f32 %v1780_v15, %v9056_v38 }
 0x15a   : > { %12626 = vst [vmem:[#allocation82_spill] sm:$0xff] %v9223_v3  ;;  %v9244_v3 = vpack.c.bf16 %v652_v35, %v645_v49  ;;  %v7824_v35 = vld [vmem:[%s12429_s2 + $0xe4] sm:$0xf]  ;;  %v6877_v49 = vld [vmem:[%s12429_s2 + $0x168] sm:$0xf0] }
 0x15b   : > { %12627 = vst [vmem:[#allocation83_spill] sm:$0xff] %v9232_v8 }
 0x15c   : > { %v1585_v29 = vpop.f32.mrf.mxu0  ;;  %12631 = vst [vmem:[#allocation87_spill] sm:$0xff] %v9244_v3 }
 0x15d   : > { %1831 = vmatmul.bf16.gmra.mxu3 %v9234_v20  ;;  %v1586_v26 = vadd.f32 %v1585_v29, %v8691_v33 }
 0x15e   : > { %7096 = vmatmul.msk.bf16.gmra.mxu2 %vm1472_vm0, %v9236_v37  ;;  %v664_v37 = vld [vmem:[%s8431_s30 + $0x3d0] sm:$0xff] }
 0x15f   : > { %v1674_v38 = vpop.f32.mrf.mxu1  ;;  %1920 = vmatmul.bf16.gmra.mxu0 %v9240_v42  ;;  %v660_v42 = vld [vmem:[%s8431_s30 + $0x3b0] sm:$0xff] }
 0x160   : > { %v9248_v15 = vadd.f32 %v1674_v38, %v1586_v26  ;;  %v1783_v31 = vpop.f32.mrf.mxu3  ;;  %v6880_v26 = vor.u32 %v7840_v13, %v6877_v49  ;;  %v666_v49 = vld [vmem:[%s8431_s30 + $0x3e0] sm:$0xff] }
 0x161   : > { %v9251_v43 = vpop.f32.mrf.mxu2  ;;  %v9254_v52 = vadd.f32 %v1783_v31, %v9079_v24  ;;  %v6816_v24 = vor.u32 %v7824_v35, %v6813_v32  ;;  %v657_v31 = vld [vmem:[%s8431_s30 + $0x398] sm:$0xff]  ;;  %v658_v35 = vld [vmem:[%s8431_s30 + $0x3a0] sm:$0xff] }
 0x162   : > { %12632 = vst [vmem:[#allocation88_spill] sm:$0xff] %v9251_v43  ;;  %2009 = vmatmul.bf16.gmra.mxu1 %v9244_v3  ;;  %v665_v32 = vld [vmem:[%s8431_s30 + $0x3d8] sm:$0xff] }
 0x163   : > { %12633 = vst [vmem:[#allocation89_spill] sm:$0xff] %v9254_v52  ;;  %2234 = vmatpush.bf16.msra.mxu0 %v6816_v24  ;;  %v667_v52 = vld [vmem:[%s8431_s30 + $0x3e8] sm:$0xff]  ;;  %2323 = vmatpush.bf16.msra.mxu1 %v6880_v26  ;;  %v9289_v24 = vpack.c.bf16 %v665_v32, %v658_v35 }
 0x164   : > { %v1587_v18 = vpop.f32.mrf.mxu0  ;;  %v9285_v13 = vpack.c.bf16 %v667_v52, %v660_v42  ;;  %v7800_v52 = vld [vmem:[%s12429_s2 + $0x24] sm:$0xf] }
 0x165   : > { %v1588_v29 = vadd.f32 %v1587_v18, %v8691_v33  ;;  %v9283_v33 = vpack.c.bf16 %v664_v37, %v657_v31  ;;  %v659_v18 = vld [vmem:[%s8431_s30 + $0x3a8] sm:$0xff]  ;;  %12639 = vst [vmem:[#allocation95_spill] sm:$0xff] %v9289_v24 }
 0x166   : > { %12638 = vst [vmem:[#allocation94_spill] sm:$0xff] %v9285_v13  ;;  %v9292_v26 = vpack.c.bf16 %v666_v49, %v659_v18  ;;  %v6717_v31 = vld [vmem:[%s12429_s2 + $0x28] sm:$0xf0] }
 0x167   : > { %v1676_v38 = vpop.f32.mrf.mxu1  ;;  %12637 = vst [vmem:[#allocation93_spill] sm:$0xff] %v9283_v33  ;;  %v671_v49 = vld [vmem:[%s8431_s30 + $0x408] sm:$0xff] }
 0x168   : > { %v9272_v3 = vadd.f32 %v1676_v38, %v1588_v29  ;;  %v1785_v20 = vpop.f32.mrf.mxu3  ;;  %12640 = vst [vmem:[#allocation96_spill] sm:$0xff] %v9292_v26 }
 0x169   : > { %v9278_v8 = vpop.f32.mrf.mxu2  ;;  %v9281_v43 = vadd.f32 %v1785_v20, %v9095_v55  ;;  %v1709_v55 = vadd.f32 %v8717_v17, %v8709_v4  ;;  %v6720_v4 = vor.u32 %v7800_v52, %v6717_v31  ;;  %v680_v31 = vld [vmem:[%s8431_s30 + $0x450] sm:$0xff] }
 0x16a   : > { %12634 = vst [vmem:[#allocation90_spill] sm:$0xff] %v9272_v3 }
 0x16b   : > { %12635 = vst [vmem:[#allocation91_spill] sm:$0xff] %v9278_v8  ;;  %2149 = vmatpush.bf16.msra.mxu3 %v6720_v4  ;;  %v679_v8 = vld [vmem:[%s8431_s30 + $0x448] sm:$0xff] }
 0x16c   : > { %12636 = vst [vmem:[#allocation92_spill] sm:$0xff] %v9281_v43  ;;  %v1886_v29 = vpop.f32.mrf.mxu0  ;;  %v672_v43 = vld [vmem:[%s8431_s30 + $0x410] sm:$0xff] }
 0x16d   : > { %1836 = vmatmul.bf16.gmra.mxu3 %v9283_v33 }
 0x16e   : > { %7097 = vmatmul.msk.bf16.gmra.mxu2 %vm1472_vm0, %v9285_v13  ;;  %v1711_v13 = vadd.f32 %v8743_v61, %v8735_v46 }
 0x16f   : > { %v1975_v38 = vpop.f32.mrf.mxu1  ;;  %1925 = vmatmul.bf16.gmra.mxu0 %v9289_v24  ;;  %v681_v24 = vld [vmem:[%s8431_s30 + $0x458] sm:$0xff] }
 0x170   : > { %v1797_v37 = vpop.f32.mrf.mxu3 }
 0x171   : > { %v1798_v42 = vadd.f32 %v1797_v37, %v1709_v55  ;;  %v2064_v20 = vpop.f32.mrf.mxu2  ;;  %v678_v55 = vld [vmem:[%s8431_s30 + $0x440] sm:$0xff] }
 0x172   : > { %2014 = vmatmul.bf16.gmra.mxu1 %v9292_v26  ;;  %v674_v26 = vld [vmem:[%s8431_s30 + $0x420] sm:$0xff] }
 0x173   : > { %v1887_v17 = vadd.f32 %v1886_v29, %v1798_v42  ;;  %v9314_v29 = vpack.c.bf16 %v678_v55, %v671_v49  ;;  %v9316_v42 = vpack.c.bf16 %v681_v24, %v674_v26  ;;  %v6869_v49 = vld [vmem:[%s12429_s2 + $0x158] sm:$0xf0] }
 0x174   : > { %v1888_v35 = vpop.f32.mrf.mxu0 }
 0x175   : > { %v1976_v32 = vadd.f32 %v1975_v38, %v1887_v17  ;;  %12641 = vst [vmem:[#allocation97_spill] sm:$0xff] %v9316_v42  ;;  %v673_v38 = vld [vmem:[%s8431_s30 + $0x418] sm:$0xff]  ;;  %v9320_v17 = vpack.c.bf16 %v679_v8, %v672_v43 }
 0x176   : > { %v9323_v46 = vpack.c.bf16 %v680_v31, %v673_v38 }
 0x177   : > { %v1977_v18 = vpop.f32.mrf.mxu1  ;;  %v2065_v37 = vadd.f32 %v2064_v20, %v1976_v32 }
 0x178   : > { %v1799_v33 = vpop.f32.mrf.mxu3 }
 0x179   : > { %v1800_v3 = vadd.f32 %v1799_v33, %v1711_v13  ;;  %v2066_v52 = vpop.f32.mrf.mxu2  ;;  %v1714_v13 = vadd.f32 %v8775_v45, %v8764_v34  ;;  %v7838_v45 = vld [vmem:[%s12429_s2 + $0x154] sm:$0xf] }
 0x17b   : > { %v1889_v4 = vadd.f32 %v1888_v35, %v1800_v3  ;;  %v2767_v3 = vmax.f32 %v2065_v37, 0.0  ;;  %v7822_v35 = vld [vmem:[%s12429_s2 + $0xd4] sm:$0xf] }
 0x17c   : > { %v1891_v20 = vpop.f32.mrf.mxu0 }
 0x17d   : > { %v1978_v32 = vadd.f32 %v1977_v18, %v1889_v4  ;;  %1841 = vmatmul.bf16.gmra.mxu3 %v9314_v29  ;;  %v6805_v18 = vld [vmem:[%s12429_s2 + $0xd8] sm:$0xf0] }
 0x17e   : > { %7098 = vmatmul.msk.bf16.gmra.mxu2 %vm1472_vm0, %v9316_v42  ;;  %v6808_v34 = vor.u32 %v7822_v35, %v6805_v18  ;;  %v688_v35 = vld [vmem:[%s8431_s30 + $0x490] sm:$0xff]  ;;  %v695_v18 = vld [vmem:[%s8431_s30 + $0x4c8] sm:$0xff]  ;;  %v693_v42 = vld [vmem:[%s8431_s30 + $0x4b8] sm:$0xff] }
 0x17f   : > { %v1980_v61 = vpop.f32.mrf.mxu1  ;;  %v2067_v33 = vadd.f32 %v2066_v52, %v1978_v32  ;;  %1930 = vmatmul.bf16.gmra.mxu0 %v9320_v17  ;;  %v6872_v52 = vor.u32 %v7838_v45, %v6869_v49  ;;  %v685_v32 = vld [vmem:[%s8431_s30 + $0x478] sm:$0xff]  ;;  %v694_v49 = vld [vmem:[%s8431_s30 + $0x4c0] sm:$0xff] }
 0x180   : > { %v1802_v24 = vpop.f32.mrf.mxu3  ;;  %2235 = vmatpush.bf16.msra.mxu0 %v6808_v34  ;;  %v687_v34 = vld [vmem:[%s8431_s30 + $0x488] sm:$0xff] }
 0x181   : > { %v2769_v8 = vmax.f32 %v2067_v33, 0.0  ;;  %v1803_v43 = vadd.f32 %v1802_v24, %v1714_v13  ;;  %v2069_v26 = vpop.f32.mrf.mxu2  ;;  %2324 = vmatpush.bf16.msra.mxu1 %v6872_v52  ;;  %v692_v33 = vld [vmem:[%s8431_s30 + $0x4b0] sm:$0xff]  ;;  %v1716_v24 = vadd.f32 %v8822_v50, %v8806_v6  ;;  %v9362_v6 = vpack.c.bf16 %v694_v49, %v687_v34  ;;  %v699_v34 = vld [vmem:[%s8431_s30 + $0x4e8] sm:$0xff]  ;;  %v706_v49 = vld [vmem:[%s8431_s30 + $0x520] sm:$0xff] }
 0x182   : > { %2019 = vmatmul.bf16.gmra.mxu1 %v9323_v46  ;;  %v9353_v45 = vpack.c.bf16 %v692_v33, %v685_v32  ;;  %v1719_v32 = vadd.f32 %v8875_v54, %v8861_v58  ;;  %v6709_v58 = vld [vmem:[%s12429_s2 + $0x18] sm:$0xf0] }
 0x183   : > { %v9343_v55 = vpack.c.bf16 %v2769_v8, %v2767_v3  ;;  %v1892_v37 = vadd.f32 %v1891_v20, %v1803_v43  ;;  %v686_v8 = vld [vmem:[%s8431_s30 + $0x480] sm:$0xff] }
 0x184   : > { %v1893_v38 = vpop.f32.mrf.mxu0  ;;  %v9359_v52 = vpack.c.bf16 %v693_v42, %v686_v8 }
 0x185   : > { %v1981_v31 = vadd.f32 %v1980_v61, %v1892_v37  ;;  %v9355_v61 = vpack.c.bf16 %v695_v18, %v688_v35  ;;  %v7798_v18 = vld [vmem:[%s12429_s2 + $0x14] sm:$0xf] }
 0x186   : > { %v6712_v54 = vor.u32 %v7798_v18, %v6709_v58  ;;  %v707_v18 = vld [vmem:[%s8431_s30 + $0x528] sm:$0xff]  ;;  %v708_v58 = vld [vmem:[%s8431_s30 + $0x530] sm:$0xff] }
 0x187   : > { %v1982_v4 = vpop.f32.mrf.mxu1  ;;  %v2070_v13 = vadd.f32 %v2069_v26, %v1981_v31  ;;  %12642 = vst [vmem:[#allocation98_spill] sm:$0xff] %v9355_v61 }
 0x188   : > { %v1804_v3 = vpop.f32.mrf.mxu3  ;;  %2150 = vmatpush.bf16.msra.mxu3 %v6712_v54 }
 0x189   : > { %v1805_v20 = vadd.f32 %v1804_v3, %v1716_v24  ;;  %v2071_v43 = vpop.f32.mrf.mxu2  ;;  %v2771_v42 = vmax.f32 %v2070_v13, 0.0 }
 0x18b   : > { %v1894_v37 = vadd.f32 %v1893_v38, %v1805_v20 }
 0x18c   : > { %v1896_v26 = vpop.f32.mrf.mxu0 }
 0x18d   : > { %v1983_v31 = vadd.f32 %v1982_v4, %v1894_v37  ;;  %1846 = vmatmul.bf16.gmra.mxu3 %v9353_v45 }
 0x18e   : > { %7099 = vmatmul.msk.bf16.gmra.mxu2 %vm1472_vm0, %v9355_v61  ;;  %v700_v61 = vld [vmem:[%s8431_s30 + $0x4f0] sm:$0xff] }
 0x18f   : > { %v1985_v50 = vpop.f32.mrf.mxu1  ;;  %v2072_v24 = vadd.f32 %v2071_v43, %v1983_v31  ;;  %1935 = vmatmul.bf16.gmra.mxu0 %v9359_v52  ;;  %v1721_v31 = vadd.f32 %v8895_v1, %v8887_v39 }
 0x190   : > { %v1807_v38 = vpop.f32.mrf.mxu3 }
 0x191   : > { %v2773_v33 = vmax.f32 %v2072_v24, 0.0  ;;  %v1808_v4 = vadd.f32 %v1807_v38, %v1719_v32  ;;  %v2074_v35 = vpop.f32.mrf.mxu2  ;;  %v702_v24 = vld [vmem:[%s8431_s30 + $0x500] sm:$0xff]  ;;  %v709_v32 = vld [vmem:[%s8431_s30 + $0x538] sm:$0xff] }
 0x192   : > { %2024 = vmatmul.bf16.gmra.mxu1 %v9362_v6 }
 0x193   : > { %v1897_v3 = vadd.f32 %v1896_v26, %v1808_v4  ;;  %v9376_v13 = vpack.c.bf16 %v2773_v33, %v2771_v42  ;;  %v9386_v33 = vpack.c.bf16 %v706_v49, %v699_v34  ;;  %v9388_v4 = vpack.c.bf16 %v709_v32, %v702_v24  ;;  %v7820_v32 = vld [vmem:[%s12429_s2 + $0xc4] sm:$0xf] }
 0x194   : > { %v1898_v8 = vpop.f32.mrf.mxu0  ;;  %v1724_v34 = vadd.f32 %v8915_v62, %v8910_v30  ;;  %v7836_v62 = vld [vmem:[%s12429_s2 + $0x144] sm:$0xf] }
 0x195   : > { %v1986_v20 = vadd.f32 %v1985_v50, %v1897_v3  ;;  %12643 = vst [vmem:[#allocation99_spill] sm:$0xff] %v9388_v4  ;;  %v701_v50 = vld [vmem:[%s8431_s30 + $0x4f8] sm:$0xff]  ;;  %v9392_v3 = vpack.c.bf16 %v707_v18, %v700_v61 }
 0x196   : > { %v9395_v39 = vpack.c.bf16 %v708_v58, %v701_v50 }
 0x197   : > { %v1987_v43 = vpop.f32.mrf.mxu1  ;;  %v2075_v37 = vadd.f32 %v2074_v35, %v1986_v20 }
 0x198   : > { %v1809_v38 = vpop.f32.mrf.mxu3 }
 0x199   : > { %v1810_v26 = vadd.f32 %v1809_v38, %v1721_v31  ;;  %v2076_v42 = vpop.f32.mrf.mxu2  ;;  %v6797_v38 = vld [vmem:[%s12429_s2 + $0xc8] sm:$0xf0] }
 0x19a   : > { %v6800_v30 = vor.u32 %v7820_v32, %v6797_v38  ;;  %v716_v32 = vld [vmem:[%s8431_s30 + $0x570] sm:$0xff]  ;;  %v723_v38 = vld [vmem:[%s8431_s30 + $0x5a8] sm:$0xff] }
 0x19b   : > { %v1899_v54 = vadd.f32 %v1898_v8, %v1810_v26  ;;  %v2775_v8 = vmax.f32 %v2075_v37, 0.0  ;;  %v6861_v37 = vld [vmem:[%s12429_s2 + $0x148] sm:$0xf0] }
 0x19c   : > { %v1901_v35 = vpop.f32.mrf.mxu0  ;;  %v6864_v26 = vor.u32 %v7836_v62, %v6861_v37  ;;  %2236 = vmatpush.bf16.msra.mxu0 %v6800_v30  ;;  %v721_v62 = vld [vmem:[%s8431_s30 + $0x598] sm:$0xff]  ;;  %v715_v30 = vld [vmem:[%s8431_s30 + $0x568] sm:$0xff] }
 0x19d   : > { %v1988_v20 = vadd.f32 %v1987_v43, %v1899_v54  ;;  %1851 = vmatmul.bf16.gmra.mxu3 %v9386_v33 }
 0x19e   : > { %7100 = vmatmul.msk.bf16.gmra.mxu2 %vm1472_vm0, %v9388_v4  ;;  %2325 = vmatpush.bf16.msra.mxu1 %v6864_v26 }
 0x19f   : > { %v1990_v1 = vpop.f32.mrf.mxu1  ;;  %v2077_v31 = vadd.f32 %v2076_v42, %v1988_v20  ;;  %1940 = vmatmul.bf16.gmra.mxu0 %v9392_v3  ;;  %v713_v20 = vld [vmem:[%s8431_s30 + $0x558] sm:$0xff] }
 0x1a0   : > { %v1812_v49 = vpop.f32.mrf.mxu3 }
 0x1a1   : > { %v2777_v61 = vmax.f32 %v2077_v31, 0.0  ;;  %v1813_v24 = vadd.f32 %v1812_v49, %v1724_v34  ;;  %v2079_v43 = vpop.f32.mrf.mxu2  ;;  %v720_v31 = vld [vmem:[%s8431_s30 + $0x590] sm:$0xff]  ;;  %v1726_v49 = vadd.f32 %v8929_v60, %v8921_v5  ;;  %v6949_v5 = vld [vmem:[%s12429_s2 + $0x1f8] sm:$0xf0] }
 0x1a2   : > { %2029 = vmatmul.bf16.gmra.mxu1 %v9395_v39  ;;  %v9425_v37 = vpack.c.bf16 %v720_v31, %v713_v20  ;;  %v7858_v60 = vld [vmem:[%s12429_s2 + $0x1f4] sm:$0xf] }
 0x1a3   : > { %v1902_v18 = vadd.f32 %v1901_v35, %v1813_v24  ;;  %v9415_v42 = vpack.c.bf16 %v2777_v61, %v2775_v8  ;;  %v714_v24 = vld [vmem:[%s8431_s30 + $0x560] sm:$0xff]  ;;  %v6952_v31 = vor.u32 %v7858_v60, %v6949_v5  ;;  %v7854_v5 = vld [vmem:[%s12429_s2 + $0x1d4] sm:$0xf] }
 0x1a4   : > { %v1903_v50 = vpop.f32.mrf.mxu0  ;;  %v9431_v4 = vpack.c.bf16 %v721_v62, %v714_v24 }
 0x1a5   : > { %v1991_v58 = vadd.f32 %v1990_v1, %v1902_v18  ;;  %v9427_v1 = vpack.c.bf16 %v723_v38, %v716_v32  ;;  %v722_v18 = vld [vmem:[%s8431_s30 + $0x5a0] sm:$0xff]  ;;  %v1729_v32 = vadd.f32 %v8958_v40, %v8953_v51  ;;  %2411 = vmatpush.bf16.msra.mxu2 %v6952_v31  ;;  %v6701_v40 = vld [vmem:[%s12429_s2 + $0x8] sm:$0xf0] }
 0x1a6   : > { %v9440_v20 = vpack.c.bf16 %v722_v18, %v715_v30  ;;  %v7796_v51 = vld [vmem:[%s12429_s2 + $0x4] sm:$0xf] }
 0x1a7   : > { %v1992_v54 = vpop.f32.mrf.mxu1  ;;  %v2080_v34 = vadd.f32 %v2079_v43, %v1991_v58  ;;  %12644 = vst [vmem:[#allocation100_spill] sm:$0xff] %v9427_v1  ;;  %v6704_v18 = vor.u32 %v7796_v51, %v6701_v40  ;;  %v735_v40 = vld [vmem:[%s8431_s30 + $0x608] sm:$0xff] }
 0x1a8   : > { %v1814_v35 = vpop.f32.mrf.mxu3  ;;  %12645 = vst [vmem:[#allocation101_spill] sm:$0xff] %v9440_v20 }
 0x1a9   : > { %v1815_v8 = vadd.f32 %v1814_v35, %v1726_v49  ;;  %v2081_v61 = vpop.f32.mrf.mxu2  ;;  %v6941_v35 = vld [vmem:[%s12429_s2 + $0x1e8] sm:$0xf0]  ;;  %v2779_v24 = vmax.f32 %v2080_v34, 0.0  ;;  %2151 = vmatpush.bf16.msra.mxu3 %v6704_v18 }
 0x1ab   : > { %v1904_v26 = vadd.f32 %v1903_v50, %v1815_v8 }
 0x1ac   : > { %v1906_v43 = vpop.f32.mrf.mxu0 }
 0x1ad   : > { %v1993_v58 = vadd.f32 %v1992_v54, %v1904_v26  ;;  %1856 = vmatmul.bf16.gmra.mxu3 %v9425_v37  ;;  %v7856_v54 = vld [vmem:[%s12429_s2 + $0x1e4] sm:$0xf] }
 0x1ae   : > { %7101 = vmatmul.msk.bf16.gmra.mxu2 %vm1472_vm0, %v9427_v1 }
 0x1af   : > { %v1995_v50 = vpop.f32.mrf.mxu1  ;;  %v2082_v49 = vadd.f32 %v2081_v61, %v1993_v58  ;;  %1945 = vmatmul.bf16.gmra.mxu0 %v9431_v4  ;;  %v6944_v61 = vor.u32 %v7856_v54, %v6941_v35  ;;  %v6933_v58 = vld [vmem:[%s12429_s2 + $0x1d8] sm:$0xf0]  ;;  %v1731_v35 = vadd.f32 %v8974_v59, %v8966_v28 }
 0x1b0   : > { %v1817_v38 = vpop.f32.mrf.mxu3  ;;  %v729_v59 = vld [vmem:[%s8431_s30 + $0x5d8] sm:$0xff] }
 0x1b1   : > { %v2781_v62 = vmax.f32 %v2082_v49, 0.0  ;;  %v1818_v8 = vadd.f32 %v1817_v38, %v1729_v32  ;;  %v2084_v30 = vpop.f32.mrf.mxu2  ;;  %2412 = vmatpush.bf16.msra.mxu2 %v6944_v61  ;;  %v6936_v49 = vor.u32 %v7854_v5, %v6933_v58  ;;  %v727_v38 = vld [vmem:[%s8431_s30 + $0x5c8] sm:$0xff]  ;;  %v736_v58 = vld [vmem:[%s8431_s30 + $0x610] sm:$0xff] }
 0x1b2   : > { %2034 = vmatmul.bf16.gmra.mxu1 %v9440_v20  ;;  %v6925_v61 = vld [vmem:[%s12429_s2 + $0x1c8] sm:$0xf0]  ;;  %v7850_v20 = vld [vmem:[%s12429_s2 + $0x1b4] sm:$0xf] }
 0x1b3   : > { %v1907_v34 = vadd.f32 %v1906_v43, %v1818_v8  ;;  %v9460_v26 = vpack.c.bf16 %v2781_v62, %v2779_v24  ;;  %v734_v43 = vld [vmem:[%s8431_s30 + $0x600] sm:$0xff]  ;;  %v737_v62 = vld [vmem:[%s8431_s30 + $0x618] sm:$0xff]  ;;  %v728_v8 = vld [vmem:[%s8431_s30 + $0x5d0] sm:$0xff] }
 0x1b4   : > { %v1908_v60 = vpop.f32.mrf.mxu0  ;;  %v730_v24 = vld [vmem:[%s8431_s30 + $0x5e0] sm:$0xff] }
 0x1b5   : > { %v1996_v31 = vadd.f32 %v1995_v50, %v1907_v34  ;;  %2413 = vmatpush.bf16.msra.mxu2 %v6936_v49  ;;  %v7852_v50 = vld [vmem:[%s12429_s2 + $0x1c4] sm:$0xf]  ;;  %v9482_v34 = vpack.c.bf16 %v734_v43, %v727_v38  ;;  %v9484_v28 = vpack.c.bf16 %v737_v62, %v730_v24  ;;  %v9488_v49 = vpack.c.bf16 %v735_v40, %v728_v8 }
 0x1b6   : > { %v6928_v5 = vor.u32 %v7852_v50, %v6925_v61  ;;  %v9497_v43 = vpack.c.bf16 %v736_v58, %v729_v59  ;;  %v1734_v8 = vadd.f32 %v8997_v41, %v8992_v9  ;;  %v7818_v9 = vld [vmem:[%s12429_s2 + $0xb4] sm:$0xf]  ;;  %v6789_v41 = vld [vmem:[%s12429_s2 + $0xb8] sm:$0xf0] }
 0x1b7   : > { %v1997_v32 = vpop.f32.mrf.mxu1  ;;  %v2085_v54 = vadd.f32 %v2084_v30, %v1996_v31  ;;  %12646 = vst [vmem:[#allocation102_spill] sm:$0xff] %v9484_v28  ;;  %v6853_v59 = vld [vmem:[%s12429_s2 + $0x138] sm:$0xf0] }
 0x1b8   : > { %v1819_v51 = vpop.f32.mrf.mxu3 }
 0x1b9   : > { %v1820_v18 = vadd.f32 %v1819_v51, %v1731_v35  ;;  %v2086_v30 = vpop.f32.mrf.mxu2  ;;  %2414 = vmatpush.bf16.msra.mxu2 %v6928_v5  ;;  %v6917_v35 = vld [vmem:[%s12429_s2 + $0x1b8] sm:$0xf0]  ;;  %v2783_v40 = vmax.f32 %v2085_v54, 0.0  ;;  %v6792_v5 = vor.u32 %v7818_v9, %v6789_v41  ;;  %v7834_v54 = vld [vmem:[%s12429_s2 + $0x134] sm:$0xf]  ;;  %v751_v9 = vld [vmem:[%s8431_s30 + $0x688] sm:$0xff] }
 0x1ba   : > { %v6920_v24 = vor.u32 %v7850_v20, %v6917_v35  ;;  %v6909_v20 = vld [vmem:[%s12429_s2 + $0x1a8] sm:$0xf0]  ;;  %v742_v41 = vld [vmem:[%s8431_s30 + $0x640] sm:$0xff] }
 0x1bb   : > { %v1909_v31 = vadd.f32 %v1908_v60, %v1820_v18  ;;  %2237 = vmatpush.bf16.msra.mxu0 %v6792_v5 }
 0x1bc   : > { %v1911_v1 = vpop.f32.mrf.mxu0 }
 0x1bd   : > { %v1998_v38 = vadd.f32 %v1997_v32, %v1909_v31  ;;  %1861 = vmatmul.bf16.gmra.mxu3 %v9482_v34  ;;  %2415 = vmatpush.bf16.msra.mxu2 %v6920_v24  ;;  %v7848_v32 = vld [vmem:[%s12429_s2 + $0x1a4] sm:$0xf]  ;;  %v6856_v31 = vor.u32 %v7834_v54, %v6853_v59  ;;  %v7846_v24 = vld [vmem:[%s12429_s2 + $0x194] sm:$0xf]  ;;  %v6781_v54 = vld [vmem:[%s12429_s2 + $0xa8] sm:$0xf0] }
 0x1be   : > { %7102 = vmatmul.msk.bf16.gmra.mxu2 %vm1472_vm0, %v9484_v28  ;;  %v7832_v28 = vld [vmem:[%s12429_s2 + $0x124] sm:$0xf] }
 0x1bf   : > { %v2000_v60 = vpop.f32.mrf.mxu1  ;;  %v2087_v62 = vadd.f32 %v2086_v30, %v1998_v38  ;;  %1950 = vmatmul.bf16.gmra.mxu0 %v9488_v49  ;;  %v6912_v30 = vor.u32 %v7848_v32, %v6909_v20  ;;  %2326 = vmatpush.bf16.msra.mxu1 %v6856_v31  ;;  %v741_v32 = vld [vmem:[%s8431_s30 + $0x638] sm:$0xff]  ;;  %v748_v20 = vld [vmem:[%s8431_s30 + $0x670] sm:$0xff] }
 0x1c0   : > { %v1822_v51 = vpop.f32.mrf.mxu3 }
 0x1c1   : > { %v2785_v50 = vmax.f32 %v2087_v62, 0.0  ;;  %v1823_v61 = vadd.f32 %v1822_v51, %v1734_v8  ;;  %v2089_v18 = vpop.f32.mrf.mxu2  ;;  %2416 = vmatpush.bf16.msra.mxu2 %v6912_v30  ;;  %v6901_v62 = vld [vmem:[%s12429_s2 + $0x198] sm:$0xf0] }
 0x1c2   : > { %2039 = vmatmul.bf16.gmra.mxu1 %v9497_v43  ;;  %v749_v30 = vld [vmem:[%s8431_s30 + $0x678] sm:$0xff] }
 0x1c3   : > { %v1912_v58 = vadd.f32 %v1911_v1, %v1823_v61  ;;  %v9523_v35 = vpack.c.bf16 %v2785_v50, %v2783_v40  ;;  %v6904_v1 = vor.u32 %v7846_v24, %v6901_v62  ;;  %v744_v40 = vld [vmem:[%s8431_s30 + $0x650] sm:$0xff]  ;;  %v1736_v61 = vadd.f32 %v9013_v53, %v9005_v10  ;;  %v6893_v24 = vld [vmem:[%s12429_s2 + $0x188] sm:$0xf0] }
 0x1c4   : > { %v1913_v38 = vpop.f32.mrf.mxu0  ;;  %v9548_v10 = vpack.c.bf16 %v748_v20, %v741_v32  ;;  %v9554_v62 = vpack.c.bf16 %v751_v9, %v744_v40  ;;  %v9563_v20 = vpack.c.bf16 %v749_v30, %v742_v41  ;;  %v7814_v40 = vld [vmem:[%s12429_s2 + $0x94] sm:$0xf]  ;;  %v6773_v9 = vld [vmem:[%s12429_s2 + $0x98] sm:$0xf0] }
 0x1c5   : > { %v2001_v8 = vadd.f32 %v2000_v60, %v1912_v58  ;;  %2417 = vmatpush.bf16.msra.mxu2 %v6904_v1  ;;  %v7816_v60 = vld [vmem:[%s12429_s2 + $0xa4] sm:$0xf]  ;;  %v743_v58 = vld [vmem:[%s8431_s30 + $0x648] sm:$0xff]  ;;  %v7830_v41 = vld [vmem:[%s12429_s2 + $0x114] sm:$0xf] }
 0x1c6   : > { %v6784_v31 = vor.u32 %v7816_v60, %v6781_v54  ;;  %12647 = vst [vmem:[#allocation103_spill] sm:$0xff] %v9554_v62  ;;  %v6837_v30 = vld [vmem:[%s12429_s2 + $0x118] sm:$0xf0] }
 0x1c7   : > { %v2002_v51 = vpop.f32.mrf.mxu1  ;;  %v2090_v50 = vadd.f32 %v2089_v18, %v2001_v8  ;;  %v7844_v18 = vld [vmem:[%s12429_s2 + $0x184] sm:$0xf] }
 0x1c8   : > { %v1824_v5 = vpop.f32.mrf.mxu3  ;;  %v750_v8 = vld [vmem:[%s8431_s30 + $0x680] sm:$0xff]  ;;  %v6896_v1 = vor.u32 %v7844_v18, %v6893_v24  ;;  %2238 = vmatpush.bf16.msra.mxu0 %v6784_v31 }
 0x1c9   : > { %v1825_v59 = vadd.f32 %v1824_v5, %v1736_v61  ;;  %v2091_v53 = vpop.f32.mrf.mxu2  ;;  %v6845_v61 = vld [vmem:[%s12429_s2 + $0x128] sm:$0xf0]  ;;  %v9572_v18 = vpack.c.bf16 %v750_v8, %v743_v58  ;;  %v6840_v58 = vor.u32 %v7830_v41, %v6837_v30  ;;  %v7812_v24 = vld [vmem:[%s12429_s2 + $0x84] sm:$0xf] }
 0x1ca   : > { %v6848_v5 = vor.u32 %v7832_v28, %v6845_v61  ;;  %2418 = vmatpush.bf16.msra.mxu2 %v6896_v1  ;;  %v6765_v8 = vld [vmem:[%s12429_s2 + $0x88] sm:$0xf0]  ;;  %v2787_v1 = vmax.f32 %v2090_v50, 0.0  ;;  %v7828_v50 = vld [vmem:[%s12429_s2 + $0x104] sm:$0xf] }
 0x1cb   : > { %v1914_v32 = vadd.f32 %v1913_v38, %v1825_v59  ;;  %v6776_v38 = vor.u32 %v7814_v40, %v6773_v9  ;;  %v6829_v9 = vld [vmem:[%s12429_s2 + $0x108] sm:$0xf0] }
 0x1cc   : > { %v1916_v60 = vpop.f32.mrf.mxu0  ;;  %2327 = vmatpush.bf16.msra.mxu1 %v6848_v5  ;;  %v6768_v5 = vor.u32 %v7812_v24, %v6765_v8  ;;  %v1741_v8 = vadd.f32 %v9058_v19, %v9050_v7 }
 0x1cd   : > { %v2003_v54 = vadd.f32 %v2002_v51, %v1914_v32  ;;  %1866 = vmatmul.bf16.gmra.mxu3 %v9548_v10  ;;  %v1739_v51 = vadd.f32 %v9042_v11, %v9037_v0  ;;  %2239 = vmatpush.bf16.msra.mxu0 %v6776_v38  ;;  %v7874_v0 = vld [vmem:[%s12429_s2 + $0x274] sm:$0xf]  ;;  %v7013_v11 = vld [vmem:[%s12429_s2 + $0x278] sm:$0xf0]  ;;  %v6832_v38 = vor.u32 %v7828_v50, %v6829_v9 }
 0x1ce   : > { %7103 = vmatmul.msk.bf16.gmra.mxu2 %vm1472_vm0, %v9554_v62  ;;  %v7016_v40 = vor.u32 %v7874_v0, %v7013_v11  ;;  %v756_v11 = vld [vmem:[%s8431_s30 + $0x6b0] sm:$0xff] }
 0x1cf   : > { %v2005_v28 = vpop.f32.mrf.mxu1  ;;  %v2092_v59 = vadd.f32 %v2091_v53, %v2003_v54  ;;  %1955 = vmatmul.bf16.gmra.mxu0 %v9563_v20  ;;  %v764_v9 = vld [vmem:[%s8431_s30 + $0x6f0] sm:$0xff] }
 0x1d0   : > { %v1827_v31 = vpop.f32.mrf.mxu3  ;;  %2328 = vmatpush.bf16.msra.mxu1 %v6840_v58  ;;  %2500 = vmatpush.bf16.msrb.mxu3 %v7016_v40  ;;  %v755_v58 = vld [vmem:[%s8431_s30 + $0x6a8] sm:$0xff] }
 0x1d1   : > { %v2789_v61 = vmax.f32 %v2092_v59, 0.0  ;;  %v1828_v32 = vadd.f32 %v1827_v31, %v1739_v51  ;;  %v2094_v53 = vpop.f32.mrf.mxu2  ;;  %2240 = vmatpush.bf16.msra.mxu0 %v6768_v5  ;;  %v762_v31 = vld [vmem:[%s8431_s30 + $0x6e0] sm:$0xff]  ;;  %v757_v5 = vld [vmem:[%s8431_s30 + $0x6b8] sm:$0xff] }
 0x1d2   : > { %2044 = vmatmul.bf16.gmra.mxu1 %v9572_v18  ;;  %v9614_v40 = vpack.c.bf16 %v762_v31, %v755_v58  ;;  %v9623_v7 = vpack.c.bf16 %v764_v9, %v757_v5  ;;  %v1744_v58 = vadd.f32 %v9081_v56, %v9076_v2 }
 0x1d3   : > { %v1917_v54 = vadd.f32 %v1916_v60, %v1828_v32  ;;  %v9604_v41 = vpack.c.bf16 %v2789_v61, %v2787_v1  ;;  %v758_v60 = vld [vmem:[%s8431_s30 + $0x6c0] sm:$0xff]  ;;  %v765_v32 = vld [vmem:[%s8431_s30 + $0x6f8] sm:$0xff]  ;;  %v763_v1 = vld [vmem:[%s8431_s30 + $0x6e8] sm:$0xff]  ;;  %s10397_s30 = scalar_lea.vmem %s12428_s1, %s6691_s21 }
 0x1d4   : > { %v1918_v30 = vpop.f32.mrf.mxu0  ;;  %2329 = vmatpush.bf16.msra.mxu1 %v6832_v38  ;;  %v9620_v62 = vpack.c.bf16 %v763_v1, %v756_v11 }
 0x1d5   : > { %v2006_v59 = vadd.f32 %v2005_v28, %v1917_v54  ;;  %v9616_v28 = vpack.c.bf16 %v765_v32, %v758_v60 }
 0x1d7   : > { %v2007_v51 = vpop.f32.mrf.mxu1  ;;  %v2095_v24 = vadd.f32 %v2094_v53, %v2006_v59  ;;  %12648 = vst [vmem:[#allocation104_spill] sm:$0xff] %v9616_v28 }
 0x1d8   : > { %v1829_v0 = vpop.f32.mrf.mxu3 }
 0x1d9   : > { %v1830_v61 = vadd.f32 %v1829_v0, %v1741_v8  ;;  %v2096_v50 = vpop.f32.mrf.mxu2 }
 0x1db   : > { %v1919_v54 = vadd.f32 %v1918_v30, %v1830_v61  ;;  %v2791_v30 = vmax.f32 %v2095_v24, 0.0 }
 0x1dc   : > { %v1921_v53 = vpop.f32.mrf.mxu0 }
 0x1dd   : > { %v2008_v38 = vadd.f32 %v2007_v51, %v1919_v54  ;;  %1871 = vmatmul.bf16.gmra.mxu3 %v9614_v40 }
 0x1de   : > { %7104 = vmatmul.msk.bf16.gmra.mxu2 %vm1472_vm0, %v9616_v28  ;;  %v12714_v28 = vld [vmem:[#allocation11_spill] sm:$0xff] }
 0x1df   : > { %v2010_v19 = vpop.f32.mrf.mxu1  ;;  %v2097_v59 = vadd.f32 %v2096_v50, %v2008_v38  ;;  %1960 = vmatmul.bf16.gmra.mxu0 %v9620_v62  ;;  %v1746_v50 = vadd.f32 %v9097_v14, %v9089_v12 }
 0x1e0   : > { %v1832_v31 = vpop.f32.mrf.mxu3 }
 0x1e1   : > { %v2793_v8 = vmax.f32 %v2097_v59, 0.0  ;;  %v1833_v60 = vadd.f32 %v1832_v31, %v1744_v58  ;;  %v2099_v32 = vpop.f32.mrf.mxu2 }
 0x1e2   : > { %2049 = vmatmul.bf16.gmra.mxu1 %v9623_v7 }
 0x1e3   : > { %v1922_v51 = vadd.f32 %v1921_v53, %v1833_v60  ;;  %v9631_v0 = vpack.c.bf16 %v2793_v8, %v2791_v30 }
 0x1e4   : > { %v1923_v11 = vpop.f32.mrf.mxu0 }
 0x1e5   : > { %v2011_v1 = vadd.f32 %v2010_v19, %v1922_v51  ;;  %v1749_v19 = vadd.f32 %v9122_v63, %v9119_v25 }
 0x1e7   : > { %v2012_v61 = vpop.f32.mrf.mxu1  ;;  %v2100_v5 = vadd.f32 %v2099_v32, %v2011_v1 }
 0x1e8   : > { %v1834_v2 = vpop.f32.mrf.mxu3 }
 0x1e9   : > { %v1835_v56 = vadd.f32 %v1834_v2, %v1746_v50  ;;  %v2101_v9 = vpop.f32.mrf.mxu2  ;;  %v2795_v31 = vmax.f32 %v2100_v5, 0.0 }
 0x1eb   : > { %v1924_v54 = vadd.f32 %v1923_v11, %v1835_v56  ;;  %v12649_v56 = vld [vmem:[#allocation5_spill] sm:$0xff] }
 0x1ec   : > { %v1926_v24 = vpop.f32.mrf.mxu0 }
 0x1ed   : > { %v2013_v38 = vadd.f32 %v2012_v61, %v1924_v54  ;;  %2152 = vmatmul.bf16.vlgmr.msra.gmra.mxu3 %v8468_v21  ;;  %v7872_v21 = vld [vmem:[%s12429_s2 + $0x264] sm:$0xf] }
 0x1ee   : > { %2419 = vmatmul.bf16.vlgmr.msra.gmra.mxu2 %v8931_v27  ;;  %v7005_v27 = vld [vmem:[%s12429_s2 + $0x268] sm:$0xf0] }
 0x1ef   : > { %v2015_v53 = vpop.f32.mrf.mxu1  ;;  %v2102_v59 = vadd.f32 %v2101_v9, %v2013_v38  ;;  %2241 = vmatmul.bf16.vlgmr.msra.gmra.mxu0 %v8471_v22  ;;  %v7008_v8 = vor.u32 %v7872_v21, %v7005_v27  ;;  %v12650_v9 = vld [vmem:[#allocation50_spill] sm:$0xff]  ;;  %v12651_v38 = vld [vmem:[#allocation72_spill] sm:$0xff] }
 0x1f0   : > { %v1837_v58 = vpop.f32.mrf.mxu3 }
 0x1f1   : > { %v2797_v14 = vmax.f32 %v2102_v59, 0.0  ;;  %v1838_v12 = vadd.f32 %v1837_v58, %v1749_v19  ;;  %v2104_v30 = vpop.f32.mrf.mxu2  ;;  %2501 = vmatpush.bf16.msrb.mxu3 %v7008_v8  ;;  %v12652_v59 = vld [vmem:[#allocation6_spill] sm:$0xff] }
 0x1f2   : > { %2330 = vmatmul.bf16.vlgmr.msra.gmra.mxu1 %v8462_v16  ;;  %v1751_v16 = vadd.f32 %v9137_v36, %v9131_v57 }
 0x1f3   : > { %v1927_v60 = vadd.f32 %v1926_v24, %v1838_v12  ;;  %v9647_v25 = vpack.c.bf16 %v2797_v14, %v2795_v31  ;;  %v12653_v14 = vld [vmem:[#allocation4_spill] sm:$0xff] }
 0x1f4   : > { %v1928_v22 = vpop.f32.mrf.mxu0 }
 0x1f5   : > { %v2016_v63 = vadd.f32 %v2015_v53, %v1927_v60  ;;  %v1754_v53 = vadd.f32 %v12651_v38, %v9162_v48 }
 0x1f7   : > { %v2017_v32 = vpop.f32.mrf.mxu1  ;;  %v2105_v51 = vadd.f32 %v2104_v30, %v2016_v63 }
 0x1f8   : > { %v1839_v11 = vpop.f32.mrf.mxu3 }
 0x1f9   : > { %v1840_v1 = vadd.f32 %v1839_v11, %v1751_v16  ;;  %v2106_v61 = vpop.f32.mrf.mxu2  ;;  %v2799_v58 = vmax.f32 %v2105_v51, 0.0 }
 0x1fb   : > { %v1929_v5 = vadd.f32 %v1928_v22, %v1840_v1  ;;  %v12654_v22 = vld [vmem:[#allocation74_spill] sm:$0xff] }
 0x1fc   : > { %v1931_v50 = vpop.f32.mrf.mxu0  ;;  %v1756_v63 = vadd.f32 %v9186_v47, %v12654_v22 }
 0x1fd   : > { %v2018_v2 = vadd.f32 %v2017_v32, %v1929_v5  ;;  %2157 = vmatmul.bf16.gmra.mxu3 %v12649_v56  ;;  %v12656_v5 = vld [vmem:[#allocation54_spill] sm:$0xff]  ;;  %v12657_v56 = vld [vmem:[#allocation80_spill] sm:$0xff] }
 0x1fe   : > { %2424 = vmatmul.bf16.gmra.mxu2 %v12650_v9  ;;  %v1759_v9 = vadd.f32 %v12657_v56, %v9211_v23  ;;  %v12664_v56 = vld [vmem:[#allocation14_spill] sm:$0xff] }
 0x1ff   : > { %v2020_v54 = vpop.f32.mrf.mxu1  ;;  %v2107_v24 = vadd.f32 %v2106_v61, %v2018_v2  ;;  %2246 = vmatmul.bf16.gmra.mxu0 %v12652_v59  ;;  %v12655_v61 = vld [vmem:[#allocation9_spill] sm:$0xff] }
 0x200   : > { %v1842_v19 = vpop.f32.mrf.mxu3 }
 0x201   : > { %v2801_v57 = vmax.f32 %v2107_v24, 0.0  ;;  %v1843_v36 = vadd.f32 %v1842_v19, %v1754_v53  ;;  %v2109_v31 = vpop.f32.mrf.mxu2  ;;  %v12659_v19 = vld [vmem:[#allocation8_spill] sm:$0xff] }
 0x202   : > { %2335 = vmatmul.bf16.gmra.mxu1 %v12653_v14 }
 0x203   : > { %v1932_v12 = vadd.f32 %v1931_v50, %v1843_v36  ;;  %v9657_v30 = vpack.c.bf16 %v2801_v57, %v2799_v58  ;;  %v7870_v58 = vld [vmem:[%s12429_s2 + $0x254] sm:$0xf]  ;;  %v6997_v57 = vld [vmem:[%s12429_s2 + $0x258] sm:$0xf0] }
 0x204   : > { %v1933_v21 = vpop.f32.mrf.mxu0  ;;  %v7000_v36 = vor.u32 %v7870_v58, %v6997_v57 }
 0x205   : > { %v2021_v27 = vadd.f32 %v2020_v54, %v1932_v12  ;;  %v12658_v54 = vld [vmem:[#allocation10_spill] sm:$0xff] }
 0x206   : > { %2502 = vmatpush.bf16.msrb.mxu3 %v7000_v36 }
 0x207   : > { %v2022_v8 = vpop.f32.mrf.mxu1  ;;  %v2110_v60 = vadd.f32 %v2109_v31, %v2021_v27 }
 0x208   : > { %v1844_v48 = vpop.f32.mrf.mxu3 }
 0x209   : > { %v1845_v32 = vadd.f32 %v1844_v48, %v1756_v63  ;;  %v2111_v16 = vpop.f32.mrf.mxu2  ;;  %v2803_v38 = vmax.f32 %v2110_v60, 0.0 }
 0x20b   : > { %v1934_v11 = vadd.f32 %v1933_v21, %v1845_v32 }
 0x20c   : > { %v1936_v51 = vpop.f32.mrf.mxu0 }
 0x20d   : > { %v2023_v1 = vadd.f32 %v2022_v8, %v1934_v11  ;;  %2162 = vmatmul.bf16.gmra.mxu3 %v12655_v61  ;;  %v12660_v8 = vld [vmem:[#allocation82_spill] sm:$0xff] }
 0x20e   : > { %2429 = vmatmul.bf16.gmra.mxu2 %v12656_v5  ;;  %v1761_v60 = vadd.f32 %v9229_v44, %v12660_v8  ;;  %v12662_v61 = vld [vmem:[#allocation58_spill] sm:$0xff] }
 0x20f   : > { %v2025_v50 = vpop.f32.mrf.mxu1  ;;  %v2112_v2 = vadd.f32 %v2111_v16, %v2023_v1  ;;  %2251 = vmatmul.bf16.gmra.mxu0 %v12658_v54  ;;  %v12661_v1 = vld [vmem:[#allocation13_spill] sm:$0xff] }
 0x210   : > { %v1847_v24 = vpop.f32.mrf.mxu3 }
 0x211   : > { %v2805_v47 = vmax.f32 %v2112_v2, 0.0  ;;  %v1848_v53 = vadd.f32 %v1847_v24, %v1759_v9  ;;  %v2114_v59 = vpop.f32.mrf.mxu2  ;;  %v12663_v2 = vld [vmem:[#allocation88_spill] sm:$0xff] }
 0x212   : > { %2340 = vmatmul.bf16.gmra.mxu1 %v12659_v19 }
 0x213   : > { %v1937_v31 = vadd.f32 %v1936_v51, %v1848_v53  ;;  %v9673_v23 = vpack.c.bf16 %v2805_v47, %v2803_v38  ;;  %v12665_v47 = vld [vmem:[#allocation12_spill] sm:$0xff] }
 0x214   : > { %v1938_v14 = vpop.f32.mrf.mxu0 }
 0x215   : > { %v2026_v12 = vadd.f32 %v2025_v50, %v1937_v31  ;;  %v1764_v50 = vadd.f32 %v12663_v2, %v9248_v15  ;;  %v12666_v31 = vld [vmem:[#allocation90_spill] sm:$0xff] }
 0x217   : > { %v2027_v21 = vpop.f32.mrf.mxu1  ;;  %v2115_v27 = vadd.f32 %v2114_v59, %v2026_v12 }
 0x218   : > { %v1849_v22 = vpop.f32.mrf.mxu3 }
 0x219   : > { %v1850_v63 = vadd.f32 %v1849_v22, %v1761_v60  ;;  %v2116_v48 = vpop.f32.mrf.mxu2  ;;  %v2807_v54 = vmax.f32 %v2115_v27, 0.0 }
 0x21b   : > { %v1939_v32 = vadd.f32 %v1938_v14, %v1850_v63  ;;  %v12667_v14 = vld [vmem:[#allocation91_spill] sm:$0xff]  ;;  %v12668_v63 = vld [vmem:[#allocation17_spill] sm:$0xff] }
 0x21c   : > { %v1941_v16 = vpop.f32.mrf.mxu0  ;;  %v1766_v12 = vadd.f32 %v12667_v14, %v12666_v31 }
 0x21d   : > { %v2028_v11 = vadd.f32 %v2027_v21, %v1939_v32  ;;  %2167 = vmatmul.bf16.gmra.mxu3 %v12661_v1 }
 0x21e   : > { %2434 = vmatmul.bf16.gmra.mxu2 %v12662_v61 }
 0x21f   : > { %v2030_v51 = vpop.f32.mrf.mxu1  ;;  %v2117_v5 = vadd.f32 %v2116_v48, %v2028_v11  ;;  %2256 = vmatmul.bf16.gmra.mxu0 %v12664_v56  ;;  %v12669_v48 = vld [vmem:[#allocation62_spill] sm:$0xff]  ;;  %v12672_v56 = vld [vmem:[#allocation16_spill] sm:$0xff] }
 0x220   : > { %v1852_v9 = vpop.f32.mrf.mxu3  ;;  %v12670_v11 = vld [vmem:[#allocation18_spill] sm:$0xff] }
 0x221   : > { %v2809_v44 = vmax.f32 %v2117_v5, 0.0  ;;  %v1853_v24 = vadd.f32 %v1852_v9, %v1764_v50  ;;  %v2119_v38 = vpop.f32.mrf.mxu2  ;;  %v12671_v5 = vld [vmem:[#allocation66_spill] sm:$0xff] }
 0x222   : > { %2345 = vmatmul.bf16.gmra.mxu1 %v12665_v47  ;;  %v7868_v9 = vld [vmem:[%s12429_s2 + $0x244] sm:$0xf] }
 0x223   : > { %v1942_v53 = vadd.f32 %v1941_v16, %v1853_v24  ;;  %v9683_v59 = vpack.c.bf16 %v2809_v44, %v2807_v54  ;;  %v6989_v54 = vld [vmem:[%s12429_s2 + $0x248] sm:$0xf0] }
 0x224   : > { %v1943_v19 = vpop.f32.mrf.mxu0  ;;  %v6992_v44 = vor.u32 %v7868_v9, %v6989_v54  ;;  %v7085_v9 = vld [vmem:[%s12429_s2 + $0x308] sm:$0xf0] }
 0x225   : > { %v2031_v58 = vadd.f32 %v2030_v51, %v1942_v53 }
 0x226   : > { %2503 = vmatpush.bf16.msrb.mxu3 %v6992_v44 }
 0x227   : > { %v2032_v57 = vpop.f32.mrf.mxu1  ;;  %v2120_v36 = vadd.f32 %v2119_v38, %v2031_v58 }
 0x228   : > { %v1854_v15 = vpop.f32.mrf.mxu3 }
 0x229   : > { %v1855_v21 = vadd.f32 %v1854_v15, %v1766_v12  ;;  %v2121_v8 = vpop.f32.mrf.mxu2  ;;  %v2811_v61 = vmax.f32 %v2120_v36, 0.0  ;;  %v12673_v36 = vld [vmem:[#allocation67_spill] sm:$0xff] }
 0x22b   : > { %v1944_v60 = vadd.f32 %v1943_v19, %v1855_v21 }
 0x22c   : > { %v1946_v27 = vpop.f32.mrf.mxu0 }
 0x22d   : > { %v2033_v22 = vadd.f32 %v2032_v57, %v1944_v60  ;;  %2172 = vmatmul.bf16.gmra.mxu3 %v12668_v63  ;;  %v12675_v60 = vld [vmem:[#allocation68_spill] sm:$0xff]  ;;  %v12676_v63 = vld [vmem:[#allocation22_spill] sm:$0xff] }
 0x22e   : > { %2439 = vmatmul.bf16.gmra.mxu2 %v12669_v48 }
 0x22f   : > { %v2035_v32 = vpop.f32.mrf.mxu1  ;;  %v2122_v16 = vadd.f32 %v2121_v8, %v2033_v22  ;;  %2261 = vmatmul.bf16.gmra.mxu0 %v12670_v11  ;;  %v12674_v8 = vld [vmem:[#allocation21_spill] sm:$0xff] }
 0x230   : > { %v1857_v1 = vpop.f32.mrf.mxu3  ;;  %v12677_v11 = vld [vmem:[#allocation73_spill] sm:$0xff] }
 0x231   : > { %v2813_v51 = vmax.f32 %v2122_v16, 0.0  ;;  %v1858_v2 = vadd.f32 %v1857_v1, %v12671_v5  ;;  %v2124_v50 = vpop.f32.mrf.mxu2  ;;  %v7890_v5 = vld [vmem:[%s12429_s2 + $0x2f4] sm:$0xf] }
 0x232   : > { %2350 = vmatmul.bf16.gmra.mxu1 %v12672_v56  ;;  %v7892_v56 = vld [vmem:[%s12429_s2 + $0x304] sm:$0xf] }
 0x233   : > { %v1947_v24 = vadd.f32 %v1946_v27, %v1858_v2  ;;  %v9698_v38 = vpack.c.bf16 %v2813_v51, %v2811_v61  ;;  %v12678_v51 = vld [vmem:[#allocation20_spill] sm:$0xff]  ;;  %v7077_v2 = vld [vmem:[%s12429_s2 + $0x2f8] sm:$0xf0]  ;;  %v7088_v44 = vor.u32 %v7892_v56, %v7085_v9 }
 0x234   : > { %v1948_v47 = vpop.f32.mrf.mxu0 }
 0x235   : > { %v2036_v53 = vadd.f32 %v2035_v32, %v1947_v24  ;;  %2685 = vmatpush.bf16.msrb.mxu1 %v7088_v44 }
 0x237   : > { %v2037_v19 = vpop.f32.mrf.mxu1  ;;  %v2125_v58 = vadd.f32 %v2124_v50, %v2036_v53  ;;  %v7080_v50 = vor.u32 %v7890_v5, %v7077_v2  ;;  %v7866_v5 = vld [vmem:[%s12429_s2 + $0x234] sm:$0xf]  ;;  %v6981_v2 = vld [vmem:[%s12429_s2 + $0x238] sm:$0xf0] }
 0x238   : > { %v1859_v57 = vpop.f32.mrf.mxu3 }
 0x239   : > { %v1860_v31 = vadd.f32 %v1859_v57, %v12673_v36  ;;  %v2126_v14 = vpop.f32.mrf.mxu2  ;;  %v2815_v16 = vmax.f32 %v2125_v58, 0.0  ;;  %2589 = vmatpush.bf16.msrb.mxu0 %v7080_v50  ;;  %v12679_v36 = vld [vmem:[#allocation75_spill] sm:$0xff]  ;;  %v6984_v50 = vor.u32 %v7866_v5, %v6981_v2  ;;  %v12690_v5 = vld [vmem:[#allocation28_spill] sm:$0xff] }
 0x23b   : > { %v1949_v12 = vadd.f32 %v1948_v47, %v1860_v31  ;;  %2504 = vmatpush.bf16.msrb.mxu3 %v6984_v50 }
 0x23c   : > { %v1951_v15 = vpop.f32.mrf.mxu0 }
 0x23d   : > { %v2038_v21 = vadd.f32 %v2037_v19, %v1949_v12  ;;  %2177 = vmatmul.bf16.gmra.mxu3 %v12674_v8 }
 0x23e   : > { %2444 = vmatmul.bf16.gmra.mxu2 %v12675_v60  ;;  %v12680_v60 = vld [vmem:[#allocation25_spill] sm:$0xff] }
 0x23f   : > { %v2040_v22 = vpop.f32.mrf.mxu1  ;;  %v2127_v27 = vadd.f32 %v2126_v14, %v2038_v21  ;;  %2266 = vmatmul.bf16.gmra.mxu0 %v12676_v63 }
 0x240   : > { %v1862_v48 = vpop.f32.mrf.mxu3 }
 0x241   : > { %v2817_v32 = vmax.f32 %v2127_v27, 0.0  ;;  %v1863_v1 = vadd.f32 %v1862_v48, %v12677_v11  ;;  %v2129_v61 = vpop.f32.mrf.mxu2  ;;  %v12681_v27 = vld [vmem:[#allocation76_spill] sm:$0xff]  ;;  %v12682_v48 = vld [vmem:[#allocation26_spill] sm:$0xff]  ;;  %v12683_v11 = vld [vmem:[#allocation81_spill] sm:$0xff] }
 0x242   : > { %2355 = vmatmul.bf16.gmra.mxu1 %v12678_v51  ;;  %v12684_v51 = vld [vmem:[#allocation24_spill] sm:$0xff] }
 0x243   : > { %v1952_v54 = vadd.f32 %v1951_v15, %v1863_v1  ;;  %v9718_v24 = vpack.c.bf16 %v2817_v32, %v2815_v16 }
 0x244   : > { %v1953_v47 = vpop.f32.mrf.mxu0 }
 0x245   : > { %v2041_v53 = vadd.f32 %v2040_v22, %v1952_v54 }
 0x247   : > { %v2042_v19 = vpop.f32.mrf.mxu1  ;;  %v2130_v58 = vadd.f32 %v2129_v61, %v2041_v53 }
 0x248   : > { %v1864_v57 = vpop.f32.mrf.mxu3 }
 0x249   : > { %v1865_v31 = vadd.f32 %v1864_v57, %v12679_v36  ;;  %v2131_v14 = vpop.f32.mrf.mxu2  ;;  %v2819_v22 = vmax.f32 %v2130_v58, 0.0  ;;  %v12685_v58 = vld [vmem:[#allocation83_spill] sm:$0xff] }
 0x24b   : > { %v1954_v12 = vadd.f32 %v1953_v47, %v1865_v31 }
 0x24c   : > { %v1956_v21 = vpop.f32.mrf.mxu0 }
 0x24d   : > { %v2043_v8 = vadd.f32 %v2042_v19, %v1954_v12  ;;  %2182 = vmatmul.bf16.gmra.mxu3 %v12680_v60  ;;  %v12687_v60 = vld [vmem:[#allocation84_spill] sm:$0xff] }
 0x24e   : > { %2449 = vmatmul.bf16.gmra.mxu2 %v12681_v27 }
 0x24f   : > { %v2045_v15 = vpop.f32.mrf.mxu1  ;;  %v2132_v63 = vadd.f32 %v2131_v14, %v2043_v8  ;;  %2271 = vmatmul.bf16.gmra.mxu0 %v12682_v48  ;;  %v12686_v8 = vld [vmem:[#allocation29_spill] sm:$0xff]  ;;  %v12688_v48 = vld [vmem:[#allocation30_spill] sm:$0xff] }
 0x250   : > { %v1867_v16 = vpop.f32.mrf.mxu3 }
 0x251   : > { %v2821_v32 = vmax.f32 %v2132_v63, 0.0  ;;  %v1868_v1 = vadd.f32 %v1867_v16, %v12683_v11  ;;  %v2134_v61 = vpop.f32.mrf.mxu2 }
 0x252   : > { %2360 = vmatmul.bf16.gmra.mxu1 %v12684_v51 }
 0x253   : > { %v1957_v56 = vadd.f32 %v1956_v21, %v1868_v1  ;;  %v9732_v9 = vpack.c.bf16 %v2821_v32, %v2819_v22  ;;  %v7888_v21 = vld [vmem:[%s12429_s2 + $0x2e4] sm:$0xf]  ;;  %v12689_v1 = vld [vmem:[#allocation89_spill] sm:$0xff] }
 0x254   : > { %v1958_v54 = vpop.f32.mrf.mxu0 }
 0x255   : > { %v2046_v44 = vadd.f32 %v2045_v15, %v1957_v56  ;;  %v7069_v15 = vld [vmem:[%s12429_s2 + $0x2e8] sm:$0xf0] }
 0x256   : > { %v7072_v16 = vor.u32 %v7888_v21, %v7069_v15  ;;  %v12693_v21 = vld [vmem:[#allocation93_spill] sm:$0xff]  ;;  %v7864_v15 = vld [vmem:[%s12429_s2 + $0x224] sm:$0xf] }
 0x257   : > { %v2047_v47 = vpop.f32.mrf.mxu1  ;;  %v2135_v53 = vadd.f32 %v2134_v61, %v2046_v44 }
 0x258   : > { %v1869_v19 = vpop.f32.mrf.mxu3  ;;  %2590 = vmatpush.bf16.msrb.mxu0 %v7072_v16  ;;  %v12694_v16 = vld [vmem:[#allocation34_spill] sm:$0xff] }
 0x259   : > { %v1870_v57 = vadd.f32 %v1869_v19, %v12685_v58  ;;  %v2136_v36 = vpop.f32.mrf.mxu2  ;;  %v2823_v32 = vmax.f32 %v2135_v53, 0.0  ;;  %v12691_v58 = vld [vmem:[#allocation92_spill] sm:$0xff] }
 0x25b   : > { %v1959_v31 = vadd.f32 %v1958_v54, %v1870_v57 }
 0x25c   : > { %v1961_v14 = vpop.f32.mrf.mxu0 }
 0x25d   : > { %v2048_v12 = vadd.f32 %v2047_v47, %v1959_v31  ;;  %2187 = vmatmul.bf16.gmra.mxu3 %v12686_v8  ;;  %v12692_v8 = vld [vmem:[#allocation33_spill] sm:$0xff] }
 0x25e   : > { %2454 = vmatmul.bf16.gmra.mxu2 %v12687_v60  ;;  %v8162_v60 = vld [vmem:[%s12430_s3] sm:$0x3] }
 0x25f   : > { %v2050_v27 = vpop.f32.mrf.mxu1  ;;  %v2137_v63 = vadd.f32 %v2136_v36, %v2048_v12  ;;  %2276 = vmatmul.bf16.gmra.mxu0 %v12688_v48 }
 0x260   : > { %v1872_v22 = vpop.f32.mrf.mxu3 }
 0x261   : > { %v2825_v11 = vmax.f32 %v2137_v63, 0.0  ;;  %v1873_v61 = vadd.f32 %v1872_v22, %v12689_v1  ;;  %v2139_v51 = vpop.f32.mrf.mxu2  ;;  %v6973_v63 = vld [vmem:[%s12429_s2 + $0x228] sm:$0xf0] }
 0x262   : > { %2365 = vmatmul.bf16.gmra.mxu1 %v12690_v5  ;;  %v6976_v22 = vor.u32 %v7864_v15, %v6973_v63  ;;  %v12695_v5 = vld [vmem:[#allocation32_spill] sm:$0xff]  ;;  %v12697_v15 = vld [vmem:[#allocation38_spill] sm:$0xff] }
 0x263   : > { %v1962_v2 = vadd.f32 %v1961_v14, %v1873_v61  ;;  %v9746_v50 = vpack.c.bf16 %v2825_v11, %v2823_v32  ;;  %v9753_v14 = vperm.slane %v8162_v60, 1  ;;  %v12696_v60 = vld [vmem:[#allocation37_spill] sm:$0xff] }
 0x264   : > { %v1963_v56 = vpop.f32.mrf.mxu0  ;;  %2505 = vmatpush.bf16.msrb.mxu3 %v6976_v22 }
 0x265   : > { %v2051_v54 = vadd.f32 %v2050_v27, %v1962_v2 }
 0x267   : > { %v2052_v44 = vpop.f32.mrf.mxu1  ;;  %v2140_v47 = vadd.f32 %v2139_v51, %v2051_v54 }
 0x268   : > { %v1874_v19 = vpop.f32.mrf.mxu3 }
 0x269   : > { %v1875_v57 = vadd.f32 %v1874_v19, %v12691_v58  ;;  %v2141_v36 = vpop.f32.mrf.mxu2  ;;  %v2827_v11 = vmax.f32 %v2140_v47, 0.0 }
 0x26b   : > { %v1964_v31 = vadd.f32 %v1963_v56, %v1875_v57 }
 0x26c   : > { %v2242_v53 = vpop.f32.mrf.mxu0 }
 0x26d   : > { %v2053_v12 = vadd.f32 %v2052_v44, %v1964_v31  ;;  %2192 = vmatmul.bf16.gmra.mxu3 %v12692_v8 }
 0x26e   : > { %2459 = vmatmul.bf16.gmra.mxu2 %v12693_v21 }
 0x26f   : > { %v2331_v27 = vpop.f32.mrf.mxu1  ;;  %v2142_v48 = vadd.f32 %v2141_v36, %v2053_v12  ;;  %2281 = vmatmul.bf16.gmra.mxu0 %v12694_v16 }
 0x270   : > { %v2153_v32 = vpop.f32.mrf.mxu3 }
 0x271   : > { %v2829_v1 = vmax.f32 %v2142_v48, 0.0  ;;  %v2154_v61 = vadd.f32 %v2153_v32, %v9753_v14  ;;  %v2420_v51 = vpop.f32.mrf.mxu2 }
 0x272   : > { %2370 = vmatmul.bf16.gmra.mxu1 %v12695_v5 }
 0x273   : > { %v2243_v2 = vadd.f32 %v2242_v53, %v2154_v61  ;;  %v9765_v56 = vpack.c.bf16 %v2829_v1, %v2827_v11  ;;  %v7886_v53 = vld [vmem:[%s12429_s2 + $0x2d4] sm:$0xf] }
 0x274   : > { %v2244_v54 = vpop.f32.mrf.mxu0  ;;  %v12698_v11 = vld [vmem:[#allocation36_spill] sm:$0xff] }
 0x275   : > { %v2332_v44 = vadd.f32 %v2331_v27, %v2243_v2  ;;  %v7061_v27 = vld [vmem:[%s12429_s2 + $0x2d8] sm:$0xf0] }
 0x276   : > { %v7064_v63 = vor.u32 %v7886_v53, %v7061_v27 }
 0x277   : > { %v2333_v19 = vpop.f32.mrf.mxu1  ;;  %v9767_v58 = vadd.f32 %v2420_v51, %v2332_v44 }
 0x278   : > { %v2155_v57 = vpop.f32.mrf.mxu3  ;;  %2591 = vmatpush.bf16.msrb.mxu0 %v7064_v63 }
 0x279   : > { %v2156_v36 = vadd.f32 %v2155_v57, %v9753_v14  ;;  %v2422_v31 = vpop.f32.mrf.mxu2 }
 0x27b   : > { %v2245_v47 = vadd.f32 %v2244_v54, %v2156_v36 }
 0x27c   : > { %v2247_v12 = vpop.f32.mrf.mxu0 }
 0x27d   : > { %v2334_v8 = vadd.f32 %v2333_v19, %v2245_v47  ;;  %2197 = vmatmul.bf16.gmra.mxu3 %v12696_v60  ;;  %v12700_v60 = vld [vmem:[#allocation42_spill] sm:$0xff] }
 0x27e   : > { %2464 = vmatmul.bf16.gmra.mxu2 %v9314_v29 }
 0x27f   : > { %v2336_v21 = vpop.f32.mrf.mxu1  ;;  %2286 = vmatmul.bf16.gmra.mxu0 %v12697_v15  ;;  %v9779_v48 = vadd.f32 %v2422_v31, %v2334_v8  ;;  %v12699_v31 = vld [vmem:[#allocation41_spill] sm:$0xff] }
 0x280   : > { %v2158_v16 = vpop.f32.mrf.mxu3  ;;  %v6965_v8 = vld [vmem:[%s12429_s2 + $0x218] sm:$0xf0] }
 0x281   : > { %v2159_v22 = vadd.f32 %v2158_v16, %v9753_v14  ;;  %v2425_v32 = vpop.f32.mrf.mxu2  ;;  %v12701_v16 = vld [vmem:[#allocation40_spill] sm:$0xff] }
 0x282   : > { %2375 = vmatmul.bf16.gmra.mxu1 %v12698_v11 }
 0x283   : > { %v2248_v29 = vadd.f32 %v2247_v12, %v2159_v22  ;;  %v7862_v12 = vld [vmem:[%s12429_s2 + $0x214] sm:$0xf] }
 0x284   : > { %v2249_v1 = vpop.f32.mrf.mxu0 }
 0x285   : > { %v2337_v61 = vadd.f32 %v2336_v21, %v2248_v29  ;;  %v6968_v21 = vor.u32 %v7862_v12, %v6965_v8 }
 0x287   : > { %v2338_v51 = vpop.f32.mrf.mxu1  ;;  %v9783_v5 = vadd.f32 %v2425_v32, %v2337_v61  ;;  %2506 = vmatpush.bf16.msrb.mxu3 %v6968_v21 }
 0x288   : > { %v2160_v2 = vpop.f32.mrf.mxu3 }
 0x289   : > { %v2161_v54 = vadd.f32 %v2160_v2, %v9753_v14  ;;  %v2427_v44 = vpop.f32.mrf.mxu2 }
 0x28b   : > { %v2250_v19 = vadd.f32 %v2249_v1, %v2161_v54 }
 0x28c   : > { %v2252_v57 = vpop.f32.mrf.mxu0 }
 0x28d   : > { %v2339_v36 = vadd.f32 %v2338_v51, %v2250_v19  ;;  %2202 = vmatmul.bf16.gmra.mxu3 %v12699_v31  ;;  %v12702_v19 = vld [vmem:[#allocation45_spill] sm:$0xff]  ;;  %v7053_v31 = vld [vmem:[%s12429_s2 + $0x2c8] sm:$0xf0] }
 0x28e   : > { %2469 = vmatmul.bf16.gmra.mxu2 %v9353_v45 }
 0x28f   : > { %v2341_v47 = vpop.f32.mrf.mxu1  ;;  %2291 = vmatmul.bf16.gmra.mxu0 %v12700_v60  ;;  %v9795_v53 = vadd.f32 %v2427_v44, %v2339_v36 }
 0x290   : > { %v2163_v27 = vpop.f32.mrf.mxu3 }
 0x291   : > { %v2164_v15 = vadd.f32 %v2163_v27, %v9753_v14  ;;  %v2430_v63 = vpop.f32.mrf.mxu2 }
 0x292   : > { %2380 = vmatmul.bf16.gmra.mxu1 %v12701_v16 }
 0x293   : > { %v2253_v45 = vadd.f32 %v2252_v57, %v2164_v15  ;;  %v7884_v57 = vld [vmem:[%s12429_s2 + $0x2c4] sm:$0xf]  ;;  %v12704_v15 = vld [vmem:[#allocation44_spill] sm:$0xff] }
 0x294   : > { %v2254_v22 = vpop.f32.mrf.mxu0  ;;  %v7056_v12 = vor.u32 %v7884_v57, %v7053_v31  ;;  %v6957_v57 = vld [vmem:[%s12429_s2 + $0x208] sm:$0xf0] }
 0x295   : > { %v2342_v32 = vadd.f32 %v2341_v47, %v2253_v45  ;;  %v12703_v47 = vld [vmem:[#allocation46_spill] sm:$0xff]  ;;  %v12706_v31 = vld [vmem:[#allocation15_spill] sm:$0xff] }
 0x296   : > { %2592 = vmatpush.bf16.msrb.mxu0 %v7056_v12 }
 0x297   : > { %v2343_v11 = vpop.f32.mrf.mxu1  ;;  %v9799_v29 = vadd.f32 %v2430_v63, %v2342_v32 }
 0x298   : > { %v2165_v1 = vpop.f32.mrf.mxu3 }
 0x299   : > { %v2166_v61 = vadd.f32 %v2165_v1, %v9753_v14  ;;  %v2432_v51 = vpop.f32.mrf.mxu2 }
 0x29b   : > { %v2255_v2 = vadd.f32 %v2254_v22, %v2166_v61 }
 0x29c   : > { %v2257_v54 = vpop.f32.mrf.mxu0 }
 0x29d   : > { %v2344_v44 = vadd.f32 %v2343_v11, %v2255_v2  ;;  %2207 = vmatmul.bf16.gmra.mxu3 %v12702_v19  ;;  %v7901_v19 = vld [vmem:[%s12431_s4 + $0x38] sm:$0xff] }
 0x29e   : > { %2474 = vmatmul.bf16.gmra.mxu2 %v9386_v33 }
 0x29f   : > { %v2346_v36 = vpop.f32.mrf.mxu1  ;;  %2296 = vmatmul.bf16.gmra.mxu0 %v12703_v47  ;;  %v9811_v8 = vadd.f32 %v2432_v51, %v2344_v44  ;;  %v12705_v44 = vld [vmem:[#allocation2_spill] sm:$0xff]  ;;  %2995 = vmatpush.bf16.msrb.mxu2 %v7901_v19 }
 0x2a0   : > { %v2168_v60 = vpop.f32.mrf.mxu3 }
 0x2a1   : > { %v2169_v21 = vadd.f32 %v2168_v60, %v9753_v14  ;;  %v2435_v27 = vpop.f32.mrf.mxu2 }
 0x2a2   : > { %2385 = vmatmul.bf16.gmra.mxu1 %v12704_v15  ;;  %v7900_v15 = vld [vmem:[%s12431_s4 + $0x30] sm:$0xff] }
 0x2a3   : > { %v2258_v33 = vadd.f32 %v2257_v54, %v2169_v21  ;;  %2996 = vmatpush.bf16.msrb.mxu2 %v7900_v15 }
 0x2a4   : > { %v2259_v63 = vpop.f32.mrf.mxu0 }
 0x2a5   : > { %v2347_v16 = vadd.f32 %v2346_v36, %v2258_v33  ;;  %v7860_v36 = vld [vmem:[%s12429_s2 + $0x204] sm:$0xf] }
 0x2a6   : > { %v6960_v47 = vor.u32 %v7860_v36, %v6957_v57  ;;  %v12708_v36 = vld [vmem:[#allocation3_spill] sm:$0xff]  ;;  %v7897_v57 = vld [vmem:[%s12431_s4 + $0x18] sm:$0xff] }
 0x2a7   : > { %v2348_v45 = vpop.f32.mrf.mxu1  ;;  %v9815_v22 = vadd.f32 %v2435_v27, %v2347_v16 }
 0x2a8   : > { %v2170_v32 = vpop.f32.mrf.mxu3  ;;  %2507 = vmatpush.bf16.msrb.mxu3 %v6960_v47  ;;  %v7882_v47 = vld [vmem:[%s12429_s2 + $0x2b4] sm:$0xf] }
 0x2a9   : > { %v2171_v11 = vadd.f32 %v2170_v32, %v9753_v14  ;;  %v2437_v1 = vpop.f32.mrf.mxu2 }
 0x2ab   : > { %v2260_v61 = vadd.f32 %v2259_v63, %v2171_v11 }
 0x2ac   : > { %v2262_v51 = vpop.f32.mrf.mxu0 }
 0x2ad   : > { %v2349_v2 = vadd.f32 %v2348_v45, %v2260_v61  ;;  %2212 = vmatmul.bf16.gmra.mxu3 %v12705_v44  ;;  %v7899_v45 = vld [vmem:[%s12431_s4 + $0x28] sm:$0xff]  ;;  %v7898_v44 = vld [vmem:[%s12431_s4 + $0x20] sm:$0xff] }
 0x2ae   : > { %2479 = vmatmul.bf16.gmra.mxu2 %v9425_v37  ;;  %v12707_v37 = vld [vmem:[#allocation31_spill] sm:$0xff] }
 0x2af   : > { %v2351_v54 = vpop.f32.mrf.mxu1  ;;  %2301 = vmatmul.bf16.gmra.mxu0 %v12706_v31  ;;  %v9830_v12 = vadd.f32 %v2437_v1, %v2349_v2  ;;  %2997 = vmatpush.bf16.msrb.mxu2 %v7899_v45 }
 0x2b0   : > { %v2173_v60 = vpop.f32.mrf.mxu3 }
 0x2b1   : > { %v2174_v21 = vadd.f32 %v2173_v60, %v9753_v14  ;;  %v2440_v27 = vpop.f32.mrf.mxu2  ;;  %v7045_v60 = vld [vmem:[%s12429_s2 + $0x2b8] sm:$0xf0] }
 0x2b2   : > { %2390 = vmatmul.bf16.gmra.mxu1 %v12707_v37 }
 0x2b3   : > { %v2263_v33 = vadd.f32 %v2262_v51, %v2174_v21  ;;  %2998 = vmatpush.bf16.msrb.mxu2 %v7898_v44  ;;  %v12709_v21 = vld [vmem:[#allocation19_spill] sm:$0xff] }
 0x2b4   : > { %v2264_v63 = vpop.f32.mrf.mxu0 }
 0x2b5   : > { %v2352_v16 = vadd.f32 %v2351_v54, %v2263_v33 }
 0x2b7   : > { %v2353_v32 = vpop.f32.mrf.mxu1  ;;  %v9840_v11 = vadd.f32 %v2440_v27, %v2352_v16  ;;  %2999 = vmatpush.bf16.msrb.mxu2 %v7897_v57  ;;  %v7048_v27 = vor.u32 %v7882_v47, %v7045_v60  ;;  %v7896_v16 = vld [vmem:[%s12431_s4 + $0x10] sm:$0xff]  ;;  %v7894_v47 = vld [vmem:[%s12431_s4] sm:$0xff] }
 0x2b8   : > { %v2175_v1 = vpop.f32.mrf.mxu3 }
 0x2b9   : > { %v2176_v61 = vadd.f32 %v2175_v1, %v9753_v14  ;;  %v2442_v2 = vpop.f32.mrf.mxu2  ;;  %2593 = vmatpush.bf16.msrb.mxu0 %v7048_v27  ;;  %v7878_v27 = vld [vmem:[%s12429_s2 + $0x294] sm:$0xf] }
 0x2bb   : > { %v2265_v51 = vadd.f32 %v2264_v63, %v2176_v61  ;;  %3000 = vmatpush.bf16.msrb.mxu2 %v7896_v16  ;;  %v7895_v61 = vld [vmem:[%s12431_s4 + $0x8] sm:$0xff] }
 0x2bc   : > { %v2267_v19 = vpop.f32.mrf.mxu0 }
 0x2bd   : > { %v2354_v54 = vadd.f32 %v2353_v32, %v2265_v51  ;;  %2217 = vmatmul.bf16.gmra.mxu3 %v12708_v36 }
 0x2be   : > { %2484 = vmatmul.bf16.gmra.mxu2 %v9482_v34  ;;  %v12710_v34 = vld [vmem:[#allocation35_spill] sm:$0xff] }
 0x2bf   : > { %v2356_v31 = vpop.f32.mrf.mxu1  ;;  %2306 = vmatmul.bf16.gmra.mxu0 %v12709_v21  ;;  %v9858_v37 = vadd.f32 %v2442_v2, %v2354_v54  ;;  %3001 = vmatpush.bf16.msrb.mxu2 %v7895_v61  ;;  %v7880_v54 = vld [vmem:[%s12429_s2 + $0x2a4] sm:$0xf] }
 0x2c0   : > { %v2178_v15 = vpop.f32.mrf.mxu3 }
 0x2c1   : > { %v2179_v33 = vadd.f32 %v2178_v15, %v9753_v14  ;;  %v2445_v63 = vpop.f32.mrf.mxu2  ;;  %v7029_v15 = vld [vmem:[%s12429_s2 + $0x298] sm:$0xf0] }
 0x2c2   : > { %2395 = vmatmul.bf16.gmra.mxu1 %v12710_v34  ;;  %v7032_v34 = vor.u32 %v7878_v27, %v7029_v15 }
 0x2c3   : > { %v2268_v45 = vadd.f32 %v2267_v19, %v2179_v33  ;;  %v7037_v19 = vld [vmem:[%s12429_s2 + $0x2a8] sm:$0xf0]  ;;  %3002 = vmatpush.bf16.msrb.mxu2 %v7894_v47 }
 0x2c4   : > { %v2269_v32 = vpop.f32.mrf.mxu0 }
 0x2c5   : > { %v2357_v1 = vadd.f32 %v2356_v31, %v2268_v45  ;;  %v7040_v31 = vor.u32 %v7880_v54, %v7037_v19  ;;  %v7909_v45 = vld [vmem:[%s12431_s4 + $0x78] sm:$0xff]  ;;  %v12713_v19 = vld [vmem:[#allocation39_spill] sm:$0xff] }
 0x2c6   : > { %3084 = vmatpush.bf16.msra.mxu3 %v7909_v45 }
 0x2c7   : > { %v2358_v2 = vpop.f32.mrf.mxu1  ;;  %v9868_v44 = vadd.f32 %v2445_v63, %v2357_v1  ;;  %2594 = vmatpush.bf16.msrb.mxu0 %v7040_v31  ;;  %v12711_v63 = vld [vmem:[#allocation7_spill] sm:$0xff] }
 0x2c8   : > { %v2180_v51 = vpop.f32.mrf.mxu3 }
 0x2c9   : > { %v2181_v36 = vadd.f32 %v2180_v51, %v9753_v14  ;;  %v2447_v57 = vpop.f32.mrf.mxu2 }
 0x2cb   : > { %v2270_v60 = vadd.f32 %v2269_v32, %v2181_v36  ;;  %v12712_v32 = vld [vmem:[#allocation23_spill] sm:$0xff]  ;;  %2595 = vmatpush.bf16.msrb.mxu0 %v7032_v34 }
 0x2cc   : > { %v2272_v21 = vpop.f32.mrf.mxu0 }
 0x2cd   : > { %v2359_v33 = vadd.f32 %v2358_v2, %v2270_v60  ;;  %2222 = vmatmul.bf16.gmra.mxu3 %v12711_v63  ;;  %v7876_v2 = vld [vmem:[%s12429_s2 + $0x284] sm:$0xf] }
 0x2ce   : > { %2489 = vmatmul.bf16.gmra.mxu2 %v9548_v10  ;;  %v7021_v10 = vld [vmem:[%s12429_s2 + $0x288] sm:$0xf0] }
 0x2cf   : > { %v2361_v16 = vpop.f32.mrf.mxu1  ;;  %2311 = vmatmul.bf16.gmra.mxu0 %v12712_v32  ;;  %v9892_v1 = vadd.f32 %v2447_v57, %v2359_v33  ;;  %v7024_v36 = vor.u32 %v7876_v2, %v7021_v10  ;;  %v12715_v2 = vld [vmem:[#allocation27_spill] sm:$0xff] }
 0x2d0   : > { %v2183_v61 = vpop.f32.mrf.mxu3 }
 0x2d1   : > { %v2184_v51 = vadd.f32 %v2183_v61, %v9753_v14  ;;  %v2450_v54 = vpop.f32.mrf.mxu2  ;;  %2596 = vmatpush.bf16.msrb.mxu0 %v7024_v36 }
 0x2d2   : > { %2400 = vmatmul.bf16.gmra.mxu1 %v12713_v19 }
 0x2d3   : > { %v2273_v31 = vadd.f32 %v2272_v21, %v2184_v51 }
 0x2d4   : > { %v2274_v57 = vpop.f32.mrf.mxu0 }
 0x2d5   : > { %v2362_v47 = vadd.f32 %v2361_v16, %v2273_v31 }
 0x2d7   : > { %v2363_v60 = vpop.f32.mrf.mxu1  ;;  %v9902_v27 = vadd.f32 %v2450_v54, %v2362_v47  ;;  %v12716_v54 = vld [vmem:[#allocation43_spill] sm:$0xff] }
 0x2d8   : > { %v2185_v15 = vpop.f32.mrf.mxu3 }
 0x2d9   : > { %v2186_v33 = vadd.f32 %v2185_v15, %v9753_v14  ;;  %v2452_v63 = vpop.f32.mrf.mxu2 }
 0x2db   : > { %v2275_v34 = vadd.f32 %v2274_v57, %v2186_v33 }
 0x2dc   : > { %v2277_v45 = vpop.f32.mrf.mxu0 }
 0x2dd   : > { %v2364_v32 = vadd.f32 %v2363_v60, %v2275_v34  ;;  %2227 = vmatmul.bf16.gmra.mxu3 %v12714_v28  ;;  %v12717_v34 = vld [vmem:[#allocation48_spill] sm:$0xff] }
 0x2de   : > { %2494 = vmatmul.bf16.gmra.mxu2 %v9614_v40 }
 0x2df   : > { %v2366_v61 = vpop.f32.mrf.mxu1  ;;  %2316 = vmatmul.bf16.gmra.mxu0 %v12715_v2  ;;  %v9908_v21 = vadd.f32 %v2452_v63, %v2364_v32 }
 0x2e0   : > { %v2188_v16 = vpop.f32.mrf.mxu3 }
 0x2e1   : > { %v2189_v10 = vadd.f32 %v2188_v16, %v9753_v14  ;;  %v2455_v51 = vpop.f32.mrf.mxu2 }
 0x2e2   : > { %2405 = vmatmul.bf16.gmra.mxu1 %v12716_v54  ;;  %v12719_v54 = vld [vmem:[#allocation47_spill] sm:$0xff] }
 0x2e3   : > { %v2278_v19 = vadd.f32 %v2277_v45, %v2189_v10  ;;  %v7908_v45 = vld [vmem:[%s12431_s4 + $0x70] sm:$0xff] }
 0x2e4   : > { %v2279_v36 = vpop.f32.mrf.mxu0  ;;  %3085 = vmatpush.bf16.msra.mxu3 %v7908_v45  ;;  %v12720_v45 = vld [vmem:[#allocation52_spill] sm:$0xff] }
 0x2e5   : > { %v2367_v31 = vadd.f32 %v2366_v61, %v2278_v19  ;;  %v12718_v61 = vld [vmem:[#allocation49_spill] sm:$0xff] }
 0x2e7   : > { %v2368_v57 = vpop.f32.mrf.mxu1  ;;  %v9912_v47 = vadd.f32 %v2455_v51, %v2367_v31 }
 0x2e8   : > { %v2190_v28 = vpop.f32.mrf.mxu3 }
 0x2e9   : > { %v2191_v40 = vadd.f32 %v2190_v28, %v9753_v14  ;;  %v2457_v60 = vpop.f32.mrf.mxu2 }
 0x2eb   : > { %v2280_v15 = vadd.f32 %v2279_v36, %v2191_v40 }
 0x2ec   : > { %v2282_v33 = vpop.f32.mrf.mxu0 }
 0x2ed   : > { %v2369_v63 = vadd.f32 %v2368_v57, %v2280_v15  ;;  %2508 = vmatmul.bf16.vlgmr.msrb.gmra.mxu3 %v12717_v34 }
 0x2ee   : > { %3003 = vmatmul.bf16.vlgmr.msrb.gmra.mxu2 %v9343_v55 }
 0x2ef   : > { %v2371_v32 = vpop.f32.mrf.mxu1  ;;  %2597 = vmatmul.bf16.vlgmr.msrb.gmra.mxu0 %v12718_v61  ;;  %v9921_v2 = vadd.f32 %v2457_v60, %v2369_v63 }
 0x2f0   : > { %v2193_v16 = vpop.f32.mrf.mxu3 }
 0x2f1   : > { %v2194_v10 = vadd.f32 %v2193_v16, %v9753_v14  ;;  %v2460_v51 = vpop.f32.mrf.mxu2  ;;  %v12721_v16 = vld [vmem:[#allocation53_spill] sm:$0xff] }
 0x2f2   : > { %7105 = vmatmul.msk.bf16.vlgmr.msrb.gmra.mxu1 %vm1472_vm0, %v12719_v54  ;;  %v12722_v54 = vld [vmem:[#allocation51_spill] sm:$0xff] }
 0x2f3   : > { %v2283_v19 = vadd.f32 %v2282_v33, %v2194_v10 }
 0x2f4   : > { %v2284_v36 = vpop.f32.mrf.mxu0 }
 0x2f5   : > { %v2372_v55 = vadd.f32 %v2371_v32, %v2283_v19 }
 0x2f7   : > { %v2373_v31 = vpop.f32.mrf.mxu1  ;;  %v9926_v57 = vadd.f32 %v2460_v51, %v2372_v55 }
 0x2f8   : > { %v2195_v28 = vpop.f32.mrf.mxu3 }
 0x2f9   : > { %v2196_v40 = vadd.f32 %v2195_v28, %v9753_v14  ;;  %v2462_v15 = vpop.f32.mrf.mxu2 }
 0x2fb   : > { %v2285_v60 = vadd.f32 %v2284_v36, %v2196_v40 }
 0x2fc   : > { %v2287_v63 = vpop.f32.mrf.mxu0 }
 0x2fd   : > { %v2374_v34 = vadd.f32 %v2373_v31, %v2285_v60  ;;  %2513 = vmatmul.bf16.gmra.mxu3 %v12720_v45 }
 0x2fe   : > { %3008 = vmatmul.bf16.gmra.mxu2 %v9376_v13 }
 0x2ff   : > { %v2376_v61 = vpop.f32.mrf.mxu1  ;;  %2602 = vmatmul.bf16.gmra.mxu0 %v12721_v16  ;;  %v9932_v33 = vadd.f32 %v2462_v15, %v2374_v34  ;;  %v12724_v16 = vld [vmem:[#allocation56_spill] sm:$0xff] }
 0x300   : > { %v2198_v32 = vpop.f32.mrf.mxu3 }
 0x301   : > { %v2199_v10 = vadd.f32 %v2198_v32, %v9753_v14  ;;  %v2465_v51 = vpop.f32.mrf.mxu2 }
 0x302   : > { %7106 = vmatmul.msk.bf16.gmra.mxu1 %vm1472_vm0, %v12722_v54 }
 0x303   : > { %v2288_v19 = vadd.f32 %v2287_v63, %v2199_v10  ;;  %v7907_v63 = vld [vmem:[%s12431_s4 + $0x68] sm:$0xff] }
 0x304   : > { %v2289_v36 = vpop.f32.mrf.mxu0  ;;  %3086 = vmatpush.bf16.msra.mxu3 %v7907_v63  ;;  %v12728_v63 = vld [vmem:[#allocation60_spill] sm:$0xff] }
 0x305   : > { %v2377_v55 = vadd.f32 %v2376_v61, %v2288_v19  ;;  %v12725_v61 = vld [vmem:[#allocation57_spill] sm:$0xff] }
 0x307   : > { %v2378_v31 = vpop.f32.mrf.mxu1  ;;  %v9937_v28 = vadd.f32 %v2465_v51, %v2377_v55 }
 0x308   : > { %v2200_v40 = vpop.f32.mrf.mxu3 }
 0x309   : > { %12723 = vst [vmem:[#allocation5_spill] sm:$0xff] %v9937_v28  ;;  %v2201_v13 = vadd.f32 %v2200_v40, %v9753_v14  ;;  %v2467_v60 = vpop.f32.mrf.mxu2  ;;  %v12729_v28 = vld [vmem:[#allocation61_spill] sm:$0xff] }
 0x30b   : > { %v2290_v45 = vadd.f32 %v2289_v36, %v2201_v13  ;;  %v12727_v36 = vld [vmem:[#allocation55_spill] sm:$0xff] }
 0x30c   : > { %v2292_v15 = vpop.f32.mrf.mxu0 }
 0x30d   : > { %v2379_v34 = vadd.f32 %v2378_v31, %v2290_v45  ;;  %2518 = vmatmul.bf16.gmra.mxu3 %v12724_v16 }
 0x30e   : > { %3013 = vmatmul.bf16.gmra.mxu2 %v9415_v42 }
 0x30f   : > { %v2381_v32 = vpop.f32.mrf.mxu1  ;;  %2607 = vmatmul.bf16.gmra.mxu0 %v12725_v61  ;;  %v9946_v10 = vadd.f32 %v2467_v60, %v2379_v34 }
 0x310   : > { %v2203_v51 = vpop.f32.mrf.mxu3 }
 0x311   : > { %12726 = vst [vmem:[#allocation50_spill] sm:$0xff] %v9946_v10  ;;  %v2204_v54 = vadd.f32 %v2203_v51, %v9753_v14  ;;  %v2470_v19 = vpop.f32.mrf.mxu2 }
 0x312   : > { %7107 = vmatmul.msk.bf16.gmra.mxu1 %vm1472_vm0, %v12727_v36  ;;  %v12730_v36 = vld [vmem:[#allocation59_spill] sm:$0xff] }
 0x313   : > { %v2293_v55 = vadd.f32 %v2292_v15, %v2204_v54 }
 0x314   : > { %v2294_v31 = vpop.f32.mrf.mxu0 }
 0x315   : > { %v2382_v42 = vadd.f32 %v2381_v32, %v2293_v55 }
 0x317   : > { %v2383_v40 = vpop.f32.mrf.mxu1  ;;  %v9951_v13 = vadd.f32 %v2470_v19, %v2382_v42 }
 0x318   : > { %v2205_v45 = vpop.f32.mrf.mxu3 }
 0x319   : > { %v2206_v16 = vadd.f32 %v2205_v45, %v9753_v14  ;;  %v2472_v61 = vpop.f32.mrf.mxu2 }
 0x31b   : > { %v2295_v60 = vadd.f32 %v2294_v31, %v2206_v16 }
 0x31c   : > { %v2297_v34 = vpop.f32.mrf.mxu0 }
 0x31d   : > { %v2384_v10 = vadd.f32 %v2383_v40, %v2295_v60  ;;  %2523 = vmatmul.bf16.gmra.mxu3 %v12728_v63  ;;  %v12732_v63 = vld [vmem:[#allocation64_spill] sm:$0xff] }
 0x31e   : > { %3018 = vmatmul.bf16.gmra.mxu2 %v9460_v26 }
 0x31f   : > { %v2386_v51 = vpop.f32.mrf.mxu1  ;;  %2612 = vmatmul.bf16.gmra.mxu0 %v12729_v28  ;;  %v9957_v15 = vadd.f32 %v2472_v61, %v2384_v10 }
 0x320   : > { %v2208_v32 = vpop.f32.mrf.mxu3 }
 0x321   : > { %v2209_v54 = vadd.f32 %v2208_v32, %v9753_v14  ;;  %v2475_v19 = vpop.f32.mrf.mxu2 }
 0x322   : > { %7108 = vmatmul.msk.bf16.gmra.mxu1 %vm1472_vm0, %v12730_v36 }
 0x323   : > { %v2298_v55 = vadd.f32 %v2297_v34, %v2209_v54  ;;  %v7906_v34 = vld [vmem:[%s12431_s4 + $0x60] sm:$0xff] }
 0x324   : > { %v2299_v31 = vpop.f32.mrf.mxu0  ;;  %3087 = vmatpush.bf16.msra.mxu3 %v7906_v34  ;;  %v12736_v34 = vld [vmem:[#allocation70_spill] sm:$0xff] }
 0x325   : > { %v2387_v42 = vadd.f32 %v2386_v51, %v2298_v55  ;;  %v12733_v51 = vld [vmem:[#allocation65_spill] sm:$0xff] }
 0x327   : > { %v2388_v40 = vpop.f32.mrf.mxu1  ;;  %v9962_v45 = vadd.f32 %v2475_v19, %v2387_v42 }
 0x328   : > { %v2210_v16 = vpop.f32.mrf.mxu3 }
 0x329   : > { %12731 = vst [vmem:[#allocation72_spill] sm:$0xff] %v9962_v45  ;;  %v2211_v26 = vadd.f32 %v2210_v16, %v9753_v14  ;;  %v2477_v60 = vpop.f32.mrf.mxu2  ;;  %v12737_v45 = vld [vmem:[#allocation71_spill] sm:$0xff] }
 0x32b   : > { %v2300_v28 = vadd.f32 %v2299_v31, %v2211_v26  ;;  %v12735_v31 = vld [vmem:[#allocation63_spill] sm:$0xff] }
 0x32c   : > { %v2302_v10 = vpop.f32.mrf.mxu0 }
 0x32d   : > { %v2389_v61 = vadd.f32 %v2388_v40, %v2300_v28  ;;  %2528 = vmatmul.bf16.gmra.mxu3 %v12732_v63 }
 0x32e   : > { %3023 = vmatmul.bf16.gmra.mxu2 %v9523_v35 }
 0x32f   : > { %v2391_v32 = vpop.f32.mrf.mxu1  ;;  %2617 = vmatmul.bf16.gmra.mxu0 %v12733_v51  ;;  %v9971_v54 = vadd.f32 %v2477_v60, %v2389_v61 }
 0x330   : > { %v2213_v19 = vpop.f32.mrf.mxu3 }
 0x331   : > { %12734 = vst [vmem:[#allocation6_spill] sm:$0xff] %v9971_v54  ;;  %v2214_v36 = vadd.f32 %v2213_v19, %v9753_v14  ;;  %v2480_v55 = vpop.f32.mrf.mxu2 }
 0x332   : > { %7109 = vmatmul.msk.bf16.gmra.mxu1 %vm1472_vm0, %v12735_v31  ;;  %v12738_v31 = vld [vmem:[#allocation69_spill] sm:$0xff] }
 0x333   : > { %v2303_v42 = vadd.f32 %v2302_v10, %v2214_v36 }
 0x334   : > { %v2304_v40 = vpop.f32.mrf.mxu0 }
 0x335   : > { %v2392_v35 = vadd.f32 %v2391_v32, %v2303_v42 }
 0x337   : > { %v2393_v16 = vpop.f32.mrf.mxu1  ;;  %v9976_v26 = vadd.f32 %v2480_v55, %v2392_v35 }
 0x338   : > { %v2215_v28 = vpop.f32.mrf.mxu3 }
 0x339   : > { %v2216_v63 = vadd.f32 %v2215_v28, %v9753_v14  ;;  %v2482_v51 = vpop.f32.mrf.mxu2 }
 0x33b   : > { %v2305_v60 = vadd.f32 %v2304_v40, %v2216_v63 }
 0x33c   : > { %v2307_v61 = vpop.f32.mrf.mxu0 }
 0x33d   : > { %v2394_v54 = vadd.f32 %v2393_v16, %v2305_v60  ;;  %2533 = vmatmul.bf16.gmra.mxu3 %v12736_v34  ;;  %v12740_v34 = vld [vmem:[#allocation78_spill] sm:$0xff] }
 0x33e   : > { %3028 = vmatmul.bf16.gmra.mxu2 %v9604_v41 }
 0x33f   : > { %v2396_v19 = vpop.f32.mrf.mxu1  ;;  %2622 = vmatmul.bf16.gmra.mxu0 %v12737_v45  ;;  %v9982_v10 = vadd.f32 %v2482_v51, %v2394_v54 }
 0x340   : > { %v2218_v32 = vpop.f32.mrf.mxu3 }
 0x341   : > { %v2219_v36 = vadd.f32 %v2218_v32, %v9753_v14  ;;  %v2485_v55 = vpop.f32.mrf.mxu2 }
 0x342   : > { %7110 = vmatmul.msk.bf16.gmra.mxu1 %vm1472_vm0, %v12738_v31 }
 0x343   : > { %v2308_v42 = vadd.f32 %v2307_v61, %v2219_v36  ;;  %v7905_v61 = vld [vmem:[%s12431_s4 + $0x58] sm:$0xff] }
 0x344   : > { %v2309_v40 = vpop.f32.mrf.mxu0  ;;  %3088 = vmatpush.bf16.msra.mxu3 %v7905_v61  ;;  %v12744_v61 = vld [vmem:[#allocation86_spill] sm:$0xff] }
 0x345   : > { %v2397_v35 = vadd.f32 %v2396_v19, %v2308_v42  ;;  %v12741_v19 = vld [vmem:[#allocation79_spill] sm:$0xff] }
 0x347   : > { %v2398_v16 = vpop.f32.mrf.mxu1  ;;  %v9987_v28 = vadd.f32 %v2485_v55, %v2397_v35 }
 0x348   : > { %v2220_v63 = vpop.f32.mrf.mxu3 }
 0x349   : > { %12739 = vst [vmem:[#allocation4_spill] sm:$0xff] %v9987_v28  ;;  %v2221_v41 = vadd.f32 %v2220_v63, %v9753_v14  ;;  %v2487_v60 = vpop.f32.mrf.mxu2  ;;  %v12745_v28 = vld [vmem:[#allocation87_spill] sm:$0xff] }
 0x34b   : > { %v2310_v45 = vadd.f32 %v2309_v40, %v2221_v41  ;;  %v12743_v40 = vld [vmem:[#allocation77_spill] sm:$0xff] }
 0x34c   : > { %v2312_v54 = vpop.f32.mrf.mxu0 }
 0x34d   : > { %v2399_v51 = vadd.f32 %v2398_v16, %v2310_v45  ;;  %2538 = vmatmul.bf16.gmra.mxu3 %v12740_v34 }
 0x34e   : > { %3033 = vmatmul.bf16.gmra.mxu2 %v9631_v0 }
 0x34f   : > { %v2401_v32 = vpop.f32.mrf.mxu1  ;;  %2627 = vmatmul.bf16.gmra.mxu0 %v12741_v19  ;;  %v9996_v36 = vadd.f32 %v2487_v60, %v2399_v51 }
 0x350   : > { %v2223_v55 = vpop.f32.mrf.mxu3 }
 0x351   : > { %12742 = vst [vmem:[#allocation74_spill] sm:$0xff] %v9996_v36  ;;  %v2224_v31 = vadd.f32 %v2223_v55, %v9753_v14  ;;  %v2490_v42 = vpop.f32.mrf.mxu2 }
 0x352   : > { %7111 = vmatmul.msk.bf16.gmra.mxu1 %vm1472_vm0, %v12743_v40  ;;  %v7924_v40 = vld [vmem:[%s12433_s6 + $0x74] sm:$0xf] }
 0x353   : > { %v2313_v35 = vadd.f32 %v2312_v54, %v2224_v31 }
 0x354   : > { %v2314_v16 = vpop.f32.mrf.mxu0 }
 0x355   : > { %v2402_v0 = vadd.f32 %v2401_v32, %v2313_v35  ;;  %v7245_v35 = vld [vmem:[%s12433_s6 + $0x78] sm:$0xf0] }
 0x357   : > { %v2403_v63 = vpop.f32.mrf.mxu1  ;;  %v10001_v41 = vadd.f32 %v2490_v42, %v2402_v0  ;;  %v12747_v42 = vld [vmem:[#allocation85_spill] sm:$0xff] }
 0x358   : > { %v2225_v45 = vpop.f32.mrf.mxu3 }
 0x359   : > { %v2226_v34 = vadd.f32 %v2225_v45, %v9753_v14  ;;  %v2492_v19 = vpop.f32.mrf.mxu2 }
 0x35b   : > { %v2315_v60 = vadd.f32 %v2314_v16, %v2226_v34 }
 0x35c   : > { %v2317_v51 = vpop.f32.mrf.mxu0 }
 0x35d   : > { %v2404_v36 = vadd.f32 %v2403_v63, %v2315_v60  ;;  %2543 = vmatmul.bf16.gmra.mxu3 %v12744_v61 }
 0x35e   : > { %3038 = vmatmul.bf16.gmra.mxu2 %v9647_v25  ;;  %v7248_v25 = vor.u32 %v7924_v40, %v7245_v35 }
 0x35f   : > { %v2406_v55 = vpop.f32.mrf.mxu1  ;;  %2632 = vmatmul.bf16.gmra.mxu0 %v12745_v28  ;;  %v10007_v54 = vadd.f32 %v2492_v19, %v2404_v36 }
 0x360   : > { %v2228_v32 = vpop.f32.mrf.mxu3  ;;  %3412 = vmatpush.bf16.msra.mxu1 %v7248_v25 }
 0x361   : > { %12746 = vst [vmem:[#allocation9_spill] sm:$0xff] %v10007_v54  ;;  %v2229_v31 = vadd.f32 %v2228_v32, %v9753_v14  ;;  %v2495_v0 = vpop.f32.mrf.mxu2 }
 0x362   : > { %7112 = vmatmul.msk.bf16.gmra.mxu1 %vm1472_vm0, %v12747_v42  ;;  %v12748_v42 = vld [vmem:[#allocation95_spill] sm:$0xff] }
 0x363   : > { %v2318_v16 = vadd.f32 %v2317_v51, %v2229_v31  ;;  %v12749_v51 = vld [vmem:[#allocation96_spill] sm:$0xff]  ;;  %v7925_v31 = vld [vmem:[%s12433_s6 + $0x74] sm:$0xf0] }
 0x364   : > { %v2319_v28 = vpop.f32.mrf.mxu0 }
 0x365   : > { %v2407_v36 = vadd.f32 %v2406_v55, %v2318_v16  ;;  %v7243_v55 = vld [vmem:[%s12433_s6 + $0x70] sm:$0xf] }
 0x366   : > { %v7244_v16 = vor.u32 %v7925_v31, %v7243_v55 }
 0x367   : > { %v2408_v63 = vpop.f32.mrf.mxu1  ;;  %v10018_v45 = vadd.f32 %v2495_v0, %v2407_v36  ;;  %v12750_v0 = vld [vmem:[#allocation94_spill] sm:$0xff] }
 0x368   : > { %v2230_v34 = vpop.f32.mrf.mxu3  ;;  %3323 = vmatpush.bf16.msra.mxu0 %v7244_v16 }
 0x369   : > { %v2231_v19 = vadd.f32 %v2230_v34, %v9753_v14  ;;  %v2497_v54 = vpop.f32.mrf.mxu2  ;;  %v7904_v14 = vld [vmem:[%s12431_s4 + $0x50] sm:$0xff] }
 0x36a   : > { %3089 = vmatpush.bf16.msra.mxu3 %v7904_v14 }
 0x36b   : > { %v2320_v60 = vadd.f32 %v2319_v28, %v2231_v19 }
 0x36c   : > { %v2598_v61 = vpop.f32.mrf.mxu0 }
 0x36d   : > { %v2409_v32 = vadd.f32 %v2408_v63, %v2320_v60  ;;  %2548 = vmatmul.bf16.gmra.mxu3 %v12748_v42 }
 0x36e   : > { %3043 = vmatmul.bf16.gmra.mxu2 %v9657_v30 }
 0x36f   : > { %v2687_v40 = vpop.f32.mrf.mxu1  ;;  %2637 = vmatmul.bf16.gmra.mxu0 %v12749_v51  ;;  %v10033_v35 = vadd.f32 %v2497_v54, %v2409_v32 }
 0x370   : > { %v2509_v25 = vpop.f32.mrf.mxu3 }
 0x371   : > { %v2510_v30 = vadd.f32 %v2509_v25, %v9767_v58 }
 0x372   : > { %7113 = vmatmul.msk.bf16.gmra.mxu1 %vm1472_vm0, %v12750_v0 }
 0x373   : > { %v2599_v63 = vadd.f32 %v2598_v61, %v2510_v30  ;;  %v7922_v61 = vld [vmem:[%s12433_s6 + $0x64] sm:$0xf] }
 0x374   : > { %v2600_v28 = vpop.f32.mrf.mxu0 }
 0x375   : > { %v2688_v60 = vadd.f32 %v2687_v40, %v2599_v63 }
 0x377   : > { %v2689_v36 = vpop.f32.mrf.mxu1  ;;  %v2768_v32 = vmax.f32 %v2688_v60, 0.0 }
 0x378   : > { %v2511_v34 = vpop.f32.mrf.mxu3 }
 0x379   : > { %v2512_v19 = vadd.f32 %v2511_v34, %v9779_v48  ;;  %v7237_v48 = vld [vmem:[%s12433_s6 + $0x68] sm:$0xf0] }
 0x37a   : > { %v7240_v31 = vor.u32 %v7922_v61, %v7237_v48  ;;  %v10071_v48 = vpop.f32.mrf.mxu2 }
 0x37b   : > { %v2601_v42 = vadd.f32 %v2600_v28, %v2512_v19 }
 0x37c   : > { %v2603_v51 = vpop.f32.mrf.mxu0  ;;  %3413 = vmatpush.bf16.msra.mxu1 %v7240_v31 }
 0x37d   : > { %v2690_v54 = vadd.f32 %v2689_v36, %v2601_v42  ;;  %2553 = vmatmul.bf16.gmra.mxu3 %v9320_v17  ;;  %v7235_v42 = vld [vmem:[%s12433_s6 + $0x60] sm:$0xf] }
 0x37e   : > { %3048 = vmatmul.bf16.gmra.mxu2 %v9673_v23  ;;  %v12751_v23 = vld [vmem:[#allocation97_spill] sm:$0xff] }
 0x37f   : > { %v2692_v58 = vpop.f32.mrf.mxu1  ;;  %v2770_v55 = vmax.f32 %v2690_v54, 0.0  ;;  %2642 = vmatmul.bf16.gmra.mxu0 %v9323_v46 }
 0x380   : > { %v2514_v40 = vpop.f32.mrf.mxu3 }
 0x381   : > { %v10048_v14 = vpack.c.bf16 %v2770_v55, %v2768_v32  ;;  %v2515_v17 = vadd.f32 %v2514_v40, %v9783_v5 }
 0x382   : > { %7114 = vmatmul.msk.bf16.gmra.mxu1 %vm1472_vm0, %v12751_v23 }
 0x383   : > { %v2604_v46 = vadd.f32 %v2603_v51, %v2515_v17  ;;  %v7903_v51 = vld [vmem:[%s12431_s4 + $0x48] sm:$0xff] }
 0x384   : > { %v2605_v25 = vpop.f32.mrf.mxu0  ;;  %3090 = vmatpush.bf16.msra.mxu3 %v7903_v51 }
 0x385   : > { %v2693_v28 = vadd.f32 %v2692_v58, %v2604_v46  ;;  %v12752_v58 = vld [vmem:[#allocation98_spill] sm:$0xff] }
 0x387   : > { %v2694_v16 = vpop.f32.mrf.mxu1  ;;  %v2772_v19 = vmax.f32 %v2693_v28, 0.0 }
 0x388   : > { %v2516_v30 = vpop.f32.mrf.mxu3 }
 0x389   : > { %v2517_v0 = vadd.f32 %v2516_v30, %v9795_v53  ;;  %v7923_v53 = vld [vmem:[%s12433_s6 + $0x64] sm:$0xf0] }
 0x38a   : > { %v7236_v54 = vor.u32 %v7923_v53, %v7235_v42 }
 0x38b   : > { %v2606_v36 = vadd.f32 %v2605_v25, %v2517_v0  ;;  %v7920_v0 = vld [vmem:[%s12433_s6 + $0x54] sm:$0xf] }
 0x38c   : > { %v2608_v63 = vpop.f32.mrf.mxu0  ;;  %3324 = vmatpush.bf16.msra.mxu0 %v7236_v54 }
 0x38d   : > { %v2695_v34 = vadd.f32 %v2694_v16, %v2606_v36  ;;  %2558 = vmatmul.bf16.gmra.mxu3 %v9359_v52 }
 0x38e   : > { %3053 = vmatmul.bf16.gmra.mxu2 %v9683_v59 }
 0x38f   : > { %v2697_v5 = vpop.f32.mrf.mxu1  ;;  %v2774_v60 = vmax.f32 %v2695_v34, 0.0  ;;  %2647 = vmatmul.bf16.gmra.mxu0 %v9362_v6  ;;  %v10088_v34 = vpop.f32.mrf.mxu2 }
 0x390   : > { %v2519_v52 = vpop.f32.mrf.mxu3 }
 0x391   : > { %v2520_v59 = vadd.f32 %v2519_v52, %v9799_v29  ;;  %v10069_v6 = vpack.c.bf16 %v2774_v60, %v2772_v19 }
 0x392   : > { %7115 = vmatmul.msk.bf16.gmra.mxu1 %vm1472_vm0, %v12752_v58 }
 0x393   : > { %v2609_v61 = vadd.f32 %v2608_v63, %v2520_v59 }
 0x394   : > { %v2610_v32 = vpop.f32.mrf.mxu0 }
 0x395   : > { %v2698_v17 = vadd.f32 %v2697_v5, %v2609_v61  ;;  %v7227_v61 = vld [vmem:[%s12433_s6 + $0x50] sm:$0xf] }
 0x397   : > { %v2699_v55 = vpop.f32.mrf.mxu1  ;;  %v2776_v16 = vmax.f32 %v2698_v17, 0.0  ;;  %v10091_v52 = vpop.f32.mrf.mxu2  ;;  %v12755_v17 = vld [vmem:[#allocation100_spill] sm:$0xff] }
 0x398   : > { %v2521_v40 = vpop.f32.mrf.mxu3 }
 0x399   : > { %v2522_v31 = vadd.f32 %v2521_v40, %v9811_v8  ;;  %v7229_v8 = vld [vmem:[%s12433_s6 + $0x58] sm:$0xf0]  ;;  %v7902_v40 = vld [vmem:[%s12431_s4 + $0x40] sm:$0xff] }
 0x39a   : > { %v7232_v36 = vor.u32 %v7920_v0, %v7229_v8  ;;  %3091 = vmatpush.bf16.msra.mxu3 %v7902_v40 }
 0x39b   : > { %v2611_v23 = vadd.f32 %v2610_v32, %v2522_v31 }
 0x39c   : > { %v2613_v25 = vpop.f32.mrf.mxu0  ;;  %3414 = vmatpush.bf16.msra.mxu1 %v7232_v36 }
 0x39d   : > { %v2700_v46 = vadd.f32 %v2699_v55, %v2611_v23  ;;  %2563 = vmatmul.bf16.gmra.mxu3 %v9392_v3  ;;  %v12753_v3 = vld [vmem:[#allocation99_spill] sm:$0xff]  ;;  %v12754_v55 = vld [vmem:[#allocation101_spill] sm:$0xff] }
 0x39e   : > { %3058 = vmatmul.bf16.gmra.mxu2 %v9698_v38 }
 0x39f   : > { %v2702_v29 = vpop.f32.mrf.mxu1  ;;  %v2778_v30 = vmax.f32 %v2700_v46, 0.0  ;;  %2652 = vmatmul.bf16.gmra.mxu0 %v9395_v39  ;;  %v10110_v46 = vpop.f32.mrf.mxu2 }
 0x3a0   : > { %v2524_v28 = vpop.f32.mrf.mxu3 }
 0x3a1   : > { %v2525_v63 = vadd.f32 %v2524_v28, %v9815_v22  ;;  %v10086_v38 = vpack.c.bf16 %v2778_v30, %v2776_v16 }
 0x3a2   : > { %7116 = vmatmul.msk.bf16.gmra.mxu1 %vm1472_vm0, %v12753_v3 }
 0x3a3   : > { %v2614_v19 = vadd.f32 %v2613_v25, %v2525_v63 }
 0x3a4   : > { %v2615_v39 = vpop.f32.mrf.mxu0 }
 0x3a5   : > { %v2703_v53 = vadd.f32 %v2702_v29, %v2614_v19  ;;  %v7918_v19 = vld [vmem:[%s12433_s6 + $0x44] sm:$0xf] }
 0x3a7   : > { %v2704_v5 = vpop.f32.mrf.mxu1  ;;  %v2780_v59 = vmax.f32 %v2703_v53, 0.0 }
 0x3a8   : > { %v2526_v60 = vpop.f32.mrf.mxu3 }
 0x3a9   : > { %v2527_v42 = vadd.f32 %v2526_v60, %v9830_v12  ;;  %v7921_v12 = vld [vmem:[%s12433_s6 + $0x54] sm:$0xf0] }
 0x3aa   : > { %v7228_v31 = vor.u32 %v7921_v12, %v7227_v61 }
 0x3ab   : > { %v2616_v51 = vadd.f32 %v2615_v39, %v2527_v42 }
 0x3ac   : > { %v2618_v54 = vpop.f32.mrf.mxu0  ;;  %3325 = vmatpush.bf16.msra.mxu0 %v7228_v31  ;;  %v7219_v31 = vld [vmem:[%s12433_s6 + $0x40] sm:$0xf] }
 0x3ad   : > { %v2705_v22 = vadd.f32 %v2704_v5, %v2616_v51  ;;  %2568 = vmatmul.bf16.gmra.mxu3 %v9431_v4  ;;  %v10122_v5 = vpop.f32.mrf.mxu2 }
 0x3ae   : > { %3063 = vmatmul.bf16.gmra.mxu2 %v9718_v24 }
 0x3af   : > { %v2707_v58 = vpop.f32.mrf.mxu1  ;;  %v2782_v32 = vmax.f32 %v2705_v22, 0.0  ;;  %2657 = vmatmul.bf16.gmra.mxu0 %v12754_v55 }
 0x3b0   : > { %v2529_v4 = vpop.f32.mrf.mxu3 }
 0x3b1   : > { %v2530_v24 = vadd.f32 %v2529_v4, %v9840_v11  ;;  %v10108_v23 = vpack.c.bf16 %v2782_v32, %v2780_v59 }
 0x3b2   : > { %7117 = vmatmul.msk.bf16.gmra.mxu1 %vm1472_vm0, %v12755_v17 }
 0x3b3   : > { %v2619_v16 = vadd.f32 %v2618_v54, %v2530_v24 }
 0x3b4   : > { %v2620_v25 = vpop.f32.mrf.mxu0 }
 0x3b5   : > { %v2708_v8 = vadd.f32 %v2707_v58, %v2619_v16  ;;  %v10130_v58 = vpop.f32.mrf.mxu2 }
 0x3b7   : > { %v2709_v29 = vpop.f32.mrf.mxu1  ;;  %v2784_v3 = vmax.f32 %v2708_v8, 0.0 }
 0x3b8   : > { %v2531_v30 = vpop.f32.mrf.mxu3 }
 0x3b9   : > { %v2532_v0 = vadd.f32 %v2531_v30, %v9858_v37  ;;  %v7221_v37 = vld [vmem:[%s12433_s6 + $0x48] sm:$0xf0] }
 0x3ba   : > { %v7224_v42 = vor.u32 %v7918_v19, %v7221_v37  ;;  %v7916_v37 = vld [vmem:[%s12433_s6 + $0x34] sm:$0xf] }
 0x3bb   : > { %v2621_v28 = vadd.f32 %v2620_v25, %v2532_v0 }
 0x3bc   : > { %v2623_v36 = vpop.f32.mrf.mxu0  ;;  %3415 = vmatpush.bf16.msra.mxu1 %v7224_v42 }
 0x3bd   : > { %v2710_v63 = vadd.f32 %v2709_v29, %v2621_v28  ;;  %2573 = vmatmul.bf16.gmra.mxu3 %v9488_v49  ;;  %v10146_v29 = vpop.f32.mrf.mxu2 }
 0x3be   : > { %3068 = vmatmul.bf16.gmra.mxu2 %v9732_v9  ;;  %v12756_v9 = vld [vmem:[#allocation102_spill] sm:$0xff] }
 0x3bf   : > { %v2712_v11 = vpop.f32.mrf.mxu1  ;;  %v2786_v39 = vmax.f32 %v2710_v63, 0.0  ;;  %2662 = vmatmul.bf16.gmra.mxu0 %v9497_v43 }
 0x3c0   : > { %v2534_v60 = vpop.f32.mrf.mxu3 }
 0x3c1   : > { %v2535_v49 = vadd.f32 %v2534_v60, %v9868_v44  ;;  %v10127_v53 = vpack.c.bf16 %v2786_v39, %v2784_v3 }
 0x3c2   : > { %7118 = vmatmul.msk.bf16.gmra.mxu1 %vm1472_vm0, %v12756_v9 }
 0x3c3   : > { %v2624_v54 = vadd.f32 %v2623_v36, %v2535_v49  ;;  %v12758_v49 = vld [vmem:[#allocation104_spill] sm:$0xff] }
 0x3c4   : > { %v2625_v43 = vpop.f32.mrf.mxu0 }
 0x3c5   : > { %v2713_v32 = vadd.f32 %v2712_v11, %v2624_v54 }
 0x3c7   : > { %v2714_v51 = vpop.f32.mrf.mxu1  ;;  %v2788_v40 = vmax.f32 %v2713_v32, 0.0 }
 0x3c8   : > { %v2536_v22 = vpop.f32.mrf.mxu3 }
 0x3c9   : > { %v2537_v59 = vadd.f32 %v2536_v22, %v9892_v1  ;;  %v7919_v1 = vld [vmem:[%s12433_s6 + $0x44] sm:$0xf0] }
 0x3ca   : > { %v7220_v17 = vor.u32 %v7919_v1, %v7219_v31 }
 0x3cb   : > { %v2626_v55 = vadd.f32 %v2625_v43, %v2537_v59 }
 0x3cc   : > { %v2628_v61 = vpop.f32.mrf.mxu0  ;;  %3326 = vmatpush.bf16.msra.mxu0 %v7220_v17 }
 0x3cd   : > { %v2715_v12 = vadd.f32 %v2714_v51, %v2626_v55  ;;  %2578 = vmatmul.bf16.gmra.mxu3 %v9563_v20  ;;  %v12757_v20 = vld [vmem:[#allocation103_spill] sm:$0xff] }
 0x3ce   : > { %3073 = vmatmul.bf16.gmra.mxu2 %v9746_v50 }
 0x3cf   : > { %v2717_v44 = vpop.f32.mrf.mxu1  ;;  %v2790_v4 = vmax.f32 %v2715_v12, 0.0  ;;  %2667 = vmatmul.bf16.gmra.mxu0 %v9572_v18 }
 0x3d0   : > { %v2539_v24 = vpop.f32.mrf.mxu3 }
 0x3d1   : > { %v2540_v25 = vadd.f32 %v2539_v24, %v9902_v27  ;;  %v10144_v50 = vpack.c.bf16 %v2790_v4, %v2788_v40  ;;  %v10150_v27 = vpop.f32.mrf.mxu2  ;;  %v7917_v40 = vld [vmem:[%s12433_s6 + $0x34] sm:$0xf0] }
 0x3d2   : > { %7119 = vmatmul.msk.bf16.gmra.mxu1 %vm1472_vm0, %v12757_v20 }
 0x3d3   : > { %v2629_v30 = vadd.f32 %v2628_v61, %v2540_v25 }
 0x3d4   : > { %v2630_v18 = vpop.f32.mrf.mxu0 }
 0x3d5   : > { %v2718_v28 = vadd.f32 %v2717_v44, %v2629_v30  ;;  %v7211_v44 = vld [vmem:[%s12433_s6 + $0x30] sm:$0xf] }
 0x3d6   : > { %v7212_v31 = vor.u32 %v7917_v40, %v7211_v44 }
 0x3d7   : > { %v2719_v16 = vpop.f32.mrf.mxu1  ;;  %v2792_v39 = vmax.f32 %v2718_v28, 0.0 }
 0x3d8   : > { %v2541_v0 = vpop.f32.mrf.mxu3  ;;  %3327 = vmatpush.bf16.msra.mxu0 %v7212_v31 }
 0x3d9   : > { %v2542_v8 = vadd.f32 %v2541_v0, %v9908_v21  ;;  %v7213_v21 = vld [vmem:[%s12433_s6 + $0x38] sm:$0xf0] }
 0x3da   : > { %v7216_v42 = vor.u32 %v7916_v37, %v7213_v21 }
 0x3db   : > { %v2631_v36 = vadd.f32 %v2630_v18, %v2542_v8  ;;  %v7933_v18 = vld [vmem:[%s12435_s8 + $0x38] sm:$0xff] }
 0x3dc   : > { %v2633_v63 = vpop.f32.mrf.mxu0  ;;  %3416 = vmatpush.bf16.msra.mxu1 %v7216_v42  ;;  %3777 = vmatpush.bf16.msra.mxu2 %v7933_v18 }
 0x3dd   : > { %v2720_v11 = vadd.f32 %v2719_v16, %v2631_v36  ;;  %2583 = vmatmul.bf16.gmra.mxu3 %v9620_v62 }
 0x3de   : > { %3078 = vmatmul.bf16.gmra.mxu2 %v9765_v56 }
 0x3df   : > { %v2722_v3 = vpop.f32.mrf.mxu1  ;;  %v2794_v19 = vmax.f32 %v2720_v11, 0.0  ;;  %2672 = vmatmul.bf16.gmra.mxu0 %v9623_v7 }
 0x3e0   : > { %v2544_v60 = vpop.f32.mrf.mxu3 }
 0x3e1   : > { %v2545_v62 = vadd.f32 %v2544_v60, %v9912_v47  ;;  %v10163_v56 = vpack.c.bf16 %v2794_v19, %v2792_v39  ;;  %v12759_v39 = vld [vmem:[#allocation5_spill] sm:$0xff] }
 0x3e2   : > { %7120 = vmatmul.msk.bf16.gmra.mxu1 %vm1472_vm0, %v12758_v49 }
 0x3e3   : > { %v2634_v43 = vadd.f32 %v2633_v63, %v2545_v62  ;;  %v7914_v63 = vld [vmem:[%s12433_s6 + $0x24] sm:$0xf] }
 0x3e4   : > { %v2635_v9 = vpop.f32.mrf.mxu0  ;;  %v12760_v62 = vld [vmem:[#allocation50_spill] sm:$0xff] }
 0x3e5   : > { %v2723_v22 = vadd.f32 %v2722_v3, %v2634_v43 }
 0x3e7   : > { %v2724_v7 = vpop.f32.mrf.mxu1  ;;  %v2796_v47 = vmax.f32 %v2723_v22, 0.0 }
 0x3e8   : > { %v2546_v51 = vpop.f32.mrf.mxu3 }
 0x3e9   : > { %v2547_v54 = vadd.f32 %v2546_v51, %v9921_v2 }
 0x3eb   : > { %v2636_v59 = vadd.f32 %v2635_v9, %v2547_v54 }
 0x3ec   : > { %v2638_v32 = vpop.f32.mrf.mxu0 }
 0x3ed   : > { %v2725_v55 = vadd.f32 %v2724_v7, %v2636_v59  ;;  %3092 = vmatmul.bf16.vlgmr.msra.gmra.mxu3 %v10048_v14 }
 0x3ef   : > { %v2727_v61 = vpop.f32.mrf.mxu1  ;;  %v2798_v12 = vmax.f32 %v2725_v55, 0.0  ;;  %v7915_v55 = vld [vmem:[%s12433_s6 + $0x24] sm:$0xf0] }
 0x3f0   : > { %v2549_v4 = vpop.f32.mrf.mxu3 }
 0x3f1   : > { %v2550_v2 = vadd.f32 %v2549_v4, %v9926_v57  ;;  %v10174_v1 = vpack.c.bf16 %v2798_v12, %v2796_v47 }
 0x3f3   : > { %v2639_v17 = vadd.f32 %v2638_v32, %v2550_v2  ;;  %v7203_v32 = vld [vmem:[%s12433_s6 + $0x20] sm:$0xf] }
 0x3f4   : > { %v2640_v24 = vpop.f32.mrf.mxu0  ;;  %v7204_v47 = vor.u32 %v7915_v55, %v7203_v32 }
 0x3f5   : > { %v2728_v16 = vadd.f32 %v2727_v61, %v2639_v17 }
 0x3f6   : > { %3328 = vmatpush.bf16.msra.mxu0 %v7204_v47  ;;  %v7931_v47 = vld [vmem:[%s12435_s8 + $0x28] sm:$0xff] }
 0x3f7   : > { %v2729_v14 = vpop.f32.mrf.mxu1  ;;  %v2800_v28 = vmax.f32 %v2728_v16, 0.0 }
 0x3f8   : > { %v2551_v25 = vpop.f32.mrf.mxu3 }
 0x3f9   : > { %v2552_v20 = vadd.f32 %v2551_v25, %v9932_v33  ;;  %v7205_v33 = vld [vmem:[%s12433_s6 + $0x28] sm:$0xf0] }
 0x3fa   : > { %v7208_v3 = vor.u32 %v7914_v63, %v7205_v33 }
 0x3fb   : > { %v2641_v30 = vadd.f32 %v2640_v24, %v2552_v20  ;;  %v7932_v24 = vld [vmem:[%s12435_s8 + $0x30] sm:$0xff] }
 0x3fc   : > { %v2643_v0 = vpop.f32.mrf.mxu0  ;;  %3417 = vmatpush.bf16.msra.mxu1 %v7208_v3  ;;  %3778 = vmatpush.bf16.msra.mxu2 %v7932_v24  ;;  %v12762_v3 = vld [vmem:[#allocation6_spill] sm:$0xff] }
 0x3fd   : > { %v2730_v8 = vadd.f32 %v2729_v14, %v2641_v30  ;;  %3097 = vmatmul.bf16.gmra.mxu3 %v10069_v6  ;;  %v7912_v30 = vld [vmem:[%s12433_s6 + $0x14] sm:$0xf]  ;;  %v7910_v24 = vld [vmem:[%s12433_s6 + $0x4] sm:$0xf] }
 0x3ff   : > { %v2732_v57 = vpop.f32.mrf.mxu1  ;;  %v2802_v36 = vmax.f32 %v2730_v8, 0.0 }
 0x400   : > { %v2554_v11 = vpop.f32.mrf.mxu3  ;;  %3779 = vmatpush.bf16.msra.mxu2 %v7931_v47 }
 0x401   : > { %v2555_v19 = vadd.f32 %v2554_v11, %v12759_v39  ;;  %v10188_v37 = vpack.c.bf16 %v2802_v36, %v2800_v28 }
 0x403   : > { %v2644_v60 = vadd.f32 %v2643_v0, %v2555_v19 }
 0x404   : > { %v2645_v21 = vpop.f32.mrf.mxu0 }
 0x405   : > { %v2733_v9 = vadd.f32 %v2732_v57, %v2644_v60  ;;  %v12761_v57 = vld [vmem:[#allocation72_spill] sm:$0xff] }
 0x407   : > { %v2734_v6 = vpop.f32.mrf.mxu1  ;;  %v2804_v22 = vmax.f32 %v2733_v9, 0.0  ;;  %v7195_v9 = vld [vmem:[%s12433_s6 + $0x10] sm:$0xf] }
 0x408   : > { %v2556_v42 = vpop.f32.mrf.mxu3 }
 0x409   : > { %v2557_v49 = vadd.f32 %v2556_v42, %v12760_v62 }
 0x40b   : > { %v2646_v7 = vadd.f32 %v2645_v21, %v2557_v49 }
 0x40c   : > { %v2648_v43 = vpop.f32.mrf.mxu0 }
 0x40d   : > { %v2735_v51 = vadd.f32 %v2734_v6, %v2646_v7  ;;  %3102 = vmatmul.bf16.gmra.mxu3 %v10086_v38  ;;  %v7913_v7 = vld [vmem:[%s12433_s6 + $0x14] sm:$0xf0] }
 0x40f   : > { %v2737_v54 = vpop.f32.mrf.mxu1  ;;  %v2806_v59 = vmax.f32 %v2735_v51, 0.0  ;;  %v7196_v51 = vor.u32 %v7913_v7, %v7195_v9  ;;  %v12765_v9 = vld [vmem:[#allocation9_spill] sm:$0xff] }
 0x410   : > { %v2559_v61 = vpop.f32.mrf.mxu3 }
 0x411   : > { %v2560_v12 = vadd.f32 %v2559_v61, %v9951_v13  ;;  %v10199_v44 = vpack.c.bf16 %v2806_v59, %v2804_v22  ;;  %3329 = vmatpush.bf16.msra.mxu0 %v7196_v51 }
 0x413   : > { %v2649_v4 = vadd.f32 %v2648_v43, %v2560_v12 }
 0x414   : > { %v2650_v40 = vpop.f32.mrf.mxu0 }
 0x415   : > { %v2738_v14 = vadd.f32 %v2737_v54, %v2649_v4 }
 0x417   : > { %v2739_v38 = vpop.f32.mrf.mxu1  ;;  %v2808_v18 = vmax.f32 %v2738_v14, 0.0 }
 0x418   : > { %v2561_v31 = vpop.f32.mrf.mxu3 }
 0x419   : > { %v2562_v2 = vadd.f32 %v2561_v31, %v9957_v15  ;;  %v7197_v15 = vld [vmem:[%s12433_s6 + $0x18] sm:$0xf0] }
 0x41a   : > { %v7200_v8 = vor.u32 %v7912_v30, %v7197_v15  ;;  %v12764_v15 = vld [vmem:[#allocation74_spill] sm:$0xff] }
 0x41b   : > { %v2651_v17 = vadd.f32 %v2650_v40, %v2562_v2 }
 0x41c   : > { %v2653_v25 = vpop.f32.mrf.mxu0  ;;  %3418 = vmatpush.bf16.msra.mxu1 %v7200_v8 }
 0x41d   : > { %v2740_v20 = vadd.f32 %v2739_v38, %v2651_v17  ;;  %3107 = vmatmul.bf16.gmra.mxu3 %v10108_v23 }
 0x41f   : > { %v2742_v13 = vpop.f32.mrf.mxu1  ;;  %v2810_v16 = vmax.f32 %v2740_v20, 0.0 }
 0x420   : > { %v2564_v0 = vpop.f32.mrf.mxu3 }
 0x421   : > { %v2565_v28 = vadd.f32 %v2564_v0, %v12761_v57  ;;  %v10213_v36 = vpack.c.bf16 %v2810_v16, %v2808_v18 }
 0x423   : > { %v2654_v33 = vadd.f32 %v2653_v25, %v2565_v28  ;;  %v12763_v25 = vld [vmem:[#allocation4_spill] sm:$0xff] }
 0x424   : > { %v2655_v63 = vpop.f32.mrf.mxu0 }
 0x425   : > { %v2743_v19 = vadd.f32 %v2742_v13, %v2654_v33 }
 0x427   : > { %v2744_v23 = vpop.f32.mrf.mxu1  ;;  %v2812_v62 = vmax.f32 %v2743_v19, 0.0 }
 0x428   : > { %v2566_v11 = vpop.f32.mrf.mxu3 }
 0x429   : > { %v2567_v39 = vadd.f32 %v2566_v11, %v12762_v3  ;;  %v7187_v3 = vld [vmem:[%s12433_s6] sm:$0xf] }
 0x42b   : > { %v2656_v21 = vadd.f32 %v2655_v63, %v2567_v39  ;;  %v7911_v39 = vld [vmem:[%s12433_s6 + $0x4] sm:$0xf0] }
 0x42c   : > { %v2658_v6 = vpop.f32.mrf.mxu0 }
 0x42d   : > { %v2745_v60 = vadd.f32 %v2744_v23, %v2656_v21  ;;  %3112 = vmatmul.bf16.gmra.mxu3 %v10127_v53  ;;  %v7188_v21 = vor.u32 %v7911_v39, %v7187_v3  ;;  %v7949_v39 = vld [vmem:[%s12437_s10 + $0x74] sm:$0xf0] }
 0x42f   : > { %v2747_v42 = vpop.f32.mrf.mxu1  ;;  %v2814_v49 = vmax.f32 %v2745_v60, 0.0  ;;  %3330 = vmatpush.bf16.msra.mxu0 %v7188_v21 }
 0x430   : > { %v2569_v43 = vpop.f32.mrf.mxu3 }
 0x431   : > { %v2570_v54 = vadd.f32 %v2569_v43, %v9976_v26  ;;  %v10224_v22 = vpack.c.bf16 %v2814_v49, %v2812_v62 }
 0x433   : > { %v2659_v32 = vadd.f32 %v2658_v6, %v2570_v54 }
 0x434   : > { %v2660_v59 = vpop.f32.mrf.mxu0 }
 0x435   : > { %v2748_v12 = vadd.f32 %v2747_v42, %v2659_v32 }
 0x437   : > { %v2749_v53 = vpop.f32.mrf.mxu1  ;;  %v2816_v31 = vmax.f32 %v2748_v12, 0.0 }
 0x438   : > { %v2571_v55 = vpop.f32.mrf.mxu3 }
 0x439   : > { %v2572_v61 = vadd.f32 %v2571_v55, %v9982_v10  ;;  %v7189_v10 = vld [vmem:[%s12433_s6 + $0x8] sm:$0xf0] }
 0x43a   : > { %v7192_v17 = vor.u32 %v7910_v24, %v7189_v10 }
 0x43b   : > { %v2661_v40 = vadd.f32 %v2660_v59, %v2572_v61  ;;  %v7930_v59 = vld [vmem:[%s12435_s8 + $0x20] sm:$0xff] }
 0x43c   : > { %v2663_v38 = vpop.f32.mrf.mxu0  ;;  %3419 = vmatpush.bf16.msra.mxu1 %v7192_v17  ;;  %3780 = vmatpush.bf16.msra.mxu2 %v7930_v59  ;;  %v7928_v59 = vld [vmem:[%s12435_s8 + $0x10] sm:$0xff] }
 0x43d   : > { %v2750_v4 = vadd.f32 %v2749_v53, %v2661_v40  ;;  %3117 = vmatmul.bf16.gmra.mxu3 %v10144_v50 }
 0x43f   : > { %v2752_v26 = vpop.f32.mrf.mxu1  ;;  %v2818_v2 = vmax.f32 %v2750_v4, 0.0 }
 0x440   : > { %v2574_v14 = vpop.f32.mrf.mxu3 }
 0x441   : > { %v2575_v20 = vadd.f32 %v2574_v14, %v12763_v25  ;;  %v10238_v13 = vpack.c.bf16 %v2818_v2, %v2816_v31 }
 0x443   : > { %v2664_v16 = vadd.f32 %v2663_v38, %v2575_v20 }
 0x444   : > { %v2665_v18 = vpop.f32.mrf.mxu0 }
 0x445   : > { %v2753_v8 = vadd.f32 %v2752_v26, %v2664_v16 }
 0x447   : > { %v2754_v50 = vpop.f32.mrf.mxu1  ;;  %v2820_v33 = vmax.f32 %v2753_v8, 0.0 }
 0x448   : > { %v2576_v30 = vpop.f32.mrf.mxu3 }
 0x449   : > { %v2577_v0 = vadd.f32 %v2576_v30, %v12764_v15  ;;  %v7929_v15 = vld [vmem:[%s12435_s8 + $0x18] sm:$0xff] }
 0x44a   : > { %3781 = vmatpush.bf16.msra.mxu2 %v7929_v15 }
 0x44b   : > { %v2666_v57 = vadd.f32 %v2665_v18, %v2577_v0  ;;  %v10275_v0 = vpop.f32.mrf.mxu2 }
 0x44c   : > { %v2668_v28 = vpop.f32.mrf.mxu0 }
 0x44d   : > { %v2755_v63 = vadd.f32 %v2754_v50, %v2666_v57  ;;  %3122 = vmatmul.bf16.gmra.mxu3 %v10163_v56 }
 0x44e   : > { %3782 = vmatpush.bf16.msra.mxu2 %v7928_v59 }
 0x44f   : > { %v2757_v23 = vpop.f32.mrf.mxu1  ;;  %v2822_v11 = vmax.f32 %v2755_v63, 0.0 }
 0x450   : > { %v2579_v19 = vpop.f32.mrf.mxu3 }
 0x451   : > { %v2580_v6 = vadd.f32 %v2579_v19, %v10001_v41  ;;  %v10249_v60 = vpack.c.bf16 %v2822_v11, %v2820_v33 }
 0x453   : > { %v2669_v62 = vadd.f32 %v2668_v28, %v2580_v6  ;;  %v3026_v28 = vpop.f32.mrf.mxu2 }
 0x454   : > { %v2670_v42 = vpop.f32.mrf.mxu0 }
 0x455   : > { %v2758_v43 = vadd.f32 %v2757_v23, %v2669_v62 }
 0x457   : > { %v2759_v56 = vpop.f32.mrf.mxu1  ;;  %v2824_v41 = vmax.f32 %v2758_v43, 0.0 }
 0x458   : > { %v2581_v49 = vpop.f32.mrf.mxu3 }
 0x459   : > { %v2582_v7 = vadd.f32 %v2581_v49, %v12765_v9 }
 0x45b   : > { %v2671_v51 = vadd.f32 %v2670_v42, %v2582_v7 }
 0x45c   : > { %v2673_v53 = vpop.f32.mrf.mxu0 }
 0x45d   : > { %v2760_v54 = vadd.f32 %v2759_v56, %v2671_v51  ;;  %3127 = vmatmul.bf16.gmra.mxu3 %v10174_v1  ;;  %v3029_v56 = vpop.f32.mrf.mxu2 }
 0x45f   : > { %v2826_v32 = vmax.f32 %v2760_v54, 0.0  ;;  %v2762_v61 = vpop.f32.mrf.mxu1 }
 0x460   : > { %v2584_v55 = vpop.f32.mrf.mxu3 }
 0x461   : > { %v2585_v47 = vadd.f32 %v2584_v55, %v10018_v45  ;;  %v10257_v12 = vpack.c.bf16 %v2826_v32, %v2824_v41  ;;  %v10264_v45 = vld [vmem:[%s12432_s5] ss:$0 sm:$0xff] }
 0x462   : > { %v3005_v20 = vadd.f32 %v10264_v45, %v10071_v48  ;;  %v3012_v57 = vadd.f32 %v10264_v45, %v10110_v46  ;;  %v7341_v46 = vld [vmem:[%s12437_s10 + $0x78] sm:$0xf0]  ;;  %v3015_v62 = vadd.f32 %v10264_v45, %v10122_v5  ;;  %v3017_v49 = vadd.f32 %v10264_v45, %v10130_v58 }
 0x463   : > { %v2674_v40 = vadd.f32 %v2673_v53, %v2585_v47  ;;  %v3020_v58 = vadd.f32 %v10264_v45, %v10146_v29  ;;  %v3022_v32 = vadd.f32 %v10264_v45, %v10150_v27  ;;  %v7946_v29 = vld [vmem:[%s12437_s10 + $0x64] sm:$0xf]  ;;  %v7333_v27 = vld [vmem:[%s12437_s10 + $0x68] sm:$0xf0] }
 0x464   : > { %v2675_v4 = vpop.f32.mrf.mxu0 }
 0x465   : > { %v2763_v31 = vadd.f32 %v2762_v61, %v2674_v40  ;;  %v3031_v51 = vpop.f32.mrf.mxu2 }
 0x467   : > { %v2764_v1 = vpop.f32.mrf.mxu1  ;;  %v2828_v10 = vmax.f32 %v2763_v31, 0.0  ;;  %v7336_v31 = vor.u32 %v7946_v29, %v7333_v27  ;;  %v3237_v29 = vld [vmem:[%s12434_s7] sm:$0x3] }
 0x468   : > { %v2586_v38 = vpop.f32.mrf.mxu3 }
 0x469   : > { %v2587_v26 = vadd.f32 %v2586_v38, %v10033_v35  ;;  %v3007_v35 = vadd.f32 %v10264_v45, %v10088_v34  ;;  %v3010_v34 = vadd.f32 %v10264_v45, %v10091_v52  ;;  %v7948_v52 = vld [vmem:[%s12437_s10 + $0x74] sm:$0xf] }
 0x46a   : > { %v7344_v6 = vor.u32 %v7948_v52, %v7341_v46 }
 0x46b   : > { %v2676_v2 = vadd.f32 %v2675_v4, %v2587_v26  ;;  %v7947_v4 = vld [vmem:[%s12437_s10 + $0x64] sm:$0xf0] }
 0x46c   : > { %4105 = vmatpush.bf16.msrb.mxu0 %v7344_v6 }
 0x46d   : > { %v2765_v24 = vadd.f32 %v2764_v1, %v2676_v2  ;;  %3132 = vmatmul.bf16.gmra.mxu3 %v10188_v37  ;;  %v3034_v41 = vpop.f32.mrf.mxu2 }
 0x46e   : > { %v3035_v46 = vadd.f32 %v10264_v45, %v3034_v41 }
 0x46f   : > { %v2830_v14 = vmax.f32 %v2765_v24, 0.0 }
 0x470   : > { %v3093_v17 = vpop.f32.mrf.mxu3  ;;  %4106 = vmatpush.bf16.msrb.mxu0 %v7336_v31 }
 0x471   : > { %v10266_v25 = vpack.c.bf16 %v2830_v14, %v2828_v10  ;;  %v3094_v18 = vadd.f32 %v3093_v17, %v3005_v20  ;;  %v3025_v10 = vadd.f32 %v10264_v45, %v10275_v0  ;;  %v3027_v14 = vadd.f32 %v10264_v45, %v3026_v28 }
 0x472   : > { %v3030_v0 = vadd.f32 %v10264_v45, %v3029_v56 }
 0x473   : > { %v3173_v37 = vmax.f32 %v3094_v18, 0.0 }
 0x475   : > { %v3036_v2 = vpop.f32.mrf.mxu2 }
 0x478   : > { %v3095_v50 = vpop.f32.mrf.mxu3 }
 0x479   : > { %v3096_v16 = vadd.f32 %v3095_v50, %v3007_v35 }
 0x47b   : > { %v3174_v30 = vmax.f32 %v3096_v16, 0.0 }
 0x47d   : > { %v3205_v8 = vpack.c.bf16 %v3174_v30, %v3173_v37  ;;  %3137 = vmatmul.bf16.gmra.mxu3 %v10199_v44  ;;  %v7339_v44 = vld [vmem:[%s12437_s10 + $0x70] sm:$0xf]  ;;  %v3039_v35 = vpop.f32.mrf.mxu2 }
 0x47e   : > { %v7340_v19 = vor.u32 %v7949_v39, %v7339_v44 }
 0x47f   : > { %3331 = vmatmul.bf16.vlgmr.msra.gmra.mxu0 %v3205_v8  ;;  %3420 = vmatmul.bf16.vlgmr.msra.gmra.mxu1 %v3205_v8  ;;  %v3032_v8 = vadd.f32 %v10264_v45, %v3031_v51 }
 0x480   : > { %v3098_v48 = vpop.f32.mrf.mxu3  ;;  %4016 = vmatpush.bf16.msrb.mxu3 %v7340_v19 }
 0x481   : > { %v3099_v63 = vadd.f32 %v3098_v48, %v3010_v34 }
 0x483   : > { %v3175_v11 = vmax.f32 %v3099_v63, 0.0 }
 0x485   : > { %v3041_v15 = vpop.f32.mrf.mxu2 }
 0x488   : > { %v3100_v23 = vpop.f32.mrf.mxu3 }
 0x489   : > { %v3101_v33 = vadd.f32 %v3100_v23, %v3012_v57  ;;  %v7323_v23 = vld [vmem:[%s12437_s10 + $0x50] sm:$0xf] }
 0x48b   : > { %v3176_v3 = vmax.f32 %v3101_v33, 0.0 }
 0x48d   : > { %3142 = vmatmul.bf16.gmra.mxu3 %v10213_v36  ;;  %v3206_v21 = vpack.c.bf16 %v3176_v3, %v3175_v11  ;;  %v7944_v11 = vld [vmem:[%s12437_s10 + $0x54] sm:$0xf]  ;;  %v7325_v3 = vld [vmem:[%s12437_s10 + $0x58] sm:$0xf0]  ;;  %v3044_v44 = vpop.f32.mrf.mxu2 }
 0x48e   : > { %v7328_v19 = vor.u32 %v7944_v11, %v7325_v3 }
 0x48f   : > { %3336 = vmatmul.bf16.gmra.mxu0 %v3206_v21  ;;  %3425 = vmatmul.bf16.gmra.mxu1 %v3206_v21  ;;  %v3037_v21 = vadd.f32 %v10264_v45, %v3036_v2 }
 0x490   : > { %v3103_v42 = vpop.f32.mrf.mxu3  ;;  %4107 = vmatpush.bf16.msrb.mxu0 %v7328_v19 }
 0x491   : > { %v3104_v9 = vadd.f32 %v3103_v42, %v3015_v62 }
 0x493   : > { %v3177_v54 = vmax.f32 %v3104_v9, 0.0 }
 0x495   : > { %v3046_v6 = vpop.f32.mrf.mxu2 }
 0x498   : > { %v3105_v7 = vpop.f32.mrf.mxu3 }
 0x499   : > { %v3106_v43 = vadd.f32 %v3105_v7, %v3017_v49 }
 0x49b   : > { %v3178_v36 = vmax.f32 %v3106_v43, 0.0 }
 0x49d   : > { %3147 = vmatmul.bf16.gmra.mxu3 %v10224_v22  ;;  %v3207_v53 = vpack.c.bf16 %v3178_v36, %v3177_v54  ;;  %v7331_v22 = vld [vmem:[%s12437_s10 + $0x60] sm:$0xf]  ;;  %v3049_v51 = vpop.f32.mrf.mxu2  ;;  %v3040_v54 = vadd.f32 %v10264_v45, %v3039_v35  ;;  %v3042_v36 = vadd.f32 %v10264_v45, %v3041_v15 }
 0x49e   : > { %v7332_v26 = vor.u32 %v7947_v4, %v7331_v22 }
 0x49f   : > { %3341 = vmatmul.bf16.gmra.mxu0 %v3207_v53  ;;  %3430 = vmatmul.bf16.gmra.mxu1 %v3207_v53 }
 0x4a0   : > { %v3108_v5 = vpop.f32.mrf.mxu3  ;;  %4017 = vmatpush.bf16.msrb.mxu3 %v7332_v26  ;;  %v7317_v26 = vld [vmem:[%s12437_s10 + $0x48] sm:$0xf0] }
 0x4a1   : > { %v3109_v55 = vadd.f32 %v3108_v5, %v3020_v58 }
 0x4a3   : > { %v3179_v40 = vmax.f32 %v3109_v55, 0.0 }
 0x4a5   : > { %v3051_v58 = vpop.f32.mrf.mxu2 }
 0x4a8   : > { %v3110_v61 = vpop.f32.mrf.mxu3 }
 0x4a9   : > { %v3111_v47 = vadd.f32 %v3110_v61, %v3022_v32  ;;  %v7315_v61 = vld [vmem:[%s12437_s10 + $0x40] sm:$0xf] }
 0x4ab   : > { %v3180_v38 = vmax.f32 %v3111_v47, 0.0  ;;  %v7943_v47 = vld [vmem:[%s12437_s10 + $0x44] sm:$0xf0] }
 0x4ac   : > { %v7316_v4 = vor.u32 %v7943_v47, %v7315_v61 }
 0x4ad   : > { %3152 = vmatmul.bf16.gmra.mxu3 %v10238_v13  ;;  %v3208_v1 = vpack.c.bf16 %v3180_v38, %v3179_v40  ;;  %v7927_v13 = vld [vmem:[%s12435_s8 + $0x8] sm:$0xff]  ;;  %v7942_v40 = vld [vmem:[%s12437_s10 + $0x44] sm:$0xf]  ;;  %v3045_v38 = vadd.f32 %v10264_v45, %v3044_v44  ;;  %v10360_v22 = vpop.f32.mrf.mxu2 }
 0x4ae   : > { %3783 = vmatpush.bf16.msra.mxu2 %v7927_v13  ;;  %v7320_v27 = vor.u32 %v7942_v40, %v7317_v26  ;;  %v3055_v40 = vadd.f32 %v10264_v45, %v10360_v22 }
 0x4af   : > { %3346 = vmatmul.bf16.gmra.mxu0 %v3208_v1  ;;  %3435 = vmatmul.bf16.gmra.mxu1 %v3208_v1  ;;  %v3047_v1 = vadd.f32 %v10264_v45, %v3046_v6 }
 0x4b0   : > { %v3113_v24 = vpop.f32.mrf.mxu3  ;;  %4108 = vmatpush.bf16.msrb.mxu0 %v7320_v27 }
 0x4b1   : > { %v3114_v17 = vadd.f32 %v3113_v24, %v3025_v10  ;;  %v10370_v10 = vperm.slane %v3237_v29, 0 }
 0x4b3   : > { %v3181_v50 = vmax.f32 %v3114_v17, 0.0 }
 0x4b8   : > { %v3115_v20 = vpop.f32.mrf.mxu3 }
 0x4b9   : > { %v3116_v18 = vadd.f32 %v3115_v20, %v3027_v14  ;;  %v10372_v14 = vperm.slane %v3237_v29, 1 }
 0x4bb   : > { %v3182_v16 = vmax.f32 %v3116_v18, 0.0 }
 0x4bd   : > { %3157 = vmatmul.bf16.gmra.mxu3 %v10249_v60  ;;  %v3209_v37 = vpack.c.bf16 %v3182_v16, %v3181_v50  ;;  %v7945_v60 = vld [vmem:[%s12437_s10 + $0x54] sm:$0xf0] }
 0x4be   : > { %v7324_v33 = vor.u32 %v7945_v60, %v7323_v23 }
 0x4bf   : > { %3351 = vmatmul.bf16.gmra.mxu0 %v3209_v37  ;;  %3440 = vmatmul.bf16.gmra.mxu1 %v3209_v37  ;;  %v10381_v37 = vpop.f32.mrf.mxu2 }
 0x4c0   : > { %v3118_v30 = vpop.f32.mrf.mxu3  ;;  %4018 = vmatpush.bf16.msrb.mxu3 %v7324_v33  ;;  %v3057_v29 = vadd.f32 %v10264_v45, %v10381_v37 }
 0x4c1   : > { %v3119_v48 = vadd.f32 %v3118_v30, %v3030_v0 }
 0x4c3   : > { %v3183_v28 = vmax.f32 %v3119_v48, 0.0 }
 0x4c4   : > { %4019 = vmatpush.bf16.msrb.mxu3 %v7316_v4 }
 0x4c7   : > { %v10392_v11 = vpop.f32.mrf.mxu2 }
 0x4c8   : > { %v3120_v34 = vpop.f32.mrf.mxu3 }
 0x4c9   : > { %v3121_v57 = vadd.f32 %v3120_v34, %v3032_v8  ;;  %v3050_v34 = vadd.f32 %v10264_v45, %v3049_v51 }
 0x4cb   : > { %v3184_v63 = vmax.f32 %v3121_v57, 0.0 }
 0x4cd   : > { %3162 = vmatmul.bf16.gmra.mxu3 %v10257_v12  ;;  %v3210_v39 = vpack.c.bf16 %v3184_v63, %v3183_v28  ;;  %v7926_v12 = vld [vmem:[%s12435_s8] sm:$0xff]  ;;  %v3052_v63 = vadd.f32 %v10264_v45, %v3051_v58  ;;  %v7940_v58 = vld [vmem:[%s12437_s10 + $0x34] sm:$0xf] }
 0x4ce   : > { %3784 = vmatpush.bf16.msra.mxu2 %v7926_v12 }
 0x4cf   : > { %3356 = vmatmul.bf16.gmra.mxu0 %v3210_v39  ;;  %3445 = vmatmul.bf16.gmra.mxu1 %v3210_v39 }
 0x4d0   : > { %v3123_v52 = vpop.f32.mrf.mxu3 }
 0x4d1   : > { %v3124_v42 = vadd.f32 %v3123_v52, %v3035_v46  ;;  %v7307_v52 = vld [vmem:[%s12437_s10 + $0x30] sm:$0xf]  ;;  %v7941_v46 = vld [vmem:[%s12437_s10 + $0x34] sm:$0xf0] }
 0x4d3   : > { %v3185_v49 = vmax.f32 %v3124_v42, 0.0  ;;  %v7308_v42 = vor.u32 %v7941_v46, %v7307_v52 }
 0x4d5   : > { %4020 = vmatpush.bf16.msrb.mxu3 %v7308_v42 }
 0x4d8   : > { %v3125_v56 = vpop.f32.mrf.mxu3 }
 0x4d9   : > { %v3126_v62 = vadd.f32 %v3125_v56, %v3037_v21 }
 0x4db   : > { %v3186_v9 = vmax.f32 %v3126_v62, 0.0  ;;  %v3501_v62 = vld [vmem:[%s10397_s30] sm:$0xff] }
 0x4dd   : > { %3167 = vmatmul.bf16.gmra.mxu3 %v10266_v25  ;;  %v3211_v7 = vpack.c.bf16 %v3186_v9, %v3185_v49 }
 0x4df   : > { %3361 = vmatmul.bf16.gmra.mxu0 %v3211_v7  ;;  %3450 = vmatmul.bf16.gmra.mxu1 %v3211_v7  ;;  %v3502_v7 = vld [vmem:[%s10397_s30 + $0x8] sm:$0xff] }
 0x4e0   : > { %v3128_v43 = vpop.f32.mrf.mxu3 }
 0x4e1   : > { %v3129_v59 = vadd.f32 %v3128_v43, %v3040_v54 }
 0x4e3   : > { %v3187_v41 = vmax.f32 %v3129_v59, 0.0 }
 0x4e8   : > { %v3130_v53 = vpop.f32.mrf.mxu3 }
 0x4e9   : > { %v3131_v5 = vadd.f32 %v3130_v53, %v3042_v36  ;;  %v3061_v53 = vpop.f32.mrf.mxu2 }
 0x4eb   : > { %v3188_v32 = vmax.f32 %v3131_v5, 0.0 }
 0x4ed   : > { %v3212_v55 = vpack.c.bf16 %v3188_v32, %v3187_v41  ;;  %v7309_v41 = vld [vmem:[%s12437_s10 + $0x38] sm:$0xf0] }
 0x4ee   : > { %v7312_v47 = vor.u32 %v7940_v58, %v7309_v41 }
 0x4ef   : > { %3366 = vmatmul.bf16.gmra.mxu0 %v3212_v55  ;;  %3455 = vmatmul.bf16.gmra.mxu1 %v3212_v55 }
 0x4f0   : > { %v3133_v25 = vpop.f32.mrf.mxu3  ;;  %4109 = vmatpush.bf16.msrb.mxu0 %v7312_v47 }
 0x4f1   : > { %v3134_v31 = vadd.f32 %v3133_v25, %v3045_v38  ;;  %v10434_v37 = vpop.f32.mrf.mxu2 }
 0x4f3   : > { %v3189_v17 = vmax.f32 %v3134_v31, 0.0 }
 0x4f8   : > { %v3135_v2 = vpop.f32.mrf.mxu3 }
 0x4f9   : > { %v3136_v24 = vadd.f32 %v3135_v2, %v3047_v1 }
 0x4fb   : > { %v3190_v20 = vmax.f32 %v3136_v24, 0.0 }
 0x4fc   : > { %v3332_v35 = vpop.f32.mrf.mxu0  ;;  %v3421_v18 = vpop.f32.mrf.mxu1 }
 0x4fd   : > { %v3333_v50 = vadd.f32 %v3332_v35, %v10370_v10  ;;  %v3422_v16 = vadd.f32 %v3421_v18, %v10372_v14  ;;  %v3213_v13 = vpack.c.bf16 %v3190_v20, %v3189_v17  ;;  %v7767_v20 = vld [vmem:[%s12439_s12 + $0x348] sm:$0xf]  ;;  %v8058_v35 = vld [vmem:[%s12439_s12 + $0x360] sm:$0xf0] }
 0x4ff   : > { %6513 = vst [vmem:[%s10377_s20] sm:$0xff] %v3333_v50  ;;  %v3533_v30 = vmul.f32 0.5, %v3422_v16  ;;  %3371 = vmatmul.bf16.gmra.mxu0 %v3213_v13  ;;  %3460 = vmatmul.bf16.gmra.mxu1 %v3213_v13 }
 0x500   : > { %6514 = vst [vmem:[%s10377_s20 + $0x8] sm:$0xff] %v3422_v16  ;;  %v3138_v15 = vpop.f32.mrf.mxu3  ;;  %v7768_v16 = vor.u32 %v8058_v35, %v7767_v20 }
 0x501   : > { %v3565_v0 = vmul.f32 1.442695, %v3533_v30  ;;  %v3139_v23 = vadd.f32 %v3138_v15, %v3050_v34  ;;  %v3504_v34 = vld [vmem:[%s10397_s30 + $0x18] sm:$0xff] }
 0x502   : > { %5099 = vmatpush.bf16.msrb.mxu2 %v7768_v16 }
 0x503   : > { %8098 = vpow2.f32 %v3565_v0  ;;  %v3191_v39 = vmax.f32 %v3139_v23, 0.0 }
 0x504   : > { %v3334_v8 = vpop.f32.mrf.mxu0  ;;  %v3423_v48 = vpop.f32.mrf.mxu1 }
 0x505   : > { %v3335_v57 = vadd.f32 %v3334_v8, %v10370_v10  ;;  %v3424_v28 = vadd.f32 %v3423_v48, %v10372_v14  ;;  %v3503_v8 = vld [vmem:[%s10397_s30 + $0x10] sm:$0xff] }
 0x507   : > { %6515 = vst [vmem:[%s10377_s20 + $0x10] sm:$0xff] %v3335_v57  ;;  %v3534_v60 = vmul.f32 0.5, %v3424_v28 }
 0x508   : > { %6516 = vst [vmem:[%s10377_s20 + $0x18] sm:$0xff] %v3424_v28  ;;  %v3140_v33 = vpop.f32.mrf.mxu3 }
 0x509   : > { %v3567_v3 = vmul.f32 1.442695, %v3534_v60  ;;  %v3141_v44 = vadd.f32 %v3140_v33, %v3052_v63  ;;  %v8099_v56 = vpop.eup %8098  ;;  %v7543_v33 = vld [vmem:[%s12439_s12 + $0x188] sm:$0xf] }
 0x50a   : > { %v3629_v51 = vmul.f32 %v8099_v56, %v3501_v62  ;;  %v3062_v62 = vadd.f32 %v10264_v45, %v3061_v53 }
 0x50b   : > { %8100 = vpow2.f32 %v3567_v3  ;;  %v3192_v19 = vmax.f32 %v3141_v44, 0.0  ;;  %v8002_v3 = vld [vmem:[%s12439_s12 + $0x1a0] sm:$0xf0] }
 0x50c   : > { %v3337_v21 = vpop.f32.mrf.mxu0  ;;  %v3426_v6 = vpop.f32.mrf.mxu1  ;;  %v3661_v32 = vadd.f32 %v3629_v51, %v3333_v50  ;;  %v7544_v46 = vor.u32 %v8002_v3, %v7543_v33 }
 0x50d   : > { %v10407_v49 = vadd.f32 %v3337_v21, %v10370_v10  ;;  %v3427_v9 = vadd.f32 %v3426_v6, %v10372_v14  ;;  %v3214_v12 = vpack.c.bf16 %v3192_v19, %v3191_v39  ;;  %v3060_v21 = vadd.f32 %v10264_v45, %v10392_v11 }
 0x50e   : > { %5010 = vmatpush.bf16.msrb.mxu1 %v7544_v46  ;;  %v3507_v46 = vld [vmem:[%s10397_s30 + $0x30] sm:$0xff] }
 0x50f   : > { %6517 = vst [vmem:[%s10377_s20 + $0x20] sm:$0xff] %v10407_v49  ;;  %v3535_v43 = vmul.f32 0.5, %v3427_v9  ;;  %3376 = vmatmul.bf16.gmra.mxu0 %v3214_v12  ;;  %3465 = vmatmul.bf16.gmra.mxu1 %v3214_v12 }
 0x510   : > { %6518 = vst [vmem:[%s10377_s20 + $0x28] sm:$0xff] %v3427_v9  ;;  %v3143_v54 = vpop.f32.mrf.mxu3  ;;  %v3066_v9 = vpop.f32.mrf.mxu2 }
 0x511   : > { %v8101_v36 = vpop.eup %8100  ;;  %v3569_v5 = vmul.f32 1.442695, %v3535_v43  ;;  %v3144_v27 = vadd.f32 %v3143_v54, %v3055_v40  ;;  %v3506_v40 = vld [vmem:[%s10397_s30 + $0x28] sm:$0xff] }
 0x512   : > { %v3630_v59 = vmul.f32 %v8101_v36, %v3502_v7  ;;  %v7299_v36 = vld [vmem:[%s12437_s10 + $0x20] sm:$0xf] }
 0x513   : > { %8102 = vpow2.f32 %v3569_v5  ;;  %v3193_v22 = vmax.f32 %v3144_v27, 0.0 }
 0x514   : > { %v3662_v55 = vadd.f32 %v3630_v59, %v3335_v57  ;;  %v3339_v25 = vpop.f32.mrf.mxu0  ;;  %v3428_v61 = vpop.f32.mrf.mxu1  ;;  %v7939_v59 = vld [vmem:[%s12437_s10 + $0x24] sm:$0xf0] }
 0x515   : > { %v3340_v38 = vadd.f32 %v3339_v25, %v10370_v10  ;;  %v3429_v4 = vadd.f32 %v3428_v61, %v10372_v14  ;;  %v7300_v58 = vor.u32 %v7939_v59, %v7299_v36  ;;  %v3505_v61 = vld [vmem:[%s10397_s30 + $0x20] sm:$0xff] }
 0x516   : > { %v3693_v26 = vpack.c.bf16 %v3662_v55, %v3661_v32 }
 0x517   : > { %6519 = vst [vmem:[%s10377_s20 + $0x30] sm:$0xff] %v3340_v38  ;;  %v3536_v1 = vmul.f32 0.5, %v3429_v4  ;;  %4021 = vmatpush.bf16.msrb.mxu3 %v7300_v58 }
 0x518   : > { %6520 = vst [vmem:[%s10377_s20 + $0x38] sm:$0xff] %v3429_v4  ;;  %v3145_v31 = vpop.f32.mrf.mxu3  ;;  %3785 = vmatmul.bf16.vlgmr.msra.gmra.mxu2 %v3693_v26 }
 0x519   : > { %v3571_v2 = vmul.f32 1.442695, %v3536_v1  ;;  %v3146_v24 = vadd.f32 %v3145_v31, %v3057_v29  ;;  %v8103_v13 = vpop.eup %8102  ;;  %v3069_v29 = vpop.f32.mrf.mxu2  ;;  %v7938_v31 = vld [vmem:[%s12437_s10 + $0x24] sm:$0xf] }
 0x51a   : > { %v3631_v28 = vmul.f32 %v8103_v13, %v3503_v8  ;;  %v3070_v59 = vadd.f32 %v10264_v45, %v3069_v29  ;;  %v7937_v29 = vld [vmem:[%s12437_s10 + $0x14] sm:$0xf0] }
 0x51b   : > { %8104 = vpow2.f32 %v3571_v2  ;;  %v3194_v17 = vmax.f32 %v3146_v24, 0.0  ;;  %v7301_v2 = vld [vmem:[%s12437_s10 + $0x28] sm:$0xf0] }
 0x51c   : > { %v3342_v18 = vpop.f32.mrf.mxu0  ;;  %v3431_v50 = vpop.f32.mrf.mxu1  ;;  %v3663_v19 = vadd.f32 %v3631_v28, %v10407_v49  ;;  %v7304_v35 = vor.u32 %v7938_v31, %v7301_v2 }
 0x51d   : > { %v10437_v30 = vadd.f32 %v3342_v18, %v10370_v10  ;;  %v3432_v15 = vadd.f32 %v3431_v50, %v10372_v14  ;;  %v3215_v0 = vpack.c.bf16 %v3194_v17, %v3193_v22  ;;  %v3065_v18 = vadd.f32 %v10264_v45, %v10434_v37 }
 0x51e   : > { %4110 = vmatpush.bf16.msrb.mxu0 %v7304_v35 }
 0x51f   : > { %6521 = vst [vmem:[%s10377_s20 + $0x40] sm:$0xff] %v10437_v30  ;;  %v3537_v48 = vmul.f32 0.5, %v3432_v15  ;;  %3381 = vmatmul.bf16.gmra.mxu0 %v3215_v0  ;;  %3470 = vmatmul.bf16.gmra.mxu1 %v3215_v0 }
 0x520   : > { %6522 = vst [vmem:[%s10377_s20 + $0x48] sm:$0xff] %v3432_v15  ;;  %v3148_v57 = vpop.f32.mrf.mxu3  ;;  %v3067_v15 = vadd.f32 %v10264_v45, %v3066_v9 }
 0x521   : > { %v8105_v63 = vpop.eup %8104  ;;  %v3573_v60 = vmul.f32 1.442695, %v3537_v48  ;;  %v3149_v12 = vadd.f32 %v3148_v57, %v3060_v21  ;;  %v3071_v37 = vpop.f32.mrf.mxu2 }
 0x522   : > { %v3632_v23 = vmul.f32 %v8105_v63, %v3504_v34  ;;  %v7739_v63 = vld [vmem:[%s12439_s12 + $0x310] sm:$0xf] }
 0x523   : > { %8106 = vpow2.f32 %v3573_v60  ;;  %v3195_v51 = vmax.f32 %v3149_v12, 0.0 }
 0x524   : > { %v3344_v44 = vpop.f32.mrf.mxu0  ;;  %v3433_v39 = vpop.f32.mrf.mxu1  ;;  %v3664_v52 = vadd.f32 %v3632_v23, %v3340_v38  ;;  %v8051_v23 = vld [vmem:[%s12439_s12 + $0x328] sm:$0xf0] }
 0x525   : > { %v3345_v6 = vadd.f32 %v3344_v44, %v10370_v10  ;;  %v3434_v42 = vadd.f32 %v3433_v39, %v10372_v14  ;;  %v7740_v3 = vor.u32 %v8051_v23, %v7739_v63 }
 0x526   : > { %v3694_v56 = vpack.c.bf16 %v3664_v52, %v3663_v19 }
 0x527   : > { %6523 = vst [vmem:[%s10377_s20 + $0x50] sm:$0xff] %v3345_v6  ;;  %v3538_v7 = vmul.f32 0.5, %v3434_v42  ;;  %5100 = vmatpush.bf16.msrb.mxu2 %v7740_v3 }
 0x528   : > { %6524 = vst [vmem:[%s10377_s20 + $0x58] sm:$0xff] %v3434_v42  ;;  %v3150_v49 = vpop.f32.mrf.mxu3  ;;  %3790 = vmatmul.bf16.gmra.mxu2 %v3694_v56 }
 0x529   : > { %v3575_v43 = vmul.f32 1.442695, %v3538_v7  ;;  %v3151_v11 = vadd.f32 %v3150_v49, %v3062_v62  ;;  %v8107_v41 = vpop.eup %8106  ;;  %v7515_v7 = vld [vmem:[%s12439_s12 + $0x150] sm:$0xf]  ;;  %v7995_v49 = vld [vmem:[%s12439_s12 + $0x168] sm:$0xf0] }
 0x52a   : > { %v3633_v4 = vmul.f32 %v8107_v41, %v3505_v61  ;;  %v7516_v36 = vor.u32 %v7995_v49, %v7515_v7 }
 0x52b   : > { %8108 = vpow2.f32 %v3575_v43  ;;  %v3196_v54 = vmax.f32 %v3151_v11, 0.0 }
 0x52c   : > { %v3347_v53 = vpop.f32.mrf.mxu0  ;;  %v3436_v5 = vpop.f32.mrf.mxu1  ;;  %v3665_v17 = vadd.f32 %v3633_v4, %v10437_v30  ;;  %5011 = vmatpush.bf16.msrb.mxu1 %v7516_v36  ;;  %v3511_v36 = vld [vmem:[%s10397_s30 + $0x50] sm:$0xff] }
 0x52d   : > { %v10466_v32 = vadd.f32 %v3347_v53, %v10370_v10  ;;  %v3437_v55 = vadd.f32 %v3436_v5, %v10372_v14  ;;  %v3216_v25 = vpack.c.bf16 %v3196_v54, %v3195_v51  ;;  %v3074_v53 = vpop.f32.mrf.mxu2 }
 0x52e   : > { %v3075_v23 = vadd.f32 %v10264_v45, %v3074_v53  ;;  %v3512_v53 = vld [vmem:[%s10397_s30 + $0x58] sm:$0xff] }
 0x52f   : > { %6525 = vst [vmem:[%s10377_s20 + $0x60] sm:$0xff] %v10466_v32  ;;  %v3539_v47 = vmul.f32 0.5, %v3437_v55  ;;  %3386 = vmatmul.bf16.gmra.mxu0 %v3216_v25  ;;  %3475 = vmatmul.bf16.gmra.mxu1 %v3216_v25 }
 0x530   : > { %6526 = vst [vmem:[%s10377_s20 + $0x68] sm:$0xff] %v3437_v55  ;;  %v3153_v38 = vpop.f32.mrf.mxu3  ;;  %v3072_v55 = vadd.f32 %v10264_v45, %v3071_v37 }
 0x531   : > { %v8109_v26 = vpop.eup %8108  ;;  %v3577_v1 = vmul.f32 1.442695, %v3539_v47  ;;  %v3154_v0 = vadd.f32 %v3153_v38, %v3065_v18 }
 0x532   : > { %v3634_v27 = vmul.f32 %v8109_v26, %v3506_v40  ;;  %v7291_v26 = vld [vmem:[%s12437_s10 + $0x10] sm:$0xf] }
 0x533   : > { %8110 = vpow2.f32 %v3577_v1  ;;  %v3197_v57 = vmax.f32 %v3154_v0, 0.0  ;;  %v7292_v31 = vor.u32 %v7937_v29, %v7291_v26 }
 0x534   : > { %v3349_v24 = vpop.f32.mrf.mxu0  ;;  %v3438_v22 = vpop.f32.mrf.mxu1  ;;  %v3666_v20 = vadd.f32 %v3634_v27, %v3345_v6  ;;  %v3508_v6 = vld [vmem:[%s10397_s30 + $0x38] sm:$0xff] }
 0x535   : > { %v3350_v50 = vadd.f32 %v3349_v24, %v10370_v10  ;;  %v3439_v16 = vadd.f32 %v3438_v22, %v10372_v14  ;;  %4022 = vmatpush.bf16.msrb.mxu3 %v7292_v31  ;;  %v3076_v35 = vpop.f32.mrf.mxu2 }
 0x536   : > { %v3695_v13 = vpack.c.bf16 %v3666_v20, %v3665_v17  ;;  %v3509_v20 = vld [vmem:[%s10397_s30 + $0x40] sm:$0xff] }
 0x537   : > { %6527 = vst [vmem:[%s10377_s20 + $0x70] sm:$0xff] %v3350_v50  ;;  %v3540_v8 = vmul.f32 0.5, %v3439_v16 }
 0x538   : > { %6528 = vst [vmem:[%s10377_s20 + $0x78] sm:$0xff] %v3439_v16  ;;  %v3155_v48 = vpop.f32.mrf.mxu3  ;;  %3795 = vmatmul.bf16.gmra.mxu2 %v3695_v13 }
 0x539   : > { %v3579_v30 = vmul.f32 1.442695, %v3540_v8  ;;  %v3156_v34 = vadd.f32 %v3155_v48, %v3067_v15  ;;  %v8111_v44 = vpop.eup %8110  ;;  %v7936_v48 = vld [vmem:[%s12437_s10 + $0x14] sm:$0xf] }
 0x53a   : > { %v3635_v56 = vmul.f32 %v8111_v44, %v3507_v46  ;;  %v3077_v44 = vadd.f32 %v10264_v45, %v3076_v35 }
 0x53b   : > { %8112 = vpow2.f32 %v3579_v30  ;;  %v3198_v28 = vmax.f32 %v3156_v34, 0.0  ;;  %v7293_v30 = vld [vmem:[%s12437_s10 + $0x18] sm:$0xf0] }
 0x53c   : > { %v3352_v60 = vpop.f32.mrf.mxu0  ;;  %v3441_v33 = vpop.f32.mrf.mxu1  ;;  %v3667_v51 = vadd.f32 %v3635_v56, %v10466_v32  ;;  %v7296_v63 = vor.u32 %v7936_v48, %v7293_v30 }
 0x53d   : > { %v10495_v39 = vadd.f32 %v3352_v60, %v10370_v10  ;;  %v3442_v19 = vadd.f32 %v3441_v33, %v10372_v14  ;;  %v3217_v52 = vpack.c.bf16 %v3198_v28, %v3197_v57 }
 0x53e   : > { %4111 = vmatpush.bf16.msrb.mxu0 %v7296_v63  ;;  %v3514_v63 = vld [vmem:[%s10397_s30 + $0x68] sm:$0xff] }
 0x53f   : > { %6529 = vst [vmem:[%s10377_s20 + $0x80] sm:$0xff] %v10495_v39  ;;  %v3541_v21 = vmul.f32 0.5, %v3442_v19  ;;  %3391 = vmatmul.bf16.gmra.mxu0 %v3217_v52  ;;  %3480 = vmatmul.bf16.gmra.mxu1 %v3217_v52 }
 0x540   : > { %6530 = vst [vmem:[%s10377_s20 + $0x88] sm:$0xff] %v3442_v19  ;;  %v3158_v42 = vpop.f32.mrf.mxu3 }
 0x541   : > { %v8113_v62 = vpop.eup %8112  ;;  %v3581_v12 = vmul.f32 1.442695, %v3541_v21  ;;  %v3159_v25 = vadd.f32 %v3158_v42, %v3070_v59 }
 0x542   : > { %v3636_v9 = vmul.f32 %v8113_v62, %v3508_v6  ;;  %v7711_v62 = vld [vmem:[%s12439_s12 + $0x2d8] sm:$0xf] }
 0x543   : > { %8114 = vpow2.f32 %v3581_v12  ;;  %v3199_v38 = vmax.f32 %v3159_v25, 0.0 }
 0x544   : > { %v3354_v43 = vpop.f32.mrf.mxu0  ;;  %v3443_v11 = vpop.f32.mrf.mxu1  ;;  %v3668_v54 = vadd.f32 %v3636_v9, %v3350_v50  ;;  %v3510_v50 = vld [vmem:[%s10397_s30 + $0x48] sm:$0xff]  ;;  %v8044_v9 = vld [vmem:[%s12439_s12 + $0x2f0] sm:$0xf0] }
 0x545   : > { %v3355_v5 = vadd.f32 %v3354_v43, %v10370_v10  ;;  %v3444_v58 = vadd.f32 %v3443_v11, %v10372_v14  ;;  %v7712_v49 = vor.u32 %v8044_v9, %v7711_v62 }
 0x546   : > { %v3696_v41 = vpack.c.bf16 %v3668_v54, %v3667_v51 }
 0x547   : > { %6531 = vst [vmem:[%s10377_s20 + $0x90] sm:$0xff] %v3355_v5  ;;  %v3542_v61 = vmul.f32 0.5, %v3444_v58  ;;  %5101 = vmatpush.bf16.msrb.mxu2 %v7712_v49  ;;  %v8037_v49 = vld [vmem:[%s12439_s12 + $0x2b8] sm:$0xf0] }
 0x548   : > { %6532 = vst [vmem:[%s10377_s20 + $0x98] sm:$0xff] %v3444_v58  ;;  %v3160_v47 = vpop.f32.mrf.mxu3  ;;  %3800 = vmatmul.bf16.gmra.mxu2 %v3696_v41 }
 0x549   : > { %v3583_v32 = vmul.f32 1.442695, %v3542_v61  ;;  %v3161_v40 = vadd.f32 %v3160_v47, %v3072_v55  ;;  %v8115_v2 = vpop.eup %8114  ;;  %v7487_v47 = vld [vmem:[%s12439_s12 + $0x118] sm:$0xf] }
 0x54a   : > { %v3637_v13 = vmul.f32 %v8115_v2, %v3509_v20 }
 0x54b   : > { %8116 = vpow2.f32 %v3583_v32  ;;  %v3200_v4 = vmax.f32 %v3161_v40, 0.0  ;;  %v7988_v32 = vld [vmem:[%s12439_s12 + $0x130] sm:$0xf0] }
 0x54c   : > { %v3357_v27 = vpop.f32.mrf.mxu0  ;;  %v3446_v1 = vpop.f32.mrf.mxu1  ;;  %v3669_v57 = vadd.f32 %v3637_v13, %v10495_v39  ;;  %v7488_v29 = vor.u32 %v7988_v32, %v7487_v47  ;;  %v7283_v13 = vld [vmem:[%s12437_s10] sm:$0xf]  ;;  %v7981_v32 = vld [vmem:[%s12439_s12 + $0xf8] sm:$0xf0] }
 0x54d   : > { %v10523_v24 = vadd.f32 %v3357_v27, %v10370_v10  ;;  %v3447_v22 = vadd.f32 %v3446_v1, %v10372_v14  ;;  %v3218_v17 = vpack.c.bf16 %v3200_v4, %v3199_v38  ;;  %v3079_v39 = vpop.f32.mrf.mxu2  ;;  %v7459_v47 = vld [vmem:[%s12439_s12 + $0xe0] sm:$0xf] }
 0x54e   : > { %v3080_v27 = vadd.f32 %v10264_v45, %v3079_v39  ;;  %5012 = vmatpush.bf16.msrb.mxu1 %v7488_v29  ;;  %v7460_v29 = vor.u32 %v7981_v32, %v7459_v47 }
 0x54f   : > { %6533 = vst [vmem:[%s10377_s20 + $0xa0] sm:$0xff] %v10523_v24  ;;  %v3543_v18 = vmul.f32 0.5, %v3447_v22  ;;  %3396 = vmatmul.bf16.gmra.mxu0 %v3218_v17  ;;  %3485 = vmatmul.bf16.gmra.mxu1 %v3218_v17 }
 0x550   : > { %6534 = vst [vmem:[%s10377_s20 + $0xa8] sm:$0xff] %v3447_v22  ;;  %v3163_v16 = vpop.f32.mrf.mxu3 }
 0x551   : > { %v8117_v15 = vpop.eup %8116  ;;  %v3585_v8 = vmul.f32 1.442695, %v3543_v18  ;;  %v3164_v19 = vadd.f32 %v3163_v16, %v3075_v23 }
 0x552   : > { %v3638_v0 = vmul.f32 %v8117_v15, %v3510_v50  ;;  %5013 = vmatpush.bf16.msrb.mxu1 %v7460_v29 }
 0x553   : > { %8118 = vpow2.f32 %v3585_v8  ;;  %v3201_v42 = vmax.f32 %v3164_v19, 0.0  ;;  %v7285_v19 = vld [vmem:[%s12437_s10 + $0x8] sm:$0xf0] }
 0x554   : > { %v3359_v34 = vpop.f32.mrf.mxu0  ;;  %v3448_v37 = vpop.f32.mrf.mxu1  ;;  %v3670_v28 = vadd.f32 %v3638_v0, %v3355_v5 }
 0x555   : > { %v3360_v60 = vadd.f32 %v3359_v34, %v10370_v10  ;;  %v3449_v33 = vadd.f32 %v3448_v37, %v10372_v14  ;;  %v3081_v25 = vpop.f32.mrf.mxu2 }
 0x556   : > { %v3697_v3 = vpack.c.bf16 %v3670_v28, %v3669_v57  ;;  %v3082_v22 = vadd.f32 %v10264_v45, %v3081_v25  ;;  %v7935_v45 = vld [vmem:[%s12437_s10 + $0x4] sm:$0xf0]  ;;  %v3513_v57 = vld [vmem:[%s10397_s30 + $0x60] sm:$0xff] }
 0x557   : > { %6535 = vst [vmem:[%s10377_s20 + $0xb0] sm:$0xff] %v3360_v60  ;;  %v3544_v52 = vmul.f32 0.5, %v3449_v33  ;;  %v7284_v8 = vor.u32 %v7935_v45, %v7283_v13  ;;  %v3518_v13 = vld [vmem:[%s10397_s30 + $0x88] sm:$0xff] }
 0x558   : > { %6536 = vst [vmem:[%s10377_s20 + $0xb8] sm:$0xff] %v3449_v33  ;;  %v3165_v46 = vpop.f32.mrf.mxu3  ;;  %3805 = vmatmul.bf16.gmra.mxu2 %v3697_v3 }
 0x559   : > { %v3587_v21 = vmul.f32 1.442695, %v3544_v52  ;;  %v3166_v6 = vadd.f32 %v3165_v46, %v3077_v44  ;;  %v8119_v43 = vpop.eup %8118  ;;  %4023 = vmatpush.bf16.msrb.mxu3 %v7284_v8  ;;  %v7934_v44 = vld [vmem:[%s12437_s10 + $0x4] sm:$0xf] }
 0x55a   : > { %v3639_v58 = vmul.f32 %v8119_v43, %v3511_v36 }
 0x55b   : > { %8120 = vpow2.f32 %v3587_v21  ;;  %v3202_v56 = vmax.f32 %v3166_v6, 0.0  ;;  %v7288_v6 = vor.u32 %v7934_v44, %v7285_v19  ;;  %v8030_v44 = vld [vmem:[%s12439_s12 + $0x280] sm:$0xf0] }
 0x55c   : > { %v3362_v12 = vpop.f32.mrf.mxu0  ;;  %v3451_v7 = vpop.f32.mrf.mxu1  ;;  %v3671_v4 = vadd.f32 %v3639_v58, %v10523_v24  ;;  %v3516_v58 = vld [vmem:[%s10397_s30 + $0x78] sm:$0xff] }
 0x55d   : > { %v10551_v11 = vadd.f32 %v3362_v12, %v10370_v10  ;;  %v3452_v51 = vadd.f32 %v3451_v7, %v10372_v14  ;;  %v3219_v54 = vpack.c.bf16 %v3202_v56, %v3201_v42  ;;  %4112 = vmatpush.bf16.msrb.mxu0 %v7288_v6  ;;  %v7683_v7 = vld [vmem:[%s12439_s12 + $0x2a0] sm:$0xf] }
 0x55f   : > { %6537 = vst [vmem:[%s10377_s20 + $0xc0] sm:$0xff] %v10551_v11  ;;  %v3545_v59 = vmul.f32 0.5, %v3452_v51  ;;  %3401 = vmatmul.bf16.gmra.mxu0 %v3219_v54  ;;  %3490 = vmatmul.bf16.gmra.mxu1 %v3219_v54 }
 0x560   : > { %6538 = vst [vmem:[%s10377_s20 + $0xc8] sm:$0xff] %v3452_v51  ;;  %v3168_v5 = vpop.f32.mrf.mxu3  ;;  %v7684_v51 = vor.u32 %v8037_v49, %v7683_v7 }
 0x561   : > { %v8121_v41 = vpop.eup %8120  ;;  %v3589_v61 = vmul.f32 1.442695, %v3545_v59  ;;  %v3169_v17 = vadd.f32 %v3168_v5, %v3080_v27 }
 0x562   : > { %v3640_v55 = vmul.f32 %v8121_v41, %v3512_v53  ;;  %v3515_v53 = vld [vmem:[%s10397_s30 + $0x70] sm:$0xff]  ;;  %5102 = vmatpush.bf16.msrb.mxu2 %v7684_v51 }
 0x563   : > { %8122 = vpow2.f32 %v3589_v61  ;;  %v3203_v50 = vmax.f32 %v3169_v17, 0.0 }
 0x564   : > { %v3364_v40 = vpop.f32.mrf.mxu0  ;;  %v3453_v38 = vpop.f32.mrf.mxu1  ;;  %v3672_v26 = vadd.f32 %v3640_v55, %v3360_v60 }
 0x565   : > { %v3365_v1 = vadd.f32 %v3364_v40, %v10370_v10  ;;  %v3454_v31 = vadd.f32 %v3453_v38, %v10372_v14 }
 0x566   : > { %v3698_v2 = vpack.c.bf16 %v3672_v26, %v3671_v4 }
 0x567   : > { %6539 = vst [vmem:[%s10377_s20 + $0xd0] sm:$0xff] %v3365_v1  ;;  %v3546_v20 = vmul.f32 0.5, %v3454_v31 }
 0x568   : > { %6540 = vst [vmem:[%s10377_s20 + $0xd8] sm:$0xff] %v3454_v31  ;;  %v3170_v35 = vpop.f32.mrf.mxu3  ;;  %3810 = vmatmul.bf16.gmra.mxu2 %v3698_v2 }
 0x569   : > { %v3591_v24 = vmul.f32 1.442695, %v3546_v20  ;;  %v3171_v18 = vadd.f32 %v3170_v35, %v3082_v22  ;;  %v8123_v48 = vpop.eup %8122 }
 0x56a   : > { %v3641_v23 = vmul.f32 %v8123_v48, %v3513_v57 }
 0x56b   : > { %8124 = vpow2.f32 %v3591_v24  ;;  %v3204_v16 = vmax.f32 %v3171_v18, 0.0 }
 0x56c   : > { %v3367_v15 = vpop.f32.mrf.mxu0  ;;  %v3456_v0 = vpop.f32.mrf.mxu1  ;;  %v3673_v39 = vadd.f32 %v3641_v23, %v10551_v11 }
 0x56d   : > { %v3368_v30 = vadd.f32 %v3367_v15, %v10370_v10  ;;  %v3457_v34 = vadd.f32 %v3456_v0, %v10372_v14  ;;  %v3220_v37 = vpack.c.bf16 %v3204_v16, %v3203_v50  ;;  %v3517_v50 = vld [vmem:[%s10397_s30 + $0x80] sm:$0xff] }
 0x56f   : > { %6541 = vst [vmem:[%s10377_s20 + $0xe0] sm:$0xff] %v3368_v30  ;;  %v3547_v28 = vmul.f32 0.5, %v3457_v34  ;;  %3406 = vmatmul.bf16.gmra.mxu0 %v3220_v37  ;;  %3495 = vmatmul.bf16.gmra.mxu1 %v3220_v37 }
 0x570   : > { %6542 = vst [vmem:[%s10377_s20 + $0xe8] sm:$0xff] %v3457_v34 }
 0x571   : > { %v8125_v60 = vpop.eup %8124  ;;  %v3593_v3 = vmul.f32 1.442695, %v3547_v28 }
 0x572   : > { %v3642_v33 = vmul.f32 %v8125_v60, %v3514_v63 }
 0x573   : > { %8126 = vpow2.f32 %v3593_v3  ;;  %v7655_v3 = vld [vmem:[%s12439_s12 + $0x268] sm:$0xf] }
 0x574   : > { %v3369_v52 = vpop.f32.mrf.mxu0  ;;  %v3458_v46 = vpop.f32.mrf.mxu1  ;;  %v3674_v21 = vadd.f32 %v3642_v33, %v3365_v1 }
 0x575   : > { %v3370_v42 = vadd.f32 %v3369_v52, %v10370_v10  ;;  %v3459_v56 = vadd.f32 %v3458_v46, %v10372_v14  ;;  %v7656_v46 = vor.u32 %v8030_v44, %v7655_v3  ;;  %v7627_v44 = vld [vmem:[%s12439_s12 + $0x230] sm:$0xf] }
 0x576   : > { %v3699_v62 = vpack.c.bf16 %v3674_v21, %v3673_v39 }
 0x577   : > { %6543 = vst [vmem:[%s10377_s20 + $0xf0] sm:$0xff] %v3370_v42  ;;  %v3548_v9 = vmul.f32 0.5, %v3459_v56  ;;  %5103 = vmatpush.bf16.msrb.mxu2 %v7656_v46 }
 0x578   : > { %6544 = vst [vmem:[%s10377_s20 + $0xf8] sm:$0xff] %v3459_v56  ;;  %3815 = vmatmul.bf16.gmra.mxu2 %v3699_v62  ;;  %v10639_v56 = vld [vmem:[%s12436_s9] ss:$0 sm:$0xff] }
 0x579   : > { %v3595_v12 = vmul.f32 1.442695, %v3548_v9  ;;  %v8127_v54 = vpop.eup %8126  ;;  %v3520_v9 = vld [vmem:[%s10397_s30 + $0x98] sm:$0xff] }
 0x57a   : > { %v3643_v41 = vmul.f32 %v8127_v54, %v3515_v53  ;;  %v7431_v54 = vld [vmem:[%s12439_s12 + $0xa8] sm:$0xf] }
 0x57b   : > { %8128 = vpow2.f32 %v3595_v12 }
 0x57c   : > { %v3372_v43 = vpop.f32.mrf.mxu0  ;;  %v3461_v11 = vpop.f32.mrf.mxu1  ;;  %v3675_v4 = vadd.f32 %v3643_v41, %v3368_v30 }
 0x57d   : > { %v3373_v36 = vadd.f32 %v3372_v43, %v10370_v10  ;;  %v3462_v59 = vadd.f32 %v3461_v11, %v10372_v14 }
 0x57f   : > { %6545 = vst [vmem:[%s10377_s20 + $0x100] sm:$0xff] %v3373_v36  ;;  %v3549_v5 = vmul.f32 0.5, %v3462_v59 }
 0x580   : > { %6546 = vst [vmem:[%s10377_s20 + $0x108] sm:$0xff] %v3462_v59 }
 0x581   : > { %v8129_v55 = vpop.eup %8128  ;;  %v3597_v61 = vmul.f32 1.442695, %v3549_v5 }
 0x582   : > { %v3644_v25 = vmul.f32 %v8129_v55, %v3516_v58 }
 0x583   : > { %8130 = vpow2.f32 %v3597_v61 }
 0x584   : > { %v3374_v40 = vpop.f32.mrf.mxu0  ;;  %v3463_v38 = vpop.f32.mrf.mxu1  ;;  %v3676_v26 = vadd.f32 %v3644_v25, %v3370_v42  ;;  %v3519_v42 = vld [vmem:[%s10397_s30 + $0x90] sm:$0xff] }
 0x585   : > { %v3375_v27 = vadd.f32 %v3374_v40, %v10370_v10  ;;  %v3464_v1 = vadd.f32 %v3463_v38, %v10372_v14 }
 0x586   : > { %v3700_v31 = vpack.c.bf16 %v3676_v26, %v3675_v4 }
 0x587   : > { %6547 = vst [vmem:[%s10377_s20 + $0x110] sm:$0xff] %v3375_v27  ;;  %v3550_v2 = vmul.f32 0.5, %v3464_v1 }
 0x588   : > { %6548 = vst [vmem:[%s10377_s20 + $0x118] sm:$0xff] %v3464_v1  ;;  %3820 = vmatmul.bf16.gmra.mxu2 %v3700_v31 }
 0x589   : > { %v3599_v22 = vmul.f32 1.442695, %v3550_v2  ;;  %v8131_v35 = vpop.eup %8130 }
 0x58a   : > { %v3645_v45 = vmul.f32 %v8131_v35, %v3517_v50  ;;  %v3522_v35 = vld [vmem:[%s10397_s30 + $0xa8] sm:$0xff] }
 0x58b   : > { %8132 = vpow2.f32 %v3599_v22 }
 0x58c   : > { %v3377_v17 = vpop.f32.mrf.mxu0  ;;  %v3466_v20 = vpop.f32.mrf.mxu1  ;;  %v3677_v34 = vadd.f32 %v3645_v45, %v3373_v36  ;;  %v7974_v36 = vld [vmem:[%s12439_s12 + $0xc0] sm:$0xf0] }
 0x58d   : > { %v3378_v24 = vadd.f32 %v3377_v17, %v10370_v10  ;;  %v3467_v18 = vadd.f32 %v3466_v20, %v10372_v14  ;;  %v7432_v55 = vor.u32 %v7974_v36, %v7431_v54  ;;  %v3521_v17 = vld [vmem:[%s10397_s30 + $0xa0] sm:$0xff]  ;;  %v7403_v36 = vld [vmem:[%s12439_s12 + $0x70] sm:$0xf] }
 0x58f   : > { %6549 = vst [vmem:[%s10377_s20 + $0x120] sm:$0xff] %v3378_v24  ;;  %v3551_v16 = vmul.f32 0.5, %v3467_v18  ;;  %5014 = vmatpush.bf16.msrb.mxu1 %v7432_v55 }
 0x590   : > { %6550 = vst [vmem:[%s10377_s20 + $0x128] sm:$0xff] %v3467_v18 }
 0x591   : > { %v8133_v15 = vpop.eup %8132  ;;  %v3601_v8 = vmul.f32 1.442695, %v3551_v16 }
 0x592   : > { %v3646_v0 = vmul.f32 %v8133_v15, %v3518_v13 }
 0x593   : > { %8134 = vpow2.f32 %v3601_v8 }
 0x594   : > { %v3379_v48 = vpop.f32.mrf.mxu0  ;;  %v3468_v30 = vpop.f32.mrf.mxu1  ;;  %v3678_v37 = vadd.f32 %v3646_v0, %v3375_v27 }
 0x595   : > { %v3380_v57 = vadd.f32 %v3379_v48, %v10370_v10  ;;  %v3469_v28 = vadd.f32 %v3468_v30, %v10372_v14 }
 0x596   : > { %v3701_v63 = vpack.c.bf16 %v3678_v37, %v3677_v34 }
 0x597   : > { %6551 = vst [vmem:[%s10377_s20 + $0x130] sm:$0xff] %v3380_v57  ;;  %v3552_v23 = vmul.f32 0.5, %v3469_v28 }
 0x598   : > { %6552 = vst [vmem:[%s10377_s20 + $0x138] sm:$0xff] %v3469_v28  ;;  %3825 = vmatmul.bf16.gmra.mxu2 %v3701_v63 }
 0x599   : > { %v3603_v60 = vmul.f32 1.442695, %v3552_v23  ;;  %v8135_v39 = vpop.eup %8134 }
 0x59a   : > { %v3647_v12 = vmul.f32 %v8135_v39, %v3519_v42 }
 0x59b   : > { %8136 = vpow2.f32 %v3603_v60  ;;  %v3786_v33 = vpop.f32.mrf.mxu2 }
 0x59c   : > { %v3382_v19 = vpop.f32.mrf.mxu0  ;;  %v3471_v52 = vpop.f32.mrf.mxu1  ;;  %v3787_v49 = vadd.f32 %v10639_v56, %v3786_v33  ;;  %v3679_v58 = vadd.f32 %v3647_v12, %v3378_v24  ;;  %v3524_v12 = vld [vmem:[%s10397_s30 + $0xb8] sm:$0xff] }
 0x59d   : > { %v3383_v21 = vadd.f32 %v3382_v19, %v10370_v10  ;;  %v3472_v6 = vadd.f32 %v3471_v52, %v10372_v14  ;;  %v8023_v19 = vld [vmem:[%s12439_s12 + $0x248] sm:$0xf0] }
 0x59e   : > { %v3866_v47 = vmax.f32 %v3787_v49, 0.0  ;;  %v7628_v39 = vor.u32 %v8023_v19, %v7627_v44  ;;  %v7599_v19 = vld [vmem:[%s12439_s12 + $0x1f8] sm:$0xf] }
 0x59f   : > { %6553 = vst [vmem:[%s10377_s20 + $0x140] sm:$0xff] %v3383_v21  ;;  %v3553_v62 = vmul.f32 0.5, %v3472_v6 }
 0x5a0   : > { %6554 = vst [vmem:[%s10377_s20 + $0x148] sm:$0xff] %v3472_v6  ;;  %5104 = vmatpush.bf16.msrb.mxu2 %v7628_v39 }
 0x5a1   : > { %v8137_v7 = vpop.eup %8136  ;;  %v3605_v11 = vmul.f32 1.442695, %v3553_v62  ;;  %v3523_v62 = vld [vmem:[%s10397_s30 + $0xb0] sm:$0xff] }
 0x5a2   : > { %v3648_v43 = vmul.f32 %v8137_v7, %v3520_v9 }
 0x5a3   : > { %v3788_v51 = vpop.f32.mrf.mxu2  ;;  %8138 = vpow2.f32 %v3605_v11 }
 0x5a4   : > { %v3789_v59 = vadd.f32 %v10639_v56, %v3788_v51  ;;  %v3384_v53 = vpop.f32.mrf.mxu0  ;;  %v3473_v5 = vpop.f32.mrf.mxu1  ;;  %v3680_v41 = vadd.f32 %v3648_v43, %v3380_v57 }
 0x5a5   : > { %v3385_v25 = vadd.f32 %v3384_v53, %v10370_v10  ;;  %v3474_v61 = vadd.f32 %v3473_v5, %v10372_v14 }
 0x5a6   : > { %v3867_v32 = vmax.f32 %v3789_v59, 0.0  ;;  %v3702_v40 = vpack.c.bf16 %v3680_v41, %v3679_v58  ;;  %v7967_v59 = vld [vmem:[%s12439_s12 + $0x88] sm:$0xf0] }
 0x5a7   : > { %6555 = vst [vmem:[%s10377_s20 + $0x150] sm:$0xff] %v3385_v25  ;;  %v3554_v38 = vmul.f32 0.5, %v3474_v61 }
 0x5a8   : > { %v3898_v4 = vpack.c.bf16 %v3867_v32, %v3866_v47  ;;  %6556 = vst [vmem:[%s10377_s20 + $0x158] sm:$0xff] %v3474_v61  ;;  %3830 = vmatmul.bf16.gmra.mxu2 %v3702_v40 }
 0x5a9   : > { %v3607_v26 = vmul.f32 1.442695, %v3554_v38  ;;  %v8139_v31 = vpop.eup %8138 }
 0x5aa   : > { %4024 = vmatmul.bf16.vlgmr.msrb.gmra.mxu3 %v3898_v4  ;;  %4113 = vmatmul.bf16.vlgmr.msrb.gmra.mxu0 %v3898_v4  ;;  %v3649_v24 = vmul.f32 %v8139_v31, %v3521_v17 }
 0x5ab   : > { %8140 = vpow2.f32 %v3607_v26  ;;  %v3791_v29 = vpop.f32.mrf.mxu2 }
 0x5ac   : > { %v3387_v27 = vpop.f32.mrf.mxu0  ;;  %v3476_v1 = vpop.f32.mrf.mxu1  ;;  %v3792_v50 = vadd.f32 %v10639_v56, %v3791_v29  ;;  %v3681_v48 = vadd.f32 %v3649_v24, %v3383_v21  ;;  %v3526_v24 = vld [vmem:[%s10397_s30 + $0xc8] sm:$0xff] }
 0x5ad   : > { %v3388_v2 = vadd.f32 %v3387_v27, %v10370_v10  ;;  %v3477_v22 = vadd.f32 %v3476_v1, %v10372_v14 }
 0x5ae   : > { %v3868_v57 = vmax.f32 %v3792_v50, 0.0 }
 0x5af   : > { %6557 = vst [vmem:[%s10377_s20 + $0x160] sm:$0xff] %v3388_v2  ;;  %v3555_v20 = vmul.f32 0.5, %v3477_v22 }
 0x5b0   : > { %6558 = vst [vmem:[%s10377_s20 + $0x168] sm:$0xff] %v3477_v22 }
 0x5b1   : > { %v8141_v18 = vpop.eup %8140  ;;  %v3609_v13 = vmul.f32 1.442695, %v3555_v20  ;;  %v3525_v20 = vld [vmem:[%s10397_s30 + $0xc0] sm:$0xff] }
 0x5b2   : > { %v3650_v16 = vmul.f32 %v8141_v18, %v3522_v35 }
 0x5b3   : > { %v3793_v45 = vpop.f32.mrf.mxu2  ;;  %8142 = vpow2.f32 %v3609_v13 }
 0x5b4   : > { %v3794_v15 = vadd.f32 %v10639_v56, %v3793_v45  ;;  %v3389_v0 = vpop.f32.mrf.mxu0  ;;  %v3478_v8 = vpop.f32.mrf.mxu1  ;;  %v3682_v30 = vadd.f32 %v3650_v16, %v3385_v25  ;;  %v7404_v25 = vor.u32 %v7967_v59, %v7403_v36 }
 0x5b5   : > { %v3390_v34 = vadd.f32 %v3389_v0, %v10370_v10  ;;  %v3479_v37 = vadd.f32 %v3478_v8, %v10372_v14 }
 0x5b6   : > { %v3869_v28 = vmax.f32 %v3794_v15, 0.0  ;;  %v3703_v63 = vpack.c.bf16 %v3682_v30, %v3681_v48  ;;  %5015 = vmatpush.bf16.msrb.mxu1 %v7404_v25 }
 0x5b7   : > { %6559 = vst [vmem:[%s10377_s20 + $0x170] sm:$0xff] %v3390_v34  ;;  %v3556_v23 = vmul.f32 0.5, %v3479_v37 }
 0x5b8   : > { %6560 = vst [vmem:[%s10377_s20 + $0x178] sm:$0xff] %v3479_v37  ;;  %3835 = vmatmul.bf16.gmra.mxu2 %v3703_v63  ;;  %v3899_v60 = vpack.c.bf16 %v3869_v28, %v3868_v57 }
 0x5b9   : > { %v3611_v33 = vmul.f32 1.442695, %v3556_v23  ;;  %v8143_v21 = vpop.eup %8142 }
 0x5ba   : > { %4029 = vmatmul.bf16.gmra.mxu3 %v3899_v60  ;;  %4118 = vmatmul.bf16.gmra.mxu0 %v3899_v60  ;;  %v3651_v7 = vmul.f32 %v8143_v21, %v3523_v62 }
 0x5bb   : > { %8144 = vpow2.f32 %v3611_v33  ;;  %v3796_v3 = vpop.f32.mrf.mxu2 }
 0x5bc   : > { %v3392_v52 = vpop.f32.mrf.mxu0  ;;  %v3481_v46 = vpop.f32.mrf.mxu1  ;;  %v3797_v43 = vadd.f32 %v10639_v56, %v3796_v3  ;;  %v3683_v41 = vadd.f32 %v3651_v7, %v3388_v2  ;;  %v7960_v7 = vld [vmem:[%s12439_s12 + $0x50] sm:$0xf0] }
 0x5bd   : > { %v3393_v6 = vadd.f32 %v3392_v52, %v10370_v10  ;;  %v3482_v42 = vadd.f32 %v3481_v46, %v10372_v14  ;;  %v8016_v52 = vld [vmem:[%s12439_s12 + $0x210] sm:$0xf0] }
 0x5be   : > { %v3870_v32 = vmax.f32 %v3797_v43, 0.0  ;;  %v7600_v21 = vor.u32 %v8016_v52, %v7599_v19  ;;  %v3528_v43 = vld [vmem:[%s10397_s30 + $0xd8] sm:$0xff] }
 0x5bf   : > { %6561 = vst [vmem:[%s10377_s20 + $0x180] sm:$0xff] %v3393_v6  ;;  %v3557_v9 = vmul.f32 0.5, %v3482_v42 }
 0x5c0   : > { %6562 = vst [vmem:[%s10377_s20 + $0x188] sm:$0xff] %v3482_v42  ;;  %5105 = vmatpush.bf16.msrb.mxu2 %v7600_v21  ;;  %v7347_v21 = vld [vmem:[%s12439_s12] sm:$0xf] }
 0x5c1   : > { %v8145_v49 = vpop.eup %8144  ;;  %v3613_v51 = vmul.f32 1.442695, %v3557_v9  ;;  %v3527_v9 = vld [vmem:[%s10397_s30 + $0xd0] sm:$0xff] }
 0x5c2   : > { %v3652_v11 = vmul.f32 %v8145_v49, %v3524_v12  ;;  %v7375_v12 = vld [vmem:[%s12439_s12 + $0x38] sm:$0xf] }
 0x5c3   : > { %v3798_v54 = vpop.f32.mrf.mxu2  ;;  %8146 = vpow2.f32 %v3613_v51 }
 0x5c4   : > { %v3799_v53 = vadd.f32 %v10639_v56, %v3798_v54  ;;  %v3394_v5 = vpop.f32.mrf.mxu0  ;;  %v3483_v58 = vpop.f32.mrf.mxu1  ;;  %v3684_v55 = vadd.f32 %v3652_v11, %v3390_v34  ;;  %v7376_v11 = vor.u32 %v7960_v7, %v7375_v12 }
 0x5c5   : > { %v3395_v61 = vadd.f32 %v3394_v5, %v10370_v10  ;;  %v3484_v47 = vadd.f32 %v3483_v58, %v10372_v14 }
 0x5c6   : > { %v3871_v40 = vmax.f32 %v3799_v53, 0.0  ;;  %v3704_v38 = vpack.c.bf16 %v3684_v55, %v3683_v41  ;;  %5016 = vmatpush.bf16.msrb.mxu1 %v7376_v11 }
 0x5c7   : > { %6563 = vst [vmem:[%s10377_s20 + $0x190] sm:$0xff] %v3395_v61  ;;  %v3558_v4 = vmul.f32 0.5, %v3484_v47 }
 0x5c8   : > { %6564 = vst [vmem:[%s10377_s20 + $0x198] sm:$0xff] %v3484_v47  ;;  %3840 = vmatmul.bf16.gmra.mxu2 %v3704_v38  ;;  %v3900_v26 = vpack.c.bf16 %v3871_v40, %v3870_v32 }
 0x5c9   : > { %v3615_v29 = vmul.f32 1.442695, %v3558_v4  ;;  %v8147_v2 = vpop.eup %8146 }
 0x5ca   : > { %4034 = vmatmul.bf16.gmra.mxu3 %v3900_v26  ;;  %4123 = vmatmul.bf16.gmra.mxu0 %v3900_v26  ;;  %v3653_v18 = vmul.f32 %v8147_v2, %v3525_v20 }
 0x5cb   : > { %8148 = vpow2.f32 %v3615_v29  ;;  %v3801_v27 = vpop.f32.mrf.mxu2 }
 0x5cc   : > { %v3397_v1 = vpop.f32.mrf.mxu0  ;;  %v3486_v31 = vpop.f32.mrf.mxu1  ;;  %v3802_v16 = vadd.f32 %v10639_v56, %v3801_v27  ;;  %v3685_v30 = vadd.f32 %v3653_v18, %v3393_v6  ;;  %v3530_v18 = vld [vmem:[%s10397_s30 + $0xe8] sm:$0xff] }
 0x5cd   : > { %v3398_v22 = vadd.f32 %v3397_v1, %v10370_v10  ;;  %v3487_v17 = vadd.f32 %v3486_v31, %v10372_v14 }
 0x5ce   : > { %v3872_v28 = vmax.f32 %v3802_v16, 0.0 }
 0x5cf   : > { %6565 = vst [vmem:[%s10377_s20 + $0x1a0] sm:$0xff] %v3398_v22  ;;  %v3559_v35 = vmul.f32 0.5, %v3487_v17 }
 0x5d0   : > { %6566 = vst [vmem:[%s10377_s20 + $0x1a8] sm:$0xff] %v3487_v17 }
 0x5d1   : > { %v8149_v50 = vpop.eup %8148  ;;  %v3617_v45 = vmul.f32 1.442695, %v3559_v35  ;;  %v3529_v35 = vld [vmem:[%s10397_s30 + $0xe0] sm:$0xff] }
 0x5d2   : > { %v3654_v13 = vmul.f32 %v8149_v50, %v3526_v24 }
 0x5d3   : > { %v3803_v15 = vpop.f32.mrf.mxu2  ;;  %8150 = vpow2.f32 %v3617_v45 }
 0x5d4   : > { %v3804_v0 = vadd.f32 %v10639_v56, %v3803_v15  ;;  %v3399_v8 = vpop.f32.mrf.mxu0  ;;  %v3488_v48 = vpop.f32.mrf.mxu1  ;;  %v3686_v34 = vadd.f32 %v3654_v13, %v3395_v61 }
 0x5d5   : > { %v3400_v37 = vadd.f32 %v3399_v8, %v10370_v10  ;;  %v3489_v57 = vadd.f32 %v3488_v48, %v10372_v14 }
 0x5d6   : > { %v3873_v63 = vmax.f32 %v3804_v0, 0.0  ;;  %v3705_v23 = vpack.c.bf16 %v3686_v34, %v3685_v30 }
 0x5d7   : > { %6567 = vst [vmem:[%s10377_s20 + $0x1b0] sm:$0xff] %v3400_v37  ;;  %v3560_v60 = vmul.f32 0.5, %v3489_v57 }
 0x5d8   : > { %6568 = vst [vmem:[%s10377_s20 + $0x1b8] sm:$0xff] %v3489_v57  ;;  %3845 = vmatmul.bf16.gmra.mxu2 %v3705_v23  ;;  %v3901_v33 = vpack.c.bf16 %v3873_v63, %v3872_v28 }
 0x5d9   : > { %v3619_v3 = vmul.f32 1.442695, %v3560_v60  ;;  %v8151_v6 = vpop.eup %8150 }
 0x5da   : > { %4039 = vmatmul.bf16.gmra.mxu3 %v3901_v33  ;;  %4128 = vmatmul.bf16.gmra.mxu0 %v3901_v33  ;;  %v3655_v51 = vmul.f32 %v8151_v6, %v3527_v9  ;;  %v7571_v33 = vld [vmem:[%s12439_s12 + $0x1c0] sm:$0xf]  ;;  %v7953_v6 = vld [vmem:[%s12439_s12 + $0x18] sm:$0xf0] }
 0x5db   : > { %8152 = vpow2.f32 %v3619_v3  ;;  %v3806_v44 = vpop.f32.mrf.mxu2  ;;  %v8009_v3 = vld [vmem:[%s12439_s12 + $0x1d8] sm:$0xf0] }
 0x5dc   : > { %v3402_v46 = vpop.f32.mrf.mxu0  ;;  %v3491_v39 = vpop.f32.mrf.mxu1  ;;  %v3807_v36 = vadd.f32 %v10639_v56, %v3806_v44  ;;  %v3687_v25 = vadd.f32 %v3655_v51, %v3398_v22  ;;  %v7572_v19 = vor.u32 %v8009_v3, %v7571_v33 }
 0x5dd   : > { %v3403_v42 = vadd.f32 %v3402_v46, %v10370_v10  ;;  %v3492_v62 = vadd.f32 %v3491_v39, %v10372_v14  ;;  %v3531_v39 = vld [vmem:[%s10397_s30 + $0xf0] sm:$0xff] }
 0x5de   : > { %v3874_v40 = vmax.f32 %v3807_v36, 0.0  ;;  %5106 = vmatpush.bf16.msrb.mxu2 %v7572_v19 }
 0x5df   : > { %6569 = vst [vmem:[%s10377_s20 + $0x1c0] sm:$0xff] %v3403_v42  ;;  %v3561_v49 = vmul.f32 0.5, %v3492_v62 }
 0x5e0   : > { %6570 = vst [vmem:[%s10377_s20 + $0x1c8] sm:$0xff] %v3492_v62  ;;  %v7348_v62 = vor.u32 %v7953_v6, %v7347_v21 }
 0x5e1   : > { %v8153_v54 = vpop.eup %8152  ;;  %v3621_v53 = vmul.f32 1.442695, %v3561_v49 }
 0x5e2   : > { %v3656_v59 = vmul.f32 %v8153_v54, %v3528_v43  ;;  %5017 = vmatpush.bf16.msrb.mxu1 %v7348_v62 }
 0x5e3   : > { %v3808_v5 = vpop.f32.mrf.mxu2  ;;  %8154 = vpow2.f32 %v3621_v53 }
 0x5e4   : > { %v3809_v58 = vadd.f32 %v10639_v56, %v3808_v5  ;;  %v3404_v41 = vpop.f32.mrf.mxu0  ;;  %v3493_v55 = vpop.f32.mrf.mxu1  ;;  %v3688_v61 = vadd.f32 %v3656_v59, %v3400_v37 }
 0x5e5   : > { %v3405_v47 = vadd.f32 %v3404_v41, %v10370_v10  ;;  %v3494_v32 = vadd.f32 %v3493_v55, %v10372_v14 }
 0x5e6   : > { %v3875_v38 = vmax.f32 %v3809_v58, 0.0  ;;  %v3706_v4 = vpack.c.bf16 %v3688_v61, %v3687_v25 }
 0x5e7   : > { %6571 = vst [vmem:[%s10377_s20 + $0x1d0] sm:$0xff] %v3405_v47  ;;  %v3562_v26 = vmul.f32 0.5, %v3494_v32 }
 0x5e8   : > { %6572 = vst [vmem:[%s10377_s20 + $0x1d8] sm:$0xff] %v3494_v32  ;;  %3850 = vmatmul.bf16.gmra.mxu2 %v3706_v4  ;;  %v3902_v29 = vpack.c.bf16 %v3875_v38, %v3874_v40  ;;  %v7999_v40 = vld [vmem:[%s12439_s12 + $0x18c] sm:$0xf]  ;;  %v7545_v38 = vld [vmem:[%s12439_s12 + $0x1a4] sm:$0xf0] }
 0x5e9   : > { %v3623_v27 = vmul.f32 1.442695, %v3562_v26  ;;  %v8155_v22 = vpop.eup %8154  ;;  %v7775_v4 = vld [vmem:[%s12439_s12 + $0x350] sm:$0xf] }
 0x5ea   : > { %4044 = vmatmul.bf16.gmra.mxu3 %v3902_v29  ;;  %4133 = vmatmul.bf16.gmra.mxu0 %v3902_v29  ;;  %v3657_v50 = vmul.f32 %v8155_v22, %v3529_v35  ;;  %v7548_v29 = vor.u32 %v7999_v40, %v7545_v38 }
 0x5eb   : > { %8156 = vpow2.f32 %v3623_v27  ;;  %v3811_v1 = vpop.f32.mrf.mxu2  ;;  %v8059_v27 = vld [vmem:[%s12439_s12 + $0x368] sm:$0xf0] }
 0x5ec   : > { %v3407_v31 = vpop.f32.mrf.mxu0  ;;  %v3496_v2 = vpop.f32.mrf.mxu1  ;;  %v3812_v13 = vadd.f32 %v10639_v56, %v3811_v1  ;;  %v3689_v34 = vadd.f32 %v3657_v50, %v3403_v42  ;;  %v3532_v42 = vld [vmem:[%s10397_s30 + $0xf8] sm:$0xff]  ;;  %v7776_v1 = vor.u32 %v8059_v27, %v7775_v4  ;;  %5188 = vmatpush.bf16.msra.mxu3 %v7548_v29 }
 0x5ed   : > { %v3408_v17 = vadd.f32 %v3407_v31, %v10370_v10  ;;  %v3497_v20 = vadd.f32 %v3496_v2, %v10372_v14  ;;  %v7551_v31 = vld [vmem:[%s12439_s12 + $0x190] sm:$0xf]  ;;  %v8003_v2 = vld [vmem:[%s12439_s12 + $0x1a8] sm:$0xf0] }
 0x5ee   : > { %v3876_v63 = vmax.f32 %v3812_v13, 0.0  ;;  %5455 = vmatpush.bf16.msra.mxu2 %v7776_v1  ;;  %v7552_v22 = vor.u32 %v8003_v2, %v7551_v31 }
 0x5ef   : > { %6573 = vst [vmem:[%s10377_s20 + $0x1e0] sm:$0xff] %v3408_v17  ;;  %v3563_v24 = vmul.f32 0.5, %v3497_v20 }
 0x5f0   : > { %6574 = vst [vmem:[%s10377_s20 + $0x1e8] sm:$0xff] %v3497_v20  ;;  %v7769_v20 = vld [vmem:[%s12439_s12 + $0x364] sm:$0xf0]  ;;  %5366 = vmatpush.bf16.msra.mxu1 %v7552_v22 }
 0x5f1   : > { %v8157_v16 = vpop.eup %8156  ;;  %v3625_v15 = vmul.f32 1.442695, %v3563_v24 }
 0x5f2   : > { %v3658_v45 = vmul.f32 %v8157_v16, %v3530_v18 }
 0x5f3   : > { %v3813_v0 = vpop.f32.mrf.mxu2  ;;  %8158 = vpow2.f32 %v3625_v15 }
 0x5f4   : > { %v3814_v8 = vadd.f32 %v10639_v56, %v3813_v0  ;;  %v3409_v48 = vpop.f32.mrf.mxu0  ;;  %v3498_v30 = vpop.f32.mrf.mxu1  ;;  %v3690_v37 = vadd.f32 %v3658_v45, %v3405_v47  ;;  %v3930_v45 = vld [vmem:[%s12438_s11] sm:$0x3] }
 0x5f5   : > { %v3410_v57 = vadd.f32 %v3409_v48, %v10370_v10  ;;  %v3499_v28 = vadd.f32 %v3498_v30, %v10372_v14 }
 0x5f6   : > { %v3877_v23 = vmax.f32 %v3814_v8, 0.0  ;;  %v3707_v60 = vpack.c.bf16 %v3690_v37, %v3689_v34  ;;  %v10787_v8 = vperm.slane %v3930_v45, 1 }
 0x5f7   : > { %6575 = vst [vmem:[%s10377_s20 + $0x1f0] sm:$0xff] %v3410_v57  ;;  %v3564_v44 = vmul.f32 0.5, %v3499_v28 }
 0x5f8   : > { %6576 = vst [vmem:[%s10377_s20 + $0x1f8] sm:$0xff] %v3499_v28  ;;  %3855 = vmatmul.bf16.gmra.mxu2 %v3707_v60  ;;  %v3903_v10 = vpack.c.bf16 %v3877_v23, %v3876_v63 }
 0x5f9   : > { %v3627_v14 = vmul.f32 1.442695, %v3564_v44  ;;  %v8159_v46 = vpop.eup %8158 }
 0x5fa   : > { %4049 = vmatmul.bf16.gmra.mxu3 %v3903_v10  ;;  %4138 = vmatmul.bf16.gmra.mxu0 %v3903_v10  ;;  %v3659_v9 = vmul.f32 %v8159_v46, %v3531_v39 }
 0x5fb   : > { %8160 = vpow2.f32 %v3627_v14  ;;  %v3816_v52 = vpop.f32.mrf.mxu2 }
 0x5fc   : > { %v3817_v7 = vadd.f32 %v10639_v56, %v3816_v52  ;;  %v3691_v51 = vadd.f32 %v3659_v9, %v3408_v17  ;;  %v8055_v17 = vld [vmem:[%s12439_s12 + $0x34c] sm:$0xf]  ;;  %v7992_v9 = vld [vmem:[%s12439_s12 + $0x154] sm:$0xf] }
 0x5fd   : > { %v7772_v35 = vor.u32 %v8055_v17, %v7769_v20 }
 0x5fe   : > { %v3878_v36 = vmax.f32 %v3817_v7, 0.0 }
 0x5ff   : > { %5277 = vmatpush.bf16.msra.mxu0 %v7772_v35 }
 0x601   : > { %v8161_v12 = vpop.eup %8160 }
 0x602   : > { %v3660_v49 = vmul.f32 %v8161_v12, %v3532_v42  ;;  %v7517_v12 = vld [vmem:[%s12439_s12 + $0x16c] sm:$0xf0] }
 0x603   : > { %v3818_v43 = vpop.f32.mrf.mxu2 }
 0x604   : > { %v3819_v11 = vadd.f32 %v10639_v56, %v3818_v43  ;;  %v3692_v54 = vadd.f32 %v3660_v49, %v3410_v57  ;;  %v10790_v57 = vperm.slane %v3930_v45, 0  ;;  %v7520_v49 = vor.u32 %v7992_v9, %v7517_v12  ;;  %v7747_v43 = vld [vmem:[%s12439_s12 + $0x318] sm:$0xf]  ;;  %v8045_v9 = vld [vmem:[%s12439_s12 + $0x2f8] sm:$0xf0] }
 0x606   : > { %v3879_v59 = vmax.f32 %v3819_v11, 0.0  ;;  %v3708_v53 = vpack.c.bf16 %v3692_v54, %v3691_v51  ;;  %v8052_v11 = vld [vmem:[%s12439_s12 + $0x330] sm:$0xf0]  ;;  %5189 = vmatpush.bf16.msra.mxu3 %v7520_v49 }
 0x607   : > { %v7748_v51 = vor.u32 %v8052_v11, %v7747_v43  ;;  %v7495_v43 = vld [vmem:[%s12439_s12 + $0x120] sm:$0xf]  ;;  %v7989_v11 = vld [vmem:[%s12439_s12 + $0x138] sm:$0xf0] }
 0x608   : > { %3860 = vmatmul.bf16.gmra.mxu2 %v3708_v53  ;;  %v3904_v5 = vpack.c.bf16 %v3879_v59, %v3878_v36  ;;  %v7523_v59 = vld [vmem:[%s12439_s12 + $0x158] sm:$0xf]  ;;  %v7996_v53 = vld [vmem:[%s12439_s12 + $0x170] sm:$0xf0] }
 0x609   : > { %5456 = vmatpush.bf16.msra.mxu2 %v7748_v51 }
 0x60a   : > { %4054 = vmatmul.bf16.gmra.mxu3 %v3904_v5  ;;  %4143 = vmatmul.bf16.gmra.mxu0 %v3904_v5 }
 0x60b   : > { %v3821_v58 = vpop.f32.mrf.mxu2 }
 0x60c   : > { %v3822_v41 = vadd.f32 %v10639_v56, %v3821_v58  ;;  %v7524_v58 = vor.u32 %v7996_v53, %v7523_v59  ;;  %v8041_v59 = vld [vmem:[%s12439_s12 + $0x2dc] sm:$0xf]  ;;  %v7713_v53 = vld [vmem:[%s12439_s12 + $0x2f4] sm:$0xf0] }
 0x60e   : > { %v3880_v61 = vmax.f32 %v3822_v41, 0.0  ;;  %5367 = vmatpush.bf16.msra.mxu1 %v7524_v58 }
 0x613   : > { %v3823_v55 = vpop.f32.mrf.mxu2 }
 0x614   : > { %v3824_v25 = vadd.f32 %v10639_v56, %v3823_v55  ;;  %v8048_v55 = vld [vmem:[%s12439_s12 + $0x314] sm:$0xf] }
 0x616   : > { %v3881_v47 = vmax.f32 %v3824_v25, 0.0  ;;  %v7741_v25 = vld [vmem:[%s12439_s12 + $0x32c] sm:$0xf0] }
 0x618   : > { %v3905_v32 = vpack.c.bf16 %v3881_v47, %v3880_v61  ;;  %v7744_v61 = vor.u32 %v8048_v55, %v7741_v25 }
 0x61a   : > { %4059 = vmatmul.bf16.gmra.mxu3 %v3905_v32  ;;  %4148 = vmatmul.bf16.gmra.mxu0 %v3905_v32 }
 0x61b   : > { %v3826_v26 = vpop.f32.mrf.mxu2  ;;  %5278 = vmatpush.bf16.msra.mxu0 %v7744_v61 }
 0x61c   : > { %v3827_v24 = vadd.f32 %v10639_v56, %v3826_v26 }
 0x61e   : > { %v3882_v16 = vmax.f32 %v3827_v24, 0.0 }
 0x623   : > { %v3828_v18 = vpop.f32.mrf.mxu2 }
 0x624   : > { %v3829_v50 = vadd.f32 %v10639_v56, %v3828_v18 }
 0x626   : > { %v3883_v13 = vmax.f32 %v3829_v50, 0.0 }
 0x627   : > { %v4114_v15 = vpop.f32.mrf.mxu0 }
 0x628   : > { %v3906_v0 = vpack.c.bf16 %v3883_v13, %v3882_v16  ;;  %v4115_v34 = vadd.f32 %v4114_v15, %v10787_v8 }
 0x62a   : > { %4064 = vmatmul.bf16.gmra.mxu3 %v3906_v0  ;;  %4153 = vmatmul.bf16.gmra.mxu0 %v3906_v0  ;;  %v4195_v63 = vmax.f32 %v4115_v34, 0.0 }
 0x62b   : > { %v3831_v48 = vpop.f32.mrf.mxu2 }
 0x62c   : > { %v3832_v23 = vadd.f32 %v10639_v56, %v3831_v48 }
 0x62d   : > { %v4025_v30 = vpop.f32.mrf.mxu3 }
 0x62e   : > { %v4026_v3 = vadd.f32 %v4025_v30, %v10790_v57  ;;  %v3884_v14 = vmax.f32 %v3832_v23, 0.0 }
 0x62f   : > { %v4116_v37 = vpop.f32.mrf.mxu0 }
 0x630   : > { %v4117_v28 = vadd.f32 %v4116_v37, %v10787_v8  ;;  %v4194_v21 = vmax.f32 %v4026_v3, 0.0 }
 0x632   : > { %v4197_v60 = vmax.f32 %v4117_v28, 0.0 }
 0x633   : > { %v3833_v33 = vpop.f32.mrf.mxu2 }
 0x634   : > { %v10795_v44 = vpack.c.bf16 %v4197_v60, %v4195_v63  ;;  %v3834_v19 = vadd.f32 %v10639_v56, %v3833_v33 }
 0x635   : > { %v4027_v10 = vpop.f32.mrf.mxu3 }
 0x636   : > { %v3885_v52 = vmax.f32 %v3834_v19, 0.0  ;;  %v4028_v46 = vadd.f32 %v4027_v10, %v10790_v57  ;;  %5107 = vmatmul.bf16.vlgmr.msrb.gmra.mxu2 %v10795_v44 }
 0x637   : > { %v4119_v39 = vpop.f32.mrf.mxu0 }
 0x638   : > { %v4196_v6 = vmax.f32 %v4028_v46, 0.0  ;;  %v3907_v42 = vpack.c.bf16 %v3885_v52, %v3884_v14  ;;  %v4120_v36 = vadd.f32 %v4119_v39, %v10787_v8  ;;  %v7985_v46 = vld [vmem:[%s12439_s12 + $0x11c] sm:$0xf]  ;;  %v7489_v39 = vld [vmem:[%s12439_s12 + $0x134] sm:$0xf0] }
 0x63a   : > { %v10800_v62 = vpack.c.bf16 %v4196_v6, %v4194_v21  ;;  %4069 = vmatmul.bf16.gmra.mxu3 %v3907_v42  ;;  %4158 = vmatmul.bf16.gmra.mxu0 %v3907_v42  ;;  %v4199_v47 = vmax.f32 %v4120_v36, 0.0  ;;  %v7492_v6 = vor.u32 %v7985_v46, %v7489_v39  ;;  %v7719_v42 = vld [vmem:[%s12439_s12 + $0x2e0] sm:$0xf] }
 0x63b   : > { %v3836_v7 = vpop.f32.mrf.mxu2  ;;  %v7720_v12 = vor.u32 %v8045_v9, %v7719_v42  ;;  %v7971_v42 = vld [vmem:[%s12439_s12 + $0xac] sm:$0xf]  ;;  %v7433_v9 = vld [vmem:[%s12439_s12 + $0xc4] sm:$0xf0] }
 0x63c   : > { %5018 = vmatmul.bf16.vlgmr.msrb.gmra.mxu1 %v10800_v62  ;;  %v3837_v32 = vadd.f32 %v10639_v56, %v3836_v7  ;;  %5190 = vmatpush.bf16.msra.mxu3 %v7492_v6 }
 0x63d   : > { %v4030_v54 = vpop.f32.mrf.mxu3  ;;  %5457 = vmatpush.bf16.msra.mxu2 %v7720_v12  ;;  %v8027_v12 = vld [vmem:[%s12439_s12 + $0x26c] sm:$0xf] }
 0x63e   : > { %v4031_v4 = vadd.f32 %v4030_v54, %v10790_v57  ;;  %v3886_v1 = vmax.f32 %v3837_v32, 0.0  ;;  %v7496_v54 = vor.u32 %v7989_v11, %v7495_v43  ;;  %v8038_v43 = vld [vmem:[%s12439_s12 + $0x2c0] sm:$0xf0]  ;;  %v7436_v11 = vor.u32 %v7971_v42, %v7433_v9 }
 0x63f   : > { %v4121_v5 = vpop.f32.mrf.mxu0 }
 0x640   : > { %v4122_v41 = vadd.f32 %v4121_v5, %v10787_v8  ;;  %v4198_v17 = vmax.f32 %v4031_v4, 0.0  ;;  %5368 = vmatpush.bf16.msra.mxu1 %v7496_v54  ;;  %v7716_v5 = vor.u32 %v8041_v59, %v7713_v53  ;;  %v7467_v53 = vld [vmem:[%s12439_s12 + $0xe8] sm:$0xf] }
 0x642   : > { %v4201_v40 = vmax.f32 %v4122_v41, 0.0  ;;  %5279 = vmatpush.bf16.msra.mxu0 %v7716_v5  ;;  %v7982_v5 = vld [vmem:[%s12439_s12 + $0x100] sm:$0xf0] }
 0x643   : > { %v3838_v38 = vpop.f32.mrf.mxu2 }
 0x644   : > { %v10831_v26 = vpack.c.bf16 %v4201_v40, %v4199_v47  ;;  %v3839_v29 = vadd.f32 %v10639_v56, %v3838_v38 }
 0x645   : > { %v4032_v27 = vpop.f32.mrf.mxu3 }
 0x646   : > { %12766 = vst [vmem:[#allocation54_spill] sm:$0xff] %v10831_v26  ;;  %v3887_v31 = vmax.f32 %v3839_v29, 0.0  ;;  %v4033_v2 = vadd.f32 %v4032_v27, %v10790_v57  ;;  %5112 = vmatmul.bf16.gmra.mxu2 %v10831_v26 }
 0x647   : > { %v4124_v22 = vpop.f32.mrf.mxu0 }
 0x648   : > { %v4200_v20 = vmax.f32 %v4033_v2, 0.0  ;;  %v3908_v35 = vpack.c.bf16 %v3887_v31, %v3886_v1  ;;  %v4125_v16 = vadd.f32 %v4124_v22, %v10787_v8 }
 0x64a   : > { %v10836_v24 = vpack.c.bf16 %v4200_v20, %v4198_v17  ;;  %4074 = vmatmul.bf16.gmra.mxu3 %v3908_v35  ;;  %4163 = vmatmul.bf16.gmra.mxu0 %v3908_v35  ;;  %v4203_v15 = vmax.f32 %v4125_v16, 0.0 }
 0x64b   : > { %v3841_v18 = vpop.f32.mrf.mxu2 }
 0x64c   : > { %12767 = vst [vmem:[#allocation80_spill] sm:$0xff] %v10836_v24  ;;  %5023 = vmatmul.bf16.gmra.mxu1 %v10836_v24  ;;  %v3842_v0 = vadd.f32 %v10639_v56, %v3841_v18 }
 0x64d   : > { %v4035_v50 = vpop.f32.mrf.mxu3 }
 0x64e   : > { %v4036_v34 = vadd.f32 %v4035_v50, %v10790_v57  ;;  %v3888_v23 = vmax.f32 %v3842_v0, 0.0 }
 0x64f   : > { %v4126_v13 = vpop.f32.mrf.mxu0 }
 0x650   : > { %v4127_v45 = vadd.f32 %v4126_v13, %v10787_v8  ;;  %v4202_v19 = vmax.f32 %v4036_v34, 0.0 }
 0x652   : > { %v4205_v48 = vmax.f32 %v4127_v45, 0.0 }
 0x653   : > { %v3843_v30 = vpop.f32.mrf.mxu2 }
 0x654   : > { %v10843_v37 = vpack.c.bf16 %v4205_v48, %v4203_v15  ;;  %v3844_v28 = vadd.f32 %v10639_v56, %v3843_v30 }
 0x655   : > { %v4037_v63 = vpop.f32.mrf.mxu3 }
 0x656   : > { %v3889_v60 = vmax.f32 %v3844_v28, 0.0  ;;  %v4038_v33 = vadd.f32 %v4037_v63, %v10790_v57  ;;  %5117 = vmatmul.bf16.gmra.mxu2 %v10843_v37  ;;  %v7978_v28 = vld [vmem:[%s12439_s12 + $0xe4] sm:$0xf]  ;;  %v7461_v63 = vld [vmem:[%s12439_s12 + $0xfc] sm:$0xf0] }
 0x657   : > { %v4129_v3 = vpop.f32.mrf.mxu0 }
 0x658   : > { %v4204_v10 = vmax.f32 %v4038_v33, 0.0  ;;  %v3909_v14 = vpack.c.bf16 %v3889_v60, %v3888_v23  ;;  %v4130_v49 = vadd.f32 %v4129_v3, %v10787_v8  ;;  %v8034_v23 = vld [vmem:[%s12439_s12 + $0x2a4] sm:$0xf] }
 0x65a   : > { %v10848_v52 = vpack.c.bf16 %v4204_v10, %v4202_v19  ;;  %4079 = vmatmul.bf16.gmra.mxu3 %v3909_v14  ;;  %4168 = vmatmul.bf16.gmra.mxu0 %v3909_v14  ;;  %v4207_v58 = vmax.f32 %v4130_v49, 0.0  ;;  %v7464_v19 = vor.u32 %v7978_v28, %v7461_v63  ;;  %v7685_v10 = vld [vmem:[%s12439_s12 + $0x2bc] sm:$0xf0]  ;;  %v7691_v49 = vld [vmem:[%s12439_s12 + $0x2a8] sm:$0xf] }
 0x65b   : > { %v3846_v21 = vpop.f32.mrf.mxu2  ;;  %v7688_v46 = vor.u32 %v8034_v23, %v7685_v10  ;;  %v7692_v54 = vor.u32 %v8038_v43, %v7691_v49  ;;  %v7349_v28 = vld [vmem:[%s12439_s12 + $0x1c] sm:$0xf0]  ;;  %v8006_v63 = vld [vmem:[%s12439_s12 + $0x1c4] sm:$0xf] }
 0x65c   : > { %5028 = vmatmul.bf16.gmra.mxu1 %v10848_v52  ;;  %v3847_v41 = vadd.f32 %v10639_v56, %v3846_v21  ;;  %5191 = vmatpush.bf16.msra.mxu3 %v7464_v19 }
 0x65d   : > { %v4040_v7 = vpop.f32.mrf.mxu3  ;;  %5280 = vmatpush.bf16.msra.mxu0 %v7688_v46  ;;  %5458 = vmatpush.bf16.msra.mxu2 %v7692_v54 }
 0x65e   : > { %v4041_v61 = vadd.f32 %v4040_v7, %v10790_v57  ;;  %v3890_v38 = vmax.f32 %v3847_v41, 0.0  ;;  %v7468_v41 = vor.u32 %v7982_v5, %v7467_v53 }
 0x65f   : > { %v4131_v51 = vpop.f32.mrf.mxu0 }
 0x660   : > { %v4132_v36 = vadd.f32 %v4131_v51, %v10787_v8  ;;  %v4206_v1 = vmax.f32 %v4041_v61, 0.0  ;;  %5192 = vmatpush.bf16.msra.mxu3 %v7436_v11  ;;  %v8020_v61 = vld [vmem:[%s12439_s12 + $0x234] sm:$0xf]  ;;  %5369 = vmatpush.bf16.msra.mxu1 %v7468_v41  ;;  %v8163_v11 = vld [vmem:[%s12436_s9] ss:$0 sm:$0xff] }
 0x662   : > { %v4209_v55 = vmax.f32 %v4132_v36, 0.0  ;;  %v7657_v36 = vld [vmem:[%s12439_s12 + $0x284] sm:$0xf0] }
 0x663   : > { %v3848_v25 = vpop.f32.mrf.mxu2  ;;  %v7660_v59 = vor.u32 %v8027_v12, %v7657_v36 }
 0x664   : > { %v10879_v47 = vpack.c.bf16 %v4209_v55, %v4207_v58  ;;  %v3849_v32 = vadd.f32 %v10639_v56, %v3848_v25  ;;  %v7964_v55 = vld [vmem:[%s12439_s12 + $0x74] sm:$0xf]  ;;  %v7405_v25 = vld [vmem:[%s12439_s12 + $0x8c] sm:$0xf0] }
 0x665   : > { %v4042_v40 = vpop.f32.mrf.mxu3  ;;  %5281 = vmatpush.bf16.msra.mxu0 %v7660_v59 }
 0x666   : > { %v3891_v4 = vmax.f32 %v3849_v32, 0.0  ;;  %v4043_v29 = vadd.f32 %v4042_v40, %v10790_v57  ;;  %5122 = vmatmul.bf16.gmra.mxu2 %v10879_v47  ;;  %v7408_v40 = vor.u32 %v7964_v55, %v7405_v25 }
 0x667   : > { %v4134_v27 = vpop.f32.mrf.mxu0 }
 0x668   : > { %v4208_v31 = vmax.f32 %v4043_v29, 0.0  ;;  %v3910_v2 = vpack.c.bf16 %v3891_v4, %v3890_v38  ;;  %v4135_v35 = vadd.f32 %v4134_v27, %v10787_v8  ;;  %v7629_v38 = vld [vmem:[%s12439_s12 + $0x24c] sm:$0xf0]  ;;  %5193 = vmatpush.bf16.msra.mxu3 %v7408_v40 }
 0x669   : > { %v7632_v29 = vor.u32 %v8020_v61, %v7629_v38 }
 0x66a   : > { %v10884_v22 = vpack.c.bf16 %v4208_v31, %v4206_v1  ;;  %4084 = vmatmul.bf16.gmra.mxu3 %v3910_v2  ;;  %4173 = vmatmul.bf16.gmra.mxu0 %v3910_v2  ;;  %v4211_v16 = vmax.f32 %v4135_v35, 0.0  ;;  %v7957_v1 = vld [vmem:[%s12439_s12 + $0x3c] sm:$0xf]  ;;  %v7377_v31 = vld [vmem:[%s12439_s12 + $0x54] sm:$0xf0] }
 0x66b   : > { %v3851_v17 = vpop.f32.mrf.mxu2  ;;  %v8013_v2 = vld [vmem:[%s12439_s12 + $0x1fc] sm:$0xf]  ;;  %5282 = vmatpush.bf16.msra.mxu0 %v7632_v29  ;;  %v7663_v29 = vld [vmem:[%s12439_s12 + $0x270] sm:$0xf] }
 0x66c   : > { %5033 = vmatmul.bf16.gmra.mxu1 %v10884_v22  ;;  %v3852_v13 = vadd.f32 %v10639_v56, %v3851_v17 }
 0x66d   : > { %v4045_v20 = vpop.f32.mrf.mxu3 }
 0x66e   : > { %v4046_v0 = vadd.f32 %v4045_v20, %v10790_v57  ;;  %v3892_v60 = vmax.f32 %v3852_v13, 0.0 }
 0x66f   : > { %v4136_v18 = vpop.f32.mrf.mxu0 }
 0x670   : > { %v4137_v50 = vadd.f32 %v4136_v18, %v10787_v8  ;;  %v4210_v39 = vmax.f32 %v4046_v0, 0.0  ;;  %v7380_v18 = vor.u32 %v7957_v1, %v7377_v31  ;;  %v7439_v31 = vld [vmem:[%s12439_s12 + $0xb0] sm:$0xf] }
 0x672   : > { %v4213_v45 = vmax.f32 %v4137_v50, 0.0  ;;  %v7601_v50 = vld [vmem:[%s12439_s12 + $0x214] sm:$0xf0]  ;;  %5194 = vmatpush.bf16.msra.mxu3 %v7380_v18 }
 0x673   : > { %v3853_v15 = vpop.f32.mrf.mxu2  ;;  %v7604_v13 = vor.u32 %v8013_v2, %v7601_v50  ;;  %v7975_v2 = vld [vmem:[%s12439_s12 + $0xc8] sm:$0xf0] }
 0x674   : > { %v10891_v48 = vpack.c.bf16 %v4213_v45, %v4211_v16  ;;  %v3854_v30 = vadd.f32 %v10639_v56, %v3853_v15 }
 0x675   : > { %v4047_v34 = vpop.f32.mrf.mxu3  ;;  %5283 = vmatpush.bf16.msra.mxu0 %v7604_v13 }
 0x676   : > { %v3893_v33 = vmax.f32 %v3854_v30, 0.0  ;;  %v4048_v3 = vadd.f32 %v4047_v34, %v10790_v57  ;;  %5127 = vmatmul.bf16.gmra.mxu2 %v10891_v48  ;;  %v7950_v34 = vld [vmem:[%s12439_s12 + $0x4] sm:$0xf] }
 0x677   : > { %v4139_v14 = vpop.f32.mrf.mxu0 }
 0x678   : > { %v4212_v21 = vmax.f32 %v4048_v3, 0.0  ;;  %v3911_v6 = vpack.c.bf16 %v3893_v33, %v3892_v60  ;;  %v4140_v32 = vadd.f32 %v4139_v14, %v10787_v8  ;;  %v7573_v3 = vld [vmem:[%s12439_s12 + $0x1dc] sm:$0xf0] }
 0x679   : > { %v7576_v10 = vor.u32 %v8006_v63, %v7573_v3 }
 0x67a   : > { %v10917_v7 = vpack.c.bf16 %v4212_v21, %v4210_v39  ;;  %4089 = vmatmul.bf16.gmra.mxu3 %v3911_v6  ;;  %4178 = vmatmul.bf16.gmra.mxu0 %v3911_v6  ;;  %v4215_v17 = vmax.f32 %v4140_v32, 0.0 }
 0x67b   : > { %v3856_v51 = vpop.f32.mrf.mxu2  ;;  %5284 = vmatpush.bf16.msra.mxu0 %v7576_v10 }
 0x67c   : > { %5038 = vmatmul.bf16.gmra.mxu1 %v10917_v7  ;;  %v3857_v20 = vadd.f32 %v10639_v56, %v3856_v51 }
 0x67d   : > { %v4050_v58 = vpop.f32.mrf.mxu3 }
 0x67e   : > { %v4051_v45 = vadd.f32 %v4050_v58, %v10790_v57  ;;  %v3894_v23 = vmax.f32 %v3857_v20, 0.0  ;;  %v7440_v20 = vor.u32 %v7975_v2, %v7439_v31 }
 0x67f   : > { %v4141_v4 = vpop.f32.mrf.mxu0 }
 0x680   : > { %v4142_v27 = vadd.f32 %v4141_v4, %v10787_v8  ;;  %v4214_v14 = vmax.f32 %v4051_v45, 0.0  ;;  %5370 = vmatpush.bf16.msra.mxu1 %v7440_v20 }
 0x682   : > { %v4217_v35 = vmax.f32 %v4142_v27, 0.0  ;;  %v8031_v27 = vld [vmem:[%s12439_s12 + $0x288] sm:$0xf0] }
 0x683   : > { %v3858_v16 = vpop.f32.mrf.mxu2  ;;  %v7664_v1 = vor.u32 %v8031_v27, %v7663_v29 }
 0x684   : > { %v10963_v15 = vpack.c.bf16 %v4217_v35, %v4215_v17  ;;  %v3859_v0 = vadd.f32 %v10639_v56, %v3858_v16  ;;  %v7352_v56 = vor.u32 %v7950_v34, %v7349_v28 }
 0x685   : > { %v4052_v30 = vpop.f32.mrf.mxu3  ;;  %5459 = vmatpush.bf16.msra.mxu2 %v7664_v1 }
 0x686   : > { %v3895_v60 = vmax.f32 %v3859_v0, 0.0  ;;  %v4053_v33 = vadd.f32 %v4052_v30, %v10790_v57  ;;  %5132 = vmatmul.bf16.gmra.mxu2 %v10963_v15  ;;  %5195 = vmatpush.bf16.msra.mxu3 %v7352_v56 }
 0x687   : > { %v4144_v19 = vpop.f32.mrf.mxu0 }
 0x688   : > { %v4216_v46 = vmax.f32 %v4053_v33, 0.0  ;;  %v3912_v39 = vpack.c.bf16 %v3895_v60, %v3894_v23  ;;  %v4145_v9 = vadd.f32 %v4144_v19, %v10787_v8 }
 0x68a   : > { %v10980_v21 = vpack.c.bf16 %v4216_v46, %v4214_v14  ;;  %4094 = vmatmul.bf16.gmra.mxu3 %v3912_v39  ;;  %4183 = vmatmul.bf16.gmra.mxu0 %v3912_v39  ;;  %v4219_v43 = vmax.f32 %v4145_v9, 0.0  ;;  %v11025_v46 = vld [vmem:[%s12440_s13] sm:$0x7f] }
 0x68b   : > { %v3861_v6 = vpop.f32.mrf.mxu2 }
 0x68c   : > { %12768 = vst [vmem:[#allocation10_spill] sm:$0xff] %v10980_v21  ;;  %5043 = vmatmul.bf16.gmra.mxu1 %v10980_v21  ;;  %v3862_v51 = vadd.f32 %v8163_v11, %v3861_v6 }
 0x68d   : > { %v4055_v42 = vpop.f32.mrf.mxu3 }
 0x68e   : > { %v4056_v59 = vadd.f32 %v4055_v42, %v10790_v57  ;;  %v3896_v41 = vmax.f32 %v3862_v51, 0.0 }
 0x68f   : > { %v4146_v12 = vpop.f32.mrf.mxu0 }
 0x690   : > { %v4147_v49 = vadd.f32 %v4146_v12, %v10787_v8  ;;  %v4218_v32 = vmax.f32 %v4056_v59, 0.0  ;;  %v11033_v12 = vperm.slane %v11025_v46, 0 }
 0x692   : > { %v4221_v54 = vmax.f32 %v4147_v49, 0.0 }
 0x693   : > { %v3863_v36 = vpop.f32.mrf.mxu2 }
 0x694   : > { %v10989_v53 = vpack.c.bf16 %v4221_v54, %v4219_v43  ;;  %v3864_v5 = vadd.f32 %v8163_v11, %v3863_v36 }
 0x695   : > { %v4057_v58 = vpop.f32.mrf.mxu3 }
 0x696   : > { %v3897_v55 = vmax.f32 %v3864_v5, 0.0  ;;  %v4058_v25 = vadd.f32 %v4057_v58, %v10790_v57  ;;  %5137 = vmatmul.bf16.gmra.mxu2 %v10989_v53  ;;  %v7635_v5 = vld [vmem:[%s12439_s12 + $0x238] sm:$0xf]  ;;  %v8024_v58 = vld [vmem:[%s12439_s12 + $0x250] sm:$0xf0] }
 0x697   : > { %v4149_v61 = vpop.f32.mrf.mxu0 }
 0x698   : > { %v4220_v40 = vmax.f32 %v4058_v25, 0.0  ;;  %v3913_v38 = vpack.c.bf16 %v3897_v55, %v3896_v41  ;;  %v4150_v35 = vadd.f32 %v4149_v61, %v10787_v8  ;;  %v7636_v41 = vor.u32 %v8024_v58, %v7635_v5  ;;  %v7411_v25 = vld [vmem:[%s12439_s12 + $0x78] sm:$0xf]  ;;  %v7968_v61 = vld [vmem:[%s12439_s12 + $0x90] sm:$0xf0] }
 0x69a   : > { %v10993_v4 = vpack.c.bf16 %v4220_v40, %v4218_v32  ;;  %4099 = vmatmul.bf16.gmra.mxu3 %v3913_v38  ;;  %4188 = vmatmul.bf16.gmra.mxu0 %v3913_v38  ;;  %v4223_v16 = vmax.f32 %v4150_v35, 0.0  ;;  %v7412_v40 = vor.u32 %v7968_v61, %v7411_v25 }
 0x69b   : > { %5460 = vmatpush.bf16.msra.mxu2 %v7636_v41 }
 0x69c   : > { %12769 = vst [vmem:[#allocation8_spill] sm:$0xff] %v10993_v4  ;;  %5048 = vmatmul.bf16.gmra.mxu1 %v10993_v4 }
 0x69d   : > { %v4060_v17 = vpop.f32.mrf.mxu3  ;;  %5371 = vmatpush.bf16.msra.mxu1 %v7412_v40 }
 0x69e   : > { %v4061_v45 = vadd.f32 %v4060_v17, %v10790_v57 }
 0x69f   : > { %v4151_v18 = vpop.f32.mrf.mxu0 }
 0x6a0   : > { %v4152_v50 = vadd.f32 %v4151_v18, %v10787_v8  ;;  %v4222_v63 = vmax.f32 %v4061_v45, 0.0 }
 0x6a2   : > { %v4225_v13 = vmax.f32 %v4152_v50, 0.0 }
 0x6a4   : > { %v11011_v0 = vpack.c.bf16 %v4225_v13, %v4223_v16 }
 0x6a5   : > { %v4062_v30 = vpop.f32.mrf.mxu3 }
 0x6a6   : > { %12770 = vst [vmem:[#allocation82_spill] sm:$0xff] %v11011_v0  ;;  %v4063_v34 = vadd.f32 %v4062_v30, %v10790_v57  ;;  %5142 = vmatmul.bf16.gmra.mxu2 %v11011_v0 }
 0x6a7   : > { %v4154_v28 = vpop.f32.mrf.mxu0 }
 0x6a8   : > { %v4224_v23 = vmax.f32 %v4063_v34, 0.0  ;;  %v4155_v56 = vadd.f32 %v4154_v28, %v10787_v8 }
 0x6aa   : > { %v11015_v60 = vpack.c.bf16 %v4224_v23, %v4222_v63  ;;  %5196 = vmatmul.bf16.vlgmr.msra.gmra.mxu3 %v10800_v62  ;;  %5285 = vmatmul.bf16.vlgmr.msra.gmra.mxu0 %v10795_v44  ;;  %v4227_v10 = vmax.f32 %v4155_v56, 0.0 }
 0x6ac   : > { %12771 = vst [vmem:[#allocation13_spill] sm:$0xff] %v11015_v60  ;;  %5053 = vmatmul.bf16.gmra.mxu1 %v11015_v60 }
 0x6ad   : > { %v4065_v33 = vpop.f32.mrf.mxu3 }
 0x6ae   : > { %v4066_v39 = vadd.f32 %v4065_v33, %v10790_v57 }
 0x6af   : > { %v4156_v3 = vpop.f32.mrf.mxu0 }
 0x6b0   : > { %v4157_v19 = vadd.f32 %v4156_v3, %v10787_v8  ;;  %v4226_v43 = vmax.f32 %v4066_v39, 0.0 }
 0x6b2   : > { %v4229_v14 = vmax.f32 %v4157_v19, 0.0 }
 0x6b4   : > { %v11028_v6 = vpack.c.bf16 %v4229_v14, %v4227_v10 }
 0x6b5   : > { %v4067_v42 = vpop.f32.mrf.mxu3 }
 0x6b6   : > { %v4068_v9 = vadd.f32 %v4067_v42, %v10790_v57  ;;  %5147 = vmatmul.bf16.gmra.mxu2 %v11028_v6 }
 0x6b7   : > { %v4159_v49 = vpop.f32.mrf.mxu0 }
 0x6b8   : > { %v4228_v11 = vmax.f32 %v4068_v9, 0.0  ;;  %v4160_v38 = vadd.f32 %v4159_v49, %v10787_v8 }
 0x6b9   : > { %v5019_v51 = vpop.f32.mrf.mxu1  ;;  %v5108_v54 = vpop.f32.mrf.mxu2 }
 0x6ba   : > { %v11035_v36 = vpack.c.bf16 %v4228_v11, %v4226_v43  ;;  %v5020_v59 = vadd.f32 %v5019_v51, %v11033_v12  ;;  %5201 = vmatmul.bf16.gmra.mxu3 %v10836_v24  ;;  %5290 = vmatmul.bf16.gmra.mxu0 %v10831_v26  ;;  %v4231_v2 = vmax.f32 %v4160_v38, 0.0 }
 0x6bc   : > { %v11046_v55 = vadd.f32 %v5108_v54, %v5020_v59  ;;  %5058 = vmatmul.bf16.gmra.mxu1 %v11035_v36 }
 0x6bd   : > { %v4070_v32 = vpop.f32.mrf.mxu3 }
 0x6be   : > { %v4071_v35 = vadd.f32 %v4070_v32, %v10790_v57 }
 0x6bf   : > { %v4161_v29 = vpop.f32.mrf.mxu0 }
 0x6c0   : > { %v4162_v27 = vadd.f32 %v4161_v29, %v10787_v8  ;;  %v4230_v30 = vmax.f32 %v4071_v35, 0.0  ;;  %v7607_v29 = vld [vmem:[%s12439_s12 + $0x200] sm:$0xf] }
 0x6c1   : > { %v5021_v1 = vpop.f32.mrf.mxu1  ;;  %v5110_v31 = vpop.f32.mrf.mxu2 }
 0x6c2   : > { %v4233_v17 = vmax.f32 %v4162_v27, 0.0  ;;  %v5022_v20 = vadd.f32 %v5021_v1, %v11033_v12  ;;  %v8017_v27 = vld [vmem:[%s12439_s12 + $0x218] sm:$0xf0] }
 0x6c3   : > { %v7608_v1 = vor.u32 %v8017_v27, %v7607_v29 }
 0x6c4   : > { %v11059_v18 = vpack.c.bf16 %v4233_v17, %v4231_v2  ;;  %v11061_v50 = vadd.f32 %v5110_v31, %v5022_v20  ;;  %v7383_v2 = vld [vmem:[%s12439_s12 + $0x40] sm:$0xf]  ;;  %v7961_v17 = vld [vmem:[%s12439_s12 + $0x58] sm:$0xf0] }
 0x6c5   : > { %v4072_v16 = vpop.f32.mrf.mxu3  ;;  %5461 = vmatpush.bf16.msra.mxu2 %v7608_v1  ;;  %v7384_v35 = vor.u32 %v7961_v17, %v7383_v2 }
 0x6c6   : > { %v4073_v13 = vadd.f32 %v4072_v16, %v10790_v57  ;;  %5152 = vmatmul.bf16.gmra.mxu2 %v11059_v18 }
 0x6c7   : > { %v4164_v45 = vpop.f32.mrf.mxu0  ;;  %5372 = vmatpush.bf16.msra.mxu1 %v7384_v35 }
 0x6c8   : > { %v4232_v34 = vmax.f32 %v4073_v13, 0.0  ;;  %v4165_v19 = vadd.f32 %v4164_v45, %v10787_v8 }
 0x6c9   : > { %v5024_v28 = vpop.f32.mrf.mxu1  ;;  %v5113_v63 = vpop.f32.mrf.mxu2 }
 0x6ca   : > { %v11065_v23 = vpack.c.bf16 %v4232_v34, %v4230_v30  ;;  %v5025_v33 = vadd.f32 %v5024_v28, %v11033_v12  ;;  %5206 = vmatmul.bf16.gmra.mxu3 %v10848_v52  ;;  %5295 = vmatmul.bf16.gmra.mxu0 %v10843_v37  ;;  %v4235_v9 = vmax.f32 %v4165_v19, 0.0 }
 0x6cc   : > { %v11070_v56 = vadd.f32 %v5113_v63, %v5025_v33  ;;  %5063 = vmatmul.bf16.gmra.mxu1 %v11065_v23 }
 0x6cd   : > { %v4075_v3 = vpop.f32.mrf.mxu3 }
 0x6ce   : > { %v4076_v11 = vadd.f32 %v4075_v3, %v10790_v57 }
 0x6cf   : > { %v4166_v10 = vpop.f32.mrf.mxu0 }
 0x6d0   : > { %v4167_v14 = vadd.f32 %v4166_v10, %v10787_v8  ;;  %v4234_v41 = vmax.f32 %v4076_v11, 0.0 }
 0x6d1   : > { %v5026_v39 = vpop.f32.mrf.mxu1  ;;  %v5115_v42 = vpop.f32.mrf.mxu2 }
 0x6d2   : > { %v4237_v49 = vmax.f32 %v4167_v14, 0.0  ;;  %v5027_v43 = vadd.f32 %v5026_v39, %v11033_v12 }
 0x6d4   : > { %v11077_v51 = vpack.c.bf16 %v4237_v49, %v4235_v9  ;;  %v11079_v54 = vadd.f32 %v5115_v42, %v5027_v43 }
 0x6d5   : > { %v4077_v59 = vpop.f32.mrf.mxu3 }
 0x6d6   : > { %v4078_v5 = vadd.f32 %v4077_v59, %v10790_v57  ;;  %5157 = vmatmul.bf16.gmra.mxu2 %v11077_v51 }
 0x6d7   : > { %v4169_v58 = vpop.f32.mrf.mxu0 }
 0x6d8   : > { %v4236_v25 = vmax.f32 %v4078_v5, 0.0  ;;  %v4170_v16 = vadd.f32 %v4169_v58, %v10787_v8 }
 0x6d9   : > { %v5029_v61 = vpop.f32.mrf.mxu1  ;;  %v5118_v32 = vpop.f32.mrf.mxu2 }
 0x6da   : > { %v11083_v40 = vpack.c.bf16 %v4236_v25, %v4234_v41  ;;  %v5030_v38 = vadd.f32 %v5029_v61, %v11033_v12  ;;  %5211 = vmatmul.bf16.gmra.mxu3 %v10884_v22  ;;  %5300 = vmatmul.bf16.gmra.mxu0 %v10879_v47  ;;  %v4239_v28 = vmax.f32 %v4170_v16, 0.0 }
 0x6dc   : > { %v11094_v31 = vadd.f32 %v5118_v32, %v5030_v38  ;;  %5068 = vmatmul.bf16.gmra.mxu1 %v11083_v40 }
 0x6dd   : > { %v4080_v20 = vpop.f32.mrf.mxu3 }
 0x6de   : > { %v4081_v3 = vadd.f32 %v4080_v20, %v10790_v57 }
 0x6df   : > { %v4171_v13 = vpop.f32.mrf.mxu0 }
 0x6e0   : > { %v4172_v45 = vadd.f32 %v4171_v13, %v10787_v8  ;;  %v4238_v9 = vmax.f32 %v4081_v3, 0.0 }
 0x6e1   : > { %v5031_v30 = vpop.f32.mrf.mxu1  ;;  %v5120_v34 = vpop.f32.mrf.mxu2 }
 0x6e2   : > { %v4241_v63 = vmax.f32 %v4172_v45, 0.0  ;;  %v5032_v33 = vadd.f32 %v5031_v30, %v11033_v12 }
 0x6e4   : > { %v11107_v19 = vpack.c.bf16 %v4241_v63, %v4239_v28  ;;  %v11109_v10 = vadd.f32 %v5120_v34, %v5032_v33 }
 0x6e5   : > { %v4082_v14 = vpop.f32.mrf.mxu3 }
 0x6e6   : > { %v4083_v39 = vadd.f32 %v4082_v14, %v10790_v57  ;;  %5162 = vmatmul.bf16.gmra.mxu2 %v11107_v19  ;;  %v7579_v14 = vld [vmem:[%s12439_s12 + $0x1c8] sm:$0xf] }
 0x6e7   : > { %v4174_v42 = vpop.f32.mrf.mxu0 }
 0x6e8   : > { %v4240_v49 = vmax.f32 %v4083_v39, 0.0  ;;  %v4175_v25 = vadd.f32 %v4174_v42, %v10787_v8  ;;  %v8010_v39 = vld [vmem:[%s12439_s12 + $0x1e0] sm:$0xf0] }
 0x6e9   : > { %v5034_v43 = vpop.f32.mrf.mxu1  ;;  %v5123_v11 = vpop.f32.mrf.mxu2  ;;  %v7580_v42 = vor.u32 %v8010_v39, %v7579_v14 }
 0x6ea   : > { %v11113_v59 = vpack.c.bf16 %v4240_v49, %v4238_v9  ;;  %v5035_v5 = vadd.f32 %v5034_v43, %v11033_v12  ;;  %5216 = vmatmul.bf16.gmra.mxu3 %v10917_v7  ;;  %5305 = vmatmul.bf16.gmra.mxu0 %v10891_v48  ;;  %v4243_v27 = vmax.f32 %v4175_v25, 0.0  ;;  %v7355_v49 = vld [vmem:[%s12439_s12 + $0x8] sm:$0xf]  ;;  %v7954_v43 = vld [vmem:[%s12439_s12 + $0x20] sm:$0xf0] }
 0x6eb   : > { %5462 = vmatpush.bf16.msra.mxu2 %v7580_v42 }
 0x6ec   : > { %12772 = vst [vmem:[#allocation58_spill] sm:$0xff] %v11113_v59  ;;  %v11118_v58 = vadd.f32 %v5123_v11, %v5035_v5  ;;  %5073 = vmatmul.bf16.gmra.mxu1 %v11113_v59  ;;  %v7356_v5 = vor.u32 %v7954_v43, %v7355_v49 }
 0x6ed   : > { %v4085_v41 = vpop.f32.mrf.mxu3 }
 0x6ee   : > { %v4086_v17 = vadd.f32 %v4085_v41, %v10790_v57  ;;  %5373 = vmatpush.bf16.msra.mxu1 %v7356_v5 }
 0x6ef   : > { %v4176_v61 = vpop.f32.mrf.mxu0 }
 0x6f0   : > { %v4177_v32 = vadd.f32 %v4176_v61, %v10787_v8  ;;  %v4242_v30 = vmax.f32 %v4086_v17, 0.0 }
 0x6f1   : > { %v5036_v38 = vpop.f32.mrf.mxu1  ;;  %v5125_v29 = vpop.f32.mrf.mxu2 }
 0x6f2   : > { %v4245_v1 = vmax.f32 %v4177_v32, 0.0  ;;  %v5037_v2 = vadd.f32 %v5036_v38, %v11033_v12 }
 0x6f4   : > { %v11125_v20 = vpack.c.bf16 %v4245_v1, %v4243_v27  ;;  %v11127_v35 = vadd.f32 %v5125_v29, %v5037_v2 }
 0x6f5   : > { %v4087_v16 = vpop.f32.mrf.mxu3 }
 0x6f6   : > { %v4088_v13 = vadd.f32 %v4087_v16, %v10790_v57  ;;  %5167 = vmatmul.bf16.gmra.mxu2 %v11125_v20 }
 0x6f7   : > { %v4179_v45 = vpop.f32.mrf.mxu0 }
 0x6f8   : > { %v4244_v34 = vmax.f32 %v4088_v13, 0.0  ;;  %v4180_v41 = vadd.f32 %v4179_v45, %v10787_v8 }
 0x6f9   : > { %v5039_v28 = vpop.f32.mrf.mxu1  ;;  %v5128_v63 = vpop.f32.mrf.mxu2 }
 0x6fa   : > { %v11131_v33 = vpack.c.bf16 %v4244_v34, %v4242_v30  ;;  %v5040_v3 = vadd.f32 %v5039_v28, %v11033_v12  ;;  %5221 = vmatmul.bf16.gmra.mxu3 %v10980_v21  ;;  %5310 = vmatmul.bf16.gmra.mxu0 %v10963_v15  ;;  %v4247_v29 = vmax.f32 %v4180_v41, 0.0 }
 0x6fc   : > { %v11142_v9 = vadd.f32 %v5128_v63, %v5040_v3  ;;  %5078 = vmatmul.bf16.gmra.mxu1 %v11131_v33 }
 0x6fd   : > { %v4090_v11 = vpop.f32.mrf.mxu3 }
 0x6fe   : > { %v4091_v2 = vadd.f32 %v4090_v11, %v10790_v57 }
 0x6ff   : > { %v4181_v25 = vpop.f32.mrf.mxu0 }
 0x700   : > { %v4182_v61 = vadd.f32 %v4181_v25, %v10787_v8  ;;  %v4246_v34 = vmax.f32 %v4091_v2, 0.0 }
 0x701   : > { %v5041_v32 = vpop.f32.mrf.mxu1  ;;  %v5130_v38 = vpop.f32.mrf.mxu2 }
 0x702   : > { %v4249_v27 = vmax.f32 %v4182_v61, 0.0  ;;  %v5042_v1 = vadd.f32 %v5041_v32, %v11033_v12 }
 0x704   : > { %v11155_v17 = vpack.c.bf16 %v4249_v27, %v4247_v29  ;;  %v11157_v16 = vadd.f32 %v5130_v38, %v5042_v1 }
 0x705   : > { %v4092_v13 = vpop.f32.mrf.mxu3 }
 0x706   : > { %v4093_v30 = vadd.f32 %v4092_v13, %v10790_v57  ;;  %5172 = vmatmul.bf16.gmra.mxu2 %v11155_v17 }
 0x707   : > { %v4184_v45 = vpop.f32.mrf.mxu0 }
 0x708   : > { %v4248_v28 = vmax.f32 %v4093_v30, 0.0  ;;  %v4185_v43 = vadd.f32 %v4184_v45, %v10787_v8 }
 0x709   : > { %v5044_v63 = vpop.f32.mrf.mxu1  ;;  %v5133_v3 = vpop.f32.mrf.mxu2 }
 0x70a   : > { %v11161_v14 = vpack.c.bf16 %v4248_v28, %v4246_v34  ;;  %v5045_v39 = vadd.f32 %v5044_v63, %v11033_v12  ;;  %5226 = vmatmul.bf16.gmra.mxu3 %v10993_v4  ;;  %5315 = vmatmul.bf16.gmra.mxu0 %v10989_v53  ;;  %v4251_v61 = vmax.f32 %v4185_v43, 0.0  ;;  %v8000_v43 = vld [vmem:[%s12439_s12 + $0x194] sm:$0xf] }
 0x70c   : > { %v11166_v42 = vadd.f32 %v5133_v3, %v5045_v39  ;;  %5083 = vmatmul.bf16.gmra.mxu1 %v11161_v14 }
 0x70d   : > { %v4095_v49 = vpop.f32.mrf.mxu3 }
 0x70e   : > { %v4096_v29 = vadd.f32 %v4095_v49, %v10790_v57 }
 0x70f   : > { %v4186_v11 = vpop.f32.mrf.mxu0 }
 0x710   : > { %v4187_v5 = vadd.f32 %v4186_v11, %v10787_v8  ;;  %v4250_v45 = vmax.f32 %v4096_v29, 0.0  ;;  %v7553_v11 = vld [vmem:[%s12439_s12 + $0x1ac] sm:$0xf0] }
 0x711   : > { %v5046_v41 = vpop.f32.mrf.mxu1  ;;  %v5135_v25 = vpop.f32.mrf.mxu2 }
 0x712   : > { %v4253_v32 = vmax.f32 %v4187_v5, 0.0  ;;  %v5047_v38 = vadd.f32 %v5046_v41, %v11033_v12  ;;  %v7783_v5 = vld [vmem:[%s12439_s12 + $0x358] sm:$0xf] }
 0x714   : > { %v11173_v27 = vpack.c.bf16 %v4253_v32, %v4251_v61  ;;  %v11175_v1 = vadd.f32 %v5135_v25, %v5047_v38  ;;  %v7556_v25 = vor.u32 %v8000_v43, %v7553_v11  ;;  %v8060_v61 = vld [vmem:[%s12439_s12 + $0x370] sm:$0xf0]  ;;  %v7559_v32 = vld [vmem:[%s12439_s12 + $0x198] sm:$0xf] }
 0x715   : > { %v4097_v2 = vpop.f32.mrf.mxu3  ;;  %v8004_v38 = vld [vmem:[%s12439_s12 + $0x1b0] sm:$0xf0] }
 0x716   : > { %v4098_v13 = vadd.f32 %v4097_v2, %v10790_v57  ;;  %5177 = vmatmul.bf16.gmra.mxu2 %v11173_v27  ;;  %v7784_v2 = vor.u32 %v8060_v61, %v7783_v5  ;;  %5544 = vmatpush.bf16.msrb.mxu3 %v7556_v25 }
 0x717   : > { %v4189_v30 = vpop.f32.mrf.mxu0 }
 0x718   : > { %v4252_v34 = vmax.f32 %v4098_v13, 0.0  ;;  %v4190_v29 = vadd.f32 %v4189_v30, %v10787_v8  ;;  %v7560_v13 = vor.u32 %v8004_v38, %v7559_v32  ;;  %5811 = vmatpush.bf16.msrb.mxu2 %v7784_v2  ;;  %v8056_v30 = vld [vmem:[%s12439_s12 + $0x354] sm:$0xf] }
 0x719   : > { %v5049_v28 = vpop.f32.mrf.mxu1  ;;  %v5138_v63 = vpop.f32.mrf.mxu2 }
 0x71a   : > { %v11179_v3 = vpack.c.bf16 %v4252_v34, %v4250_v45  ;;  %v5050_v39 = vadd.f32 %v5049_v28, %v11033_v12  ;;  %5231 = vmatmul.bf16.gmra.mxu3 %v11015_v60  ;;  %5320 = vmatmul.bf16.gmra.mxu0 %v11011_v0 }
 0x71b   : > { %5722 = vmatpush.bf16.msrb.mxu1 %v7560_v13 }
 0x71c   : > { %v11184_v49 = vadd.f32 %v5138_v63, %v5050_v39  ;;  %5088 = vmatmul.bf16.gmra.mxu1 %v11179_v3  ;;  %v4255_v39 = vmax.f32 %v4190_v29, 0.0 }
 0x71d   : > { %v4100_v41 = vpop.f32.mrf.mxu3 }
 0x71e   : > { %v4101_v60 = vadd.f32 %v4100_v41, %v10790_v57 }
 0x71f   : > { %v4191_v45 = vpop.f32.mrf.mxu0 }
 0x720   : > { %v4192_v34 = vadd.f32 %v4191_v45, %v10787_v8  ;;  %v7777_v8 = vld [vmem:[%s12439_s12 + $0x36c] sm:$0xf0]  ;;  %v4254_v32 = vmax.f32 %v4101_v60, 0.0 }
 0x721   : > { %v5051_v28 = vpop.f32.mrf.mxu1  ;;  %v5140_v63 = vpop.f32.mrf.mxu2  ;;  %v7780_v25 = vor.u32 %v8056_v30, %v7777_v8 }
 0x722   : > { %v4257_v43 = vmax.f32 %v4192_v34, 0.0  ;;  %v5052_v11 = vadd.f32 %v5051_v28, %v11033_v12  ;;  %v11227_v34 = vperm.slane %v11025_v46, 1 }
 0x723   : > { %5633 = vmatpush.bf16.msrb.mxu0 %v7780_v25 }
 0x724   : > { %v11209_v0 = vpack.c.bf16 %v4257_v43, %v4255_v39  ;;  %v11211_v4 = vadd.f32 %v5140_v63, %v5052_v11 }
 0x725   : > { %v4102_v5 = vpop.f32.mrf.mxu3 }
 0x726   : > { %v4103_v61 = vadd.f32 %v4102_v5, %v10790_v57  ;;  %5182 = vmatmul.bf16.gmra.mxu2 %v11209_v0 }
 0x727   : > { %v5286_v41 = vpop.f32.mrf.mxu0 }
 0x728   : > { %v4256_v38 = vmax.f32 %v4103_v61, 0.0 }
 0x729   : > { %v5054_v29 = vpop.f32.mrf.mxu1  ;;  %v5143_v2 = vpop.f32.mrf.mxu2 }
 0x72a   : > { %v11221_v13 = vpack.c.bf16 %v4256_v38, %v4254_v32  ;;  %v5055_v45 = vadd.f32 %v5054_v29, %v11033_v12  ;;  %5236 = vmatmul.bf16.gmra.mxu3 %v11035_v36  ;;  %5325 = vmatmul.bf16.gmra.mxu0 %v11028_v6 }
 0x72c   : > { %v11229_v57 = vadd.f32 %v5143_v2, %v5055_v45  ;;  %5093 = vmatmul.bf16.gmra.mxu1 %v11221_v13  ;;  %v7993_v45 = vld [vmem:[%s12439_s12 + $0x15c] sm:$0xf] }
 0x72d   : > { %v5197_v60 = vpop.f32.mrf.mxu3 }
 0x72e   : > { %v5198_v28 = vadd.f32 %v5197_v60, %v11227_v34  ;;  %v7525_v60 = vld [vmem:[%s12439_s12 + $0x174] sm:$0xf0] }
 0x72f   : > { %v5288_v63 = vpop.f32.mrf.mxu0 }
 0x730   : > { %v5287_v39 = vadd.f32 %v5286_v41, %v5198_v28  ;;  %v7528_v28 = vor.u32 %v7993_v45, %v7525_v60  ;;  %v8049_v60 = vld [vmem:[%s12439_s12 + $0x31c] sm:$0xf] }
 0x731   : > { %v5056_v43 = vpop.f32.mrf.mxu1  ;;  %v5145_v11 = vpop.f32.mrf.mxu2 }
 0x732   : > { %v6256_v46 = vpack.c.bf16 %v5287_v39, %v11046_v55  ;;  %v5057_v30 = vadd.f32 %v5056_v43, %v11033_v12  ;;  %v8053_v39 = vld [vmem:[%s12439_s12 + $0x338] sm:$0xf0]  ;;  %v7531_v43 = vld [vmem:[%s12439_s12 + $0x160] sm:$0xf]  ;;  %5545 = vmatpush.bf16.msrb.mxu3 %v7528_v28 }
 0x734   : > { %6384 = vst [vmem:[%s11237_s17] sm:$0xff] %v6256_v46  ;;  %v11242_v8 = vadd.f32 %v5145_v11, %v5057_v30  ;;  %v7997_v30 = vld [vmem:[%s12439_s12 + $0x178] sm:$0xf0] }
 0x735   : > { %v5199_v5 = vpop.f32.mrf.mxu3 }
 0x736   : > { %v5200_v25 = vadd.f32 %v5199_v5, %v11227_v34  ;;  %5463 = vmatmul.bf16.vlgmr.msra.gmra.mxu2 %v10795_v44 }
 0x737   : > { %v5291_v61 = vpop.f32.mrf.mxu0 }
 0x738   : > { %v5289_v41 = vadd.f32 %v5288_v63, %v5200_v25  ;;  %v7755_v63 = vld [vmem:[%s12439_s12 + $0x320] sm:$0xf]  ;;  %v7532_v25 = vor.u32 %v7997_v30, %v7531_v43 }
 0x739   : > { %v5059_v32 = vpop.f32.mrf.mxu1  ;;  %v5148_v38 = vpop.f32.mrf.mxu2  ;;  %v7756_v46 = vor.u32 %v8053_v39, %v7755_v63 }
 0x73a   : > { %v6260_v29 = vpack.c.bf16 %v5289_v41, %v11061_v50  ;;  %v5060_v2 = vadd.f32 %v5059_v32, %v11033_v12  ;;  %5241 = vmatmul.bf16.gmra.mxu3 %v11065_v23  ;;  %5330 = vmatmul.bf16.gmra.mxu0 %v11059_v18 }
 0x73b   : > { %5812 = vmatpush.bf16.msrb.mxu2 %v7756_v46  ;;  %5723 = vmatpush.bf16.msrb.mxu1 %v7532_v25 }
 0x73c   : > { %6389 = vst [vmem:[%s11237_s17 + $0x1c] sm:$0xff] %v6260_v29  ;;  %v11251_v55 = vadd.f32 %v5148_v38, %v5060_v2  ;;  %5374 = vmatmul.bf16.vlgmr.msra.gmra.mxu1 %v10800_v62 }
 0x73d   : > { %v5202_v50 = vpop.f32.mrf.mxu3 }
 0x73e   : > { %v5203_v11 = vadd.f32 %v5202_v50, %v11227_v34 }
 0x73f   : > { %v5293_v5 = vpop.f32.mrf.mxu0 }
 0x740   : > { %v5292_v41 = vadd.f32 %v5291_v61, %v5203_v11  ;;  %v7749_v61 = vld [vmem:[%s12439_s12 + $0x334] sm:$0xf0] }
 0x741   : > { %v5061_v32 = vpop.f32.mrf.mxu1  ;;  %v5150_v38 = vpop.f32.mrf.mxu2  ;;  %v7752_v28 = vor.u32 %v8049_v60, %v7749_v61 }
 0x742   : > { %v6264_v29 = vpack.c.bf16 %v5292_v41, %v11070_v56  ;;  %v5062_v2 = vadd.f32 %v5061_v32, %v11033_v12 }
 0x743   : > { %5634 = vmatpush.bf16.msrb.mxu0 %v7752_v28 }
 0x744   : > { %6393 = vst [vmem:[%s11237_s17 + $0x38] sm:$0xff] %v6264_v29  ;;  %v11276_v45 = vadd.f32 %v5150_v38, %v5062_v2 }
 0x745   : > { %v5204_v50 = vpop.f32.mrf.mxu3 }
 0x746   : > { %v5205_v63 = vadd.f32 %v5204_v50, %v11227_v34  ;;  %5468 = vmatmul.bf16.gmra.mxu2 %v10831_v26 }
 0x747   : > { %v5296_v56 = vpop.f32.mrf.mxu0 }
 0x748   : > { %v5294_v39 = vadd.f32 %v5293_v5, %v5205_v63 }
 0x749   : > { %v5064_v43 = vpop.f32.mrf.mxu1  ;;  %v5153_v11 = vpop.f32.mrf.mxu2 }
 0x74a   : > { %v6268_v46 = vpack.c.bf16 %v5294_v39, %v11079_v54  ;;  %v5065_v30 = vadd.f32 %v5064_v43, %v11033_v12  ;;  %5246 = vmatmul.bf16.gmra.mxu3 %v11083_v40  ;;  %5335 = vmatmul.bf16.gmra.mxu0 %v11077_v51 }
 0x74c   : > { %6397 = vst [vmem:[%s11237_s17 + $0x54] sm:$0xff] %v6268_v46  ;;  %v11291_v25 = vadd.f32 %v5153_v11, %v5065_v30  ;;  %5379 = vmatmul.bf16.gmra.mxu1 %v10836_v24  ;;  %v7986_v30 = vld [vmem:[%s12439_s12 + $0x124] sm:$0xf] }
 0x74d   : > { %v5207_v41 = vpop.f32.mrf.mxu3 }
 0x74e   : > { %v5208_v32 = vadd.f32 %v5207_v41, %v11227_v34  ;;  %v7497_v41 = vld [vmem:[%s12439_s12 + $0x13c] sm:$0xf0] }
 0x74f   : > { %v5298_v5 = vpop.f32.mrf.mxu0 }
 0x750   : > { %v5297_v38 = vadd.f32 %v5296_v56, %v5208_v32  ;;  %v7500_v32 = vor.u32 %v7986_v30, %v7497_v41  ;;  %v8042_v41 = vld [vmem:[%s12439_s12 + $0x2e4] sm:$0xf] }
 0x751   : > { %v5066_v29 = vpop.f32.mrf.mxu1  ;;  %v5155_v2 = vpop.f32.mrf.mxu2 }
 0x752   : > { %v6272_v54 = vpack.c.bf16 %v5297_v38, %v11094_v31  ;;  %v5067_v60 = vadd.f32 %v5066_v29, %v11033_v12  ;;  %v8046_v38 = vld [vmem:[%s12439_s12 + $0x300] sm:$0xf0]  ;;  %v7503_v29 = vld [vmem:[%s12439_s12 + $0x128] sm:$0xf]  ;;  %5546 = vmatpush.bf16.msrb.mxu3 %v7500_v32 }
 0x754   : > { %6401 = vst [vmem:[%s11237_s17 + $0x70] sm:$0xff] %v6272_v54  ;;  %v11298_v61 = vadd.f32 %v5155_v2, %v5067_v60  ;;  %v7990_v60 = vld [vmem:[%s12439_s12 + $0x140] sm:$0xf0] }
 0x755   : > { %v5209_v50 = vpop.f32.mrf.mxu3 }
 0x756   : > { %v5210_v28 = vadd.f32 %v5209_v50, %v11227_v34  ;;  %5473 = vmatmul.bf16.gmra.mxu2 %v10843_v37 }
 0x757   : > { %v5301_v63 = vpop.f32.mrf.mxu0 }
 0x758   : > { %v5299_v39 = vadd.f32 %v5298_v5, %v5210_v28  ;;  %v7727_v5 = vld [vmem:[%s12439_s12 + $0x2e8] sm:$0xf]  ;;  %v7504_v28 = vor.u32 %v7990_v60, %v7503_v29 }
 0x759   : > { %v5069_v43 = vpop.f32.mrf.mxu1  ;;  %v5158_v11 = vpop.f32.mrf.mxu2  ;;  %v7728_v54 = vor.u32 %v8046_v38, %v7727_v5 }
 0x75a   : > { %v6276_v56 = vpack.c.bf16 %v5299_v39, %v11109_v10  ;;  %v5070_v46 = vadd.f32 %v5069_v43, %v11033_v12  ;;  %5251 = vmatmul.bf16.gmra.mxu3 %v11113_v59  ;;  %5340 = vmatmul.bf16.gmra.mxu0 %v11107_v19 }
 0x75b   : > { %5813 = vmatpush.bf16.msrb.mxu2 %v7728_v54  ;;  %5724 = vmatpush.bf16.msrb.mxu1 %v7504_v28 }
 0x75c   : > { %6405 = vst [vmem:[%s11237_s17 + $0x8c] sm:$0xff] %v6276_v56  ;;  %v11307_v31 = vadd.f32 %v5158_v11, %v5070_v46  ;;  %5384 = vmatmul.bf16.gmra.mxu1 %v10848_v52 }
 0x75d   : > { %v5212_v10 = vpop.f32.mrf.mxu3 }
 0x75e   : > { %v5213_v2 = vadd.f32 %v5212_v10, %v11227_v34 }
 0x75f   : > { %v5303_v50 = vpop.f32.mrf.mxu0 }
 0x760   : > { %v5302_v39 = vadd.f32 %v5301_v63, %v5213_v2  ;;  %v7721_v63 = vld [vmem:[%s12439_s12 + $0x2fc] sm:$0xf0] }
 0x761   : > { %v5071_v43 = vpop.f32.mrf.mxu1  ;;  %v5160_v11 = vpop.f32.mrf.mxu2  ;;  %v7724_v32 = vor.u32 %v8042_v41, %v7721_v63 }
 0x762   : > { %v6280_v56 = vpack.c.bf16 %v5302_v39, %v11118_v58  ;;  %v5072_v46 = vadd.f32 %v5071_v43, %v11033_v12 }
 0x763   : > { %5635 = vmatpush.bf16.msrb.mxu0 %v7724_v32  ;;  %v7979_v32 = vld [vmem:[%s12439_s12 + $0xec] sm:$0xf] }
 0x764   : > { %6409 = vst [vmem:[%s11237_s17 + $0xa8] sm:$0xff] %v6280_v56  ;;  %v11332_v30 = vadd.f32 %v5160_v11, %v5072_v46 }
 0x765   : > { %v5214_v10 = vpop.f32.mrf.mxu3 }
 0x766   : > { %v5215_v5 = vadd.f32 %v5214_v10, %v11227_v34  ;;  %5478 = vmatmul.bf16.gmra.mxu2 %v10879_v47 }
 0x767   : > { %v5306_v58 = vpop.f32.mrf.mxu0 }
 0x768   : > { %v5304_v38 = vadd.f32 %v5303_v50, %v5215_v5  ;;  %v7469_v5 = vld [vmem:[%s12439_s12 + $0x104] sm:$0xf0] }
 0x769   : > { %v5074_v29 = vpop.f32.mrf.mxu1  ;;  %v5163_v2 = vpop.f32.mrf.mxu2 }
 0x76a   : > { %v6284_v54 = vpack.c.bf16 %v5304_v38, %v11127_v35  ;;  %v5075_v60 = vadd.f32 %v5074_v29, %v11033_v12  ;;  %5256 = vmatmul.bf16.gmra.mxu3 %v11131_v33  ;;  %5345 = vmatmul.bf16.gmra.mxu0 %v11125_v20  ;;  %v7472_v38 = vor.u32 %v7979_v32, %v7469_v5  ;;  %v7693_v29 = vld [vmem:[%s12439_s12 + $0x2c4] sm:$0xf0] }
 0x76c   : > { %6413 = vst [vmem:[%s11237_s17 + $0xc4] sm:$0xff] %v6284_v54  ;;  %v11347_v28 = vadd.f32 %v5163_v2, %v5075_v60  ;;  %5389 = vmatmul.bf16.gmra.mxu1 %v10884_v22  ;;  %5547 = vmatpush.bf16.msrb.mxu3 %v7472_v38 }
 0x76d   : > { %v5217_v39 = vpop.f32.mrf.mxu3 }
 0x76e   : > { %v5218_v43 = vadd.f32 %v5217_v39, %v11227_v34 }
 0x76f   : > { %v5308_v50 = vpop.f32.mrf.mxu0 }
 0x770   : > { %v5307_v11 = vadd.f32 %v5306_v58, %v5218_v43  ;;  %v8035_v58 = vld [vmem:[%s12439_s12 + $0x2ac] sm:$0xf] }
 0x771   : > { %v5076_v56 = vpop.f32.mrf.mxu1  ;;  %v5165_v46 = vpop.f32.mrf.mxu2  ;;  %v7696_v54 = vor.u32 %v8035_v58, %v7693_v29  ;;  %v8039_v58 = vld [vmem:[%s12439_s12 + $0x2c8] sm:$0xf0]  ;;  %v7475_v29 = vld [vmem:[%s12439_s12 + $0xf0] sm:$0xf] }
 0x772   : > { %v6288_v35 = vpack.c.bf16 %v5307_v11, %v11142_v9  ;;  %v5077_v41 = vadd.f32 %v5076_v56, %v11033_v12  ;;  %v7972_v11 = vld [vmem:[%s12439_s12 + $0xb4] sm:$0xf]  ;;  %v7441_v56 = vld [vmem:[%s12439_s12 + $0xcc] sm:$0xf0] }
 0x773   : > { %5636 = vmatpush.bf16.msrb.mxu0 %v7696_v54  ;;  %v7983_v54 = vld [vmem:[%s12439_s12 + $0x108] sm:$0xf0] }
 0x774   : > { %6417 = vst [vmem:[%s11237_s17 + $0xe0] sm:$0xff] %v6288_v35  ;;  %v11354_v63 = vadd.f32 %v5165_v46, %v5077_v41  ;;  %v8028_v46 = vld [vmem:[%s12439_s12 + $0x274] sm:$0xf]  ;;  %v7444_v41 = vor.u32 %v7972_v11, %v7441_v56  ;;  %v7413_v11 = vld [vmem:[%s12439_s12 + $0x94] sm:$0xf0] }
 0x775   : > { %v5219_v10 = vpop.f32.mrf.mxu3  ;;  %v8021_v56 = vld [vmem:[%s12439_s12 + $0x23c] sm:$0xf] }
 0x776   : > { %v5220_v9 = vadd.f32 %v5219_v10, %v11227_v34  ;;  %5483 = vmatmul.bf16.gmra.mxu2 %v10891_v48  ;;  %v7665_v10 = vld [vmem:[%s12439_s12 + $0x28c] sm:$0xf0]  ;;  %5548 = vmatpush.bf16.msrb.mxu3 %v7444_v41 }
 0x777   : > { %v5311_v2 = vpop.f32.mrf.mxu0  ;;  %v7668_v32 = vor.u32 %v8028_v46, %v7665_v10  ;;  %v7637_v46 = vld [vmem:[%s12439_s12 + $0x254] sm:$0xf0] }
 0x778   : > { %v5309_v60 = vadd.f32 %v5308_v50, %v5220_v9  ;;  %v7640_v41 = vor.u32 %v8021_v56, %v7637_v46  ;;  %v7951_v56 = vld [vmem:[%s12439_s12 + $0xc] sm:$0xf] }
 0x779   : > { %v5079_v39 = vpop.f32.mrf.mxu1  ;;  %v5168_v43 = vpop.f32.mrf.mxu2  ;;  %5637 = vmatpush.bf16.msrb.mxu0 %v7668_v32  ;;  %v8007_v46 = vld [vmem:[%s12439_s12 + $0x1cc] sm:$0xf] }
 0x77a   : > { %v6292_v35 = vpack.c.bf16 %v5309_v60, %v11157_v16  ;;  %v5080_v50 = vadd.f32 %v5079_v39, %v11033_v12  ;;  %5261 = vmatmul.bf16.gmra.mxu3 %v11161_v14  ;;  %5350 = vmatmul.bf16.gmra.mxu0 %v11155_v17  ;;  %v7699_v16 = vld [vmem:[%s12439_s12 + $0x2b0] sm:$0xf]  ;;  %v7965_v60 = vld [vmem:[%s12439_s12 + $0x7c] sm:$0xf] }
 0x77b   : > { %v7700_v38 = vor.u32 %v8039_v58, %v7699_v16  ;;  %v7958_v58 = vld [vmem:[%s12439_s12 + $0x44] sm:$0xf] }
 0x77c   : > { %6421 = vst [vmem:[%s11237_s17 + $0xfc] sm:$0xff] %v6292_v35  ;;  %v11387_v5 = vadd.f32 %v5168_v43, %v5080_v50  ;;  %5394 = vmatmul.bf16.gmra.mxu1 %v10917_v7  ;;  %v7476_v43 = vor.u32 %v7983_v54, %v7475_v29  ;;  %v7416_v50 = vor.u32 %v7965_v60, %v7413_v11  ;;  %v7609_v60 = vld [vmem:[%s12439_s12 + $0x21c] sm:$0xf0] }
 0x77d   : > { %v5222_v9 = vpop.f32.mrf.mxu3  ;;  %5814 = vmatpush.bf16.msrb.mxu2 %v7700_v38  ;;  %5638 = vmatpush.bf16.msrb.mxu0 %v7640_v41  ;;  %v8014_v38 = vld [vmem:[%s12439_s12 + $0x204] sm:$0xf] }
 0x77e   : > { %v5223_v39 = vadd.f32 %v5222_v9, %v11227_v34  ;;  %5725 = vmatpush.bf16.msrb.mxu1 %v7476_v43  ;;  %5549 = vmatpush.bf16.msrb.mxu3 %v7416_v50  ;;  %v7385_v9 = vld [vmem:[%s12439_s12 + $0x5c] sm:$0xf0] }
 0x77f   : > { %v5313_v35 = vpop.f32.mrf.mxu0  ;;  %v7388_v54 = vor.u32 %v7958_v58, %v7385_v9 }
 0x780   : > { %v5312_v10 = vadd.f32 %v5311_v2, %v5223_v39  ;;  %v7612_v39 = vor.u32 %v8014_v38, %v7609_v60 }
 0x781   : > { %v5081_v32 = vpop.f32.mrf.mxu1  ;;  %v5170_v16 = vpop.f32.mrf.mxu2 }
 0x782   : > { %v6296_v29 = vpack.c.bf16 %v5312_v10, %v11166_v42  ;;  %v5082_v2 = vadd.f32 %v5081_v32, %v11033_v12  ;;  %5550 = vmatpush.bf16.msrb.mxu3 %v7388_v54  ;;  %5639 = vmatpush.bf16.msrb.mxu0 %v7612_v39  ;;  %v7357_v42 = vld [vmem:[%s12439_s12 + $0x24] sm:$0xf0] }
 0x783   : > { %v7360_v41 = vor.u32 %v7951_v56, %v7357_v42  ;;  %v7581_v10 = vld [vmem:[%s12439_s12 + $0x1e4] sm:$0xf0] }
 0x784   : > { %6425 = vst [vmem:[%s11237_s17 + $0x118] sm:$0xff] %v6296_v29  ;;  %v11430_v43 = vadd.f32 %v5170_v16, %v5082_v2  ;;  %v7584_v16 = vor.u32 %v8007_v46, %v7581_v10 }
 0x785   : > { %v5224_v11 = vpop.f32.mrf.mxu3 }
 0x786   : > { %v5225_v50 = vadd.f32 %v5224_v11, %v11227_v34  ;;  %5488 = vmatmul.bf16.gmra.mxu2 %v10963_v15  ;;  %5551 = vmatpush.bf16.msrb.mxu3 %v7360_v41 }
 0x787   : > { %v5316_v32 = vpop.f32.mrf.mxu0  ;;  %5640 = vmatpush.bf16.msrb.mxu0 %v7584_v16 }
 0x788   : > { %v5314_v58 = vadd.f32 %v5313_v35, %v5225_v50 }
 0x789   : > { %v5084_v9 = vpop.f32.mrf.mxu1  ;;  %v5173_v38 = vpop.f32.mrf.mxu2 }
 0x78a   : > { %v6300_v29 = vpack.c.bf16 %v5314_v58, %v11175_v1  ;;  %v5085_v2 = vadd.f32 %v5084_v9, %v11033_v12  ;;  %5266 = vmatmul.bf16.gmra.mxu3 %v11179_v3  ;;  %5355 = vmatmul.bf16.gmra.mxu0 %v11173_v27 }
 0x78c   : > { %6429 = vst [vmem:[%s11237_s17 + $0x134] sm:$0xff] %v6300_v29  ;;  %v11451_v54 = vadd.f32 %v5173_v38, %v5085_v2  ;;  %5399 = vmatmul.bf16.gmra.mxu1 %v10980_v21  ;;  %v12773_v2 = vld [vmem:[#allocation8_spill] sm:$0xff] }
 0x78d   : > { %v5227_v60 = vpop.f32.mrf.mxu3 }
 0x78e   : > { %v5228_v35 = vadd.f32 %v5227_v60, %v11227_v34  ;;  %v7671_v60 = vld [vmem:[%s12439_s12 + $0x278] sm:$0xf] }
 0x78f   : > { %v5318_v39 = vpop.f32.mrf.mxu0 }
 0x790   : > { %v5317_v11 = vadd.f32 %v5316_v32, %v5228_v35 }
 0x791   : > { %v5086_v56 = vpop.f32.mrf.mxu1  ;;  %v5175_v42 = vpop.f32.mrf.mxu2 }
 0x792   : > { %v6304_v1 = vpack.c.bf16 %v5317_v11, %v11184_v49  ;;  %v5087_v46 = vadd.f32 %v5086_v56, %v11033_v12  ;;  %v7447_v11 = vld [vmem:[%s12439_s12 + $0xb8] sm:$0xf]  ;;  %v7976_v56 = vld [vmem:[%s12439_s12 + $0xd0] sm:$0xf0] }
 0x794   : > { %6433 = vst [vmem:[%s11237_s17 + $0x150] sm:$0xff] %v6304_v1  ;;  %v11458_v50 = vadd.f32 %v5175_v42, %v5087_v46  ;;  %v7448_v1 = vor.u32 %v7976_v56, %v7447_v11 }
 0x795   : > { %v5229_v41 = vpop.f32.mrf.mxu3 }
 0x796   : > { %v5230_v10 = vadd.f32 %v5229_v41, %v11227_v34  ;;  %5493 = vmatmul.bf16.gmra.mxu2 %v10989_v53  ;;  %5726 = vmatpush.bf16.msrb.mxu1 %v7448_v1  ;;  %v12775_v1 = vld [vmem:[#allocation13_spill] sm:$0xff] }
 0x797   : > { %v5321_v16 = vpop.f32.mrf.mxu0 }
 0x798   : > { %v5319_v58 = vadd.f32 %v5318_v39, %v5230_v10 }
 0x799   : > { %v5089_v9 = vpop.f32.mrf.mxu1  ;;  %v5178_v38 = vpop.f32.mrf.mxu2 }
 0x79a   : > { %v6308_v32 = vpack.c.bf16 %v5319_v58, %v11211_v4  ;;  %v5090_v29 = vadd.f32 %v5089_v9, %v11033_v12  ;;  %5271 = vmatmul.bf16.gmra.mxu3 %v11221_v13  ;;  %5360 = vmatmul.bf16.gmra.mxu0 %v11209_v0  ;;  %v8032_v4 = vld [vmem:[%s12439_s12 + $0x290] sm:$0xf0] }
 0x79b   : > { %v7672_v39 = vor.u32 %v8032_v4, %v7671_v60  ;;  %v12774_v4 = vld [vmem:[#allocation82_spill] sm:$0xff] }
 0x79c   : > { %6437 = vst [vmem:[%s11237_s17 + $0x16c] sm:$0xff] %v6308_v32  ;;  %v11467_v49 = vadd.f32 %v5178_v38, %v5090_v29  ;;  %5404 = vmatmul.bf16.gmra.mxu1 %v12773_v2 }
 0x79d   : > { %v5232_v35 = vpop.f32.mrf.mxu3  ;;  %5815 = vmatpush.bf16.msrb.mxu2 %v7672_v39 }
 0x79e   : > { %v5233_v42 = vadd.f32 %v5232_v35, %v11227_v34 }
 0x79f   : > { %v5323_v46 = vpop.f32.mrf.mxu0 }
 0x7a0   : > { %v5322_v41 = vadd.f32 %v5321_v16, %v5233_v42 }
 0x7a1   : > { %v5091_v10 = vpop.f32.mrf.mxu1  ;;  %v5180_v58 = vpop.f32.mrf.mxu2 }
 0x7a2   : > { %v6312_v9 = vpack.c.bf16 %v5322_v41, %v11229_v57  ;;  %v5092_v38 = vadd.f32 %v5091_v10, %v11033_v12 }
 0x7a4   : > { %6441 = vst [vmem:[%s11237_s17 + $0x188] sm:$0xff] %v6312_v9  ;;  %v11486_v32 = vadd.f32 %v5180_v58, %v5092_v38 }
 0x7a5   : > { %v5234_v29 = vpop.f32.mrf.mxu3 }
 0x7a6   : > { %v5235_v60 = vadd.f32 %v5234_v29, %v11227_v34  ;;  %5498 = vmatmul.bf16.gmra.mxu2 %v12774_v4 }
 0x7a7   : > { %v5326_v35 = vpop.f32.mrf.mxu0 }
 0x7a8   : > { %v5324_v11 = vadd.f32 %v5323_v46, %v5235_v60 }
 0x7a9   : > { %v5094_v39 = vpop.f32.mrf.mxu1  ;;  %v5183_v16 = vpop.f32.mrf.mxu2 }
 0x7aa   : > { %v6316_v56 = vpack.c.bf16 %v5324_v11, %v11242_v8  ;;  %v5095_v42 = vadd.f32 %v5094_v39, %v11033_v12  ;;  %5552 = vmatmul.bf16.vlgmr.msrb.gmra.mxu3 %v10800_v62  ;;  %5641 = vmatmul.bf16.vlgmr.msrb.gmra.mxu0 %v10795_v44 }
 0x7ac   : > { %6445 = vst [vmem:[%s11237_s17 + $0x1a4] sm:$0xff] %v6316_v56  ;;  %v11495_v57 = vadd.f32 %v5183_v16, %v5095_v42  ;;  %5409 = vmatmul.bf16.gmra.mxu1 %v12775_v1  ;;  %v11509_v16 = vld [vmem:[%s12440_s13] sm:$0x7f] }
 0x7ad   : > { %v5237_v41 = vpop.f32.mrf.mxu3 }
 0x7ae   : > { %v5238_v10 = vadd.f32 %v5237_v41, %v11227_v34 }
 0x7af   : > { %v5328_v46 = vpop.f32.mrf.mxu0 }
 0x7b0   : > { %v5327_v58 = vadd.f32 %v5326_v35, %v5238_v10  ;;  %v11512_v35 = vperm.slane %v11509_v16, 2 }
 0x7b1   : > { %v5096_v9 = vpop.f32.mrf.mxu1  ;;  %v5185_v38 = vpop.f32.mrf.mxu2 }
 0x7b2   : > { %v6320_v8 = vpack.c.bf16 %v5327_v58, %v11251_v55  ;;  %v5097_v29 = vadd.f32 %v5096_v9, %v11033_v12  ;;  %v7643_v9 = vld [vmem:[%s12439_s12 + $0x240] sm:$0xf] }
 0x7b4   : > { %6449 = vst [vmem:[%s11237_s17 + $0x1c0] sm:$0xff] %v6320_v8  ;;  %v11502_v60 = vadd.f32 %v5185_v38, %v5097_v29  ;;  %v7419_v8 = vld [vmem:[%s12439_s12 + $0x80] sm:$0xf]  ;;  %v7969_v29 = vld [vmem:[%s12439_s12 + $0x98] sm:$0xf0] }
 0x7b5   : > { %v5239_v11 = vpop.f32.mrf.mxu3 }
 0x7b6   : > { %v5240_v39 = vadd.f32 %v5239_v11, %v11227_v34  ;;  %5503 = vmatmul.bf16.gmra.mxu2 %v11028_v6 }
 0x7b7   : > { %v5331_v55 = vpop.f32.mrf.mxu0 }
 0x7b8   : > { %v5329_v56 = vadd.f32 %v5328_v46, %v5240_v39  ;;  %v7420_v39 = vor.u32 %v7969_v29, %v7419_v8 }
 0x7b9   : > { %v5375_v12 = vpop.f32.mrf.mxu1  ;;  %v5464_v42 = vpop.f32.mrf.mxu2 }
 0x7ba   : > { %v6324_v41 = vpack.c.bf16 %v5329_v56, %v11276_v45  ;;  %v5376_v10 = vadd.f32 %v5375_v12, %v11512_v35  ;;  %5557 = vmatmul.bf16.gmra.mxu3 %v10836_v24  ;;  %5646 = vmatmul.bf16.gmra.mxu0 %v10831_v26  ;;  %v8025_v45 = vld [vmem:[%s12439_s12 + $0x258] sm:$0xf0] }
 0x7bb   : > { %v7644_v38 = vor.u32 %v8025_v45, %v7643_v9  ;;  %5727 = vmatpush.bf16.msrb.mxu1 %v7420_v39 }
 0x7bc   : > { %6453 = vst [vmem:[%s11237_s17 + $0x1dc] sm:$0xff] %v6324_v41  ;;  %v11519_v58 = vadd.f32 %v5464_v42, %v5376_v10  ;;  %5414 = vmatmul.bf16.gmra.mxu1 %v11035_v36 }
 0x7bd   : > { %v5242_v46 = vpop.f32.mrf.mxu3  ;;  %5816 = vmatpush.bf16.msrb.mxu2 %v7644_v38 }
 0x7be   : > { %v5243_v11 = vadd.f32 %v5242_v46, %v11227_v34 }
 0x7bf   : > { %v5333_v56 = vpop.f32.mrf.mxu0 }
 0x7c0   : > { %v5332_v12 = vadd.f32 %v5331_v55, %v5243_v11 }
 0x7c1   : > { %v5377_v42 = vpop.f32.mrf.mxu1  ;;  %v5466_v41 = vpop.f32.mrf.mxu2 }
 0x7c2   : > { %v6328_v10 = vpack.c.bf16 %v5332_v12, %v11291_v25  ;;  %v5378_v9 = vadd.f32 %v5377_v42, %v11512_v35 }
 0x7c4   : > { %6457 = vst [vmem:[%s11237_s17 + $0x1f8] sm:$0xff] %v6328_v10  ;;  %v11538_v45 = vadd.f32 %v5466_v41, %v5378_v9 }
 0x7c5   : > { %v5244_v24 = vpop.f32.mrf.mxu3 }
 0x7c6   : > { %v5245_v26 = vadd.f32 %v5244_v24, %v11227_v34  ;;  %5508 = vmatmul.bf16.gmra.mxu2 %v11059_v18 }
 0x7c7   : > { %v5336_v46 = vpop.f32.mrf.mxu0 }
 0x7c8   : > { %v5334_v8 = vadd.f32 %v5333_v56, %v5245_v26 }
 0x7c9   : > { %v5380_v38 = vpop.f32.mrf.mxu1  ;;  %v5469_v55 = vpop.f32.mrf.mxu2 }
 0x7ca   : > { %v6332_v29 = vpack.c.bf16 %v5334_v8, %v11298_v61  ;;  %v5381_v11 = vadd.f32 %v5380_v38, %v11512_v35  ;;  %5562 = vmatmul.bf16.gmra.mxu3 %v10848_v52  ;;  %5651 = vmatmul.bf16.gmra.mxu0 %v10843_v37 }
 0x7cc   : > { %6461 = vst [vmem:[%s11237_s17 + $0x214] sm:$0xff] %v6332_v29  ;;  %v11547_v25 = vadd.f32 %v5469_v55, %v5381_v11  ;;  %5419 = vmatmul.bf16.gmra.mxu1 %v11065_v23 }
 0x7cd   : > { %v5247_v24 = vpop.f32.mrf.mxu3 }
 0x7ce   : > { %v5248_v39 = vadd.f32 %v5247_v24, %v11227_v34 }
 0x7cf   : > { %v5338_v26 = vpop.f32.mrf.mxu0 }
 0x7d0   : > { %v5337_v56 = vadd.f32 %v5336_v46, %v5248_v39  ;;  %v7615_v39 = vld [vmem:[%s12439_s12 + $0x208] sm:$0xf] }
 0x7d1   : > { %v5382_v12 = vpop.f32.mrf.mxu1  ;;  %v5471_v42 = vpop.f32.mrf.mxu2 }
 0x7d2   : > { %v6336_v61 = vpack.c.bf16 %v5337_v56, %v11307_v31  ;;  %v5383_v41 = vadd.f32 %v5382_v12, %v11512_v35  ;;  %v7391_v12 = vld [vmem:[%s12439_s12 + $0x48] sm:$0xf] }
 0x7d4   : > { %6465 = vst [vmem:[%s11237_s17 + $0x230] sm:$0xff] %v6336_v61  ;;  %v11554_v10 = vadd.f32 %v5471_v42, %v5383_v41  ;;  %v7962_v42 = vld [vmem:[%s12439_s12 + $0x60] sm:$0xf0] }
 0x7d5   : > { %v5249_v9 = vpop.f32.mrf.mxu3  ;;  %v7392_v41 = vor.u32 %v7962_v42, %v7391_v12 }
 0x7d6   : > { %v5250_v8 = vadd.f32 %v5249_v9, %v11227_v34  ;;  %5513 = vmatmul.bf16.gmra.mxu2 %v11077_v51 }
 0x7d7   : > { %v5341_v38 = vpop.f32.mrf.mxu0  ;;  %5728 = vmatpush.bf16.msrb.mxu1 %v7392_v41 }
 0x7d8   : > { %v5339_v55 = vadd.f32 %v5338_v26, %v5250_v8 }
 0x7d9   : > { %v5385_v29 = vpop.f32.mrf.mxu1  ;;  %v5474_v11 = vpop.f32.mrf.mxu2 }
 0x7da   : > { %v6340_v46 = vpack.c.bf16 %v5339_v55, %v11332_v30  ;;  %v5386_v24 = vadd.f32 %v5385_v29, %v11512_v35  ;;  %5567 = vmatmul.bf16.gmra.mxu3 %v10884_v22  ;;  %5656 = vmatmul.bf16.gmra.mxu0 %v10879_v47  ;;  %v8018_v30 = vld [vmem:[%s12439_s12 + $0x220] sm:$0xf0] }
 0x7db   : > { %v7616_v56 = vor.u32 %v8018_v30, %v7615_v39 }
 0x7dc   : > { %6469 = vst [vmem:[%s11237_s17 + $0x24c] sm:$0xff] %v6340_v46  ;;  %v11563_v31 = vadd.f32 %v5474_v11, %v5386_v24  ;;  %5424 = vmatmul.bf16.gmra.mxu1 %v11083_v40 }
 0x7dd   : > { %v5252_v26 = vpop.f32.mrf.mxu3  ;;  %5817 = vmatpush.bf16.msrb.mxu2 %v7616_v56 }
 0x7de   : > { %v5253_v61 = vadd.f32 %v5252_v26, %v11227_v34 }
 0x7df   : > { %v5343_v9 = vpop.f32.mrf.mxu0 }
 0x7e0   : > { %v5342_v8 = vadd.f32 %v5341_v38, %v5253_v61 }
 0x7e1   : > { %v5387_v55 = vpop.f32.mrf.mxu1  ;;  %v5476_v29 = vpop.f32.mrf.mxu2 }
 0x7e2   : > { %v6344_v11 = vpack.c.bf16 %v5342_v8, %v11347_v28  ;;  %v5388_v46 = vadd.f32 %v5387_v55, %v11512_v35 }
 0x7e4   : > { %6473 = vst [vmem:[%s11237_s17 + $0x268] sm:$0xff] %v6344_v11  ;;  %v11582_v24 = vadd.f32 %v5476_v29, %v5388_v46 }
 0x7e5   : > { %v5254_v39 = vpop.f32.mrf.mxu3 }
 0x7e6   : > { %v5255_v30 = vadd.f32 %v5254_v39, %v11227_v34  ;;  %5518 = vmatmul.bf16.gmra.mxu2 %v11107_v19 }
 0x7e7   : > { %v5346_v26 = vpop.f32.mrf.mxu0 }
 0x7e8   : > { %v5344_v12 = vadd.f32 %v5343_v9, %v5255_v30 }
 0x7e9   : > { %v5390_v56 = vpop.f32.mrf.mxu1  ;;  %v5479_v38 = vpop.f32.mrf.mxu2 }
 0x7ea   : > { %v6348_v42 = vpack.c.bf16 %v5344_v12, %v11354_v63  ;;  %v5391_v61 = vadd.f32 %v5390_v56, %v11512_v35  ;;  %5572 = vmatmul.bf16.gmra.mxu3 %v10917_v7  ;;  %5661 = vmatmul.bf16.gmra.mxu0 %v10891_v48 }
 0x7ec   : > { %6477 = vst [vmem:[%s11237_s17 + $0x284] sm:$0xff] %v6348_v42  ;;  %v11591_v28 = vadd.f32 %v5479_v38, %v5391_v61  ;;  %5429 = vmatmul.bf16.gmra.mxu1 %v11113_v59 }
 0x7ed   : > { %v5257_v41 = vpop.f32.mrf.mxu3 }
 0x7ee   : > { %v5258_v8 = vadd.f32 %v5257_v41, %v11227_v34 }
 0x7ef   : > { %v5348_v9 = vpop.f32.mrf.mxu0 }
 0x7f0   : > { %v5347_v55 = vadd.f32 %v5346_v26, %v5258_v8  ;;  %v7587_v8 = vld [vmem:[%s12439_s12 + $0x1d0] sm:$0xf] }
 0x7f1   : > { %v5392_v29 = vpop.f32.mrf.mxu1  ;;  %v5481_v11 = vpop.f32.mrf.mxu2 }
 0x7f2   : > { %v6352_v63 = vpack.c.bf16 %v5347_v55, %v11387_v5  ;;  %v5393_v46 = vadd.f32 %v5392_v29, %v11512_v35  ;;  %v7363_v29 = vld [vmem:[%s12439_s12 + $0x10] sm:$0xf] }
 0x7f4   : > { %6481 = vst [vmem:[%s11237_s17 + $0x2a0] sm:$0xff] %v6352_v63  ;;  %v11598_v39 = vadd.f32 %v5481_v11, %v5393_v46  ;;  %v7955_v11 = vld [vmem:[%s12439_s12 + $0x28] sm:$0xf0] }
 0x7f5   : > { %v5259_v30 = vpop.f32.mrf.mxu3  ;;  %v7364_v46 = vor.u32 %v7955_v11, %v7363_v29 }
 0x7f6   : > { %v5260_v12 = vadd.f32 %v5259_v30, %v11227_v34  ;;  %5523 = vmatmul.bf16.gmra.mxu2 %v11125_v20 }
 0x7f7   : > { %v5351_v56 = vpop.f32.mrf.mxu0  ;;  %5729 = vmatpush.bf16.msrb.mxu1 %v7364_v46 }
 0x7f8   : > { %v5349_v38 = vadd.f32 %v5348_v9, %v5260_v12 }
 0x7f9   : > { %v5395_v42 = vpop.f32.mrf.mxu1  ;;  %v5484_v61 = vpop.f32.mrf.mxu2 }
 0x7fa   : > { %v6356_v26 = vpack.c.bf16 %v5349_v38, %v11430_v43  ;;  %v5396_v41 = vadd.f32 %v5395_v42, %v11512_v35  ;;  %5577 = vmatmul.bf16.gmra.mxu3 %v10980_v21  ;;  %5666 = vmatmul.bf16.gmra.mxu0 %v10963_v15  ;;  %v8011_v43 = vld [vmem:[%s12439_s12 + $0x1e8] sm:$0xf0] }
 0x7fb   : > { %v7588_v55 = vor.u32 %v8011_v43, %v7587_v8 }
 0x7fc   : > { %6485 = vst [vmem:[%s11237_s17 + $0x2bc] sm:$0xff] %v6356_v26  ;;  %v11607_v5 = vadd.f32 %v5484_v61, %v5396_v41  ;;  %5434 = vmatmul.bf16.gmra.mxu1 %v11131_v33 }
 0x7fd   : > { %v5262_v9 = vpop.f32.mrf.mxu3  ;;  %5818 = vmatpush.bf16.msrb.mxu2 %v7588_v55 }
 0x7fe   : > { %v5263_v63 = vadd.f32 %v5262_v9, %v11227_v34 }
 0x7ff   : > { %v5353_v30 = vpop.f32.mrf.mxu0 }
 0x800   : > { %v5352_v12 = vadd.f32 %v5351_v56, %v5263_v63 }
 0x801   : > { %v5397_v38 = vpop.f32.mrf.mxu1  ;;  %v5486_v42 = vpop.f32.mrf.mxu2 }
 0x802   : > { %v6360_v61 = vpack.c.bf16 %v5352_v12, %v11451_v54  ;;  %v5398_v26 = vadd.f32 %v5397_v38, %v11512_v35 }
 0x804   : > { %6489 = vst [vmem:[%s11237_s17 + $0x2d8] sm:$0xff] %v6360_v61  ;;  %v11626_v41 = vadd.f32 %v5486_v42, %v5398_v26 }
 0x805   : > { %v5264_v8 = vpop.f32.mrf.mxu3 }
 0x806   : > { %v5265_v43 = vadd.f32 %v5264_v8, %v11227_v34  ;;  %5528 = vmatmul.bf16.gmra.mxu2 %v11155_v17 }
 0x807   : > { %v5356_v9 = vpop.f32.mrf.mxu0 }
 0x808   : > { %v5354_v29 = vadd.f32 %v5353_v30, %v5265_v43 }
 0x809   : > { %v5400_v55 = vpop.f32.mrf.mxu1  ;;  %v5489_v56 = vpop.f32.mrf.mxu2 }
 0x80a   : > { %v6364_v11 = vpack.c.bf16 %v5354_v29, %v11458_v50  ;;  %v5401_v63 = vadd.f32 %v5400_v55, %v11512_v35  ;;  %5582 = vmatmul.bf16.gmra.mxu3 %v12773_v2  ;;  %5671 = vmatmul.bf16.gmra.mxu0 %v10989_v53 }
 0x80c   : > { %6493 = vst [vmem:[%s11237_s17 + $0x2f4] sm:$0xff] %v6364_v11  ;;  %v11635_v54 = vadd.f32 %v5489_v56, %v5401_v63  ;;  %5439 = vmatmul.bf16.gmra.mxu1 %v11161_v14 }
 0x80d   : > { %v5267_v46 = vpop.f32.mrf.mxu3 }
 0x80e   : > { %v5268_v12 = vadd.f32 %v5267_v46, %v11227_v34 }
 0x80f   : > { %v5358_v30 = vpop.f32.mrf.mxu0 }
 0x810   : > { %v5357_v38 = vadd.f32 %v5356_v9, %v5268_v12  ;;  %v8001_v12 = vld [vmem:[%s12439_s12 + $0x19c] sm:$0xf] }
 0x811   : > { %v5402_v42 = vpop.f32.mrf.mxu1  ;;  %v5491_v61 = vpop.f32.mrf.mxu2 }
 0x812   : > { %v6368_v50 = vpack.c.bf16 %v5357_v38, %v11467_v49  ;;  %v5403_v26 = vadd.f32 %v5402_v42, %v11512_v35  ;;  %v7791_v42 = vld [vmem:[%s12439_s12 + $0x360] sm:$0xf] }
 0x814   : > { %6497 = vst [vmem:[%s11237_s17 + $0x310] sm:$0xff] %v6368_v50  ;;  %v11642_v8 = vadd.f32 %v5491_v61, %v5403_v26  ;;  %v8061_v61 = vld [vmem:[%s12439_s12 + $0x378] sm:$0xf0]  ;;  %v7567_v50 = vld [vmem:[%s12439_s12 + $0x1a0] sm:$0xf] }
 0x815   : > { %v5269_v43 = vpop.f32.mrf.mxu3 }
 0x816   : > { %v5270_v29 = vadd.f32 %v5269_v43, %v11227_v34  ;;  %5533 = vmatmul.bf16.gmra.mxu2 %v11173_v27  ;;  %v7792_v43 = vor.u32 %v8061_v61, %v7791_v42 }
 0x817   : > { %v5361_v55 = vpop.f32.mrf.mxu0 }
 0x818   : > { %v5359_v56 = vadd.f32 %v5358_v30, %v5270_v29  ;;  %v7561_v30 = vld [vmem:[%s12439_s12 + $0x1b4] sm:$0xf0]  ;;  %v8005_v29 = vld [vmem:[%s12439_s12 + $0x1b8] sm:$0xf0]  ;;  %6167 = vmatpush.bf16.msra.mxu2 %v7792_v43 }
 0x819   : > { %v5405_v11 = vpop.f32.mrf.mxu1  ;;  %v5494_v63 = vpop.f32.mrf.mxu2  ;;  %v7564_v38 = vor.u32 %v8001_v12, %v7561_v30 }
 0x81a   : > { %v6372_v9 = vpack.c.bf16 %v5359_v56, %v11486_v32  ;;  %v5406_v46 = vadd.f32 %v5405_v11, %v11512_v35  ;;  %5587 = vmatmul.bf16.gmra.mxu3 %v12775_v1  ;;  %5676 = vmatmul.bf16.gmra.mxu0 %v12774_v4  ;;  %v7568_v11 = vor.u32 %v8005_v29, %v7567_v50 }
 0x81b   : > { %5900 = vmatpush.bf16.msra.mxu3 %v7564_v38 }
 0x81c   : > { %6501 = vst [vmem:[%s11237_s17 + $0x32c] sm:$0xff] %v6372_v9  ;;  %v11651_v49 = vadd.f32 %v5494_v63, %v5406_v46  ;;  %5444 = vmatmul.bf16.gmra.mxu1 %v11179_v3 }
 0x81d   : > { %v5272_v32 = vpop.f32.mrf.mxu3  ;;  %6078 = vmatpush.bf16.msra.mxu1 %v7568_v11 }
 0x81e   : > { %v5273_v26 = vadd.f32 %v5272_v32, %v11227_v34  ;;  %v8057_v32 = vld [vmem:[%s12439_s12 + $0x35c] sm:$0xf] }
 0x81f   : > { %v5363_v56 = vpop.f32.mrf.mxu0 }
 0x820   : > { %v5362_v63 = vadd.f32 %v5361_v55, %v5273_v26  ;;  %v7785_v55 = vld [vmem:[%s12439_s12 + $0x374] sm:$0xf0] }
 0x821   : > { %v5407_v9 = vpop.f32.mrf.mxu1  ;;  %v5496_v46 = vpop.f32.mrf.mxu2  ;;  %v7788_v42 = vor.u32 %v8057_v32, %v7785_v55 }
 0x822   : > { %v6376_v12 = vpack.c.bf16 %v5362_v63, %v11495_v57  ;;  %v5408_v30 = vadd.f32 %v5407_v9, %v11512_v35  ;;  %v11691_v63 = vperm.slane %v11509_v16, 3 }
 0x823   : > { %5989 = vmatpush.bf16.msra.mxu0 %v7788_v42 }
 0x824   : > { %6505 = vst [vmem:[%s11237_s17 + $0x348] sm:$0xff] %v6376_v12  ;;  %v11676_v1 = vadd.f32 %v5496_v46, %v5408_v30 }
 0x825   : > { %v5274_v38 = vpop.f32.mrf.mxu3 }
 0x826   : > { %v5275_v61 = vadd.f32 %v5274_v38, %v11227_v34  ;;  %5538 = vmatmul.bf16.gmra.mxu2 %v11209_v0 }
 0x827   : > { %v5642_v57 = vpop.f32.mrf.mxu0 }
 0x828   : > { %v5364_v50 = vadd.f32 %v5363_v56, %v5275_v61 }
 0x829   : > { %v5410_v26 = vpop.f32.mrf.mxu1  ;;  %v5499_v43 = vpop.f32.mrf.mxu2 }
 0x82a   : > { %v6380_v29 = vpack.c.bf16 %v5364_v50, %v11502_v60  ;;  %v5411_v11 = vadd.f32 %v5410_v26, %v11512_v35  ;;  %5592 = vmatmul.bf16.gmra.mxu3 %v11035_v36  ;;  %5681 = vmatmul.bf16.gmra.mxu0 %v11028_v6 }
 0x82c   : > { %6509 = vst [vmem:[%s11237_s17 + $0x364] sm:$0xff] %v6380_v29  ;;  %v11694_v34 = vadd.f32 %v5499_v43, %v5411_v11  ;;  %5449 = vmatmul.bf16.gmra.mxu1 %v11221_v13  ;;  %v7994_v11 = vld [vmem:[%s12439_s12 + $0x164] sm:$0xf] }
 0x82d   : > { %v5553_v56 = vpop.f32.mrf.mxu3 }
 0x82e   : > { %v5554_v9 = vadd.f32 %v5553_v56, %v11691_v63  ;;  %v7533_v56 = vld [vmem:[%s12439_s12 + $0x17c] sm:$0xf0] }
 0x82f   : > { %v5644_v46 = vpop.f32.mrf.mxu0 }
 0x830   : > { %v5643_v60 = vadd.f32 %v5642_v57, %v5554_v9  ;;  %v7536_v9 = vor.u32 %v7994_v11, %v7533_v56  ;;  %v8050_v56 = vld [vmem:[%s12439_s12 + $0x324] sm:$0xf] }
 0x831   : > { %v5412_v12 = vpop.f32.mrf.mxu1  ;;  %v5501_v30 = vpop.f32.mrf.mxu2 }
 0x832   : > { %v6257_v32 = vpack.c.bf16 %v5643_v60, %v11519_v58  ;;  %v5413_v55 = vadd.f32 %v5412_v12, %v11512_v35  ;;  %v8054_v60 = vld [vmem:[%s12439_s12 + $0x340] sm:$0xf0]  ;;  %v7539_v12 = vld [vmem:[%s12439_s12 + $0x168] sm:$0xf]  ;;  %5901 = vmatpush.bf16.msra.mxu3 %v7536_v9 }
 0x834   : > { %6385 = vst [vmem:[%s11237_s17 + $0x8] sm:$0xff] %v6257_v32  ;;  %v11701_v16 = vadd.f32 %v5501_v30, %v5413_v55  ;;  %v7998_v55 = vld [vmem:[%s12439_s12 + $0x180] sm:$0xf0] }
 0x835   : > { %v5555_v38 = vpop.f32.mrf.mxu3 }
 0x836   : > { %v5556_v42 = vadd.f32 %v5555_v38, %v11691_v63  ;;  %5819 = vmatmul.bf16.vlgmr.msrb.gmra.mxu2 %v10795_v44 }
 0x837   : > { %v5647_v61 = vpop.f32.mrf.mxu0 }
 0x838   : > { %v5645_v50 = vadd.f32 %v5644_v46, %v5556_v42  ;;  %v7763_v46 = vld [vmem:[%s12439_s12 + $0x328] sm:$0xf]  ;;  %v7540_v42 = vor.u32 %v7998_v55, %v7539_v12 }
 0x839   : > { %v5415_v26 = vpop.f32.mrf.mxu1  ;;  %v5504_v43 = vpop.f32.mrf.mxu2  ;;  %v7764_v32 = vor.u32 %v8054_v60, %v7763_v46  ;;  %v12776_v60 = vld [vmem:[#allocation54_spill] sm:$0xff] }
 0x83a   : > { %v6261_v57 = vpack.c.bf16 %v5645_v50, %v11538_v45  ;;  %v5416_v29 = vadd.f32 %v5415_v26, %v11512_v35  ;;  %5597 = vmatmul.bf16.gmra.mxu3 %v11065_v23  ;;  %5686 = vmatmul.bf16.gmra.mxu0 %v11059_v18 }
 0x83b   : > { %6168 = vmatpush.bf16.msra.mxu2 %v7764_v32  ;;  %6079 = vmatpush.bf16.msra.mxu1 %v7540_v42 }
 0x83c   : > { %6390 = vst [vmem:[%s11237_s17 + $0x24] sm:$0xff] %v6261_v57  ;;  %v11710_v58 = vadd.f32 %v5504_v43, %v5416_v29  ;;  %5730 = vmatmul.bf16.vlgmr.msrb.gmra.mxu1 %v10800_v62 }
 0x83d   : > { %v5558_v45 = vpop.f32.mrf.mxu3 }
 0x83e   : > { %v5559_v30 = vadd.f32 %v5558_v45, %v11691_v63 }
 0x83f   : > { %v5649_v38 = vpop.f32.mrf.mxu0 }
 0x840   : > { %v5648_v50 = vadd.f32 %v5647_v61, %v5559_v30  ;;  %v7757_v61 = vld [vmem:[%s12439_s12 + $0x33c] sm:$0xf0] }
 0x841   : > { %v5417_v26 = vpop.f32.mrf.mxu1  ;;  %v5506_v43 = vpop.f32.mrf.mxu2  ;;  %v7760_v9 = vor.u32 %v8050_v56, %v7757_v61 }
 0x842   : > { %v6265_v57 = vpack.c.bf16 %v5648_v50, %v11547_v25  ;;  %v5418_v29 = vadd.f32 %v5417_v26, %v11512_v35  ;;  %v12777_v26 = vld [vmem:[#allocation80_spill] sm:$0xff] }
 0x843   : > { %5990 = vmatpush.bf16.msra.mxu0 %v7760_v9 }
 0x844   : > { %6394 = vst [vmem:[%s11237_s17 + $0x40] sm:$0xff] %v6265_v57  ;;  %v11735_v11 = vadd.f32 %v5506_v43, %v5418_v29 }
 0x845   : > { %v5560_v45 = vpop.f32.mrf.mxu3 }
 0x846   : > { %v5561_v46 = vadd.f32 %v5560_v45, %v11691_v63  ;;  %5824 = vmatmul.bf16.gmra.mxu2 %v12776_v60 }
 0x847   : > { %v5652_v25 = vpop.f32.mrf.mxu0 }
 0x848   : > { %v5650_v12 = vadd.f32 %v5649_v38, %v5561_v46 }
 0x849   : > { %v5420_v30 = vpop.f32.mrf.mxu1  ;;  %v5509_v32 = vpop.f32.mrf.mxu2 }
 0x84a   : > { %v6269_v55 = vpack.c.bf16 %v5650_v12, %v11554_v10  ;;  %v5421_v42 = vadd.f32 %v5420_v30, %v11512_v35  ;;  %5602 = vmatmul.bf16.gmra.mxu3 %v11083_v40  ;;  %5691 = vmatmul.bf16.gmra.mxu0 %v11077_v51 }
 0x84c   : > { %6398 = vst [vmem:[%s11237_s17 + $0x5c] sm:$0xff] %v6269_v55  ;;  %v11750_v50 = vadd.f32 %v5509_v32, %v5421_v42  ;;  %5735 = vmatmul.bf16.gmra.mxu1 %v12777_v26 }
 0x84d   : > { %v5563_v43 = vpop.f32.mrf.mxu3 }
 0x84e   : > { %v5564_v57 = vadd.f32 %v5563_v43, %v11691_v63 }
 0x84f   : > { %v5654_v38 = vpop.f32.mrf.mxu0 }
 0x850   : > { %v5653_v29 = vadd.f32 %v5652_v25, %v5564_v57  ;;  %v7987_v57 = vld [vmem:[%s12439_s12 + $0x12c] sm:$0xf] }
 0x851   : > { %v5422_v56 = vpop.f32.mrf.mxu1  ;;  %v5511_v61 = vpop.f32.mrf.mxu2 }
 0x852   : > { %v6273_v10 = vpack.c.bf16 %v5653_v29, %v11563_v31  ;;  %v5423_v45 = vadd.f32 %v5422_v56, %v11512_v35  ;;  %v7735_v56 = vld [vmem:[%s12439_s12 + $0x2f0] sm:$0xf] }
 0x854   : > { %6402 = vst [vmem:[%s11237_s17 + $0x78] sm:$0xff] %v6273_v10  ;;  %v11757_v9 = vadd.f32 %v5511_v61, %v5423_v45  ;;  %v8047_v61 = vld [vmem:[%s12439_s12 + $0x308] sm:$0xf0]  ;;  %v7511_v10 = vld [vmem:[%s12439_s12 + $0x130] sm:$0xf] }
 0x855   : > { %v5565_v46 = vpop.f32.mrf.mxu3 }
 0x856   : > { %v5566_v12 = vadd.f32 %v5565_v46, %v11691_v63  ;;  %5829 = vmatmul.bf16.gmra.mxu2 %v10843_v37  ;;  %v7736_v46 = vor.u32 %v8047_v61, %v7735_v56 }
 0x857   : > { %v5657_v30 = vpop.f32.mrf.mxu0 }
 0x858   : > { %v5655_v32 = vadd.f32 %v5654_v38, %v5566_v12  ;;  %v7505_v38 = vld [vmem:[%s12439_s12 + $0x144] sm:$0xf0]  ;;  %v7991_v12 = vld [vmem:[%s12439_s12 + $0x148] sm:$0xf0]  ;;  %6169 = vmatpush.bf16.msra.mxu2 %v7736_v46 }
 0x859   : > { %v5425_v55 = vpop.f32.mrf.mxu1  ;;  %v5514_v42 = vpop.f32.mrf.mxu2  ;;  %v7508_v29 = vor.u32 %v7987_v57, %v7505_v38 }
 0x85a   : > { %v6277_v25 = vpack.c.bf16 %v5655_v32, %v11582_v24  ;;  %v5426_v43 = vadd.f32 %v5425_v55, %v11512_v35  ;;  %5607 = vmatmul.bf16.gmra.mxu3 %v11113_v59  ;;  %5696 = vmatmul.bf16.gmra.mxu0 %v11107_v19  ;;  %v7512_v55 = vor.u32 %v7991_v12, %v7511_v10 }
 0x85b   : > { %5902 = vmatpush.bf16.msra.mxu3 %v7508_v29 }
 0x85c   : > { %6406 = vst [vmem:[%s11237_s17 + $0x94] sm:$0xff] %v6277_v25  ;;  %v11766_v31 = vadd.f32 %v5514_v42, %v5426_v43  ;;  %5740 = vmatmul.bf16.gmra.mxu1 %v10848_v52 }
 0x85d   : > { %v5568_v24 = vpop.f32.mrf.mxu3  ;;  %6080 = vmatpush.bf16.msra.mxu1 %v7512_v55 }
 0x85e   : > { %v5569_v45 = vadd.f32 %v5568_v24, %v11691_v63  ;;  %v8043_v24 = vld [vmem:[%s12439_s12 + $0x2ec] sm:$0xf] }
 0x85f   : > { %v5659_v32 = vpop.f32.mrf.mxu0 }
 0x860   : > { %v5658_v42 = vadd.f32 %v5657_v30, %v5569_v45  ;;  %v7729_v30 = vld [vmem:[%s12439_s12 + $0x304] sm:$0xf0] }
 0x861   : > { %v5427_v25 = vpop.f32.mrf.mxu1  ;;  %v5516_v43 = vpop.f32.mrf.mxu2  ;;  %v7732_v56 = vor.u32 %v8043_v24, %v7729_v30 }
 0x862   : > { %v6281_v57 = vpack.c.bf16 %v5658_v42, %v11591_v28  ;;  %v5428_v38 = vadd.f32 %v5427_v25, %v11512_v35 }
 0x863   : > { %5991 = vmatpush.bf16.msra.mxu0 %v7732_v56 }
 0x864   : > { %6410 = vst [vmem:[%s11237_s17 + $0xb0] sm:$0xff] %v6281_v57  ;;  %v11791_v59 = vadd.f32 %v5516_v43, %v5428_v38 }
 0x865   : > { %v5570_v29 = vpop.f32.mrf.mxu3 }
 0x866   : > { %v5571_v61 = vadd.f32 %v5570_v29, %v11691_v63  ;;  %5834 = vmatmul.bf16.gmra.mxu2 %v10879_v47 }
 0x867   : > { %v5662_v28 = vpop.f32.mrf.mxu0 }
 0x868   : > { %v5660_v10 = vadd.f32 %v5659_v32, %v5571_v61  ;;  %v7980_v61 = vld [vmem:[%s12439_s12 + $0xf4] sm:$0xf] }
 0x869   : > { %v5430_v45 = vpop.f32.mrf.mxu1  ;;  %v5519_v46 = vpop.f32.mrf.mxu2 }
 0x86a   : > { %v6285_v12 = vpack.c.bf16 %v5660_v10, %v11598_v39  ;;  %v5431_v55 = vadd.f32 %v5430_v45, %v11512_v35  ;;  %5612 = vmatmul.bf16.gmra.mxu3 %v11131_v33  ;;  %5701 = vmatmul.bf16.gmra.mxu0 %v11125_v20  ;;  %v7477_v10 = vld [vmem:[%s12439_s12 + $0x10c] sm:$0xf0] }
 0x86b   : > { %v7480_v45 = vor.u32 %v7980_v61, %v7477_v10  ;;  %v7673_v61 = vld [vmem:[%s12439_s12 + $0x294] sm:$0xf0] }
 0x86c   : > { %6414 = vst [vmem:[%s11237_s17 + $0xcc] sm:$0xff] %v6285_v12  ;;  %v11806_v42 = vadd.f32 %v5519_v46, %v5431_v55  ;;  %5745 = vmatmul.bf16.gmra.mxu1 %v10884_v22  ;;  %v7701_v46 = vld [vmem:[%s12439_s12 + $0x2cc] sm:$0xf0] }
 0x86d   : > { %v5573_v25 = vpop.f32.mrf.mxu3  ;;  %5903 = vmatpush.bf16.msra.mxu3 %v7480_v45 }
 0x86e   : > { %v5574_v43 = vadd.f32 %v5573_v25, %v11691_v63 }
 0x86f   : > { %v5664_v32 = vpop.f32.mrf.mxu0 }
 0x870   : > { %v5663_v57 = vadd.f32 %v5662_v28, %v5574_v43  ;;  %v8036_v28 = vld [vmem:[%s12439_s12 + $0x2b4] sm:$0xf] }
 0x871   : > { %v5432_v38 = vpop.f32.mrf.mxu1  ;;  %v5521_v24 = vpop.f32.mrf.mxu2  ;;  %v7704_v55 = vor.u32 %v8036_v28, %v7701_v46 }
 0x872   : > { %v6289_v39 = vpack.c.bf16 %v5663_v57, %v11607_v5  ;;  %v5433_v30 = vadd.f32 %v5432_v38, %v11512_v35  ;;  %v7973_v38 = vld [vmem:[%s12439_s12 + $0xbc] sm:$0xf] }
 0x873   : > { %5992 = vmatpush.bf16.msra.mxu0 %v7704_v55  ;;  %v7483_v55 = vld [vmem:[%s12439_s12 + $0xf8] sm:$0xf] }
 0x874   : > { %6418 = vst [vmem:[%s11237_s17 + $0xe8] sm:$0xff] %v6289_v39  ;;  %v11813_v29 = vadd.f32 %v5521_v24, %v5433_v30  ;;  %v7449_v24 = vld [vmem:[%s12439_s12 + $0xd4] sm:$0xf0]  ;;  %v8029_v39 = vld [vmem:[%s12439_s12 + $0x27c] sm:$0xf] }
 0x875   : > { %v5575_v56 = vpop.f32.mrf.mxu3  ;;  %v7676_v10 = vor.u32 %v8029_v39, %v7673_v61  ;;  %v8022_v39 = vld [vmem:[%s12439_s12 + $0x244] sm:$0xf] }
 0x876   : > { %v5576_v5 = vadd.f32 %v5575_v56, %v11691_v63  ;;  %5839 = vmatmul.bf16.gmra.mxu2 %v10891_v48  ;;  %v7452_v56 = vor.u32 %v7973_v38, %v7449_v24  ;;  %v7421_v24 = vld [vmem:[%s12439_s12 + $0x9c] sm:$0xf0] }
 0x877   : > { %v5667_v12 = vpop.f32.mrf.mxu0  ;;  %5993 = vmatpush.bf16.msra.mxu0 %v7676_v10 }
 0x878   : > { %v5665_v25 = vadd.f32 %v5664_v32, %v5576_v5  ;;  %v8040_v5 = vld [vmem:[%s12439_s12 + $0x2d0] sm:$0xf0]  ;;  %5904 = vmatpush.bf16.msra.mxu3 %v7452_v56 }
 0x879   : > { %v5435_v43 = vpop.f32.mrf.mxu1  ;;  %v5524_v57 = vpop.f32.mrf.mxu2 }
 0x87a   : > { %v6293_v30 = vpack.c.bf16 %v5665_v25, %v11626_v41  ;;  %v5436_v32 = vadd.f32 %v5435_v43, %v11512_v35  ;;  %5617 = vmatmul.bf16.gmra.mxu3 %v11161_v14  ;;  %5706 = vmatmul.bf16.gmra.mxu0 %v11155_v17  ;;  %v7707_v41 = vld [vmem:[%s12439_s12 + $0x2b8] sm:$0xf]  ;;  %v7984_v25 = vld [vmem:[%s12439_s12 + $0x110] sm:$0xf0]  ;;  %v7966_v43 = vld [vmem:[%s12439_s12 + $0x84] sm:$0xf] }
 0x87b   : > { %v7708_v46 = vor.u32 %v8040_v5, %v7707_v41  ;;  %v7484_v38 = vor.u32 %v7984_v25, %v7483_v55  ;;  %v7424_v56 = vor.u32 %v7966_v43, %v7421_v24  ;;  %v7393_v55 = vld [vmem:[%s12439_s12 + $0x64] sm:$0xf0] }
 0x87c   : > { %6422 = vst [vmem:[%s11237_s17 + $0x104] sm:$0xff] %v6293_v30  ;;  %v11846_v28 = vadd.f32 %v5524_v57, %v5436_v32  ;;  %5750 = vmatmul.bf16.gmra.mxu1 %v10917_v7  ;;  %v7645_v30 = vld [vmem:[%s12439_s12 + $0x25c] sm:$0xf0] }
 0x87d   : > { %v5578_v45 = vpop.f32.mrf.mxu3  ;;  %6170 = vmatpush.bf16.msra.mxu2 %v7708_v46  ;;  %v7648_v61 = vor.u32 %v8022_v39, %v7645_v30  ;;  %6081 = vmatpush.bf16.msra.mxu1 %v7484_v38  ;;  %v8015_v46 = vld [vmem:[%s12439_s12 + $0x20c] sm:$0xf]  ;;  %v7952_v30 = vld [vmem:[%s12439_s12 + $0x14] sm:$0xf] }
 0x87e   : > { %v5579_v57 = vadd.f32 %v5578_v45, %v11691_v63  ;;  %5905 = vmatpush.bf16.msra.mxu3 %v7424_v56  ;;  %v7959_v45 = vld [vmem:[%s12439_s12 + $0x4c] sm:$0xf]  ;;  %v8008_v56 = vld [vmem:[%s12439_s12 + $0x1d4] sm:$0xf] }
 0x87f   : > { %v5669_v32 = vpop.f32.mrf.mxu0  ;;  %5994 = vmatpush.bf16.msra.mxu0 %v7648_v61  ;;  %v7396_v43 = vor.u32 %v7959_v45, %v7393_v55 }
 0x880   : > { %v5668_v10 = vadd.f32 %v5667_v12, %v5579_v57  ;;  %v7617_v57 = vld [vmem:[%s12439_s12 + $0x224] sm:$0xf0] }
 0x881   : > { %v5437_v41 = vpop.f32.mrf.mxu1  ;;  %v5526_v5 = vpop.f32.mrf.mxu2  ;;  %v7620_v38 = vor.u32 %v8015_v46, %v7617_v57 }
 0x882   : > { %v6297_v25 = vpack.c.bf16 %v5668_v10, %v11635_v54  ;;  %v5438_v12 = vadd.f32 %v5437_v41, %v11512_v35  ;;  %5906 = vmatpush.bf16.msra.mxu3 %v7396_v43  ;;  %v7365_v54 = vld [vmem:[%s12439_s12 + $0x2c] sm:$0xf0] }
 0x883   : > { %5995 = vmatpush.bf16.msra.mxu0 %v7620_v38  ;;  %v7368_v10 = vor.u32 %v7952_v30, %v7365_v54  ;;  %v7589_v41 = vld [vmem:[%s12439_s12 + $0x1ec] sm:$0xf0] }
 0x884   : > { %6426 = vst [vmem:[%s11237_s17 + $0x120] sm:$0xff] %v6297_v25  ;;  %v11889_v24 = vadd.f32 %v5526_v5, %v5438_v12  ;;  %v7592_v45 = vor.u32 %v8008_v56, %v7589_v41 }
 0x885   : > { %v5580_v39 = vpop.f32.mrf.mxu3 }
 0x886   : > { %v5581_v61 = vadd.f32 %v5580_v39, %v11691_v63  ;;  %5844 = vmatmul.bf16.gmra.mxu2 %v10963_v15  ;;  %5907 = vmatpush.bf16.msra.mxu3 %v7368_v10 }
 0x887   : > { %v5672_v5 = vpop.f32.mrf.mxu0  ;;  %5996 = vmatpush.bf16.msra.mxu0 %v7592_v45 }
 0x888   : > { %v5670_v55 = vadd.f32 %v5669_v32, %v5581_v61 }
 0x889   : > { %v5440_v46 = vpop.f32.mrf.mxu1  ;;  %v5529_v25 = vpop.f32.mrf.mxu2 }
 0x88a   : > { %v6301_v12 = vpack.c.bf16 %v5670_v55, %v11642_v8  ;;  %v5441_v43 = vadd.f32 %v5440_v46, %v11512_v35  ;;  %5622 = vmatmul.bf16.gmra.mxu3 %v11179_v3  ;;  %5711 = vmatmul.bf16.gmra.mxu0 %v11173_v27 }
 0x88c   : > { %6430 = vst [vmem:[%s11237_s17 + $0x13c] sm:$0xff] %v6301_v12  ;;  %v11910_v57 = vadd.f32 %v5529_v25, %v5441_v43  ;;  %5755 = vmatmul.bf16.gmra.mxu1 %v10980_v21 }
 0x88d   : > { %v5583_v38 = vpop.f32.mrf.mxu3 }
 0x88e   : > { %v5584_v32 = vadd.f32 %v5583_v38, %v11691_v63  ;;  %v7679_v38 = vld [vmem:[%s12439_s12 + $0x280] sm:$0xf] }
 0x88f   : > { %v5674_v39 = vpop.f32.mrf.mxu0 }
 0x890   : > { %v5673_v30 = vadd.f32 %v5672_v5, %v5584_v32 }
 0x891   : > { %v5442_v54 = vpop.f32.mrf.mxu1  ;;  %v5531_v56 = vpop.f32.mrf.mxu2 }
 0x892   : > { %v6305_v8 = vpack.c.bf16 %v5673_v30, %v11651_v49  ;;  %v5443_v61 = vadd.f32 %v5442_v54, %v11512_v35  ;;  %v7455_v30 = vld [vmem:[%s12439_s12 + $0xc0] sm:$0xf]  ;;  %v7977_v54 = vld [vmem:[%s12439_s12 + $0xd8] sm:$0xf0] }
 0x894   : > { %6434 = vst [vmem:[%s11237_s17 + $0x158] sm:$0xff] %v6305_v8  ;;  %v11917_v10 = vadd.f32 %v5531_v56, %v5443_v61  ;;  %v7456_v8 = vor.u32 %v7977_v54, %v7455_v30 }
 0x895   : > { %v5585_v41 = vpop.f32.mrf.mxu3 }
 0x896   : > { %v5586_v45 = vadd.f32 %v5585_v41, %v11691_v63  ;;  %5849 = vmatmul.bf16.gmra.mxu2 %v10989_v53  ;;  %6082 = vmatpush.bf16.msra.mxu1 %v7456_v8 }
 0x897   : > { %v5677_v55 = vpop.f32.mrf.mxu0 }
 0x898   : > { %v5675_v46 = vadd.f32 %v5674_v39, %v5586_v45 }
 0x899   : > { %v5445_v25 = vpop.f32.mrf.mxu1  ;;  %v5534_v12 = vpop.f32.mrf.mxu2 }
 0x89a   : > { %v6309_v5 = vpack.c.bf16 %v5675_v46, %v11676_v1  ;;  %v5446_v43 = vadd.f32 %v5445_v25, %v11512_v35  ;;  %5627 = vmatmul.bf16.gmra.mxu3 %v11221_v13  ;;  %5716 = vmatmul.bf16.gmra.mxu0 %v11209_v0  ;;  %v8033_v1 = vld [vmem:[%s12439_s12 + $0x298] sm:$0xf0] }
 0x89b   : > { %v7680_v39 = vor.u32 %v8033_v1, %v7679_v38 }
 0x89c   : > { %6438 = vst [vmem:[%s11237_s17 + $0x174] sm:$0xff] %v6309_v5  ;;  %v11926_v49 = vadd.f32 %v5534_v12, %v5446_v43  ;;  %5760 = vmatmul.bf16.gmra.mxu1 %v12773_v2 }
 0x89d   : > { %v5588_v32 = vpop.f32.mrf.mxu3  ;;  %6171 = vmatpush.bf16.msra.mxu2 %v7680_v39 }
 0x89e   : > { %v5589_v56 = vadd.f32 %v5588_v32, %v11691_v63 }
 0x89f   : > { %v5679_v61 = vpop.f32.mrf.mxu0 }
 0x8a0   : > { %v5678_v41 = vadd.f32 %v5677_v55, %v5589_v56  ;;  %v12778_v56 = vld [vmem:[#allocation13_spill] sm:$0xff] }
 0x8a1   : > { %v5447_v45 = vpop.f32.mrf.mxu1  ;;  %v5536_v46 = vpop.f32.mrf.mxu2 }
 0x8a2   : > { %v6313_v25 = vpack.c.bf16 %v5678_v41, %v11694_v34  ;;  %v5448_v12 = vadd.f32 %v5447_v45, %v11512_v35 }
 0x8a4   : > { %6442 = vst [vmem:[%s11237_s17 + $0x190] sm:$0xff] %v6313_v25  ;;  %v11945_v5 = vadd.f32 %v5536_v46, %v5448_v12 }
 0x8a5   : > { %v5590_v43 = vpop.f32.mrf.mxu3 }
 0x8a6   : > { %v5591_v38 = vadd.f32 %v5590_v43, %v11691_v63  ;;  %5854 = vmatmul.bf16.gmra.mxu2 %v12774_v4 }
 0x8a7   : > { %v5682_v1 = vpop.f32.mrf.mxu0 }
 0x8a8   : > { %v5680_v32 = vadd.f32 %v5679_v61, %v5591_v38 }
 0x8a9   : > { %v5450_v39 = vpop.f32.mrf.mxu1  ;;  %v5539_v55 = vpop.f32.mrf.mxu2 }
 0x8aa   : > { %v6317_v30 = vpack.c.bf16 %v5680_v32, %v11701_v16  ;;  %v5451_v54 = vadd.f32 %v5450_v39, %v11512_v35  ;;  %5908 = vmatmul.bf16.vlgmr.msra.gmra.mxu3 %v10800_v62  ;;  %5997 = vmatmul.bf16.vlgmr.msra.gmra.mxu0 %v10795_v44  ;;  %v11968_v39 = vld [vmem:[%s12440_s13] sm:$0x7f] }
 0x8ac   : > { %6446 = vst [vmem:[%s11237_s17 + $0x1ac] sm:$0xff] %v6317_v30  ;;  %v11954_v34 = vadd.f32 %v5539_v55, %v5451_v54  ;;  %5765 = vmatmul.bf16.gmra.mxu1 %v12778_v56 }
 0x8ad   : > { %v5593_v8 = vpop.f32.mrf.mxu3 }
 0x8ae   : > { %v5594_v41 = vadd.f32 %v5593_v8, %v11691_v63 }
 0x8af   : > { %v5684_v61 = vpop.f32.mrf.mxu0 }
 0x8b0   : > { %v5683_v45 = vadd.f32 %v5682_v1, %v5594_v41  ;;  %v11971_v1 = vperm.slane %v11968_v39, 4 }
 0x8b1   : > { %v5452_v46 = vpop.f32.mrf.mxu1  ;;  %v5541_v25 = vpop.f32.mrf.mxu2 }
 0x8b2   : > { %v6321_v16 = vpack.c.bf16 %v5683_v45, %v11710_v58  ;;  %v5453_v12 = vadd.f32 %v5452_v46, %v11512_v35  ;;  %v7651_v45 = vld [vmem:[%s12439_s12 + $0x248] sm:$0xf] }
 0x8b4   : > { %6450 = vst [vmem:[%s11237_s17 + $0x1c8] sm:$0xff] %v6321_v16  ;;  %v11961_v43 = vadd.f32 %v5541_v25, %v5453_v12  ;;  %v7427_v25 = vld [vmem:[%s12439_s12 + $0x88] sm:$0xf]  ;;  %v7970_v16 = vld [vmem:[%s12439_s12 + $0xa0] sm:$0xf0] }
 0x8b5   : > { %v5595_v38 = vpop.f32.mrf.mxu3 }
 0x8b6   : > { %v5596_v32 = vadd.f32 %v5595_v38, %v11691_v63  ;;  %5859 = vmatmul.bf16.gmra.mxu2 %v11028_v6  ;;  %v7428_v38 = vor.u32 %v7970_v16, %v7427_v25 }
 0x8b7   : > { %v5687_v58 = vpop.f32.mrf.mxu0 }
 0x8b8   : > { %v5685_v55 = vadd.f32 %v5684_v61, %v5596_v32  ;;  %6083 = vmatpush.bf16.msra.mxu1 %v7428_v38 }
 0x8b9   : > { %v5731_v35 = vpop.f32.mrf.mxu1  ;;  %v5820_v30 = vpop.f32.mrf.mxu2 }
 0x8ba   : > { %v6325_v54 = vpack.c.bf16 %v5685_v55, %v11735_v11  ;;  %v5732_v8 = vadd.f32 %v5731_v35, %v11971_v1  ;;  %5913 = vmatmul.bf16.gmra.mxu3 %v12777_v26  ;;  %6002 = vmatmul.bf16.gmra.mxu0 %v12776_v60  ;;  %v8026_v11 = vld [vmem:[%s12439_s12 + $0x260] sm:$0xf0] }
 0x8bb   : > { %v7652_v46 = vor.u32 %v8026_v11, %v7651_v45 }
 0x8bc   : > { %6454 = vst [vmem:[%s11237_s17 + $0x1e4] sm:$0xff] %v6325_v54  ;;  %v11978_v41 = vadd.f32 %v5820_v30, %v5732_v8  ;;  %5770 = vmatmul.bf16.gmra.mxu1 %v11035_v36 }
 0x8bd   : > { %v5598_v61 = vpop.f32.mrf.mxu3  ;;  %6172 = vmatpush.bf16.msra.mxu2 %v7652_v46 }
 0x8be   : > { %v5599_v12 = vadd.f32 %v5598_v61, %v11691_v63 }
 0x8bf   : > { %v5689_v32 = vpop.f32.mrf.mxu0 }
 0x8c0   : > { %v5688_v55 = vadd.f32 %v5687_v58, %v5599_v12 }
 0x8c1   : > { %v5733_v35 = vpop.f32.mrf.mxu1  ;;  %v5822_v30 = vpop.f32.mrf.mxu2 }
 0x8c2   : > { %v6329_v54 = vpack.c.bf16 %v5688_v55, %v11750_v50  ;;  %v5734_v8 = vadd.f32 %v5733_v35, %v11971_v1 }
 0x8c4   : > { %6458 = vst [vmem:[%s11237_s17 + $0x200] sm:$0xff] %v6329_v54  ;;  %v11997_v45 = vadd.f32 %v5822_v30, %v5734_v8 }
 0x8c5   : > { %v5600_v11 = vpop.f32.mrf.mxu3 }
 0x8c6   : > { %v5601_v26 = vadd.f32 %v5600_v11, %v11691_v63  ;;  %5864 = vmatmul.bf16.gmra.mxu2 %v11059_v18 }
 0x8c7   : > { %v5692_v61 = vpop.f32.mrf.mxu0 }
 0x8c8   : > { %v5690_v25 = vadd.f32 %v5689_v32, %v5601_v26 }
 0x8c9   : > { %v5736_v46 = vpop.f32.mrf.mxu1  ;;  %v5825_v58 = vpop.f32.mrf.mxu2 }
 0x8ca   : > { %v6333_v16 = vpack.c.bf16 %v5690_v25, %v11757_v9  ;;  %v5737_v12 = vadd.f32 %v5736_v46, %v11971_v1  ;;  %5918 = vmatmul.bf16.gmra.mxu3 %v10848_v52  ;;  %6007 = vmatmul.bf16.gmra.mxu0 %v10843_v37 }
 0x8cc   : > { %6462 = vst [vmem:[%s11237_s17 + $0x21c] sm:$0xff] %v6333_v16  ;;  %v12006_v50 = vadd.f32 %v5825_v58, %v5737_v12  ;;  %5775 = vmatmul.bf16.gmra.mxu1 %v11065_v23 }
 0x8cd   : > { %v5603_v38 = vpop.f32.mrf.mxu3 }
 0x8ce   : > { %v5604_v55 = vadd.f32 %v5603_v38, %v11691_v63 }
 0x8cf   : > { %v5694_v26 = vpop.f32.mrf.mxu0 }
 0x8d0   : > { %v5693_v32 = vadd.f32 %v5692_v61, %v5604_v55  ;;  %v7623_v55 = vld [vmem:[%s12439_s12 + $0x210] sm:$0xf] }
 0x8d1   : > { %v5738_v35 = vpop.f32.mrf.mxu1  ;;  %v5827_v30 = vpop.f32.mrf.mxu2 }
 0x8d2   : > { %v6337_v9 = vpack.c.bf16 %v5693_v32, %v11766_v31  ;;  %v5739_v54 = vadd.f32 %v5738_v35, %v11971_v1  ;;  %v7399_v35 = vld [vmem:[%s12439_s12 + $0x50] sm:$0xf] }
 0x8d4   : > { %6466 = vst [vmem:[%s11237_s17 + $0x238] sm:$0xff] %v6337_v9  ;;  %v12013_v8 = vadd.f32 %v5827_v30, %v5739_v54  ;;  %v7963_v30 = vld [vmem:[%s12439_s12 + $0x68] sm:$0xf0] }
 0x8d5   : > { %v5605_v11 = vpop.f32.mrf.mxu3  ;;  %v7400_v54 = vor.u32 %v7963_v30, %v7399_v35 }
 0x8d6   : > { %v5606_v25 = vadd.f32 %v5605_v11, %v11691_v63  ;;  %5869 = vmatmul.bf16.gmra.mxu2 %v11077_v51 }
 0x8d7   : > { %v5697_v46 = vpop.f32.mrf.mxu0  ;;  %6084 = vmatpush.bf16.msra.mxu1 %v7400_v54  ;;  %v12779_v54 = vld [vmem:[#allocation58_spill] sm:$0xff] }
 0x8d8   : > { %v5695_v58 = vadd.f32 %v5694_v26, %v5606_v25 }
 0x8d9   : > { %v5741_v16 = vpop.f32.mrf.mxu1  ;;  %v5830_v12 = vpop.f32.mrf.mxu2 }
 0x8da   : > { %v6341_v61 = vpack.c.bf16 %v5695_v58, %v11791_v59  ;;  %v5742_v38 = vadd.f32 %v5741_v16, %v11971_v1  ;;  %5923 = vmatmul.bf16.gmra.mxu3 %v10884_v22  ;;  %6012 = vmatmul.bf16.gmra.mxu0 %v10879_v47  ;;  %v8019_v59 = vld [vmem:[%s12439_s12 + $0x228] sm:$0xf0] }
 0x8db   : > { %v7624_v32 = vor.u32 %v8019_v59, %v7623_v55 }
 0x8dc   : > { %6470 = vst [vmem:[%s11237_s17 + $0x254] sm:$0xff] %v6341_v61  ;;  %v12022_v31 = vadd.f32 %v5830_v12, %v5742_v38  ;;  %5780 = vmatmul.bf16.gmra.mxu1 %v11083_v40 }
 0x8dd   : > { %v5608_v26 = vpop.f32.mrf.mxu3  ;;  %6173 = vmatpush.bf16.msra.mxu2 %v7624_v32 }
 0x8de   : > { %v5609_v9 = vadd.f32 %v5608_v26, %v11691_v63 }
 0x8df   : > { %v5699_v11 = vpop.f32.mrf.mxu0 }
 0x8e0   : > { %v5698_v25 = vadd.f32 %v5697_v46, %v5609_v9 }
 0x8e1   : > { %v5743_v58 = vpop.f32.mrf.mxu1  ;;  %v5832_v16 = vpop.f32.mrf.mxu2 }
 0x8e2   : > { %v6345_v12 = vpack.c.bf16 %v5698_v25, %v11806_v42  ;;  %v5744_v61 = vadd.f32 %v5743_v58, %v11971_v1 }
 0x8e4   : > { %6474 = vst [vmem:[%s11237_s17 + $0x270] sm:$0xff] %v6345_v12  ;;  %v12041_v38 = vadd.f32 %v5832_v16, %v5744_v61 }
 0x8e5   : > { %v5610_v55 = vpop.f32.mrf.mxu3 }
 0x8e6   : > { %v5611_v59 = vadd.f32 %v5610_v55, %v11691_v63  ;;  %5874 = vmatmul.bf16.gmra.mxu2 %v11107_v19 }
 0x8e7   : > { %v5702_v26 = vpop.f32.mrf.mxu0 }
 0x8e8   : > { %v5700_v35 = vadd.f32 %v5699_v11, %v5611_v59 }
 0x8e9   : > { %v5746_v32 = vpop.f32.mrf.mxu1  ;;  %v5835_v46 = vpop.f32.mrf.mxu2 }
 0x8ea   : > { %v6349_v30 = vpack.c.bf16 %v5700_v35, %v11813_v29  ;;  %v5747_v9 = vadd.f32 %v5746_v32, %v11971_v1  ;;  %5928 = vmatmul.bf16.gmra.mxu3 %v10917_v7  ;;  %6017 = vmatmul.bf16.gmra.mxu0 %v10891_v48 }
 0x8ec   : > { %6478 = vst [vmem:[%s11237_s17 + $0x28c] sm:$0xff] %v6349_v30  ;;  %v12050_v42 = vadd.f32 %v5835_v46, %v5747_v9  ;;  %5785 = vmatmul.bf16.gmra.mxu1 %v12779_v54 }
 0x8ed   : > { %v5613_v25 = vpop.f32.mrf.mxu3 }
 0x8ee   : > { %v5614_v58 = vadd.f32 %v5613_v25, %v11691_v63 }
 0x8ef   : > { %v5704_v11 = vpop.f32.mrf.mxu0 }
 0x8f0   : > { %v5703_v16 = vadd.f32 %v5702_v26, %v5614_v58 }
 0x8f1   : > { %v5748_v12 = vpop.f32.mrf.mxu1  ;;  %v5837_v61 = vpop.f32.mrf.mxu2 }
 0x8f2   : > { %v6353_v29 = vpack.c.bf16 %v5703_v16, %v11846_v28  ;;  %v5749_v55 = vadd.f32 %v5748_v12, %v11971_v1  ;;  %v7595_v16 = vld [vmem:[%s12439_s12 + $0x1d8] sm:$0xf] }
 0x8f4   : > { %6482 = vst [vmem:[%s11237_s17 + $0x2a8] sm:$0xff] %v6353_v29  ;;  %v12057_v59 = vadd.f32 %v5837_v61, %v5749_v55  ;;  %v7371_v61 = vld [vmem:[%s12439_s12 + $0x18] sm:$0xf]  ;;  %v7956_v29 = vld [vmem:[%s12439_s12 + $0x30] sm:$0xf0] }
 0x8f5   : > { %v5615_v35 = vpop.f32.mrf.mxu3 }
 0x8f6   : > { %v5616_v32 = vadd.f32 %v5615_v35, %v11691_v63  ;;  %5879 = vmatmul.bf16.gmra.mxu2 %v11125_v20  ;;  %v7372_v35 = vor.u32 %v7956_v29, %v7371_v61 }
 0x8f7   : > { %v5707_v46 = vpop.f32.mrf.mxu0 }
 0x8f8   : > { %v5705_v30 = vadd.f32 %v5704_v11, %v5616_v32  ;;  %6085 = vmatpush.bf16.msra.mxu1 %v7372_v35 }
 0x8f9   : > { %v5751_v9 = vpop.f32.mrf.mxu1  ;;  %v5840_v25 = vpop.f32.mrf.mxu2 }
 0x8fa   : > { %v6357_v26 = vpack.c.bf16 %v5705_v30, %v11889_v24  ;;  %v5752_v58 = vadd.f32 %v5751_v9, %v11971_v1  ;;  %5933 = vmatmul.bf16.gmra.mxu3 %v10980_v21  ;;  %6022 = vmatmul.bf16.gmra.mxu0 %v10963_v15  ;;  %v8012_v24 = vld [vmem:[%s12439_s12 + $0x1f0] sm:$0xf0] }
 0x8fb   : > { %v7596_v12 = vor.u32 %v8012_v24, %v7595_v16 }
 0x8fc   : > { %6486 = vst [vmem:[%s11237_s17 + $0x2c4] sm:$0xff] %v6357_v26  ;;  %v12066_v28 = vadd.f32 %v5840_v25, %v5752_v58  ;;  %5790 = vmatmul.bf16.gmra.mxu1 %v11131_v33 }
 0x8fd   : > { %v5618_v11 = vpop.f32.mrf.mxu3  ;;  %6174 = vmatpush.bf16.msra.mxu2 %v7596_v12 }
 0x8fe   : > { %v5619_v55 = vadd.f32 %v5618_v11, %v11691_v63 }
 0x8ff   : > { %v5709_v32 = vpop.f32.mrf.mxu0 }
 0x900   : > { %v5708_v30 = vadd.f32 %v5707_v46, %v5619_v55 }
 0x901   : > { %v5753_v9 = vpop.f32.mrf.mxu1  ;;  %v5842_v25 = vpop.f32.mrf.mxu2 }
 0x902   : > { %v6361_v26 = vpack.c.bf16 %v5708_v30, %v11910_v57  ;;  %v5754_v58 = vadd.f32 %v5753_v9, %v11971_v1 }
 0x904   : > { %6490 = vst [vmem:[%s11237_s17 + $0x2e0] sm:$0xff] %v6361_v26  ;;  %v12085_v16 = vadd.f32 %v5842_v25, %v5754_v58 }
 0x905   : > { %v5620_v24 = vpop.f32.mrf.mxu3 }
 0x906   : > { %v5621_v21 = vadd.f32 %v5620_v24, %v11691_v63  ;;  %5884 = vmatmul.bf16.gmra.mxu2 %v11155_v17 }
 0x907   : > { %v5712_v11 = vpop.f32.mrf.mxu0 }
 0x908   : > { %v5710_v61 = vadd.f32 %v5709_v32, %v5621_v21 }
 0x909   : > { %v5756_v12 = vpop.f32.mrf.mxu1  ;;  %v5845_v46 = vpop.f32.mrf.mxu2 }
 0x90a   : > { %v6365_v29 = vpack.c.bf16 %v5710_v61, %v11917_v10  ;;  %v5757_v55 = vadd.f32 %v5756_v12, %v11971_v1  ;;  %5938 = vmatmul.bf16.gmra.mxu3 %v12773_v2  ;;  %6027 = vmatmul.bf16.gmra.mxu0 %v10989_v53 }
 0x90c   : > { %6494 = vst [vmem:[%s11237_s17 + $0x2fc] sm:$0xff] %v6365_v29  ;;  %v12094_v57 = vadd.f32 %v5845_v46, %v5757_v55  ;;  %5795 = vmatmul.bf16.gmra.mxu1 %v11161_v14 }
 0x90d   : > { %v5623_v35 = vpop.f32.mrf.mxu3 }
 0x90e   : > { %v5624_v30 = vadd.f32 %v5623_v35, %v11691_v63 }
 0x90f   : > { %v5714_v21 = vpop.f32.mrf.mxu0 }
 0x910   : > { %v5713_v32 = vadd.f32 %v5712_v11, %v5624_v30 }
 0x911   : > { %v5758_v9 = vpop.f32.mrf.mxu1  ;;  %v5847_v25 = vpop.f32.mrf.mxu2 }
 0x912   : > { %v6369_v10 = vpack.c.bf16 %v5713_v32, %v11926_v49  ;;  %v5759_v26 = vadd.f32 %v5758_v9, %v11971_v1 }
 0x914   : > { %6498 = vst [vmem:[%s11237_s17 + $0x318] sm:$0xff] %v6369_v10  ;;  %v12101_v58 = vadd.f32 %v5847_v25, %v5759_v26 }
 0x915   : > { %v5625_v24 = vpop.f32.mrf.mxu3 }
 0x916   : > { %v5626_v61 = vadd.f32 %v5625_v24, %v11691_v63  ;;  %5889 = vmatmul.bf16.gmra.mxu2 %v11173_v27 }
 0x917   : > { %v5717_v12 = vpop.f32.mrf.mxu0 }
 0x918   : > { %v5715_v46 = vadd.f32 %v5714_v21, %v5626_v61 }
 0x919   : > { %v5761_v29 = vpop.f32.mrf.mxu1  ;;  %v5850_v55 = vpop.f32.mrf.mxu2 }
 0x91a   : > { %v6373_v11 = vpack.c.bf16 %v5715_v46, %v11945_v5  ;;  %v5762_v35 = vadd.f32 %v5761_v29, %v11971_v1  ;;  %5943 = vmatmul.bf16.gmra.mxu3 %v12778_v56  ;;  %6032 = vmatmul.bf16.gmra.mxu0 %v12774_v4 }
 0x91c   : > { %6502 = vst [vmem:[%s11237_s17 + $0x334] sm:$0xff] %v6373_v11  ;;  %v12110_v49 = vadd.f32 %v5850_v55, %v5762_v35  ;;  %5800 = vmatmul.bf16.gmra.mxu1 %v11179_v3 }
 0x91d   : > { %v5628_v30 = vpop.f32.mrf.mxu3 }
 0x91e   : > { %v5629_v32 = vadd.f32 %v5628_v30, %v11691_v63  ;;  %v12126_v30 = vperm.slane %v11968_v39, 5 }
 0x91f   : > { %v5719_v21 = vpop.f32.mrf.mxu0 }
 0x920   : > { %v5718_v9 = vadd.f32 %v5717_v12, %v5629_v32 }
 0x921   : > { %v5763_v25 = vpop.f32.mrf.mxu1  ;;  %v5852_v10 = vpop.f32.mrf.mxu2 }
 0x922   : > { %v6377_v5 = vpack.c.bf16 %v5718_v9, %v11954_v34  ;;  %v5764_v26 = vadd.f32 %v5763_v25, %v11971_v1 }
 0x924   : > { %6506 = vst [vmem:[%s11237_s17 + $0x350] sm:$0xff] %v6377_v5  ;;  %v12117_v24 = vadd.f32 %v5852_v10, %v5764_v26 }
 0x925   : > { %v5630_v61 = vpop.f32.mrf.mxu3 }
 0x926   : > { %v5631_v46 = vadd.f32 %v5630_v61, %v11691_v63  ;;  %5894 = vmatmul.bf16.gmra.mxu2 %v11209_v0 }
 0x927   : > { %v5998_v29 = vpop.f32.mrf.mxu0 }
 0x928   : > { %v5720_v55 = vadd.f32 %v5719_v21, %v5631_v46 }
 0x929   : > { %v5766_v11 = vpop.f32.mrf.mxu1  ;;  %v5855_v35 = vpop.f32.mrf.mxu2 }
 0x92a   : > { %v6381_v12 = vpack.c.bf16 %v5720_v55, %v11961_v43  ;;  %v5767_v34 = vadd.f32 %v5766_v11, %v11971_v1  ;;  %5948 = vmatmul.bf16.gmra.mxu3 %v11035_v36  ;;  %6037 = vmatmul.bf16.gmra.mxu0 %v11028_v6 }
 0x92c   : > { %6510 = vst [vmem:[%s11237_s17 + $0x36c] sm:$0xff] %v6381_v12  ;;  %v12129_v63 = vadd.f32 %v5855_v35, %v5767_v34  ;;  %5805 = vmatmul.bf16.gmra.mxu1 %v11221_v13 }
 0x92d   : > { %v5909_v32 = vpop.f32.mrf.mxu3 }
 0x92e   : > { %v5910_v21 = vadd.f32 %v5909_v32, %v12126_v30 }
 0x92f   : > { %v6000_v9 = vpop.f32.mrf.mxu0 }
 0x930   : > { %v5999_v43 = vadd.f32 %v5998_v29, %v5910_v21 }
 0x931   : > { %v5768_v25 = vpop.f32.mrf.mxu1  ;;  %v5857_v10 = vpop.f32.mrf.mxu2 }
 0x932   : > { %v6258_v5 = vpack.c.bf16 %v5999_v43, %v11978_v41  ;;  %v5769_v26 = vadd.f32 %v5768_v25, %v11971_v1 }
 0x934   : > { %6386 = vst [vmem:[%s11237_s17 + $0x10] sm:$0xff] %v6258_v5  ;;  %v12136_v61 = vadd.f32 %v5857_v10, %v5769_v26 }
 0x935   : > { %v5911_v46 = vpop.f32.mrf.mxu3 }
 0x936   : > { %v5912_v55 = vadd.f32 %v5911_v46, %v12126_v30  ;;  %6175 = vmatmul.bf16.vlgmr.msra.gmra.mxu2 %v10795_v44 }
 0x937   : > { %v6003_v11 = vpop.f32.mrf.mxu0 }
 0x938   : > { %v6001_v35 = vadd.f32 %v6000_v9, %v5912_v55 }
 0x939   : > { %v5771_v12 = vpop.f32.mrf.mxu1  ;;  %v5860_v34 = vpop.f32.mrf.mxu2 }
 0x93a   : > { %v6262_v29 = vpack.c.bf16 %v6001_v35, %v11997_v45  ;;  %v5772_v32 = vadd.f32 %v5771_v12, %v11971_v1  ;;  %5953 = vmatmul.bf16.gmra.mxu3 %v11065_v23  ;;  %6042 = vmatmul.bf16.gmra.mxu0 %v11059_v18 }
 0x93c   : > { %6391 = vst [vmem:[%s11237_s17 + $0x2c] sm:$0xff] %v6262_v29  ;;  %v12145_v41 = vadd.f32 %v5860_v34, %v5772_v32  ;;  %6086 = vmatmul.bf16.vlgmr.msra.gmra.mxu1 %v10800_v62  ;;  %v12780_v32 = vld [vmem:[#allocation80_spill] sm:$0xff] }
 0x93d   : > { %v5914_v21 = vpop.f32.mrf.mxu3 }
 0x93e   : > { %v5915_v44 = vadd.f32 %v5914_v21, %v12126_v30 }
 0x93f   : > { %v6005_v9 = vpop.f32.mrf.mxu0 }
 0x940   : > { %v6004_v43 = vadd.f32 %v6003_v11, %v5915_v44 }
 0x941   : > { %v5773_v25 = vpop.f32.mrf.mxu1  ;;  %v5862_v10 = vpop.f32.mrf.mxu2 }
 0x942   : > { %v6266_v45 = vpack.c.bf16 %v6004_v43, %v12006_v50  ;;  %v5774_v5 = vadd.f32 %v5773_v25, %v11971_v1 }
 0x944   : > { %6395 = vst [vmem:[%s11237_s17 + $0x48] sm:$0xff] %v6266_v45  ;;  %v12152_v26 = vadd.f32 %v5862_v10, %v5774_v5 }
 0x945   : > { %v5916_v46 = vpop.f32.mrf.mxu3 }
 0x946   : > { %v5917_v55 = vadd.f32 %v5916_v46, %v12126_v30  ;;  %6180 = vmatmul.bf16.gmra.mxu2 %v12776_v60 }
 0x947   : > { %v6008_v62 = vpop.f32.mrf.mxu0 }
 0x948   : > { %v6006_v35 = vadd.f32 %v6005_v9, %v5917_v55 }
 0x949   : > { %v5776_v12 = vpop.f32.mrf.mxu1  ;;  %v5865_v34 = vpop.f32.mrf.mxu2 }
 0x94a   : > { %v6270_v11 = vpack.c.bf16 %v6006_v35, %v12013_v8  ;;  %v5777_v29 = vadd.f32 %v5776_v12, %v11971_v1  ;;  %5958 = vmatmul.bf16.gmra.mxu3 %v11083_v40  ;;  %6047 = vmatmul.bf16.gmra.mxu0 %v11077_v51 }
 0x94c   : > { %6399 = vst [vmem:[%s11237_s17 + $0x64] sm:$0xff] %v6270_v11  ;;  %v12161_v50 = vadd.f32 %v5865_v34, %v5777_v29  ;;  %6091 = vmatmul.bf16.gmra.mxu1 %v12780_v32 }
 0x94d   : > { %v5919_v21 = vpop.f32.mrf.mxu3 }
 0x94e   : > { %v5920_v60 = vadd.f32 %v5919_v21, %v12126_v30 }
 0x94f   : > { %v6010_v44 = vpop.f32.mrf.mxu0 }
 0x950   : > { %v6009_v9 = vadd.f32 %v6008_v62, %v5920_v60 }
 0x951   : > { %v5778_v43 = vpop.f32.mrf.mxu1  ;;  %v5867_v25 = vpop.f32.mrf.mxu2 }
 0x952   : > { %v6274_v8 = vpack.c.bf16 %v6009_v9, %v12022_v31  ;;  %v5779_v10 = vadd.f32 %v5778_v43, %v11971_v1 }
 0x954   : > { %6403 = vst [vmem:[%s11237_s17 + $0x80] sm:$0xff] %v6274_v8  ;;  %v12168_v45 = vadd.f32 %v5867_v25, %v5779_v10 }
 0x955   : > { %v5921_v5 = vpop.f32.mrf.mxu3 }
 0x956   : > { %v5922_v46 = vadd.f32 %v5921_v5, %v12126_v30  ;;  %6185 = vmatmul.bf16.gmra.mxu2 %v10843_v37 }
 0x957   : > { %v6013_v55 = vpop.f32.mrf.mxu0 }
 0x958   : > { %v6011_v35 = vadd.f32 %v6010_v44, %v5922_v46 }
 0x959   : > { %v5781_v12 = vpop.f32.mrf.mxu1  ;;  %v5870_v34 = vpop.f32.mrf.mxu2 }
 0x95a   : > { %v6278_v62 = vpack.c.bf16 %v6011_v35, %v12041_v38  ;;  %v5782_v11 = vadd.f32 %v5781_v12, %v11971_v1  ;;  %5963 = vmatmul.bf16.gmra.mxu3 %v12779_v54  ;;  %6052 = vmatmul.bf16.gmra.mxu0 %v11107_v19 }
 0x95c   : > { %6407 = vst [vmem:[%s11237_s17 + $0x9c] sm:$0xff] %v6278_v62  ;;  %v12177_v31 = vadd.f32 %v5870_v34, %v5782_v11  ;;  %6096 = vmatmul.bf16.gmra.mxu1 %v10848_v52 }
 0x95d   : > { %v5924_v29 = vpop.f32.mrf.mxu3 }
 0x95e   : > { %v5925_v37 = vadd.f32 %v5924_v29, %v12126_v30 }
 0x95f   : > { %v6015_v32 = vpop.f32.mrf.mxu0 }
 0x960   : > { %v6014_v21 = vadd.f32 %v6013_v55, %v5925_v37 }
 0x961   : > { %v5783_v60 = vpop.f32.mrf.mxu1  ;;  %v5872_v44 = vpop.f32.mrf.mxu2 }
 0x962   : > { %v6282_v38 = vpack.c.bf16 %v6014_v21, %v12050_v42  ;;  %v5784_v9 = vadd.f32 %v5783_v60, %v11971_v1 }
 0x964   : > { %6411 = vst [vmem:[%s11237_s17 + $0xb8] sm:$0xff] %v6282_v38  ;;  %v12184_v43 = vadd.f32 %v5872_v44, %v5784_v9 }
 0x965   : > { %v5926_v25 = vpop.f32.mrf.mxu3 }
 0x966   : > { %v5927_v8 = vadd.f32 %v5926_v25, %v12126_v30  ;;  %6190 = vmatmul.bf16.gmra.mxu2 %v10879_v47 }
 0x967   : > { %v6018_v52 = vpop.f32.mrf.mxu0 }
 0x968   : > { %v6016_v10 = vadd.f32 %v6015_v32, %v5927_v8 }
 0x969   : > { %v5786_v5 = vpop.f32.mrf.mxu1  ;;  %v5875_v46 = vpop.f32.mrf.mxu2 }
 0x96a   : > { %v6286_v55 = vpack.c.bf16 %v6016_v10, %v12057_v59  ;;  %v5787_v35 = vadd.f32 %v5786_v5, %v11971_v1  ;;  %5968 = vmatmul.bf16.gmra.mxu3 %v11131_v33  ;;  %6057 = vmatmul.bf16.gmra.mxu0 %v11125_v20 }
 0x96c   : > { %6415 = vst [vmem:[%s11237_s17 + $0xd4] sm:$0xff] %v6286_v55  ;;  %v12193_v42 = vadd.f32 %v5875_v46, %v5787_v35  ;;  %6101 = vmatmul.bf16.gmra.mxu1 %v10884_v22 }
 0x96d   : > { %v5929_v12 = vpop.f32.mrf.mxu3 }
 0x96e   : > { %v5930_v47 = vadd.f32 %v5929_v12, %v12126_v30 }
 0x96f   : > { %v6020_v34 = vpop.f32.mrf.mxu0 }
 0x970   : > { %v6019_v62 = vadd.f32 %v6018_v52, %v5930_v47 }
 0x971   : > { %v5788_v11 = vpop.f32.mrf.mxu1  ;;  %v5877_v29 = vpop.f32.mrf.mxu2 }
 0x972   : > { %v6290_v59 = vpack.c.bf16 %v6019_v62, %v12066_v28  ;;  %v5789_v37 = vadd.f32 %v5788_v11, %v11971_v1 }
 0x974   : > { %6419 = vst [vmem:[%s11237_s17 + $0xf0] sm:$0xff] %v6290_v59  ;;  %v12200_v32 = vadd.f32 %v5877_v29, %v5789_v37 }
 0x975   : > { %v5931_v21 = vpop.f32.mrf.mxu3 }
 0x976   : > { %v5932_v60 = vadd.f32 %v5931_v21, %v12126_v30  ;;  %6195 = vmatmul.bf16.gmra.mxu2 %v10891_v48  ;;  %v12781_v21 = vld [vmem:[#allocation10_spill] sm:$0xff] }
 0x977   : > { %v6023_v22 = vpop.f32.mrf.mxu0 }
 0x978   : > { %v6021_v44 = vadd.f32 %v6020_v34, %v5932_v60 }
 0x979   : > { %v5791_v38 = vpop.f32.mrf.mxu1  ;;  %v5880_v9 = vpop.f32.mrf.mxu2 }
 0x97a   : > { %v6294_v25 = vpack.c.bf16 %v6021_v44, %v12085_v16  ;;  %v5792_v8 = vadd.f32 %v5791_v38, %v11971_v1  ;;  %5973 = vmatmul.bf16.gmra.mxu3 %v11161_v14  ;;  %6062 = vmatmul.bf16.gmra.mxu0 %v11155_v17 }
 0x97c   : > { %6423 = vst [vmem:[%s11237_s17 + $0x10c] sm:$0xff] %v6294_v25  ;;  %v12209_v28 = vadd.f32 %v5880_v9, %v5792_v8  ;;  %6106 = vmatmul.bf16.gmra.mxu1 %v10917_v7 }
 0x97d   : > { %v5934_v52 = vpop.f32.mrf.mxu3 }
 0x97e   : > { %v5935_v48 = vadd.f32 %v5934_v52, %v12126_v30 }
 0x97f   : > { %v6025_v10 = vpop.f32.mrf.mxu0 }
 0x980   : > { %v6024_v5 = vadd.f32 %v6023_v22, %v5935_v48 }
 0x981   : > { %v5793_v46 = vpop.f32.mrf.mxu1  ;;  %v5882_v55 = vpop.f32.mrf.mxu2 }
 0x982   : > { %v6298_v16 = vpack.c.bf16 %v6024_v5, %v12094_v57  ;;  %v5794_v35 = vadd.f32 %v5793_v46, %v11971_v1 }
 0x984   : > { %6427 = vst [vmem:[%s11237_s17 + $0x128] sm:$0xff] %v6298_v16  ;;  %v12216_v12 = vadd.f32 %v5882_v55, %v5794_v35 }
 0x985   : > { %v5936_v47 = vpop.f32.mrf.mxu3 }
 0x986   : > { %v5937_v34 = vadd.f32 %v5936_v47, %v12126_v30  ;;  %6200 = vmatmul.bf16.gmra.mxu2 %v10963_v15 }
 0x987   : > { %v6028_v7 = vpop.f32.mrf.mxu0 }
 0x988   : > { %v6026_v62 = vadd.f32 %v6025_v10, %v5937_v34 }
 0x989   : > { %v5796_v11 = vpop.f32.mrf.mxu1  ;;  %v5885_v29 = vpop.f32.mrf.mxu2 }
 0x98a   : > { %v6302_v59 = vpack.c.bf16 %v6026_v62, %v12101_v58  ;;  %v5797_v37 = vadd.f32 %v5796_v11, %v11971_v1  ;;  %5978 = vmatmul.bf16.gmra.mxu3 %v11179_v3  ;;  %6067 = vmatmul.bf16.gmra.mxu0 %v11173_v27 }
 0x98c   : > { %6431 = vst [vmem:[%s11237_s17 + $0x144] sm:$0xff] %v6302_v59  ;;  %v12225_v57 = vadd.f32 %v5885_v29, %v5797_v37  ;;  %6111 = vmatmul.bf16.gmra.mxu1 %v12781_v21 }
 0x98d   : > { %v5939_v60 = vpop.f32.mrf.mxu3 }
 0x98e   : > { %v5940_v15 = vadd.f32 %v5939_v60, %v12126_v30 }
 0x98f   : > { %v6030_v22 = vpop.f32.mrf.mxu0 }
 0x990   : > { %v6029_v44 = vadd.f32 %v6028_v7, %v5940_v15 }
 0x991   : > { %v5798_v38 = vpop.f32.mrf.mxu1  ;;  %v5887_v9 = vpop.f32.mrf.mxu2 }
 0x992   : > { %v6306_v58 = vpack.c.bf16 %v6029_v44, %v12110_v49  ;;  %v5799_v25 = vadd.f32 %v5798_v38, %v11971_v1 }
 0x994   : > { %6435 = vst [vmem:[%s11237_s17 + $0x160] sm:$0xff] %v6306_v58  ;;  %v12232_v8 = vadd.f32 %v5887_v9, %v5799_v25 }
 0x995   : > { %v5941_v52 = vpop.f32.mrf.mxu3 }
 0x996   : > { %v5942_v48 = vadd.f32 %v5941_v52, %v12126_v30  ;;  %6205 = vmatmul.bf16.gmra.mxu2 %v10989_v53 }
 0x997   : > { %v6033_v10 = vpop.f32.mrf.mxu0 }
 0x998   : > { %v6031_v5 = vadd.f32 %v6030_v22, %v5942_v48 }
 0x999   : > { %v5801_v46 = vpop.f32.mrf.mxu1  ;;  %v5890_v55 = vpop.f32.mrf.mxu2 }
 0x99a   : > { %v6310_v16 = vpack.c.bf16 %v6031_v5, %v12117_v24  ;;  %v5802_v35 = vadd.f32 %v5801_v46, %v11971_v1  ;;  %5983 = vmatmul.bf16.gmra.mxu3 %v11221_v13  ;;  %6072 = vmatmul.bf16.gmra.mxu0 %v11209_v0 }
 0x99c   : > { %6439 = vst [vmem:[%s11237_s17 + $0x17c] sm:$0xff] %v6310_v16  ;;  %v12241_v49 = vadd.f32 %v5890_v55, %v5802_v35  ;;  %6116 = vmatmul.bf16.gmra.mxu1 %v12773_v2 }
 0x99d   : > { %v5944_v47 = vpop.f32.mrf.mxu3 }
 0x99e   : > { %v5945_v53 = vadd.f32 %v5944_v47, %v12126_v30 }
 0x99f   : > { %v6035_v34 = vpop.f32.mrf.mxu0 }
 0x9a0   : > { %v6034_v7 = vadd.f32 %v6033_v10, %v5945_v53 }
 0x9a1   : > { %v5803_v62 = vpop.f32.mrf.mxu1  ;;  %v5892_v11 = vpop.f32.mrf.mxu2 }
 0x9a2   : > { %v6314_v24 = vpack.c.bf16 %v6034_v7, %v12129_v63  ;;  %v5804_v29 = vadd.f32 %v5803_v62, %v11971_v1 }
 0x9a4   : > { %6443 = vst [vmem:[%s11237_s17 + $0x198] sm:$0xff] %v6314_v24  ;;  %v12248_v59 = vadd.f32 %v5892_v11, %v5804_v29 }
 0x9a5   : > { %v5946_v37 = vpop.f32.mrf.mxu3 }
 0x9a6   : > { %v5947_v21 = vadd.f32 %v5946_v37, %v12126_v30  ;;  %6210 = vmatmul.bf16.gmra.mxu2 %v12774_v4 }
 0x9a7   : > { %v6038_v2 = vpop.f32.mrf.mxu0 }
 0x9a8   : > { %v6036_v60 = vadd.f32 %v6035_v34, %v5947_v21 }
 0x9a9   : > { %v5806_v15 = vpop.f32.mrf.mxu1  ;;  %v5895_v22 = vpop.f32.mrf.mxu2 }
 0x9aa   : > { %v6318_v44 = vpack.c.bf16 %v6036_v60, %v12136_v61  ;;  %v5807_v38 = vadd.f32 %v5806_v15, %v11971_v1 }
 0x9ac   : > { %6447 = vst [vmem:[%s11237_s17 + $0x1b4] sm:$0xff] %v6318_v44  ;;  %v12255_v63 = vadd.f32 %v5895_v22, %v5807_v38  ;;  %6121 = vmatmul.bf16.gmra.mxu1 %v12778_v56  ;;  %v12267_v56 = vperm.slane %v11968_v39, 6 }
 0x9ad   : > { %v5949_v9 = vpop.f32.mrf.mxu3 }
 0x9ae   : > { %v5950_v58 = vadd.f32 %v5949_v9, %v12126_v30 }
 0x9af   : > { %v6040_v25 = vpop.f32.mrf.mxu0 }
 0x9b0   : > { %v6039_v52 = vadd.f32 %v6038_v2, %v5950_v58 }
 0x9b1   : > { %v5808_v4 = vpop.f32.mrf.mxu1  ;;  %v5897_v48 = vpop.f32.mrf.mxu2 }
 0x9b2   : > { %v6322_v10 = vpack.c.bf16 %v6039_v52, %v12145_v41  ;;  %v5809_v5 = vadd.f32 %v5808_v4, %v11971_v1 }
 0x9b4   : > { %6451 = vst [vmem:[%s11237_s17 + $0x1d0] sm:$0xff] %v6322_v10  ;;  %v12262_v61 = vadd.f32 %v5897_v48, %v5809_v5 }
 0x9b5   : > { %v5951_v46 = vpop.f32.mrf.mxu3 }
 0x9b6   : > { %v5952_v55 = vadd.f32 %v5951_v46, %v12126_v30  ;;  %6215 = vmatmul.bf16.gmra.mxu2 %v11028_v6 }
 0x9b7   : > { %v6043_v16 = vpop.f32.mrf.mxu0 }
 0x9b8   : > { %v6041_v35 = vadd.f32 %v6040_v25, %v5952_v55 }
 0x9b9   : > { %v6087_v47 = vpop.f32.mrf.mxu1  ;;  %v6176_v53 = vpop.f32.mrf.mxu2 }
 0x9ba   : > { %v6326_v41 = vpack.c.bf16 %v6041_v35, %v12152_v26  ;;  %v6088_v1 = vadd.f32 %v6087_v47, %v12267_v56 }
 0x9bc   : > { %6455 = vst [vmem:[%s11237_s17 + $0x1ec] sm:$0xff] %v6326_v41  ;;  %v6177_v34 = vadd.f32 %v6176_v53, %v6088_v1  ;;  %6126 = vmatmul.bf16.gmra.mxu1 %v11035_v36 }
 0x9bd   : > { %v5954_v7 = vpop.f32.mrf.mxu3 }
 0x9be   : > { %v6259_v6 = vpack.c.bf16 %v6177_v34, %v6177_v34  ;;  %v5955_v39 = vadd.f32 %v5954_v7, %v12126_v30 }
 0x9bf   : > { %v6045_v62 = vpop.f32.mrf.mxu0 }
 0x9c0   : > { %6388 = vst.msk [vmem:[%s11237_s17 + $0x18] sm:$0xf] %vm6387_vm1, %v6259_v6  ;;  %v6044_v11 = vadd.f32 %v6043_v16, %v5955_v39 }
 0x9c1   : > { %v6089_v24 = vpop.f32.mrf.mxu1  ;;  %v6178_v29 = vpop.f32.mrf.mxu2 }
 0x9c2   : > { %v6330_v26 = vpack.c.bf16 %v6044_v11, %v12161_v50  ;;  %v6090_v37 = vadd.f32 %v6089_v24, %v12267_v56 }
 0x9c4   : > { %6459 = vst [vmem:[%s11237_s17 + $0x208] sm:$0xff] %v6330_v26  ;;  %v6179_v21 = vadd.f32 %v6178_v29, %v6090_v37 }
 0x9c5   : > { %v5956_v36 = vpop.f32.mrf.mxu3 }
 0x9c6   : > { %v6263_v2 = vpack.c.bf16 %v6179_v21, %v6179_v21  ;;  %v5957_v60 = vadd.f32 %v5956_v36, %v12126_v30  ;;  %6220 = vmatmul.bf16.gmra.mxu2 %v11059_v18 }
 0x9c7   : > { %v6048_v15 = vpop.f32.mrf.mxu0 }
 0x9c8   : > { %6392 = vst.msk [vmem:[%s11237_s17 + $0x34] sm:$0xf] %vm6387_vm1, %v6263_v2  ;;  %v6046_v22 = vadd.f32 %v6045_v62, %v5957_v60 }
 0x9c9   : > { %v6092_v44 = vpop.f32.mrf.mxu1  ;;  %v6181_v38 = vpop.f32.mrf.mxu2 }
 0x9ca   : > { %v6334_v50 = vpack.c.bf16 %v6046_v22, %v12168_v45  ;;  %v6093_v9 = vadd.f32 %v6092_v44, %v12267_v56 }
 0x9cc   : > { %6463 = vst [vmem:[%s11237_s17 + $0x224] sm:$0xff] %v6334_v50  ;;  %v6182_v58 = vadd.f32 %v6181_v38, %v6093_v9  ;;  %6131 = vmatmul.bf16.gmra.mxu1 %v11065_v23 }
 0x9cd   : > { %v5959_v25 = vpop.f32.mrf.mxu3 }
 0x9ce   : > { %v6267_v52 = vpack.c.bf16 %v6182_v58, %v6182_v58  ;;  %v5960_v18 = vadd.f32 %v5959_v25, %v12126_v30 }
 0x9cf   : > { %v6050_v4 = vpop.f32.mrf.mxu0 }
 0x9d0   : > { %6396 = vst.msk [vmem:[%s11237_s17 + $0x50] sm:$0xf] %vm6387_vm1, %v6267_v52  ;;  %v6049_v48 = vadd.f32 %v6048_v15, %v5960_v18 }
 0x9d1   : > { %v6094_v10 = vpop.f32.mrf.mxu1  ;;  %v6183_v5 = vpop.f32.mrf.mxu2 }
 0x9d2   : > { %v6338_v45 = vpack.c.bf16 %v6049_v48, %v12177_v31  ;;  %v6095_v46 = vadd.f32 %v6094_v10, %v12267_v56 }
 0x9d4   : > { %6467 = vst [vmem:[%s11237_s17 + $0x240] sm:$0xff] %v6338_v45  ;;  %v6184_v55 = vadd.f32 %v6183_v5, %v6095_v46 }
 0x9d5   : > { %v5961_v16 = vpop.f32.mrf.mxu3 }
 0x9d6   : > { %v6271_v23 = vpack.c.bf16 %v6184_v55, %v6184_v55  ;;  %v5962_v35 = vadd.f32 %v5961_v16, %v12126_v30  ;;  %6225 = vmatmul.bf16.gmra.mxu2 %v11077_v51 }
 0x9d7   : > { %v6053_v47 = vpop.f32.mrf.mxu0 }
 0x9d8   : > { %6400 = vst.msk [vmem:[%s11237_s17 + $0x6c] sm:$0xf] %vm6387_vm1, %v6271_v23  ;;  %v6051_v53 = vadd.f32 %v6050_v4, %v5962_v35 }
 0x9d9   : > { %v6097_v41 = vpop.f32.mrf.mxu1  ;;  %v6186_v1 = vpop.f32.mrf.mxu2 }
 0x9da   : > { %v6342_v31 = vpack.c.bf16 %v6051_v53, %v12184_v43  ;;  %v6098_v34 = vadd.f32 %v6097_v41, %v12267_v56 }
 0x9dc   : > { %6471 = vst [vmem:[%s11237_s17 + $0x25c] sm:$0xff] %v6342_v31  ;;  %v6187_v7 = vadd.f32 %v6186_v1, %v6098_v34  ;;  %6136 = vmatmul.bf16.gmra.mxu1 %v11083_v40 }
 0x9dd   : > { %v5964_v6 = vpop.f32.mrf.mxu3 }
 0x9de   : > { %v6275_v39 = vpack.c.bf16 %v6187_v7, %v6187_v7  ;;  %v5965_v51 = vadd.f32 %v5964_v6, %v12126_v30 }
 0x9df   : > { %v6055_v62 = vpop.f32.mrf.mxu0 }
 0x9e0   : > { %6404 = vst.msk [vmem:[%s11237_s17 + $0x88] sm:$0xf] %vm6387_vm1, %v6275_v39  ;;  %v6054_v11 = vadd.f32 %v6053_v47, %v5965_v51 }
 0x9e1   : > { %v6099_v24 = vpop.f32.mrf.mxu1  ;;  %v6188_v29 = vpop.f32.mrf.mxu2 }
 0x9e2   : > { %v6346_v43 = vpack.c.bf16 %v6054_v11, %v12193_v42  ;;  %v6100_v26 = vadd.f32 %v6099_v24, %v12267_v56 }
 0x9e4   : > { %6475 = vst [vmem:[%s11237_s17 + $0x278] sm:$0xff] %v6346_v43  ;;  %v6189_v37 = vadd.f32 %v6188_v29, %v6100_v26 }
 0x9e5   : > { %v5966_v21 = vpop.f32.mrf.mxu3 }
 0x9e6   : > { %v6279_v40 = vpack.c.bf16 %v6189_v37, %v6189_v37  ;;  %v5967_v36 = vadd.f32 %v5966_v21, %v12126_v30  ;;  %6230 = vmatmul.bf16.gmra.mxu2 %v11107_v19 }
 0x9e7   : > { %v6058_v2 = vpop.f32.mrf.mxu0 }
 0x9e8   : > { %6408 = vst.msk [vmem:[%s11237_s17 + $0xa4] sm:$0xf] %vm6387_vm1, %v6279_v40  ;;  %v6056_v60 = vadd.f32 %v6055_v62, %v5967_v36 }
 0x9e9   : > { %v6102_v15 = vpop.f32.mrf.mxu1  ;;  %v6191_v22 = vpop.f32.mrf.mxu2 }
 0x9ea   : > { %v6350_v42 = vpack.c.bf16 %v6056_v60, %v12200_v32  ;;  %v6103_v44 = vadd.f32 %v6102_v15, %v12267_v56 }
 0x9ec   : > { %6479 = vst [vmem:[%s11237_s17 + $0x294] sm:$0xff] %v6350_v42  ;;  %v6192_v38 = vadd.f32 %v6191_v22, %v6103_v44  ;;  %6141 = vmatmul.bf16.gmra.mxu1 %v12779_v54 }
 0x9ed   : > { %v5969_v50 = vpop.f32.mrf.mxu3 }
 0x9ee   : > { %v6283_v9 = vpack.c.bf16 %v6192_v38, %v6192_v38  ;;  %v5970_v19 = vadd.f32 %v5969_v50, %v12126_v30 }
 0x9ef   : > { %v6060_v58 = vpop.f32.mrf.mxu0 }
 0x9f0   : > { %6412 = vst.msk [vmem:[%s11237_s17 + $0xc0] sm:$0xf] %vm6387_vm1, %v6283_v9  ;;  %v6059_v25 = vadd.f32 %v6058_v2, %v5970_v19 }
 0x9f1   : > { %v6104_v52 = vpop.f32.mrf.mxu1  ;;  %v6193_v18 = vpop.f32.mrf.mxu2 }
 0x9f2   : > { %v6354_v32 = vpack.c.bf16 %v6059_v25, %v12209_v28  ;;  %v6105_v4 = vadd.f32 %v6104_v52, %v12267_v56 }
 0x9f4   : > { %6483 = vst [vmem:[%s11237_s17 + $0x2b0] sm:$0xff] %v6354_v32  ;;  %v6194_v48 = vadd.f32 %v6193_v18, %v6105_v4 }
 0x9f5   : > { %v5971_v10 = vpop.f32.mrf.mxu3 }
 0x9f6   : > { %v6287_v54 = vpack.c.bf16 %v6194_v48, %v6194_v48  ;;  %v5972_v5 = vadd.f32 %v5971_v10, %v12126_v30  ;;  %6235 = vmatmul.bf16.gmra.mxu2 %v11125_v20 }
 0x9f7   : > { %v6063_v45 = vpop.f32.mrf.mxu0 }
 0x9f8   : > { %6416 = vst.msk [vmem:[%s11237_s17 + $0xdc] sm:$0xf] %vm6387_vm1, %v6287_v54  ;;  %v6061_v46 = vadd.f32 %v6060_v58, %v5972_v5 }
 0x9f9   : > { %v6107_v55 = vpop.f32.mrf.mxu1  ;;  %v6196_v16 = vpop.f32.mrf.mxu2 }
 0x9fa   : > { %v6358_v28 = vpack.c.bf16 %v6061_v46, %v12216_v12  ;;  %v6108_v23 = vadd.f32 %v6107_v55, %v12267_v56 }
 0x9fc   : > { %6487 = vst [vmem:[%s11237_s17 + $0x2cc] sm:$0xff] %v6358_v28  ;;  %v6197_v35 = vadd.f32 %v6196_v16, %v6108_v23  ;;  %6146 = vmatmul.bf16.gmra.mxu1 %v11131_v33 }
 0x9fd   : > { %v5974_v47 = vpop.f32.mrf.mxu3 }
 0x9fe   : > { %v6291_v53 = vpack.c.bf16 %v6197_v35, %v6197_v35  ;;  %v5975_v20 = vadd.f32 %v5974_v47, %v12126_v30 }
 0x9ff   : > { %v6065_v41 = vpop.f32.mrf.mxu0 }
 0xa00   : > { %6420 = vst.msk [vmem:[%s11237_s17 + $0xf8] sm:$0xf] %vm6387_vm1, %v6291_v53  ;;  %v6064_v1 = vadd.f32 %v6063_v45, %v5975_v20 }
 0xa01   : > { %v6109_v31 = vpop.f32.mrf.mxu1  ;;  %v6198_v34 = vpop.f32.mrf.mxu2 }
 0xa02   : > { %v6362_v12 = vpack.c.bf16 %v6064_v1, %v12225_v57  ;;  %v6110_v7 = vadd.f32 %v6109_v31, %v12267_v56 }
 0xa04   : > { %6491 = vst [vmem:[%s11237_s17 + $0x2e8] sm:$0xff] %v6362_v12  ;;  %v6199_v6 = vadd.f32 %v6198_v34, %v6110_v7 }
 0xa05   : > { %v5976_v39 = vpop.f32.mrf.mxu3 }
 0xa06   : > { %v6295_v33 = vpack.c.bf16 %v6199_v6, %v6199_v6  ;;  %v5977_v51 = vadd.f32 %v5976_v39, %v12126_v30  ;;  %6240 = vmatmul.bf16.gmra.mxu2 %v11155_v17 }
 0xa07   : > { %v6068_v11 = vpop.f32.mrf.mxu0 }
 0xa08   : > { %6424 = vst.msk [vmem:[%s11237_s17 + $0x114] sm:$0xf] %vm6387_vm1, %v6295_v33  ;;  %v6066_v62 = vadd.f32 %v6065_v41, %v5977_v51 }
 0xa09   : > { %v6112_v24 = vpop.f32.mrf.mxu1  ;;  %v6201_v29 = vpop.f32.mrf.mxu2 }
 0xa0a   : > { %v6366_v57 = vpack.c.bf16 %v6066_v62, %v12232_v8  ;;  %v6113_v43 = vadd.f32 %v6112_v24, %v12267_v56 }
 0xa0c   : > { %6495 = vst [vmem:[%s11237_s17 + $0x304] sm:$0xff] %v6366_v57  ;;  %v6202_v26 = vadd.f32 %v6201_v29, %v6113_v43  ;;  %6151 = vmatmul.bf16.gmra.mxu1 %v11161_v14 }
 0xa0d   : > { %v5979_v37 = vpop.f32.mrf.mxu3 }
 0xa0e   : > { %v6299_v21 = vpack.c.bf16 %v6202_v26, %v6202_v26  ;;  %v5980_v17 = vadd.f32 %v5979_v37, %v12126_v30 }
 0xa0f   : > { %v6070_v15 = vpop.f32.mrf.mxu0 }
 0xa10   : > { %6428 = vst.msk [vmem:[%s11237_s17 + $0x130] sm:$0xf] %vm6387_vm1, %v6299_v21  ;;  %v6069_v40 = vadd.f32 %v6068_v11, %v5980_v17 }
 0xa11   : > { %v6114_v36 = vpop.f32.mrf.mxu1  ;;  %v6203_v2 = vpop.f32.mrf.mxu2 }
 0xa12   : > { %v6370_v60 = vpack.c.bf16 %v6069_v40, %v12241_v49  ;;  %v6115_v8 = vadd.f32 %v6114_v36, %v12267_v56 }
 0xa14   : > { %6499 = vst [vmem:[%s11237_s17 + $0x320] sm:$0xff] %v6370_v60  ;;  %v6204_v22 = vadd.f32 %v6203_v2, %v6115_v8 }
 0xa15   : > { %v5981_v42 = vpop.f32.mrf.mxu3 }
 0xa16   : > { %v6303_v14 = vpack.c.bf16 %v6204_v22, %v6204_v22  ;;  %v5982_v44 = vadd.f32 %v5981_v42, %v12126_v30  ;;  %6245 = vmatmul.bf16.gmra.mxu2 %v11173_v27 }
 0xa17   : > { %v6073_v25 = vpop.f32.mrf.mxu0 }
 0xa18   : > { %6432 = vst.msk [vmem:[%s11237_s17 + $0x14c] sm:$0xf] %vm6387_vm1, %v6303_v14  ;;  %v6071_v38 = vadd.f32 %v6070_v15, %v5982_v44 }
 0xa19   : > { %v6117_v50 = vpop.f32.mrf.mxu1  ;;  %v6206_v9 = vpop.f32.mrf.mxu2 }
 0xa1a   : > { %v6374_v49 = vpack.c.bf16 %v6071_v38, %v12248_v59  ;;  %v6118_v19 = vadd.f32 %v6117_v50, %v12267_v56 }
 0xa1c   : > { %6503 = vst [vmem:[%s11237_s17 + $0x33c] sm:$0xff] %v6374_v49  ;;  %v6207_v58 = vadd.f32 %v6206_v9, %v6118_v19  ;;  %6156 = vmatmul.bf16.gmra.mxu1 %v11179_v3 }
 0xa1d   : > { %v5984_v52 = vpop.f32.mrf.mxu3 }
 0xa1e   : > { %v6307_v18 = vpack.c.bf16 %v6207_v58, %v6207_v58  ;;  %v5985_v27 = vadd.f32 %v5984_v52, %v12126_v30 }
 0xa1f   : > { %v6075_v46 = vpop.f32.mrf.mxu0 }
 0xa20   : > { %6436 = vst.msk [vmem:[%s11237_s17 + $0x168] sm:$0xf] %vm6387_vm1, %v6307_v18  ;;  %v6074_v32 = vadd.f32 %v6073_v25, %v5985_v27 }
 0xa21   : > { %v6119_v4 = vpop.f32.mrf.mxu1  ;;  %v6208_v48 = vpop.f32.mrf.mxu2 }
 0xa22   : > { %v6378_v59 = vpack.c.bf16 %v6074_v32, %v12255_v63  ;;  %v6120_v10 = vadd.f32 %v6119_v4, %v12267_v56 }
 0xa24   : > { %6507 = vst [vmem:[%s11237_s17 + $0x358] sm:$0xff] %v6378_v59  ;;  %v6209_v54 = vadd.f32 %v6208_v48, %v6120_v10 }
 0xa25   : > { %v5986_v3 = vpop.f32.mrf.mxu3 }
 0xa26   : > { %v6311_v5 = vpack.c.bf16 %v6209_v54, %v6209_v54  ;;  %v5987_v45 = vadd.f32 %v5986_v3, %v12126_v30  ;;  %6250 = vmatmul.bf16.gmra.mxu2 %v11209_v0 }
 0xa28   : > { %6440 = vst.msk [vmem:[%s11237_s17 + $0x184] sm:$0xf] %vm6387_vm1, %v6311_v5  ;;  %v6076_v55 = vadd.f32 %v6075_v46, %v5987_v45 }
 0xa29   : > { %v6122_v16 = vpop.f32.mrf.mxu1  ;;  %v6211_v28 = vpop.f32.mrf.mxu2 }
 0xa2a   : > { %v6382_v63 = vpack.c.bf16 %v6076_v55, %v12262_v61  ;;  %v6123_v23 = vadd.f32 %v6122_v16, %v12267_v56 }
 0xa2c   : > { %6511 = vst [vmem:[%s11237_s17 + $0x374] sm:$0xff] %v6382_v63  ;;  %v6212_v35 = vadd.f32 %v6211_v28, %v6123_v23  ;;  %6161 = vmatmul.bf16.gmra.mxu1 %v11221_v13 }
 0xa2e   : > { %v6315_v47 = vpack.c.bf16 %v6212_v35, %v6212_v35 }
 0xa30   : > { %6444 = vst.msk [vmem:[%s11237_s17 + $0x1a0] sm:$0xf] %vm6387_vm1, %v6315_v47 }
 0xa31   : > { %v6124_v0 = vpop.f32.mrf.mxu1  ;;  %v6213_v30 = vpop.f32.mrf.mxu2 }
 0xa32   : > { %v6125_v53 = vadd.f32 %v6124_v0, %v12267_v56 }
 0xa34   : > { %v6214_v20 = vadd.f32 %v6213_v30, %v6125_v53 }
 0xa36   : > { %v6319_v41 = vpack.c.bf16 %v6214_v20, %v6214_v20 }
 0xa38   : > { %6448 = vst.msk [vmem:[%s11237_s17 + $0x1bc] sm:$0xf] %vm6387_vm1, %v6319_v41 }
 0xa39   : > { %v6127_v61 = vpop.f32.mrf.mxu1  ;;  %v6216_v1 = vpop.f32.mrf.mxu2 }
 0xa3a   : > { %v6128_v31 = vadd.f32 %v6127_v61, %v12267_v56 }
 0xa3c   : > { %v6217_v34 = vadd.f32 %v6216_v1, %v6128_v31 }
 0xa3e   : > { %v6323_v12 = vpack.c.bf16 %v6217_v34, %v6217_v34 }
 0xa40   : > { %6452 = vst.msk [vmem:[%s11237_s17 + $0x1d8] sm:$0xf] %vm6387_vm1, %v6323_v12 }
 0xa41   : > { %v6129_v13 = vpop.f32.mrf.mxu1  ;;  %v6218_v7 = vpop.f32.mrf.mxu2 }
 0xa42   : > { %v6130_v6 = vadd.f32 %v6129_v13, %v12267_v56 }
 0xa44   : > { %v6219_v39 = vadd.f32 %v6218_v7, %v6130_v6 }
 0xa46   : > { %v6327_v33 = vpack.c.bf16 %v6219_v39, %v6219_v39 }
 0xa48   : > { %6456 = vst.msk [vmem:[%s11237_s17 + $0x1f4] sm:$0xf] %vm6387_vm1, %v6327_v33 }
 0xa49   : > { %v6132_v51 = vpop.f32.mrf.mxu1  ;;  %v6221_v62 = vpop.f32.mrf.mxu2 }
 0xa4a   : > { %v6133_v11 = vadd.f32 %v6132_v51, %v12267_v56 }
 0xa4c   : > { %v6222_v24 = vadd.f32 %v6221_v62, %v6133_v11 }
 0xa4e   : > { %v6331_v29 = vpack.c.bf16 %v6222_v24, %v6222_v24 }
 0xa50   : > { %6460 = vst.msk [vmem:[%s11237_s17 + $0x210] sm:$0xf] %vm6387_vm1, %v6331_v29 }
 0xa51   : > { %v6134_v57 = vpop.f32.mrf.mxu1  ;;  %v6223_v43 = vpop.f32.mrf.mxu2 }
 0xa52   : > { %v6135_v26 = vadd.f32 %v6134_v57, %v12267_v56 }
 0xa54   : > { %v6224_v37 = vadd.f32 %v6223_v43, %v6135_v26 }
 0xa56   : > { %v6335_v21 = vpack.c.bf16 %v6224_v37, %v6224_v37 }
 0xa58   : > { %6464 = vst.msk [vmem:[%s11237_s17 + $0x22c] sm:$0xf] %vm6387_vm1, %v6335_v21 }
 0xa59   : > { %v6137_v17 = vpop.f32.mrf.mxu1  ;;  %v6226_v40 = vpop.f32.mrf.mxu2 }
 0xa5a   : > { %v6138_v36 = vadd.f32 %v6137_v17, %v12267_v56 }
 0xa5c   : > { %v6227_v2 = vadd.f32 %v6226_v40, %v6138_v36 }
 0xa5e   : > { %v6339_v60 = vpack.c.bf16 %v6227_v2, %v6227_v2 }
 0xa60   : > { %6468 = vst.msk [vmem:[%s11237_s17 + $0x248] sm:$0xf] %vm6387_vm1, %v6339_v60 }
 0xa61   : > { %v6139_v8 = vpop.f32.mrf.mxu1  ;;  %v6228_v15 = vpop.f32.mrf.mxu2 }
 0xa62   : > { %v6140_v22 = vadd.f32 %v6139_v8, %v12267_v56 }
 0xa64   : > { %v6229_v42 = vadd.f32 %v6228_v15, %v6140_v22 }
 0xa66   : > { %v6343_v14 = vpack.c.bf16 %v6229_v42, %v6229_v42 }
 0xa68   : > { %6472 = vst.msk [vmem:[%s11237_s17 + $0x264] sm:$0xf] %vm6387_vm1, %v6343_v14 }
 0xa69   : > { %v6142_v44 = vpop.f32.mrf.mxu1  ;;  %v6231_v38 = vpop.f32.mrf.mxu2 }
 0xa6a   : > { %v6143_v50 = vadd.f32 %v6142_v44, %v12267_v56 }
 0xa6c   : > { %v6232_v9 = vadd.f32 %v6231_v38, %v6143_v50 }
 0xa6e   : > { %v6347_v49 = vpack.c.bf16 %v6232_v9, %v6232_v9 }
 0xa70   : > { %6476 = vst.msk [vmem:[%s11237_s17 + $0x280] sm:$0xf] %vm6387_vm1, %v6347_v49 }
 0xa71   : > { %v6144_v19 = vpop.f32.mrf.mxu1  ;;  %v6233_v58 = vpop.f32.mrf.mxu2 }
 0xa72   : > { %v6145_v25 = vadd.f32 %v6144_v19, %v12267_v56 }
 0xa74   : > { %v6234_v52 = vadd.f32 %v6233_v58, %v6145_v25 }
 0xa76   : > { %v6351_v18 = vpack.c.bf16 %v6234_v52, %v6234_v52 }
 0xa78   : > { %6480 = vst.msk [vmem:[%s11237_s17 + $0x29c] sm:$0xf] %vm6387_vm1, %v6351_v18 }
 0xa79   : > { %v6147_v27 = vpop.f32.mrf.mxu1  ;;  %v6236_v32 = vpop.f32.mrf.mxu2 }
 0xa7a   : > { %v6148_v4 = vadd.f32 %v6147_v27, %v12267_v56 }
 0xa7c   : > { %v6237_v48 = vadd.f32 %v6236_v32, %v6148_v4 }
 0xa7e   : > { %v6355_v59 = vpack.c.bf16 %v6237_v48, %v6237_v48 }
 0xa80   : > { %6484 = vst.msk [vmem:[%s11237_s17 + $0x2b8] sm:$0xf] %vm6387_vm1, %v6355_v59 }
 0xa81   : > { %v6149_v10 = vpop.f32.mrf.mxu1  ;;  %v6238_v54 = vpop.f32.mrf.mxu2 }
 0xa82   : > { %v6150_v3 = vadd.f32 %v6149_v10, %v12267_v56 }
 0xa84   : > { %v6239_v5 = vadd.f32 %v6238_v54, %v6150_v3 }
 0xa86   : > { %v6359_v45 = vpack.c.bf16 %v6239_v5, %v6239_v5 }
 0xa88   : > { %6488 = vst.msk [vmem:[%s11237_s17 + $0x2d4] sm:$0xf] %vm6387_vm1, %v6359_v45 }
 0xa89   : > { %v6152_v46 = vpop.f32.mrf.mxu1  ;;  %v6241_v55 = vpop.f32.mrf.mxu2 }
 0xa8a   : > { %v6153_v16 = vadd.f32 %v6152_v46, %v12267_v56 }
 0xa8c   : > { %v6242_v28 = vadd.f32 %v6241_v55, %v6153_v16 }
 0xa8e   : > { %v6363_v63 = vpack.c.bf16 %v6242_v28, %v6242_v28 }
 0xa90   : > { %6492 = vst.msk [vmem:[%s11237_s17 + $0x2f0] sm:$0xf] %vm6387_vm1, %v6363_v63 }
 0xa91   : > { %v6154_v23 = vpop.f32.mrf.mxu1  ;;  %v6243_v35 = vpop.f32.mrf.mxu2 }
 0xa92   : > { %v6155_v47 = vadd.f32 %v6154_v23, %v12267_v56 }
 0xa94   : > { %v6244_v0 = vadd.f32 %v6243_v35, %v6155_v47 }
 0xa96   : > { %v6367_v30 = vpack.c.bf16 %v6244_v0, %v6244_v0 }
 0xa98   : > { %6496 = vst.msk [vmem:[%s11237_s17 + $0x30c] sm:$0xf] %vm6387_vm1, %v6367_v30 }
 0xa99   : > { %v6157_v53 = vpop.f32.mrf.mxu1  ;;  %v6246_v20 = vpop.f32.mrf.mxu2 }
 0xa9a   : > { %v6158_v41 = vadd.f32 %v6157_v53, %v12267_v56 }
 0xa9c   : > { %v6247_v61 = vadd.f32 %v6246_v20, %v6158_v41 }
 0xa9e   : > { %v6371_v1 = vpack.c.bf16 %v6247_v61, %v6247_v61 }
 0xaa0   : > { %6500 = vst.msk [vmem:[%s11237_s17 + $0x328] sm:$0xf] %vm6387_vm1, %v6371_v1 }
 0xaa1   : > { %v6159_v31 = vpop.f32.mrf.mxu1  ;;  %v6248_v34 = vpop.f32.mrf.mxu2 }
 0xaa2   : > { %v6160_v12 = vadd.f32 %v6159_v31, %v12267_v56 }
 0xaa4   : > { %v6249_v13 = vadd.f32 %v6248_v34, %v6160_v12 }
 0xaa6   : > { %v6375_v7 = vpack.c.bf16 %v6249_v13, %v6249_v13 }
 0xaa8   : > { %6504 = vst.msk [vmem:[%s11237_s17 + $0x344] sm:$0xf] %vm6387_vm1, %v6375_v7 }
 0xaa9   : > { %v6162_v6 = vpop.f32.mrf.mxu1  ;;  %v6251_v39 = vpop.f32.mrf.mxu2 }
 0xaaa   : > { %v6163_v33 = vadd.f32 %v6162_v6, %v12267_v56 }
 0xaac   : > { %v6252_v51 = vadd.f32 %v6251_v39, %v6163_v33 }
 0xaae   : > { %v6379_v62 = vpack.c.bf16 %v6252_v51, %v6252_v51 }
 0xab0   : > { %6508 = vst.msk [vmem:[%s11237_s17 + $0x360] sm:$0xf] %vm6387_vm1, %v6379_v62 }
 0xab1   : > { %v6164_v11 = vpop.f32.mrf.mxu1  ;;  %v6253_v29 = vpop.f32.mrf.mxu2 }
 0xab2   : > { %v6165_v24 = vadd.f32 %v6164_v11, %v12267_v56 }
 0xab4   : > { %v6254_v57 = vadd.f32 %v6253_v29, %v6165_v24 }
 0xab6   : > { %v6383_v43 = vpack.c.bf16 %v6254_v57, %v6254_v57 }
 0xab8   : > { %6512 = vst.msk [vmem:[%s11237_s17 + $0x37c] sm:$0xf] %vm6387_vm1, %v6383_v43 }
 0xab9 PF: > { %s26_s18 = sadd.s32 1, %s8172_s18  }
 0xaba   : > { %p23_p4 = scmp.ge.s32.totalorder %s26_s18, 4  }
 0xabc   :  { %25 = sbr.rel (!%p23_p4) target bundleno = 1 (0x1), region = 121 }

</bundles_post_ra>
